<compile_context>
chip_gen: v6e
topology: v6e:2x2x1
jax: 0.10.0
libtpu: 0.0.40
codegen_flags: <defaults>
</compile_context>

<pallas_src>
import jax
import jax.numpy as jnp
from jax.experimental import pallas as pl
from jax.experimental.pallas import tpu as pltpu

_HIGH = jax.lax.Precision.HIGHEST


def _recip(x):
    """1/x via the EUP reciprocal (free VLIW slot) + one Newton refinement."""
    r = pl.reciprocal(x, approx=True)
    return r * (2.0 - x * r)


def _choose_block_b(B, N, target_rows=256, max_rows=2048):
    """Largest batch sub-block with a TPU-friendly row count (multiple of 8)."""
    best = B  # full batch is always legal (block dims == full array dims)
    for d in range(1, B + 1):
        if B % d or (d * N) % 8:
            continue
        if d * N <= max_rows:
            best = d
        if d * N >= target_rows:
            break
    # keep >= 2 grid steps when possible so both v7x TensorCores get work
    if B // best < 2:
        for d in range(best - 1, 0, -1):
            if B % d == 0 and (d * N) % 8 == 0:
                best = d
                break
    return best


def _fuse_params(params, num_heads, compute_dtype):
    """Fold trans_dims+linear_0 and linear_1+proj across heads (f32 math)."""
    wt, bt = params["wt"], params["bt"]        # (4C, C), (4C,)
    w0, b0 = params["w0"], params["b0"]        # (k, d),  (k,)
    w1, b1 = params["w1"], params["b1"]        # (d, k),  (d,)
    wp, bp = params["wp"], params["bp"]        # (C, 4C), (C,)

    C4, C = wt.shape
    H = num_heads
    d = C4 // H
    k = w0.shape[0]
    assert w0.shape[1] == d and w1.shape == (d, k)

    # S = x @ wt0 + b0f  gives the pre-softmax logits of head h in the
    # 64-lane column segment [h*k : (h+1)*k]  (head-major layout).
    wt0 = jnp.einsum("chd,kd->chk", wt.T.reshape(C, H, d), w0,
                     precision=_HIGH).reshape(C, H * k)
    b0f = (jnp.einsum("hd,kd->hk", bt.reshape(H, d), w0, precision=_HIGH)
           + b0[None, :]).reshape(1, H * k)

    # out = A @ w1p + bpf   fuses linear_1, the head-major concat and proj.
    w1p = jnp.einsum("dk,hdc->hkc", w1, wp.T.reshape(H, d, C),
                     precision=_HIGH).reshape(H * k, C)
    bpf = (bp + jnp.einsum("e,ec->c", jnp.tile(b1, H), wp.T,
                           precision=_HIGH)).reshape(1, C)

    # 0/1 head-membership matrix for the per-head double normalization.
    seg = jnp.repeat(jnp.eye(H, dtype=jnp.float32), k, axis=0)   # (H*k, H)
    segt = jnp.asarray(seg.T)                                     # (H, H*k)

    return (wt0.astype(compute_dtype), b0f.astype(jnp.float32),
            w1p.astype(compute_dtype), bpf.astype(jnp.float32),
            seg, segt, k)


def _make_kernel(block_b, seq_len, num_heads, k, compute_dtype):
    HK = num_heads * k

    def kernel(x_ref, wt0_ref, b0_ref, w1p_ref, bp_ref, seg_ref, segt_ref,
               o_ref):
        M, C = x_ref.shape                        # M = block_b * seq_len

        # fused trans_dims + linear_0: one dense (M, C) @ (C, H*k) matmul
        s = jnp.dot(x_ref[...].astype(compute_dtype), wt0_ref[...],
                    preferred_element_type=jnp.float32) + b0_ref[...]

        # softmax over the sequence axis (per batch element, per column), f32
        s3 = s.reshape(block_b, seq_len, HK)
        s3 = s3 - jnp.max(s3, axis=1, keepdims=True)
        e = jnp.exp(s3)
        p = e * _recip(jnp.sum(e, axis=1, keepdims=True))

        # double normalization over k within each head: segment sums via
        # tiny 0/1 matmuls (no lane-splitting reshapes), f32 throughout
        p2 = p.reshape(M, HK)
        head_sum = jnp.dot(p2, seg_ref[...],
                           preferred_element_type=jnp.float32)        # (M, H)
        p2 = p2 * jnp.dot(_recip(1e-9 + head_sum), segt_ref[...],
                          preferred_element_type=jnp.float32)         # (M, HK)

        # fused linear_1 + head concat + proj: one (M, H*k) @ (H*k, C) matmul
        out = jnp.dot(p2.astype(compute_dtype), w1p_ref[...],
                      preferred_element_type=jnp.float32) + bp_ref[...]
        o_ref[...] = out.astype(o_ref.dtype)

    return kernel


def attention_forward(x, params, *, num_heads_base=2, coef=4,
                      compute_dtype=jnp.bfloat16, block_b=None):
    """Pallas forward pass matching Attention.forward (eval mode)."""
    B, N, C = x.shape
    H = num_heads_base * coef
    out_dtype = x.dtype

    wt0, b0f, w1p, bpf, seg, segt, k = _fuse_params(params, H, compute_dtype)

    if block_b is None:
        block_b = _choose_block_b(B, N)
    assert B % block_b == 0
    rows = block_b * N

    # Flatten (B, N, C) -> (B*N, C) in the wrapper (free XLA reshape) so the
    # kernel sees 2-D row slabs and all in-kernel reshapes are layout-trivial.
    x2 = x.reshape(B * N, C).astype(compute_dtype)

    full = lambda a: pl.BlockSpec(a.shape, lambda b: (0,) * a.ndim)

    out2 = pl.pallas_call(
        _make_kernel(block_b, N, H, k, compute_dtype),
        out_shape=jax.ShapeDtypeStruct((B * N, C), out_dtype),
        grid=(B // block_b,),
        in_specs=[
            pl.BlockSpec((rows, C), lambda b: (b, 0)),
            full(wt0), full(b0f), full(w1p), full(bpf), full(seg), full(segt),
        ],
        out_specs=pl.BlockSpec((rows, C), lambda b: (b, 0)),
        compiler_params=pltpu.CompilerParams(
            dimension_semantics=("parallel",)),
    )(x2, wt0, b0f, w1p, bpf, seg, segt)

    return out2.reshape(B, N, C)


def attention_reference(x, params, *, num_heads_base=2, coef=4):
    """Pure-JAX reference mirroring the PyTorch forward exactly."""
    B, N, C = x.shape
    H = num_heads_base * coef
    xt = x @ params["wt"].T + params["bt"]                       # (B, N, 4C)
    xt = xt.reshape(B, N, H, -1).transpose(0, 2, 1, 3)           # (B, H, N, d)
    attn = xt @ params["w0"].T + params["b0"]                    # (B, H, N, k)
    attn = jax.nn.softmax(attn, axis=-2)
    attn = attn / (1e-9 + attn.sum(axis=-1, keepdims=True))
    y = attn @ params["w1"].T + params["b1"]                     # (B, H, N, d)
    y = y.transpose(0, 2, 1, 3).reshape(B, N, -1)                # (B, N, 4C)
    return y @ params["wp"].T + params["bp"]                     # (B, N, C)


def init_params(key, dim, *, num_heads_base=2, coef=4):
    H = num_heads_base * coef
    d = (dim * coef) // H
    k = 256 // coef
    ks = jax.random.split(key, 8)
    s = 0.02
    return {
        # PyTorch nn.Linear convention: weight (out, in), bias (out,)
        "wt": s * jax.random.normal(ks[0], (dim * coef, dim), jnp.float32),
        "bt": s * jax.random.normal(ks[1], (dim * coef,), jnp.float32),
        "w0": s * jax.random.normal(ks[2], (k, d), jnp.float32),
        "b0": s * jax.random.normal(ks[3], (k,), jnp.float32),
        "w1": s * jax.random.normal(ks[4], (d, k), jnp.float32),
        "b1": s * jax.random.normal(ks[5], (d,), jnp.float32),
        "wp": s * jax.random.normal(ks[6], (dim, dim * coef), jnp.float32),
        "bp": s * jax.random.normal(ks[7], (dim,), jnp.float32),
    }


if __name__ == "__main__":
    # batch, sequence, channels (dim % num_heads_base == 0)
    B, N, dim = 64, 8, 32
    key = jax.random.PRNGKey(0)
    kx, kp = jax.random.split(key)
    x = jax.random.normal(kx, (B, N, dim), jnp.float32)
    params = init_params(kp, dim)

    with jax.default_matmul_precision("highest"):
        ref = attention_reference(x, params)
    ref = jax.block_until_ready(ref)

    # f32 operands: tight check against the PyTorch-equivalent reference.
    out_f32 = jax.block_until_ready(
        attention_forward(x, params, compute_dtype=jnp.float32))
    assert out_f32.shape == (B, N, dim)
    assert jnp.allclose(out_f32, ref, atol=1e-4, rtol=1e-3), "f32 mismatch"

    # bf16 matmul operands (f32 accumulation + f32 softmax math): looser check.
    out_bf16 = jax.block_until_ready(
        attention_forward(x, params, compute_dtype=jnp.bfloat16))
    assert out_bf16.shape == (B, N, dim)
    max_err = float(jnp.max(jnp.abs(out_bf16 - ref)))
    assert max_err < 5e-3, f"bf16 mismatch: max_err={max_err}"

    print("KERNEL_OK")
</pallas_src>

<mosaic_0001>
module attributes {stable_mosaic.version = 11 : i64} {
  func.func @kernel(%arg0: i32, %arg1: memref<256x32xf32, #tpu.memory_space<vmem>>, %arg2: memref<32x512xf32, #tpu.memory_space<vmem>>, %arg3: memref<1x512xf32, #tpu.memory_space<vmem>>, %arg4: memref<512x32xf32, #tpu.memory_space<vmem>>, %arg5: memref<1x32xf32, #tpu.memory_space<vmem>>, %arg6: memref<512x8xf32, #tpu.memory_space<vmem>>, %arg7: memref<8x512xf32, #tpu.memory_space<vmem>>, %arg8: memref<256x32xf32, #tpu.memory_space<vmem>>) attributes {dimension_semantics = [#tpu.dimension_semantics<parallel>], iteration_bounds = array<i64: 2>, scalar_prefetch = 0 : i64, scratch_operands = 0 : i64, tpu.core_type = #tpu.core_type<tc>, window_params = [{transform_indices = @transform_0, window_bounds = array<i64: 256, 32>}, {pipeline_mode = #tpu.pipeline_mode<synchronous>, transform_indices = @transform_1, window_bounds = array<i64: 32, 512>}, {pipeline_mode = #tpu.pipeline_mode<synchronous>, transform_indices = @transform_2, window_bounds = array<i64: 1, 512>}, {pipeline_mode = #tpu.pipeline_mode<synchronous>, transform_indices = @transform_3, window_bounds = array<i64: 512, 32>}, {pipeline_mode = #tpu.pipeline_mode<synchronous>, transform_indices = @transform_4, window_bounds = array<i64: 1, 32>}, {pipeline_mode = #tpu.pipeline_mode<synchronous>, transform_indices = @transform_5, window_bounds = array<i64: 512, 8>}, {pipeline_mode = #tpu.pipeline_mode<synchronous>, transform_indices = @transform_6, window_bounds = array<i64: 8, 512>}, {transform_indices = @transform_7, window_bounds = array<i64: 256, 32>}]} {
    %c0 = arith.constant 0 : index
    %c0_0 = arith.constant 0 : index
    %0 = vector.load %arg1[%c0, %c0_0] : memref<256x32xf32, #tpu.memory_space<vmem>>, vector<256x32xf32>
    %c0_1 = arith.constant 0 : index
    %c0_2 = arith.constant 0 : index
    %1 = vector.load %arg2[%c0_1, %c0_2] : memref<32x512xf32, #tpu.memory_space<vmem>>, vector<32x512xf32>
    %cst = arith.constant dense<0.000000e+00> : vector<256x512xf32>
    %2 = tpu.matmul %0, %1, %cst {dimension_numbers = #tpu.dot_dimension_numbers<[1], [0], [0], [1], [0, 0, 1, 1], [], []>} : vector<256x32xf32>, vector<32x512xf32>, vector<256x512xf32> -> vector<256x512xf32>
    %c0_3 = arith.constant 0 : index
    %c0_4 = arith.constant 0 : index
    %3 = vector.load %arg3[%c0_3, %c0_4] : memref<1x512xf32, #tpu.memory_space<vmem>>, vector<1x512xf32>
    %4 = vector.broadcast %3 : vector<1x512xf32> to vector<256x512xf32>
    %5 = arith.addf %2, %4 : vector<256x512xf32>
    %6 = vector.shape_cast %5 : vector<256x512xf32> to vector<32x8x512xf32>
    %cst_5 = arith.constant dense<0xFF800000> : vector<32x512xf32>
    %7 = vector.multi_reduction <maximumf>, %6, %cst_5 [1] : vector<32x8x512xf32> to vector<32x512xf32>
    %8 = vector.shape_cast %7 : vector<32x512xf32> to vector<32x1x512xf32>
    %9 = vector.broadcast %8 : vector<32x1x512xf32> to vector<32x8x512xf32>
    %10 = arith.subf %6, %9 : vector<32x8x512xf32>
    %11 = math.exp %10 : vector<32x8x512xf32>
    %cst_6 = arith.constant dense<0.000000e+00> : vector<32x512xf32>
    %12 = vector.multi_reduction <add>, %11, %cst_6 [1] : vector<32x8x512xf32> to vector<32x512xf32>
    %13 = vector.shape_cast %12 : vector<32x512xf32> to vector<32x1x512xf32>
    %14 = tpu.reciprocal %13 {approx = true} : vector<32x1x512xf32> -> vector<32x1x512xf32>
    %15 = arith.mulf %13, %14 : vector<32x1x512xf32>
    %cst_7 = arith.constant 2.000000e+00 : f32
    %16 = vector.broadcast %cst_7 : f32 to vector<32x1x512xf32>
    %17 = arith.subf %16, %15 : vector<32x1x512xf32>
    %18 = arith.mulf %14, %17 : vector<32x1x512xf32>
    %19 = vector.broadcast %18 : vector<32x1x512xf32> to vector<32x8x512xf32>
    %20 = arith.mulf %11, %19 : vector<32x8x512xf32>
    %21 = vector.shape_cast %20 : vector<32x8x512xf32> to vector<256x512xf32>
    %c0_8 = arith.constant 0 : index
    %c0_9 = arith.constant 0 : index
    %22 = vector.load %arg6[%c0_8, %c0_9] : memref<512x8xf32, #tpu.memory_space<vmem>>, vector<512x8xf32>
    %cst_10 = arith.constant dense<0.000000e+00> : vector<256x8xf32>
    %23 = tpu.matmul %21, %22, %cst_10 {dimension_numbers = #tpu.dot_dimension_numbers<[1], [0], [0], [1], [0, 0, 1, 1], [], []>} : vector<256x512xf32>, vector<512x8xf32>, vector<256x8xf32> -> vector<256x8xf32>
    %cst_11 = arith.constant 9.99999971E-10 : f32
    %24 = vector.broadcast %cst_11 : f32 to vector<256x8xf32>
    %25 = arith.addf %24, %23 : vector<256x8xf32>
    %26 = tpu.reciprocal %25 {approx = true} : vector<256x8xf32> -> vector<256x8xf32>
    %27 = arith.mulf %25, %26 : vector<256x8xf32>
    %cst_12 = arith.constant 2.000000e+00 : f32
    %28 = vector.broadcast %cst_12 : f32 to vector<256x8xf32>
    %29 = arith.subf %28, %27 : vector<256x8xf32>
    %30 = arith.mulf %26, %29 : vector<256x8xf32>
    %c0_13 = arith.constant 0 : index
    %c0_14 = arith.constant 0 : index
    %31 = vector.load %arg7[%c0_13, %c0_14] : memref<8x512xf32, #tpu.memory_space<vmem>>, vector<8x512xf32>
    %cst_15 = arith.constant dense<0.000000e+00> : vector<256x512xf32>
    %32 = tpu.matmul %30, %31, %cst_15 {dimension_numbers = #tpu.dot_dimension_numbers<[1], [0], [0], [1], [0, 0, 1, 1], [], []>} : vector<256x8xf32>, vector<8x512xf32>, vector<256x512xf32> -> vector<256x512xf32>
    %33 = arith.mulf %21, %32 : vector<256x512xf32>
    %c0_16 = arith.constant 0 : index
    %c0_17 = arith.constant 0 : index
    %34 = vector.load %arg4[%c0_16, %c0_17] : memref<512x32xf32, #tpu.memory_space<vmem>>, vector<512x32xf32>
    %cst_18 = arith.constant dense<0.000000e+00> : vector<256x32xf32>
    %35 = tpu.matmul %33, %34, %cst_18 {dimension_numbers = #tpu.dot_dimension_numbers<[1], [0], [0], [1], [0, 0, 1, 1], [], []>} : vector<256x512xf32>, vector<512x32xf32>, vector<256x32xf32> -> vector<256x32xf32>
    %c0_19 = arith.constant 0 : index
    %c0_20 = arith.constant 0 : index
    %36 = vector.load %arg5[%c0_19, %c0_20] : memref<1x32xf32, #tpu.memory_space<vmem>>, vector<1x32xf32>
    %37 = vector.broadcast %36 : vector<1x32xf32> to vector<256x32xf32>
    %38 = arith.addf %35, %37 : vector<256x32xf32>
    %c0_21 = arith.constant 0 : index
    %c0_22 = arith.constant 0 : index
    %39 = vector.load %arg8[%c0_21, %c0_22] : memref<256x32xf32, #tpu.memory_space<vmem>>, vector<256x32xf32>
    tpu.vector_store %arg8[%c0_21, %c0_22], %38 {strides = array<i32>} : memref<256x32xf32, #tpu.memory_space<vmem>>, vector<256x32xf32>,
    return
  }
  func.func @transform_0(%arg0: i32) -> (i32, i32) {
    %c0_i32 = arith.constant 0 : i32
    %c0_i32_0 = arith.constant 0 : i32
    return %arg0, %c0_i32 : i32, i32
  }
  func.func @transform_1(%arg0: i32) -> (i32, i32) {
    %c0_i32 = arith.constant 0 : i32
    %c0_i32_0 = arith.constant 0 : i32
    %c0_i32_1 = arith.constant 0 : i32
    return %c0_i32, %c0_i32_0 : i32, i32
  }
  func.func @transform_2(%arg0: i32) -> (i32, i32) {
    %c0_i32 = arith.constant 0 : i32
    %c0_i32_0 = arith.constant 0 : i32
    %c0_i32_1 = arith.constant 0 : i32
    return %c0_i32, %c0_i32_0 : i32, i32
  }
  func.func @transform_3(%arg0: i32) -> (i32, i32) {
    %c0_i32 = arith.constant 0 : i32
    %c0_i32_0 = arith.constant 0 : i32
    %c0_i32_1 = arith.constant 0 : i32
    return %c0_i32, %c0_i32_0 : i32, i32
  }
  func.func @transform_4(%arg0: i32) -> (i32, i32) {
    %c0_i32 = arith.constant 0 : i32
    %c0_i32_0 = arith.constant 0 : i32
    %c0_i32_1 = arith.constant 0 : i32
    return %c0_i32, %c0_i32_0 : i32, i32
  }
  func.func @transform_5(%arg0: i32) -> (i32, i32) {
    %c0_i32 = arith.constant 0 : i32
    %c0_i32_0 = arith.constant 0 : i32
    %c0_i32_1 = arith.constant 0 : i32
    return %c0_i32, %c0_i32_0 : i32, i32
  }
  func.func @transform_6(%arg0: i32) -> (i32, i32) {
    %c0_i32 = arith.constant 0 : i32
    %c0_i32_0 = arith.constant 0 : i32
    %c0_i32_1 = arith.constant 0 : i32
    return %c0_i32, %c0_i32_0 : i32, i32
  }
  func.func @transform_7(%arg0: i32) -> (i32, i32) {
    %c0_i32 = arith.constant 0 : i32
    %c0_i32_0 = arith.constant 0 : i32
    return %arg0, %c0_i32 : i32, i32
  }
}

</mosaic_0001>

<bundles_post_ra>
// kernel: tpu_custom_call.1
= control target key start
LH: loop header
LB: loop body
LE: loop exit
PB: predicated region body
PF: predicated region fallthrough
CT: control target
= control target key end

     0   :  { %s6291_s24 = smov 0   ;;  %s9926_s0 = inlined_call_operand.vmem [shape: f32[512,32], index: 0, kind: input, shape index: {}]   ;;  %s9927_s1 = inlined_call_operand.vmem [shape: f32[32,512], index: 1, kind: input, shape index: {}]   ;;  %s9928_s2 = inlined_call_operand.vmem [shape: f32[1,512], index: 2, kind: input, shape index: {}]   ;;  %s9929_s3 = inlined_call_operand.vmem [shape: f32[512,32], index: 3, kind: input, shape index: {}]   ;;  %s9930_s4 = inlined_call_operand.vmem [shape: f32[1,32], index: 4, kind: input, shape index: {}]   ;;  %s9931_s5 = inlined_call_operand.vmem [shape: f32[512,8], index: 5, kind: input, shape index: {}]   ;;  %s9932_s6 = inlined_call_operand.vmem [shape: f32[8,512], index: 6, kind: input, shape index: {}]   ;;  %s9933_s7 = inlined_call_operand.vmem [shape: f32[512,32], index: 7, kind: output, shape index: {}]  }
   0x1 LB: > { %s5517_s25 = sadd.s32 4294967295, %s6248_s24   ;;  %p5521_p0 = scmp.ge.s32.totalorder %s6248_s24, 1  ;;  %s6248_s24 = sphi %s6291_s24, %s17_s24  }
   0x2   : > { %p238_p1 = scmp.lt.s32.totalorder %s6248_s24, 3 }
   0x4   : > { %p239_p2 = pnand %p5521_p0, %p238_p1 }
   0x6   : > { %242 = sbr.rel (%p239_p2) target bundleno = 1524 (0x5f4), region = 48 }
   0xb   : > { %v327_v0 = vld [vmem:[%s9927_s1 + $0x68] sm:$0xff]  ;;  %v329_v1 = vld [vmem:[%s9927_s1 + $0x78] sm:$0xff]  ;;  %v326_v2 = vld [vmem:[%s9927_s1 + $0x60] sm:$0xff]  ;;  %s5522_s9 = sshll.u32 %s5517_s25, 5  ;;  %vm352_vm0 = vcmask 261120   ;;  %v9934_v17 = vmov 0.0  }
   0xc   : > { %473 = vmatprep.subr.mxu0 %v327_v0  ;;  %730 = vmatprep.subr.mxu1 %v329_v1  ;;  %v328_v3 = vld [vmem:[%s9927_s1 + $0x70] sm:$0xff]  ;;  %v323_v4 = vld [vmem:[%s9927_s1 + $0x48] sm:$0xff]  ;;  %v325_v5 = vld [vmem:[%s9927_s1 + $0x58] sm:$0xff]  ;;  %p271_p3 = scmp.lt.s32.totalorder %s5522_s9, 63  ;;  %vm4169_vm1 = vcmask 64512  }
   0xd   : > { %474 = vmatpush1.msra.mxu0 %v326_v2  ;;  %731 = vmatpush1.msra.mxu1 %v328_v3  ;;  %v322_v6 = vld [vmem:[%s9927_s1 + $0x40] sm:$0xff]  ;;  %v324_v7 = vld [vmem:[%s9927_s1 + $0x50] sm:$0xff]  ;;  %v319_v8 = vld [vmem:[%s9927_s1 + $0x28] sm:$0xff] }
   0xe   : > { %475 = vmatprep.subr.mxu0 %v323_v4  ;;  %732 = vmatprep.subr.mxu1 %v325_v5  ;;  %v321_v9 = vld [vmem:[%s9927_s1 + $0x38] sm:$0xff]  ;;  %v318_v10 = vld [vmem:[%s9927_s1 + $0x20] sm:$0xff]  ;;  %v320_v11 = vld [vmem:[%s9927_s1 + $0x30] sm:$0xff]  ;;  %s10547_s9 = smov (!%p271_p3, %s5522_s9), 63 }
   0xf   : > { %476 = vmatpush1.msra.mxu0 %v322_v6  ;;  %733 = vmatpush1.msra.mxu1 %v324_v7  ;;  %v315_v12 = vld [vmem:[%s9927_s1 + $0x8] sm:$0xff]  ;;  %v317_v13 = vld [vmem:[%s9927_s1 + $0x18] sm:$0xff]  ;;  %v314_v14 = vld [vmem:[%s9927_s1] sm:$0xff]  ;;  %s5523_s13 = sshll.u32 %s10547_s9, 3 }
  0x10   : > { %477 = vmatprep.subr.mxu0 %v319_v8  ;;  %734 = vmatprep.subr.mxu1 %v321_v9  ;;  %v316_v15 = vld [vmem:[%s9927_s1 + $0x10] sm:$0xff]  ;;  %s6355_s18 = scalar_lea.vmem %s9926_s0, %s5523_s13  ;;  %v3538_v18 = vld [vmem:[%s9931_s5 + $0x78] sm:$0xff]  ;;  %v3536_v24 = vld [vmem:[%s9931_s5 + $0x68] sm:$0xff]  ;;  %s9826_s11 = scalar_lea.vmem %s9933_s7, %s5523_s13 }
  0x11   : > { %478 = vmatpush1.msra.mxu0 %v318_v10  ;;  %735 = vmatpush1.msra.mxu1 %v320_v11  ;;  %v282_v16 = vld [vmem:[%s6355_s18] sm:$0xff]  ;;  %v3570_v19 = vld [vmem:[%s9931_s5 + $0x178] sm:$0xff]  ;;  %v283_v20 = vld [vmem:[%s6355_s18 + $0x8] sm:$0xff] }
  0x12   : > { %479 = vmatprep.subr.mxu0 %v315_v12  ;;  %736 = vmatprep.subr.mxu1 %v317_v13  ;;  %v3537_v21 = vld [vmem:[%s9931_s5 + $0x70] sm:$0xff]  ;;  %v285_v25 = vld [vmem:[%s6355_s18 + $0x18] sm:$0xff]  ;;  %v3568_v26 = vld [vmem:[%s9931_s5 + $0x168] sm:$0xff] }
  0x13   : > { %480 = vmatpush1.msra.mxu0 %v314_v14  ;;  %513 = vmatprep.mubr.f32.mxu0 %v9934_v17  ;;  %v284_v22 = vld [vmem:[%s6355_s18 + $0x10] sm:$0xff]  ;;  %v3535_v27 = vld [vmem:[%s9931_s5 + $0x60] sm:$0xff]  ;;  %v3534_v30 = vld [vmem:[%s9931_s5 + $0x58] sm:$0xff] }
  0x14   : > { %737 = vmatpush1.msra.mxu1 %v316_v15  ;;  %770 = vmatprep.mubr.f32.mxu1 %v9934_v17  ;;  %v3569_v23 = vld [vmem:[%s9931_s5 + $0x170] sm:$0xff]  ;;  %v286_v28 = vld [vmem:[%s6355_s18 + $0x20] sm:$0xff]  ;;  %v287_v31 = vld [vmem:[%s6355_s18 + $0x28] sm:$0xff] }
  0x15   : > { %5526 = vmatmul.mubr.msk.f32.vlgmr.msra.gmra.mxu0 %vm352_vm0, %v282_v16  ;;  %5558 = vmatmul.mubr.msk.f32.vlgmr.msra.gmra.mxu1 %vm352_vm0, %v282_v16  ;;  %v3567_v29 = vld [vmem:[%s9931_s5 + $0x160] sm:$0xff]  ;;  %v3566_v32 = vld [vmem:[%s9931_s5 + $0x158] sm:$0xff]  ;;  %v3533_v33 = vld [vmem:[%s9931_s5 + $0x50] sm:$0xff] }
  0x16   : > { %519 = vmatprep.mubr.f32.mxu0 %v9934_v17  ;;  %776 = vmatprep.mubr.f32.mxu1 %v9934_v17  ;;  %v288_v34 = vld [vmem:[%s6355_s18 + $0x30] sm:$0xff]  ;;  %v3532_v36 = vld [vmem:[%s9931_s5 + $0x48] sm:$0xff]  ;;  %v289_v37 = vld [vmem:[%s6355_s18 + $0x38] sm:$0xff] }
  0x17   : > { %3587 = vmatprep.subr.mxu0 %v9934_v17  ;;  %3812 = vmatprep.subr.mxu1 %v9934_v17  ;;  %v3565_v35 = vld [vmem:[%s9931_s5 + $0x150] sm:$0xff]  ;;  %v3564_v38 = vld [vmem:[%s9931_s5 + $0x148] sm:$0xff]  ;;  %v3531_v39 = vld [vmem:[%s9931_s5 + $0x40] sm:$0xff] }
  0x18   : > { %3588 = vmatpush1.msra.mxu0 %v3538_v18  ;;  %3813 = vmatpush1.msra.mxu1 %v3570_v19  ;;  %v290_v40 = vld [vmem:[%s6355_s18 + $0x40] sm:$0xff]  ;;  %v3530_v42 = vld [vmem:[%s9931_s5 + $0x38] sm:$0xff]  ;;  %v291_v43 = vld [vmem:[%s6355_s18 + $0x48] sm:$0xff] }
  0x19   : > { %5527 = vmatmul.mubr.msk.f32.gmra.mxu0 %vm352_vm0, %v283_v20  ;;  %5559 = vmatmul.mubr.msk.f32.gmra.mxu1 %vm352_vm0, %v283_v20  ;;  %v3563_v41 = vld [vmem:[%s9931_s5 + $0x140] sm:$0xff]  ;;  %v3562_v44 = vld [vmem:[%s9931_s5 + $0x138] sm:$0xff]  ;;  %v3529_v45 = vld [vmem:[%s9931_s5 + $0x30] sm:$0xff] }
  0x1a   : > { %525 = vmatprep.mubr.f32.mxu0 %v9934_v17  ;;  %782 = vmatprep.mubr.f32.mxu1 %v9934_v17  ;;  %v292_v46 = vld [vmem:[%s6355_s18 + $0x50] sm:$0xff]  ;;  %v3528_v48 = vld [vmem:[%s9931_s5 + $0x28] sm:$0xff]  ;;  %v293_v49 = vld [vmem:[%s6355_s18 + $0x58] sm:$0xff] }
  0x1b   : > { %3589 = vmatprep.subr.mxu0 %v9934_v17  ;;  %3814 = vmatprep.subr.mxu1 %v9934_v17  ;;  %v3561_v47 = vld [vmem:[%s9931_s5 + $0x130] sm:$0xff]  ;;  %v3560_v50 = vld [vmem:[%s9931_s5 + $0x128] sm:$0xff]  ;;  %v3527_v51 = vld [vmem:[%s9931_s5 + $0x20] sm:$0xff] }
  0x1c   : > { %3590 = vmatpush1.msra.mxu0 %v3537_v21  ;;  %3815 = vmatpush1.msra.mxu1 %v3569_v23  ;;  %v294_v52 = vld [vmem:[%s6355_s18 + $0x60] sm:$0xff]  ;;  %v3526_v54 = vld [vmem:[%s9931_s5 + $0x18] sm:$0xff]  ;;  %v295_v55 = vld [vmem:[%s6355_s18 + $0x68] sm:$0xff] }
  0x1d   : > { %5528 = vmatmul.mubr.msk.f32.gmra.mxu0 %vm352_vm0, %v284_v22  ;;  %5560 = vmatmul.mubr.msk.f32.gmra.mxu1 %vm352_vm0, %v284_v22  ;;  %v3559_v53 = vld [vmem:[%s9931_s5 + $0x120] sm:$0xff]  ;;  %v3558_v56 = vld [vmem:[%s9931_s5 + $0x118] sm:$0xff]  ;;  %v3525_v57 = vld [vmem:[%s9931_s5 + $0x10] sm:$0xff] }
  0x1e   : > { %531 = vmatprep.mubr.f32.mxu0 %v9934_v17  ;;  %788 = vmatprep.mubr.f32.mxu1 %v9934_v17  ;;  %v296_v58 = vld [vmem:[%s6355_s18 + $0x70] sm:$0xff]  ;;  %v3524_v60 = vld [vmem:[%s9931_s5 + $0x8] sm:$0xff]  ;;  %v297_v61 = vld [vmem:[%s6355_s18 + $0x78] sm:$0xff] }
  0x1f   : > { %3591 = vmatprep.subr.mxu0 %v9934_v17  ;;  %3816 = vmatprep.subr.mxu1 %v9934_v17  ;;  %v3557_v59 = vld [vmem:[%s9931_s5 + $0x110] sm:$0xff]  ;;  %v298_v62 = vld [vmem:[%s6355_s18 + $0x80] sm:$0xff]  ;;  %v299_v63 = vld [vmem:[%s6355_s18 + $0x88] sm:$0xff] }
  0x20   : > { %3592 = vmatpush1.msra.mxu0 %v3536_v24  ;;  %3817 = vmatpush1.msra.mxu1 %v3568_v26  ;;  %v300_v0 = vld [vmem:[%s6355_s18 + $0x90] sm:$0xff]  ;;  %v301_v1 = vld [vmem:[%s6355_s18 + $0x98] sm:$0xff]  ;;  %v302_v2 = vld [vmem:[%s6355_s18 + $0xa0] sm:$0xff] }
  0x21   : > { %5529 = vmatmul.mubr.msk.f32.gmra.mxu0 %vm352_vm0, %v285_v25  ;;  %5561 = vmatmul.mubr.msk.f32.gmra.mxu1 %vm352_vm0, %v285_v25  ;;  %v303_v3 = vld [vmem:[%s6355_s18 + $0xa8] sm:$0xff]  ;;  %v304_v5 = vld [vmem:[%s6355_s18 + $0xb0] sm:$0xff]  ;;  %v3523_v6 = vld [vmem:[%s9931_s5] sm:$0xff] }
  0x22   : > { %537 = vmatprep.mubr.f32.mxu0 %v9934_v17  ;;  %794 = vmatprep.mubr.f32.mxu1 %v9934_v17  ;;  %v3556_v4 = vld [vmem:[%s9931_s5 + $0x108] sm:$0xff]  ;;  %v305_v7 = vld [vmem:[%s6355_s18 + $0xb8] sm:$0xff]  ;;  %v3555_v8 = vld [vmem:[%s9931_s5 + $0x100] sm:$0xff] }
  0x23   : > { %3593 = vmatprep.subr.mxu0 %v9934_v17  ;;  %3818 = vmatprep.subr.mxu1 %v9934_v17  ;;  %v3554_v9 = vld [vmem:[%s9931_s5 + $0xf8] sm:$0xff]  ;;  %v306_v10 = vld [vmem:[%s6355_s18 + $0xc0] sm:$0xff]  ;;  %v307_v11 = vld [vmem:[%s6355_s18 + $0xc8] sm:$0xff] }
  0x24   : > { %3594 = vmatpush1.msra.mxu0 %v3535_v27  ;;  %3819 = vmatpush1.msra.mxu1 %v3567_v29  ;;  %v308_v12 = vld [vmem:[%s6355_s18 + $0xd0] sm:$0xff]  ;;  %v3586_v13 = vld [vmem:[%s9931_s5 + $0x1f8] sm:$0xff]  ;;  %v310_v16 = vld [vmem:[%s6355_s18 + $0xe0] sm:$0xff] }
  0x25   : > { %5530 = vmatmul.mubr.msk.f32.gmra.mxu0 %vm352_vm0, %v286_v28  ;;  %5562 = vmatmul.mubr.msk.f32.gmra.mxu1 %vm352_vm0, %v286_v28  ;;  %v309_v14 = vld [vmem:[%s6355_s18 + $0xd8] sm:$0xff]  ;;  %v3553_v15 = vld [vmem:[%s9931_s5 + $0xf0] sm:$0xff]  ;;  %v3552_v19 = vld [vmem:[%s9931_s5 + $0xe8] sm:$0xff] }
  0x26   : > { %543 = vmatprep.mubr.f32.mxu0 %v9934_v17  ;;  %800 = vmatprep.mubr.f32.mxu1 %v9934_v17  ;;  %v3585_v18 = vld [vmem:[%s9931_s5 + $0x1f0] sm:$0xff]  ;;  %v311_v20 = vld [vmem:[%s6355_s18 + $0xe8] sm:$0xff]  ;;  %v313_v22 = vld [vmem:[%s6355_s18 + $0xf8] sm:$0xff] }
  0x27   : > { %3595 = vmatprep.subr.mxu0 %v9934_v17  ;;  %3820 = vmatprep.subr.mxu1 %v9934_v17  ;;  %v312_v21 = vld [vmem:[%s6355_s18 + $0xf0] sm:$0xff]  ;;  %v3584_v23 = vld [vmem:[%s9931_s5 + $0x1e8] sm:$0xff]  ;;  %v3551_v24 = vld [vmem:[%s9931_s5 + $0xe0] sm:$0xff] }
  0x28   : > { %3596 = vmatpush1.msra.mxu0 %v3534_v30  ;;  %3821 = vmatpush1.msra.mxu1 %v3566_v32  ;;  %v3583_v25 = vld [vmem:[%s9931_s5 + $0x1e0] sm:$0xff]  ;;  %v3550_v26 = vld [vmem:[%s9931_s5 + $0xd8] sm:$0xff]  ;;  %v3549_v28 = vld [vmem:[%s9931_s5 + $0xd0] sm:$0xff] }
  0x29   : > { %5531 = vmatmul.mubr.msk.f32.gmra.mxu0 %vm352_vm0, %v287_v31  ;;  %5563 = vmatmul.mubr.msk.f32.gmra.mxu1 %vm352_vm0, %v287_v31  ;;  %v3582_v27 = vld [vmem:[%s9931_s5 + $0x1d8] sm:$0xff]  ;;  %v3581_v29 = vld [vmem:[%s9931_s5 + $0x1d0] sm:$0xff]  ;;  %v3548_v30 = vld [vmem:[%s9931_s5 + $0xc8] sm:$0xff] }
  0x2a   : > { %549 = vmatprep.mubr.f32.mxu0 %v9934_v17  ;;  %806 = vmatprep.mubr.f32.mxu1 %v9934_v17  ;;  %v3580_v31 = vld [vmem:[%s9931_s5 + $0x1c8] sm:$0xff]  ;;  %v3547_v32 = vld [vmem:[%s9931_s5 + $0xc0] sm:$0xff] }
  0x2b   : > { %3597 = vmatprep.subr.mxu0 %v9934_v17  ;;  %3822 = vmatprep.subr.mxu1 %v9934_v17 }
  0x2c   : > { %3598 = vmatpush1.msra.mxu0 %v3533_v33  ;;  %3823 = vmatpush1.msra.mxu1 %v3565_v35  ;;  %v3579_v33 = vld [vmem:[%s9931_s5 + $0x1c0] sm:$0xff]  ;;  %v332_v35 = vlaneseq }
  0x2d   : > { %5532 = vmatmul.mubr.msk.f32.gmra.mxu0 %vm352_vm0, %v288_v34  ;;  %5564 = vmatmul.mubr.msk.f32.gmra.mxu1 %vm352_vm0, %v288_v34  ;;  %v3546_v34 = vld [vmem:[%s9931_s5 + $0xb8] sm:$0xff] }
  0x2e   : > { %555 = vmatprep.mubr.f32.mxu0 %v9934_v17  ;;  %812 = vmatprep.mubr.f32.mxu1 %v9934_v17 }
  0x2f   : > { %3599 = vmatprep.subr.mxu0 %v9934_v17  ;;  %3824 = vmatprep.subr.mxu1 %v9934_v17 }
  0x30   : > { %3600 = vmatpush1.msra.mxu0 %v3532_v36  ;;  %3825 = vmatpush1.msra.mxu1 %v3564_v38  ;;  %v3578_v36 = vld [vmem:[%s9931_s5 + $0x1b8] sm:$0xff]  ;;  %v3545_v38 = vld [vmem:[%s9931_s5 + $0xb0] sm:$0xff] }
  0x31   : > { %5533 = vmatmul.mubr.msk.f32.gmra.mxu0 %vm352_vm0, %v289_v37  ;;  %5565 = vmatmul.mubr.msk.f32.gmra.mxu1 %vm352_vm0, %v289_v37  ;;  %v333_v37 = vshrl.u32 %v332_v35, 7 }
  0x32   : > { %561 = vmatprep.mubr.f32.mxu0 %v9934_v17  ;;  %818 = vmatprep.mubr.f32.mxu1 %v9934_v17 }
  0x33   : > { %3601 = vmatprep.subr.mxu0 %v9934_v17  ;;  %3826 = vmatprep.subr.mxu1 %v9934_v17 }
  0x34   : > { %3602 = vmatpush1.msra.mxu0 %v3531_v39  ;;  %3827 = vmatpush1.msra.mxu1 %v3563_v41  ;;  %v3577_v39 = vld [vmem:[%s9931_s5 + $0x1b0] sm:$0xff]  ;;  %v334_v41 = vsub.s32 0, %v333_v37 }
  0x35   : > { %5534 = vmatmul.mubr.msk.f32.gmra.mxu0 %vm352_vm0, %v290_v40  ;;  %5566 = vmatmul.mubr.msk.f32.gmra.mxu1 %vm352_vm0, %v290_v40  ;;  %v3544_v40 = vld [vmem:[%s9931_s5 + $0xa8] sm:$0xff] }
  0x36   : > { %567 = vmatprep.mubr.f32.mxu0 %v9934_v17  ;;  %824 = vmatprep.mubr.f32.mxu1 %v9934_v17 }
  0x37   : > { %3603 = vmatprep.subr.mxu0 %v9934_v17  ;;  %3828 = vmatprep.subr.mxu1 %v9934_v17 }
  0x38   : > { %3604 = vmatpush1.msra.mxu0 %v3530_v42  ;;  %3829 = vmatpush1.msra.mxu1 %v3562_v44  ;;  %v342_v42 = vsub.s32 2, %v333_v37  ;;  %v338_v44 = vsub.s32 1, %v333_v37 }
  0x39   : > { %5535 = vmatmul.mubr.msk.f32.gmra.mxu0 %vm352_vm0, %v291_v43  ;;  %5567 = vmatmul.mubr.msk.f32.gmra.mxu1 %vm352_vm0, %v291_v43  ;;  %v330_v43 = vld [vmem:[%s9928_s2] sm:$0xf] }
  0x3a   : > { %573 = vmatprep.mubr.f32.mxu0 %v9934_v17  ;;  %830 = vmatprep.mubr.f32.mxu1 %v9934_v17 }
  0x3b   : > { %3605 = vmatprep.subr.mxu0 %v9934_v17  ;;  %3830 = vmatprep.subr.mxu1 %v9934_v17 }
  0x3c   : > { %3606 = vmatpush1.msra.mxu0 %v3529_v45  ;;  %3831 = vmatpush1.msra.mxu1 %v3561_v47  ;;  %v346_v45 = vsub.s32 3, %v333_v37  ;;  %v6736_v47 = vrot.slane %v330_v43, %v342_v42 }
  0x3d   : > { %5536 = vmatmul.mubr.msk.f32.gmra.mxu0 %vm352_vm0, %v292_v46  ;;  %5568 = vmatmul.mubr.msk.f32.gmra.mxu1 %vm352_vm0, %v292_v46  ;;  %v6734_v46 = vrot.slane %v330_v43, %v334_v41 }
  0x3e   : > { %579 = vmatprep.mubr.f32.mxu0 %v9934_v17  ;;  %836 = vmatprep.mubr.f32.mxu1 %v9934_v17 }
  0x3f   : > { %3607 = vmatprep.subr.mxu0 %v9934_v17  ;;  %3832 = vmatprep.subr.mxu1 %v9934_v17 }
  0x40   : > { %3608 = vmatpush1.msra.mxu0 %v3528_v48  ;;  %3833 = vmatpush1.msra.mxu1 %v3560_v50  ;;  %v6738_v48 = vrot.slane %v330_v43, %v338_v44 }
  0x41   : > { %5537 = vmatmul.mubr.msk.f32.gmra.mxu0 %vm352_vm0, %v293_v49  ;;  %5569 = vmatmul.mubr.msk.f32.gmra.mxu1 %vm352_vm0, %v293_v49  ;;  %v6740_v49 = vrot.slane %v330_v43, %v346_v45 }
  0x42   : > { %585 = vmatprep.mubr.f32.mxu0 %v9934_v17  ;;  %842 = vmatprep.mubr.f32.mxu1 %v9934_v17 }
  0x43   : > { %3609 = vmatprep.subr.mxu0 %v9934_v17  ;;  %3834 = vmatprep.subr.mxu1 %v9934_v17 }
  0x44   : > { %3610 = vmatpush1.msra.mxu0 %v3527_v51  ;;  %3835 = vmatpush1.msra.mxu1 %v3559_v53 }
  0x45   : > { %5538 = vmatmul.mubr.msk.f32.gmra.mxu0 %vm352_vm0, %v294_v52  ;;  %5570 = vmatmul.mubr.msk.f32.gmra.mxu1 %vm352_vm0, %v294_v52 }
  0x46   : > { %591 = vmatprep.mubr.f32.mxu0 %v9934_v17  ;;  %848 = vmatprep.mubr.f32.mxu1 %v9934_v17 }
  0x47   : > { %3611 = vmatprep.subr.mxu0 %v9934_v17  ;;  %3836 = vmatprep.subr.mxu1 %v9934_v17 }
  0x48   : > { %3612 = vmatpush1.msra.mxu0 %v3526_v54  ;;  %3837 = vmatpush1.msra.mxu1 %v3558_v56  ;;  %v3576_v54 = vld [vmem:[%s9931_s5 + $0x1a8] sm:$0xff] }
  0x49   : > { %5539 = vmatmul.mubr.msk.f32.gmra.mxu0 %vm352_vm0, %v295_v55  ;;  %5571 = vmatmul.mubr.msk.f32.gmra.mxu1 %vm352_vm0, %v295_v55 }
  0x4a   : > { %597 = vmatprep.mubr.f32.mxu0 %v9934_v17  ;;  %854 = vmatprep.mubr.f32.mxu1 %v9934_v17 }
  0x4b   : > { %3613 = vmatprep.subr.mxu0 %v9934_v17  ;;  %3838 = vmatprep.subr.mxu1 %v9934_v17 }
  0x4c   : > { %3614 = vmatpush1.msra.mxu0 %v3525_v57  ;;  %3839 = vmatpush1.msra.mxu1 %v3557_v59 }
  0x4d   : > { %5540 = vmatmul.mubr.msk.f32.gmra.mxu0 %vm352_vm0, %v296_v58  ;;  %5572 = vmatmul.mubr.msk.f32.gmra.mxu1 %vm352_vm0, %v296_v58 }
  0x4e   : > { %603 = vmatprep.mubr.f32.mxu0 %v9934_v17  ;;  %860 = vmatprep.mubr.f32.mxu1 %v9934_v17 }
  0x4f   : > { %3615 = vmatprep.subr.mxu0 %v9934_v17  ;;  %3840 = vmatprep.subr.mxu1 %v9934_v17 }
  0x50   : > { %3616 = vmatpush1.msra.mxu0 %v3524_v60  ;;  %3841 = vmatpush1.msra.mxu1 %v3556_v4 }
  0x51   : > { %5541 = vmatmul.mubr.msk.f32.gmra.mxu0 %vm352_vm0, %v297_v61  ;;  %5573 = vmatmul.mubr.msk.f32.gmra.mxu1 %vm352_vm0, %v297_v61 }
  0x52   : > { %609 = vmatprep.mubr.f32.mxu0 %v9934_v17  ;;  %866 = vmatprep.mubr.f32.mxu1 %v9934_v17 }
  0x53   : > { %3617 = vmatprep.subr.mxu0 %v9934_v17  ;;  %3842 = vmatprep.subr.mxu1 %v9934_v17 }
  0x54   : > { %3618 = vmatpush1.msra.mxu0 %v3523_v6  ;;  %3843 = vmatpush1.msra.mxu1 %v3555_v8  ;;  %v3575_v8 = vld [vmem:[%s9931_s5 + $0x1a0] sm:$0xff] }
  0x55   : > { %5542 = vmatmul.mubr.msk.f32.gmra.mxu0 %vm352_vm0, %v298_v62  ;;  %5574 = vmatmul.mubr.msk.f32.gmra.mxu1 %vm352_vm0, %v298_v62 }
  0x56   : > { %615 = vmatprep.mubr.f32.mxu0 %v9934_v17  ;;  %872 = vmatprep.mubr.f32.mxu1 %v9934_v17 }
  0x57   : > { %3619 = vmatprep.subr.mxu0 %v9934_v17  ;;  %3844 = vmatprep.subr.mxu1 %v9934_v17 }
  0x58   : > { %3620 = vmatpush2.msra.mxu0 %v3554_v9  ;;  %3845 = vmatpush2.msra.mxu1 %v3586_v13 }
  0x59   : > { %5543 = vmatmul.mubr.msk.f32.gmra.mxu0 %vm352_vm0, %v299_v63  ;;  %5575 = vmatmul.mubr.msk.f32.gmra.mxu1 %vm352_vm0, %v299_v63 }
  0x5a   : > { %621 = vmatprep.mubr.f32.mxu0 %v9934_v17  ;;  %878 = vmatprep.mubr.f32.mxu1 %v9934_v17 }
  0x5b   : > { %3621 = vmatprep.subr.mxu0 %v9934_v17  ;;  %3846 = vmatprep.subr.mxu1 %v9934_v17 }
  0x5c   : > { %3622 = vmatpush2.msra.mxu0 %v3553_v15  ;;  %3847 = vmatpush2.msra.mxu1 %v3585_v18  ;;  %v3542_v18 = vld [vmem:[%s9931_s5 + $0x98] sm:$0xff] }
  0x5d   : > { %5544 = vmatmul.mubr.msk.f32.gmra.mxu0 %vm352_vm0, %v300_v0  ;;  %5576 = vmatmul.mubr.msk.f32.gmra.mxu1 %vm352_vm0, %v300_v0 }
  0x5e   : > { %627 = vmatprep.mubr.f32.mxu0 %v9934_v17  ;;  %884 = vmatprep.mubr.f32.mxu1 %v9934_v17 }
  0x5f   : > { %3623 = vmatprep.subr.mxu0 %v9934_v17  ;;  %3848 = vmatprep.subr.mxu1 %v9934_v17 }
  0x60   : > { %3624 = vmatpush2.msra.mxu0 %v3552_v19  ;;  %3849 = vmatpush2.msra.mxu1 %v3584_v23 }
  0x61   : > { %5545 = vmatmul.mubr.msk.f32.gmra.mxu0 %vm352_vm0, %v301_v1  ;;  %5577 = vmatmul.mubr.msk.f32.gmra.mxu1 %vm352_vm0, %v301_v1 }
  0x62   : > { %633 = vmatprep.mubr.f32.mxu0 %v9934_v17  ;;  %890 = vmatprep.mubr.f32.mxu1 %v9934_v17 }
  0x63   : > { %3625 = vmatprep.subr.mxu0 %v9934_v17  ;;  %3850 = vmatprep.subr.mxu1 %v9934_v17 }
  0x64   : > { %3626 = vmatpush2.msra.mxu0 %v3551_v24  ;;  %3851 = vmatpush2.msra.mxu1 %v3583_v25 }
  0x65   : > { %5546 = vmatmul.mubr.msk.f32.gmra.mxu0 %vm352_vm0, %v302_v2  ;;  %5578 = vmatmul.mubr.msk.f32.gmra.mxu1 %vm352_vm0, %v302_v2 }
  0x66   : > { %639 = vmatprep.mubr.f32.mxu0 %v9934_v17  ;;  %896 = vmatprep.mubr.f32.mxu1 %v9934_v17 }
  0x67   : > { %3627 = vmatprep.subr.mxu0 %v9934_v17  ;;  %3852 = vmatprep.subr.mxu1 %v9934_v17 }
  0x68   : > { %3628 = vmatpush2.msra.mxu0 %v3550_v26  ;;  %3853 = vmatpush2.msra.mxu1 %v3582_v27 }
  0x69   : > { %5547 = vmatmul.mubr.msk.f32.gmra.mxu0 %vm352_vm0, %v303_v3  ;;  %5579 = vmatmul.mubr.msk.f32.gmra.mxu1 %vm352_vm0, %v303_v3  ;;  %v3543_v3 = vld [vmem:[%s9931_s5 + $0xa0] sm:$0xff] }
  0x6a   : > { %645 = vmatprep.mubr.f32.mxu0 %v9934_v17  ;;  %902 = vmatprep.mubr.f32.mxu1 %v9934_v17 }
  0x6b   : > { %3629 = vmatprep.subr.mxu0 %v9934_v17  ;;  %3854 = vmatprep.subr.mxu1 %v9934_v17 }
  0x6c   : > { %3630 = vmatpush2.msra.mxu0 %v3549_v28  ;;  %3855 = vmatpush2.msra.mxu1 %v3581_v29 }
  0x6d   : > { %5548 = vmatmul.mubr.msk.f32.gmra.mxu0 %vm352_vm0, %v304_v5  ;;  %5580 = vmatmul.mubr.msk.f32.gmra.mxu1 %vm352_vm0, %v304_v5 }
  0x6e   : > { %651 = vmatprep.mubr.f32.mxu0 %v9934_v17  ;;  %908 = vmatprep.mubr.f32.mxu1 %v9934_v17 }
  0x6f   : > { %3631 = vmatprep.subr.mxu0 %v9934_v17  ;;  %3856 = vmatprep.subr.mxu1 %v9934_v17 }
  0x70   : > { %3632 = vmatpush2.msra.mxu0 %v3548_v30  ;;  %3857 = vmatpush2.msra.mxu1 %v3580_v31 }
  0x71   : > { %5549 = vmatmul.mubr.msk.f32.gmra.mxu0 %vm352_vm0, %v305_v7  ;;  %5581 = vmatmul.mubr.msk.f32.gmra.mxu1 %vm352_vm0, %v305_v7 }
  0x72   : > { %657 = vmatprep.mubr.f32.mxu0 %v9934_v17  ;;  %914 = vmatprep.mubr.f32.mxu1 %v9934_v17 }
  0x73   : > { %3633 = vmatprep.subr.mxu0 %v9934_v17  ;;  %3858 = vmatprep.subr.mxu1 %v9934_v17 }
  0x74   : > { %3634 = vmatpush2.msra.mxu0 %v3547_v32  ;;  %3859 = vmatpush2.msra.mxu1 %v3579_v33 }
  0x75   : > { %5550 = vmatmul.mubr.msk.f32.gmra.mxu0 %vm352_vm0, %v306_v10  ;;  %5582 = vmatmul.mubr.msk.f32.gmra.mxu1 %vm352_vm0, %v306_v10 }
  0x76   : > { %663 = vmatprep.mubr.f32.mxu0 %v9934_v17  ;;  %920 = vmatprep.mubr.f32.mxu1 %v9934_v17 }
  0x77   : > { %3635 = vmatprep.subr.mxu0 %v9934_v17  ;;  %3860 = vmatprep.subr.mxu1 %v9934_v17 }
  0x78   : > { %3636 = vmatpush2.msra.mxu0 %v3546_v34  ;;  %3861 = vmatpush2.msra.mxu1 %v3578_v36 }
  0x79   : > { %5551 = vmatmul.mubr.msk.f32.gmra.mxu0 %vm352_vm0, %v307_v11  ;;  %5583 = vmatmul.mubr.msk.f32.gmra.mxu1 %vm352_vm0, %v307_v11 }
  0x7a   : > { %669 = vmatprep.mubr.f32.mxu0 %v9934_v17  ;;  %926 = vmatprep.mubr.f32.mxu1 %v9934_v17 }
  0x7b   : > { %3637 = vmatprep.subr.mxu0 %v9934_v17  ;;  %3862 = vmatprep.subr.mxu1 %v9934_v17 }
  0x7c   : > { %3638 = vmatpush2.msra.mxu0 %v3545_v38  ;;  %3863 = vmatpush2.msra.mxu1 %v3577_v39 }
  0x7d   : > { %5552 = vmatmul.mubr.msk.f32.gmra.mxu0 %vm352_vm0, %v308_v12  ;;  %5584 = vmatmul.mubr.msk.f32.gmra.mxu1 %vm352_vm0, %v308_v12 }
  0x7e   : > { %675 = vmatprep.mubr.f32.mxu0 %v9934_v17  ;;  %932 = vmatprep.mubr.f32.mxu1 %v9934_v17 }
  0x7f   : > { %3639 = vmatprep.subr.mxu0 %v9934_v17  ;;  %3864 = vmatprep.subr.mxu1 %v9934_v17 }
  0x80   : > { %3640 = vmatpush2.msra.mxu0 %v3544_v40  ;;  %3865 = vmatpush2.msra.mxu1 %v3576_v54 }
  0x81   : > { %5553 = vmatmul.mubr.msk.f32.gmra.mxu0 %vm352_vm0, %v309_v14  ;;  %5585 = vmatmul.mubr.msk.f32.gmra.mxu1 %vm352_vm0, %v309_v14 }
  0x82   : > { %681 = vmatprep.mubr.f32.mxu0 %v9934_v17  ;;  %938 = vmatprep.mubr.f32.mxu1 %v9934_v17 }
  0x83   : > { %3641 = vmatprep.subr.mxu0 %v9934_v17  ;;  %3866 = vmatprep.subr.mxu1 %v9934_v17 }
  0x84   : > { %3642 = vmatpush2.msra.mxu0 %v3543_v3  ;;  %3867 = vmatpush2.msra.mxu1 %v3575_v8 }
  0x85   : > { %5554 = vmatmul.mubr.msk.f32.gmra.mxu0 %vm352_vm0, %v310_v16  ;;  %5586 = vmatmul.mubr.msk.f32.gmra.mxu1 %vm352_vm0, %v310_v16 }
  0x86   : > { %687 = vmatprep.mubr.f32.mxu0 %v9934_v17  ;;  %944 = vmatprep.mubr.f32.mxu1 %v9934_v17 }
  0x87   : > { %3643 = vmatprep.subr.mxu0 %v9934_v17  ;;  %3868 = vmatprep.subr.mxu1 %v9934_v17 }
  0x88   : > { %3644 = vmatpush2.msra.mxu0 %v3542_v18 }
  0x89   : > { %5555 = vmatmul.mubr.msk.f32.gmra.mxu0 %vm352_vm0, %v311_v20  ;;  %5587 = vmatmul.mubr.msk.f32.gmra.mxu1 %vm352_vm0, %v311_v20 }
  0x8a   : > { %693 = vmatprep.mubr.f32.mxu0 %v9934_v17  ;;  %950 = vmatprep.mubr.f32.mxu1 %v9934_v17 }
  0x8b   : > { %3645 = vmatprep.subr.mxu0 %v9934_v17 }
  0x8d   : > { %5556 = vmatmul.mubr.msk.f32.gmra.mxu0 %vm352_vm0, %v312_v21  ;;  %5588 = vmatmul.mubr.msk.f32.gmra.mxu1 %vm352_vm0, %v312_v21 }
  0x8e   : > { %699 = vmatprep.mubr.f32.mxu0 %v9934_v17  ;;  %956 = vmatprep.mubr.f32.mxu1 %v9934_v17 }
  0x91   : > { %5557 = vmatmul.mubr.msk.f32.gmra.mxu0 %vm352_vm0, %v313_v22  ;;  %5589 = vmatmul.mubr.msk.f32.gmra.mxu1 %vm352_vm0, %v313_v22 }
  0xd5   : > { %v515_v50 = vpop.f32.mrf.mxu0  ;;  %v772_v51 = vpop.f32.mrf.mxu1 }
  0xd6   : > { %v6743_v52 = vadd.f32 %v515_v50, %v6734_v46  ;;  %v6746_v53 = vadd.f32 %v772_v51, %v6736_v47 }
  0xd7   : > { %v517_v55 = vpop.f32.mrf.mxu0  ;;  %v774_v56 = vpop.f32.mrf.mxu1 }
  0xd8   : > { %v963_v57 = vrot.slane %v6743_v52, 4  ;;  %v975_v58 = vrot.slane %v6746_v53, 4  ;;  %v6754_v59 = vadd.f32 %v517_v55, %v6738_v48  ;;  %v6757_v60 = vadd.f32 %v774_v56, %v6740_v49 }
  0xd9   : > { %v521_v61 = vpop.f32.mrf.mxu0  ;;  %v778_v62 = vpop.f32.mrf.mxu1 }
  0xda   : > { %v964_v63 = vmax.f32 %v6743_v52, %v963_v57  ;;  %v976_v0 = vmax.f32 %v6746_v53, %v975_v58  ;;  %v969_v1 = vrot.slane %v6754_v59, 4  ;;  %v981_v2 = vrot.slane %v6757_v60, 4 }
  0xdb   : > { %v6768_v4 = vadd.f32 %v521_v61, %v6734_v46  ;;  %v6771_v5 = vadd.f32 %v778_v62, %v6736_v47  ;;  %v523_v6 = vpop.f32.mrf.mxu0  ;;  %v780_v7 = vpop.f32.mrf.mxu1 }
  0xdc   : > { %v965_v9 = vrot.slane %v964_v63, 2  ;;  %v977_v10 = vrot.slane %v976_v0, 2  ;;  %v970_v11 = vmax.f32 %v6754_v59, %v969_v1  ;;  %v982_v12 = vmax.f32 %v6757_v60, %v981_v2  ;;  %v3574_v2 = vld [vmem:[%s9931_s5 + $0x198] sm:$0xff] }
  0xdd   : > { %v987_v13 = vrot.slane %v6768_v4, 4  ;;  %v999_v14 = vrot.slane %v6771_v5, 4  ;;  %v6782_v15 = vadd.f32 %v523_v6, %v6738_v48  ;;  %v6785_v16 = vadd.f32 %v780_v7, %v6740_v49  ;;  %v527_v39 = vpop.f32.mrf.mxu0  ;;  %v784_v44 = vpop.f32.mrf.mxu1  ;;  %3869 = vmatpush2.msra.mxu1 %v3574_v2 }
  0xde   : > { %v966_v19 = vmax.f32 %v964_v63, %v965_v9  ;;  %v978_v20 = vmax.f32 %v976_v0, %v977_v10  ;;  %v971_v21 = vrot.slane %v970_v11, 2  ;;  %v983_v22 = vrot.slane %v982_v12, 2  ;;  %3870 = vmatprep.subr.mxu1 %v9934_v17 }
  0xdf   : > { %v988_v23 = vmax.f32 %v6768_v4, %v987_v13  ;;  %v1000_v24 = vmax.f32 %v6771_v5, %v999_v14  ;;  %v993_v25 = vrot.slane %v6782_v15, 4  ;;  %v1005_v26 = vrot.slane %v6785_v16, 4  ;;  %v529_v1 = vpop.f32.mrf.mxu0  ;;  %v786_v7 = vpop.f32.mrf.mxu1 }
  0xe0   : > { %v967_v27 = vrot.slane %v966_v19, 1  ;;  %v979_v28 = vrot.slane %v978_v20, 1  ;;  %v972_v29 = vmax.f32 %v970_v11, %v971_v21  ;;  %v984_v30 = vmax.f32 %v982_v12, %v983_v22 }
  0xe1   : > { %v989_v31 = vrot.slane %v988_v23, 2  ;;  %v1001_v32 = vrot.slane %v1000_v24, 2  ;;  %v994_v33 = vmax.f32 %v6782_v15, %v993_v25  ;;  %v1006_v34 = vmax.f32 %v6785_v16, %v1005_v26  ;;  %v533_v18 = vpop.f32.mrf.mxu0  ;;  %v790_v22 = vpop.f32.mrf.mxu1 }
  0xe2   : > { %v968_v35 = vmax.f32 %v966_v19, %v967_v27  ;;  %v980_v36 = vmax.f32 %v978_v20, %v979_v28  ;;  %v973_v37 = vrot.slane %v972_v29, 1  ;;  %v985_v38 = vrot.slane %v984_v30, 1  ;;  %v3541_v19 = vld [vmem:[%s9931_s5 + $0x90] sm:$0xff] }
  0xe3   : > { %v990_v40 = vmax.f32 %v988_v23, %v989_v31  ;;  %v1002_v41 = vmax.f32 %v1000_v24, %v1001_v32  ;;  %v995_v42 = vrot.slane %v994_v33, 2  ;;  %v1007_v43 = vrot.slane %v1006_v34, 2  ;;  %3646 = vmatpush2.msra.mxu0 %v3541_v19  ;;  %v535_v32 = vpop.f32.mrf.mxu0 }
  0xe4   : > { %v1731_v45 = vsub.f32 %v6743_v52, %v968_v35  ;;  %v1733_v50 = vsub.f32 %v6746_v53, %v980_v36  ;;  %v974_v51 = vmax.f32 %v972_v29, %v973_v37  ;;  %v986_v54 = vmax.f32 %v984_v30, %v985_v38  ;;  %3647 = vmatprep.subr.mxu0 %v9934_v17  ;;  %v792_v36 = vpop.f32.mrf.mxu1 }
  0xe5   : > { %v991_v55 = vrot.slane %v990_v40, 1  ;;  %v1003_v56 = vrot.slane %v1002_v41, 1  ;;  %v996_v57 = vmax.f32 %v994_v33, %v995_v42  ;;  %v1008_v58 = vmax.f32 %v1006_v34, %v1007_v43 }
  0xe6   : > { %v1859_v61 = vmul.f32 1.442695, %v1731_v45  ;;  %v1863_v62 = vmul.f32 1.442695, %v1733_v50  ;;  %v1732_v63 = vsub.f32 %v6754_v59, %v974_v51  ;;  %v1734_v0 = vsub.f32 %v6757_v60, %v986_v54 }
  0xe7   : > { %v992_v52 = vmax.f32 %v990_v40, %v991_v55  ;;  %v1004_v3 = vmax.f32 %v1002_v41, %v1003_v56  ;;  %v997_v53 = vrot.slane %v996_v57, 1  ;;  %v1009_v6 = vrot.slane %v1008_v58, 1 }
  0xe8   : > { %5666 = vpow2.f32 %v1859_v61  ;;  %v1861_v8 = vmul.f32 1.442695, %v1732_v63  ;;  %v1865_v9 = vmul.f32 1.442695, %v1734_v0  ;;  %v6806_v10 = vadd.f32 %v527_v39, %v6734_v46 }
  0xe9   : > { %5668 = vpow2.f32 %v1863_v62  ;;  %v1735_v59 = vsub.f32 %v6768_v4, %v992_v52  ;;  %v1737_v60 = vsub.f32 %v6771_v5, %v1004_v3  ;;  %v998_v11 = vmax.f32 %v996_v57, %v997_v53  ;;  %v3573_v5 = vld [vmem:[%s9931_s5 + $0x190] sm:$0xff] }
  0xea   : > { %5670 = vpow2.f32 %v1861_v8  ;;  %v1010_v12 = vmax.f32 %v1008_v58, %v1009_v6  ;;  %v1011_v13 = vrot.slane %v6806_v10, 4  ;;  %v6813_v14 = vadd.f32 %v784_v44, %v6736_v47  ;;  %3871 = vmatpush2.msra.mxu1 %v3573_v5 }
  0xeb   : > { %5672 = vpow2.f32 %v1865_v9  ;;  %v1867_v20 = vmul.f32 1.442695, %v1735_v59  ;;  %v1871_v21 = vmul.f32 1.442695, %v1737_v60  ;;  %v1736_v4 = vsub.f32 %v6782_v15, %v998_v11  ;;  %3872 = vmatprep.subr.mxu1 %v9934_v17  ;;  %v539_v59 = vpop.f32.mrf.mxu0  ;;  %v3572_v60 = vld [vmem:[%s9931_s5 + $0x188] sm:$0xff] }
  0xec   : > { %v1738_v23 = vsub.f32 %v6785_v16, %v1010_v12  ;;  %v1012_v24 = vmax.f32 %v6806_v10, %v1011_v13  ;;  %v1023_v25 = vrot.slane %v6813_v14, 4  ;;  %v6826_v26 = vadd.f32 %v529_v1, %v6738_v48  ;;  %v3540_v16 = vld [vmem:[%s9931_s5 + $0x88] sm:$0xff]  ;;  %3873 = vmatpush2.msra.mxu1 %v3572_v60 }
  0xed   : > { %5674 = vpow2.f32 %v1867_v20  ;;  %v1869_v15 = vmul.f32 1.442695, %v1736_v4  ;;  %v6830_v27 = vadd.f32 %v786_v7, %v6740_v49  ;;  %v6833_v28 = vadd.f32 %v533_v18, %v6734_v46  ;;  %3648 = vmatpush2.msra.mxu0 %v3540_v16  ;;  %v796_v20 = vpop.f32.mrf.mxu1  ;;  %3874 = vmatprep.subr.mxu1 %v9934_v17 }
  0xee   : > { %5676 = vpow2.f32 %v1871_v21  ;;  %v1873_v29 = vmul.f32 1.442695, %v1738_v23  ;;  %v1013_v30 = vrot.slane %v1012_v24, 2  ;;  %v1024_v31 = vmax.f32 %v6813_v14, %v1023_v25  ;;  %3649 = vmatprep.subr.mxu0 %v9934_v17 }
  0xef   : > { %5678 = vpow2.f32 %v1869_v15  ;;  %v1017_v33 = vrot.slane %v6826_v26, 4  ;;  %v1029_v34 = vrot.slane %v6830_v27, 4  ;;  %v1035_v35 = vrot.slane %v6833_v28, 4 }
  0xf0   : > { %5680 = vpow2.f32 %v1873_v29  ;;  %v1014_v37 = vmax.f32 %v1012_v24, %v1013_v30  ;;  %v1025_v38 = vrot.slane %v1024_v31, 2  ;;  %v6845_v39 = vadd.f32 %v790_v22, %v6736_v47 }
  0xf1   : > { %v1018_v40 = vmax.f32 %v6826_v26, %v1017_v33  ;;  %v1030_v41 = vmax.f32 %v6830_v27, %v1029_v34  ;;  %v1036_v42 = vmax.f32 %v6833_v28, %v1035_v35  ;;  %v6851_v43 = vadd.f32 %v535_v32, %v6738_v48  ;;  %v541_v32 = vpop.f32.mrf.mxu0  ;;  %v3539_v33 = vld [vmem:[%s9931_s5 + $0x80] sm:$0xff] }
  0xf2   : > { %v1015_v44 = vrot.slane %v1014_v37, 1  ;;  %v1026_v45 = vmax.f32 %v1024_v31, %v1025_v38  ;;  %v1047_v50 = vrot.slane %v6845_v39, 4  ;;  %v6855_v51 = vadd.f32 %v792_v36, %v6740_v49  ;;  %v798_v38 = vpop.f32.mrf.mxu1  ;;  %3650 = vmatpush2.msra.mxu0 %v3539_v33 }
  0xf3   : > { %v1019_v54 = vrot.slane %v1018_v40, 2  ;;  %v1031_v55 = vrot.slane %v1030_v41, 2  ;;  %v1037_v56 = vrot.slane %v1036_v42, 2  ;;  %v1041_v57 = vrot.slane %v6851_v43, 4 }
  0xf4   : > { %v1016_v58 = vmax.f32 %v1014_v37, %v1015_v44  ;;  %v1027_v61 = vrot.slane %v1026_v45, 1  ;;  %v1048_v62 = vmax.f32 %v6845_v39, %v1047_v50  ;;  %v1053_v63 = vrot.slane %v6855_v51, 4 }
  0xf5   : > { %v6860_v0 = vpop.eup %5666  ;;  %v1020_v1 = vmax.f32 %v1018_v40, %v1019_v54  ;;  %v1032_v2 = vmax.f32 %v1030_v41, %v1031_v55  ;;  %v1038_v52 = vmax.f32 %v1036_v42, %v1037_v56  ;;  %v1042_v3 = vmax.f32 %v6851_v43, %v1041_v57  ;;  %v3571_v40 = vld [vmem:[%s9931_s5 + $0x180] sm:$0xff] }
  0xf6   : > { %v6863_v53 = vpop.eup %5668  ;;  %v1739_v6 = vsub.f32 %v6806_v10, %v1016_v58  ;;  %v1028_v7 = vmax.f32 %v1026_v45, %v1027_v61  ;;  %v1049_v8 = vrot.slane %v1048_v62, 2  ;;  %v1054_v9 = vmax.f32 %v6855_v51, %v1053_v63  ;;  %3875 = vmatpush2.msra.mxu1 %v3571_v40  ;;  %v545_v61 = vpop.f32.mrf.mxu0 }
  0xf7   : > { %v6870_v11 = vpop.eup %5670  ;;  %v1021_v12 = vrot.slane %v1020_v1, 1  ;;  %v1033_v13 = vrot.slane %v1032_v2, 1  ;;  %v1039_v18 = vrot.slane %v1038_v52, 1  ;;  %v1043_v19 = vrot.slane %v1042_v3, 2 }
  0xf8   : > { %v6872_v21 = vpop.eup %5672  ;;  %v1875_v10 = vmul.f32 1.442695, %v1739_v6  ;;  %v1741_v4 = vsub.f32 %v6813_v14, %v1028_v7  ;;  %v1050_v22 = vmax.f32 %v1048_v62, %v1049_v8  ;;  %v1055_v5 = vrot.slane %v1054_v9, 2  ;;  %v547_v60 = vpop.f32.mrf.mxu0 }
  0xf9   : > { %v1022_v23 = vmax.f32 %v1020_v1, %v1021_v12  ;;  %v1034_v24 = vmax.f32 %v1032_v2, %v1033_v13  ;;  %v1040_v25 = vmax.f32 %v1038_v52, %v1039_v18  ;;  %v1044_v15 = vmax.f32 %v1042_v3, %v1043_v19  ;;  %v802_v2 = vpop.f32.mrf.mxu1 }
  0xfa   : > { %v6876_v16 = vpop.eup %5674  ;;  %5682 = vpow2.f32 %v1875_v10  ;;  %v1879_v29 = vmul.f32 1.442695, %v1741_v4  ;;  %v1051_v30 = vrot.slane %v1050_v22, 1  ;;  %v1056_v31 = vmax.f32 %v1054_v9, %v1055_v5 }
  0xfb   : > { %v6881_v14 = vpop.eup %5676  ;;  %v1740_v34 = vsub.f32 %v6826_v26, %v1022_v23  ;;  %v1742_v35 = vsub.f32 %v6830_v27, %v1034_v24  ;;  %v1743_v36 = vsub.f32 %v6833_v28, %v1040_v25  ;;  %v1045_v37 = vrot.slane %v1044_v15, 1  ;;  %v804_v18 = vpop.f32.mrf.mxu1 }
  0xfc   : > { %v6889_v41 = vpop.eup %5678  ;;  %5684 = vpow2.f32 %v1879_v29  ;;  %v1052_v42 = vmax.f32 %v1050_v22, %v1051_v30  ;;  %v1057_v44 = vrot.slane %v1056_v31, 1  ;;  %v6892_v45 = vadd.f32 %v539_v59, %v6734_v46 }
  0xfd   : > { %v6894_v26 = vpop.eup %5680  ;;  %v1877_v27 = vmul.f32 1.442695, %v1740_v34  ;;  %v1881_v28 = vmul.f32 1.442695, %v1742_v35  ;;  %v1883_v50 = vmul.f32 1.442695, %v1743_v36  ;;  %v1046_v54 = vmax.f32 %v1044_v15, %v1045_v37 }
  0xfe   : > { %v1745_v55 = vsub.f32 %v6845_v39, %v1052_v42  ;;  %v1058_v56 = vmax.f32 %v1056_v31, %v1057_v44  ;;  %v1059_v57 = vrot.slane %v6892_v45, 4  ;;  %v6899_v58 = vadd.f32 %v796_v20, %v6736_v47 }
  0xff   : > { %5686 = vpow2.f32 %v1877_v27  ;;  %v1744_v62 = vsub.f32 %v6851_v43, %v1046_v54  ;;  %v6903_v63 = vadd.f32 %v541_v32, %v6738_v48  ;;  %v6906_v1 = vadd.f32 %v798_v38, %v6740_v49 }
 0x100   : > { %5688 = vpow2.f32 %v1881_v28  ;;  %v1887_v52 = vmul.f32 1.442695, %v1745_v55  ;;  %v1746_v39 = vsub.f32 %v6855_v51, %v1058_v56  ;;  %v1060_v3 = vmax.f32 %v6892_v45, %v1059_v57  ;;  %v551_v57 = vpop.f32.mrf.mxu0 }
 0x101   : > { %5690 = vpow2.f32 %v1883_v50  ;;  %v1885_v6 = vmul.f32 1.442695, %v1744_v62  ;;  %v1071_v7 = vrot.slane %v6899_v58, 4  ;;  %v1065_v8 = vrot.slane %v6903_v63, 4 }
 0x102   : > { %5692 = vpow2.f32 %v1887_v52  ;;  %v1889_v43 = vmul.f32 1.442695, %v1746_v39  ;;  %v1061_v9 = vrot.slane %v1060_v3, 2  ;;  %v1077_v59 = vrot.slane %v6906_v1, 4  ;;  %v808_v39 = vpop.f32.mrf.mxu1 }
 0x103   : > { %5694 = vpow2.f32 %v1885_v6  ;;  %v1072_v12 = vmax.f32 %v6899_v58, %v1071_v7  ;;  %v1066_v13 = vmax.f32 %v6903_v63, %v1065_v8  ;;  %v6916_v51 = vadd.f32 %v545_v61, %v6734_v46 }
 0x104   : > { %5696 = vpow2.f32 %v1889_v43  ;;  %v1062_v19 = vmax.f32 %v1060_v3, %v1061_v9  ;;  %v1078_v20 = vmax.f32 %v6906_v1, %v1077_v59  ;;  %v6920_v10 = vadd.f32 %v802_v2, %v6736_v47 }
 0x105   : > { %v1073_v4 = vrot.slane %v1072_v12, 2  ;;  %v1067_v22 = vrot.slane %v1066_v13, 2  ;;  %v1083_v5 = vrot.slane %v6916_v51, 4  ;;  %v6924_v23 = vadd.f32 %v547_v60, %v6738_v48 }
 0x106   : > { %v1063_v24 = vrot.slane %v1062_v19, 1  ;;  %v1079_v25 = vrot.slane %v1078_v20, 2  ;;  %v1095_v15 = vrot.slane %v6920_v10, 4  ;;  %v6928_v29 = vadd.f32 %v804_v18, %v6740_v49 }
 0x107   : > { %v6930_v30 = vpop.eup %5682  ;;  %v1074_v31 = vmax.f32 %v1072_v12, %v1073_v4  ;;  %v1068_v32 = vmax.f32 %v1066_v13, %v1067_v22  ;;  %v1084_v33 = vmax.f32 %v6916_v51, %v1083_v5  ;;  %v1089_v34 = vrot.slane %v6924_v23, 4  ;;  %v553_v4 = vpop.f32.mrf.mxu0 }
 0x108   : > { %v1064_v35 = vmax.f32 %v1062_v19, %v1063_v24  ;;  %v1080_v36 = vmax.f32 %v1078_v20, %v1079_v25  ;;  %v1096_v37 = vmax.f32 %v6920_v10, %v1095_v15  ;;  %v1101_v38 = vrot.slane %v6928_v29, 4 }
 0x109   : > { %v6936_v40 = vpop.eup %5684  ;;  %v1075_v42 = vrot.slane %v1074_v31, 1  ;;  %v1069_v44 = vrot.slane %v1068_v32, 1  ;;  %v1085_v27 = vrot.slane %v1084_v33, 2  ;;  %v1090_v28 = vmax.f32 %v6924_v23, %v1089_v34 }
 0x10a   : > { %v1747_v50 = vsub.f32 %v6892_v45, %v1064_v35  ;;  %v1081_v54 = vrot.slane %v1080_v36, 1  ;;  %v1097_v55 = vrot.slane %v1096_v37, 2  ;;  %v1102_v56 = vmax.f32 %v6928_v29, %v1101_v38 }
 0x10b   : > { %v1076_v61 = vmax.f32 %v1074_v31, %v1075_v42  ;;  %v1070_v62 = vmax.f32 %v1068_v32, %v1069_v44  ;;  %v1086_v2 = vmax.f32 %v1084_v33, %v1085_v27  ;;  %v1091_v52 = vrot.slane %v1090_v28, 2  ;;  %v810_v31 = vpop.f32.mrf.mxu1  ;;  %v557_v27 = vpop.f32.mrf.mxu0 }
 0x10c   : > { %v6941_v3 = vpop.eup %5686  ;;  %v1891_v6 = vmul.f32 1.442695, %v1747_v50  ;;  %v1082_v7 = vmax.f32 %v1080_v36, %v1081_v54  ;;  %v1098_v8 = vmax.f32 %v1096_v37, %v1097_v55  ;;  %v1103_v43 = vrot.slane %v1102_v56, 2 }
 0x10d   : > { %v6943_v9 = vpop.eup %5688  ;;  %v1749_v45 = vsub.f32 %v6899_v58, %v1076_v61  ;;  %v1748_v59 = vsub.f32 %v6903_v63, %v1070_v62  ;;  %v1087_v60 = vrot.slane %v1086_v2, 1  ;;  %v1092_v12 = vmax.f32 %v1090_v28, %v1091_v52  ;;  %v814_v55 = vpop.f32.mrf.mxu1 }
 0x10e   : > { %v6947_v13 = vpop.eup %5690  ;;  %5698 = vpow2.f32 %v1891_v6  ;;  %v1750_v18 = vsub.f32 %v6906_v1, %v1082_v7  ;;  %v1099_v19 = vrot.slane %v1098_v8, 1  ;;  %v1104_v20 = vmax.f32 %v1102_v56, %v1103_v43  ;;  %v559_v6 = vpop.f32.mrf.mxu0 }
 0x10f   : > { %v6950_v22 = vpop.eup %5692  ;;  %v1895_v5 = vmul.f32 1.442695, %v1749_v45  ;;  %v1893_v24 = vmul.f32 1.442695, %v1748_v59  ;;  %v1088_v25 = vmax.f32 %v1086_v2, %v1087_v60  ;;  %v1093_v15 = vrot.slane %v1092_v12, 1  ;;  %v816_v43 = vpop.f32.mrf.mxu1 }
 0x110   : > { %v6952_v58 = vpop.eup %5694  ;;  %v1897_v63 = vmul.f32 1.442695, %v1750_v18  ;;  %v1100_v32 = vmax.f32 %v1098_v8, %v1099_v19  ;;  %v1105_v33 = vrot.slane %v1104_v20, 1  ;;  %v6955_v34 = vadd.f32 %v551_v57, %v6734_v46 }
 0x111   : > { %v6957_v35 = vpop.eup %5696  ;;  %5700 = vpow2.f32 %v1895_v5  ;;  %v1751_v1 = vsub.f32 %v6916_v51, %v1088_v25  ;;  %v1094_v36 = vmax.f32 %v1092_v12, %v1093_v15  ;;  %v6961_v37 = vadd.f32 %v808_v39, %v6736_v47 }
 0x112   : > { %5702 = vpow2.f32 %v1893_v24  ;;  %v1753_v38 = vsub.f32 %v6920_v10, %v1100_v32  ;;  %v1106_v42 = vmax.f32 %v1104_v20, %v1105_v33  ;;  %v1107_v44 = vrot.slane %v6955_v34, 4 }
 0x113   : > { %5704 = vpow2.f32 %v1897_v63  ;;  %v1899_v28 = vmul.f32 1.442695, %v1751_v1  ;;  %v1752_v50 = vsub.f32 %v6924_v23, %v1094_v36  ;;  %v1119_v54 = vrot.slane %v6961_v37, 4 }
 0x114   : > { %v1903_v56 = vmul.f32 1.442695, %v1753_v38  ;;  %v1754_v51 = vsub.f32 %v6928_v29, %v1106_v42  ;;  %v1108_v57 = vmax.f32 %v6955_v34, %v1107_v44  ;;  %v6970_v61 = vadd.f32 %v553_v4, %v6738_v48 }
 0x115   : > { %5706 = vpow2.f32 %v1899_v28  ;;  %v1901_v10 = vmul.f32 1.442695, %v1752_v50  ;;  %v1120_v62 = vmax.f32 %v6961_v37, %v1119_v54  ;;  %v6974_v2 = vadd.f32 %v810_v31, %v6740_v49 }
 0x116   : > { %5708 = vpow2.f32 %v1903_v56  ;;  %v1905_v23 = vmul.f32 1.442695, %v1754_v51  ;;  %v1109_v52 = vrot.slane %v1108_v57, 2  ;;  %v1113_v39 = vrot.slane %v6970_v61, 4 }
 0x117   : > { %5710 = vpow2.f32 %v1901_v10  ;;  %v1121_v29 = vrot.slane %v1120_v62, 2  ;;  %v1125_v7 = vrot.slane %v6974_v2, 4  ;;  %v6979_v8 = vadd.f32 %v557_v27, %v6734_v46  ;;  %v563_v10 = vpop.f32.mrf.mxu0 }
 0x118   : > { %5712 = vpow2.f32 %v1905_v23  ;;  %v1110_v45 = vmax.f32 %v1108_v57, %v1109_v52  ;;  %v1114_v59 = vmax.f32 %v6970_v61, %v1113_v39  ;;  %v6983_v60 = vadd.f32 %v814_v55, %v6736_v47 }
 0x119   : > { %v1122_v12 = vmax.f32 %v1120_v62, %v1121_v29  ;;  %v1126_v18 = vmax.f32 %v6974_v2, %v1125_v7  ;;  %v1131_v19 = vrot.slane %v6979_v8, 4  ;;  %v6988_v20 = vadd.f32 %v559_v6, %v6738_v48  ;;  %v820_v29 = vpop.f32.mrf.mxu1 }
 0x11a   : > { %v1111_v4 = vrot.slane %v1110_v45, 1  ;;  %v1115_v5 = vrot.slane %v1114_v59, 2  ;;  %v1143_v24 = vrot.slane %v6983_v60, 4  ;;  %v6992_v25 = vadd.f32 %v816_v43, %v6740_v49 }
 0x11b   : > { %v6994_v15 = vpop.eup %5698  ;;  %v1123_v31 = vrot.slane %v1122_v12, 1  ;;  %v1127_v63 = vrot.slane %v1126_v18, 2  ;;  %v1132_v32 = vmax.f32 %v6979_v8, %v1131_v19  ;;  %v1137_v33 = vrot.slane %v6988_v20, 4 }
 0x11c   : > { %v1112_v1 = vmax.f32 %v1110_v45, %v1111_v4  ;;  %v1116_v36 = vmax.f32 %v1114_v59, %v1115_v5  ;;  %v1144_v38 = vmax.f32 %v6983_v60, %v1143_v24  ;;  %v1149_v42 = vrot.slane %v6992_v25, 4 }
 0x11d   : > { %v1124_v44 = vmax.f32 %v1122_v12, %v1123_v31  ;;  %v1128_v27 = vmax.f32 %v1126_v18, %v1127_v63  ;;  %v1133_v28 = vrot.slane %v1132_v32, 2  ;;  %v1138_v50 = vmax.f32 %v6988_v20, %v1137_v33  ;;  %v565_v63 = vpop.f32.mrf.mxu0 }
 0x11e   : > { %v7001_v54 = vpop.eup %5700  ;;  %v1755_v55 = vsub.f32 %v6955_v34, %v1112_v1  ;;  %v1117_v56 = vrot.slane %v1116_v36, 1  ;;  %v1145_v51 = vrot.slane %v1144_v38, 2  ;;  %v1150_v57 = vmax.f32 %v6992_v25, %v1149_v42 }
 0x11f   : > { %v7005_v62 = vpop.eup %5702  ;;  %v1757_v23 = vsub.f32 %v6961_v37, %v1124_v44  ;;  %v1129_v52 = vrot.slane %v1128_v27, 1  ;;  %v1134_v39 = vmax.f32 %v1132_v32, %v1133_v28  ;;  %v1139_v6 = vrot.slane %v1138_v50, 2 }
 0x120   : > { %v7008_v7 = vpop.eup %5704  ;;  %v1907_v43 = vmul.f32 1.442695, %v1755_v55  ;;  %v1118_v45 = vmax.f32 %v1116_v36, %v1117_v56  ;;  %v1146_v59 = vmax.f32 %v1144_v38, %v1145_v51  ;;  %v1151_v12 = vrot.slane %v1150_v57, 2  ;;  %v822_v38 = vpop.f32.mrf.mxu1 }
 0x121   : > { %v1911_v34 = vmul.f32 1.442695, %v1757_v23  ;;  %v1130_v18 = vmax.f32 %v1128_v27, %v1129_v52  ;;  %v1135_v19 = vrot.slane %v1134_v39, 1  ;;  %v1140_v4 = vmax.f32 %v1138_v50, %v1139_v6 }
 0x122   : > { %v7010_v5 = vpop.eup %5706  ;;  %5714 = vpow2.f32 %v1907_v43  ;;  %v1756_v24 = vsub.f32 %v6970_v61, %v1118_v45  ;;  %v1147_v37 = vrot.slane %v1146_v59, 1  ;;  %v1152_v31 = vmax.f32 %v1150_v57, %v1151_v12  ;;  %v826_v45 = vpop.f32.mrf.mxu1 }
 0x123   : > { %v7013_v32 = vpop.eup %5708  ;;  %5716 = vpow2.f32 %v1911_v34  ;;  %v1758_v33 = vsub.f32 %v6974_v2, %v1130_v18  ;;  %v1136_v1 = vmax.f32 %v1134_v39, %v1135_v19  ;;  %v1141_v36 = vrot.slane %v1140_v4, 1  ;;  %v569_v39 = vpop.f32.mrf.mxu0 }
 0x124   : > { %v7016_v42 = vpop.eup %5710  ;;  %v1909_v44 = vmul.f32 1.442695, %v1756_v24  ;;  %v1148_v27 = vmax.f32 %v1146_v59, %v1147_v37  ;;  %v1153_v28 = vrot.slane %v1152_v31, 1  ;;  %v7019_v50 = vadd.f32 %v563_v10, %v6734_v46 }
 0x125   : > { %v7021_v61 = vpop.eup %5712  ;;  %v1913_v55 = vmul.f32 1.442695, %v1758_v33  ;;  %v1759_v56 = vsub.f32 %v6979_v8, %v1136_v1  ;;  %v1142_v51 = vmax.f32 %v1140_v4, %v1141_v36  ;;  %v7025_v57 = vadd.f32 %v820_v29, %v6736_v47  ;;  %v571_v24 = vpop.f32.mrf.mxu0 }
 0x126   : > { %5718 = vpow2.f32 %v1909_v44  ;;  %v1761_v2 = vsub.f32 %v6983_v60, %v1148_v27  ;;  %v1154_v23 = vmax.f32 %v1152_v31, %v1153_v28  ;;  %v1155_v52 = vrot.slane %v7019_v50, 4 }
 0x127   : > { %5720 = vpow2.f32 %v1913_v55  ;;  %v1915_v6 = vmul.f32 1.442695, %v1759_v56  ;;  %v1760_v10 = vsub.f32 %v6988_v20, %v1142_v51  ;;  %v1167_v43 = vrot.slane %v7025_v57, 4 }
 0x128   : > { %v1919_v59 = vmul.f32 1.442695, %v1761_v2  ;;  %v1762_v8 = vsub.f32 %v6992_v25, %v1154_v23  ;;  %v1156_v29 = vmax.f32 %v7019_v50, %v1155_v52  ;;  %v7034_v12 = vadd.f32 %v565_v63, %v6738_v48  ;;  %v828_v63 = vpop.f32.mrf.mxu1 }
 0x129   : > { %5722 = vpow2.f32 %v1915_v6  ;;  %v1917_v60 = vmul.f32 1.442695, %v1760_v10  ;;  %v1168_v34 = vmax.f32 %v7025_v57, %v1167_v43  ;;  %v7038_v18 = vadd.f32 %v822_v38, %v6740_v49 }
 0x12a   : > { %5724 = vpow2.f32 %v1919_v59  ;;  %v1921_v20 = vmul.f32 1.442695, %v1762_v8  ;;  %v1157_v19 = vrot.slane %v1156_v29, 2  ;;  %v1161_v4 = vrot.slane %v7034_v12, 4 }
 0x12b   : > { %5726 = vpow2.f32 %v1917_v60  ;;  %v1169_v25 = vrot.slane %v1168_v34, 2  ;;  %v1173_v37 = vrot.slane %v7038_v18, 4  ;;  %v7043_v31 = vadd.f32 %v569_v39, %v6734_v46 }
 0x12c   : > { %5728 = vpow2.f32 %v1921_v20  ;;  %v1158_v33 = vmax.f32 %v1156_v29, %v1157_v19  ;;  %v1162_v1 = vmax.f32 %v7034_v12, %v1161_v4  ;;  %v7047_v36 = vadd.f32 %v826_v45, %v6736_v47 }
 0x12d   : > { %v1170_v38 = vmax.f32 %v1168_v34, %v1169_v25  ;;  %v1174_v44 = vmax.f32 %v7038_v18, %v1173_v37  ;;  %v1179_v27 = vrot.slane %v7043_v31, 4  ;;  %v7052_v28 = vadd.f32 %v571_v24, %v6738_v48 }
 0x12e   : > { %v1159_v55 = vrot.slane %v1158_v33, 1  ;;  %v1163_v56 = vrot.slane %v1162_v1, 2  ;;  %v1191_v51 = vrot.slane %v7047_v36, 4  ;;  %v7056_v2 = vadd.f32 %v828_v63, %v6740_v49  ;;  %v575_v63 = vpop.f32.mrf.mxu0 }
 0x12f   : > { %v7058_v23 = vpop.eup %5714  ;;  %v1171_v52 = vrot.slane %v1170_v38, 1  ;;  %v1175_v39 = vrot.slane %v1174_v44, 2  ;;  %v1180_v6 = vmax.f32 %v7043_v31, %v1179_v27  ;;  %v1185_v10 = vrot.slane %v7052_v28, 4 }
 0x130   : > { %10134 = vst [vmem:[#allocation2_spill] sm:$0xff] %v7058_v23  ;;  %v7062_v43 = vpop.eup %5716  ;;  %v1160_v45 = vmax.f32 %v1158_v33, %v1159_v55  ;;  %v1164_v59 = vmax.f32 %v1162_v1, %v1163_v56  ;;  %v1192_v8 = vmax.f32 %v7047_v36, %v1191_v51  ;;  %v1197_v29 = vrot.slane %v7056_v2, 4  ;;  %v832_v51 = vpop.f32.mrf.mxu1 }
 0x131   : > { %10135 = vst [vmem:[#allocation3_spill] sm:$0xff] %v7062_v43  ;;  %v1172_v60 = vmax.f32 %v1170_v38, %v1171_v52  ;;  %v1176_v34 = vmax.f32 %v1174_v44, %v1175_v39  ;;  %v1181_v20 = vrot.slane %v1180_v6, 2  ;;  %v1186_v19 = vmax.f32 %v7052_v28, %v1185_v10 }
 0x132   : > { %v1763_v4 = vsub.f32 %v7019_v50, %v1160_v45  ;;  %v1165_v24 = vrot.slane %v1164_v59, 1  ;;  %v1193_v25 = vrot.slane %v1192_v8, 2  ;;  %v1198_v37 = vmax.f32 %v7056_v2, %v1197_v29 }
 0x133   : > { %v7069_v27 = vpop.eup %5718  ;;  %v1765_v33 = vsub.f32 %v7025_v57, %v1172_v60  ;;  %v1177_v1 = vrot.slane %v1176_v34, 1  ;;  %v1182_v55 = vmax.f32 %v1180_v6, %v1181_v20  ;;  %v1187_v56 = vrot.slane %v1186_v19, 2  ;;  %v577_v6 = vpop.f32.mrf.mxu0 }
 0x134   : > { %10136 = vst [vmem:[#allocation4_spill] sm:$0xff] %v7069_v27  ;;  %v7072_v38 = vpop.eup %5720  ;;  %v1923_v44 = vmul.f32 1.442695, %v1763_v4  ;;  %v1166_v52 = vmax.f32 %v1164_v59, %v1165_v24  ;;  %v1194_v39 = vmax.f32 %v1192_v8, %v1193_v25  ;;  %v1199_v10 = vrot.slane %v1198_v37, 2  ;;  %v834_v24 = vpop.f32.mrf.mxu1 }
 0x135   : > { %10137 = vst [vmem:[#allocation5_spill] sm:$0xff] %v7072_v38  ;;  %v1927_v50 = vmul.f32 1.442695, %v1765_v33  ;;  %v1178_v45 = vmax.f32 %v1176_v34, %v1177_v1  ;;  %v1183_v17 = vrot.slane %v1182_v55, 1  ;;  %v1188_v43 = vmax.f32 %v1186_v19, %v1187_v56 }
 0x136   : > { %v7074_v29 = vpop.eup %5722  ;;  %5730 = vpow2.f32 %v1923_v44  ;;  %v1764_v23 = vsub.f32 %v7034_v12, %v1166_v52  ;;  %v1195_v57 = vrot.slane %v1194_v39, 1  ;;  %v1200_v60 = vmax.f32 %v1198_v37, %v1199_v10 }
 0x137   : > { %10138 = vst [vmem:[#allocation6_spill] sm:$0xff] %v7074_v29  ;;  %v7077_v20 = vpop.eup %5724  ;;  %5732 = vpow2.f32 %v1927_v50  ;;  %v1766_v4 = vsub.f32 %v7038_v18, %v1178_v45  ;;  %v1184_v59 = vmax.f32 %v1182_v55, %v1183_v17  ;;  %v1189_v8 = vrot.slane %v1188_v43, 1  ;;  %v581_v55 = vpop.f32.mrf.mxu0 }
 0x138   : > { %10139 = vst [vmem:[#allocation7_spill] sm:$0xff] %v7077_v20  ;;  %v7080_v25 = vpop.eup %5726  ;;  %v1925_v34 = vmul.f32 1.442695, %v1764_v23  ;;  %v1196_v19 = vmax.f32 %v1194_v39, %v1195_v57  ;;  %v1201_v33 = vrot.slane %v1200_v60, 1  ;;  %v7083_v1 = vadd.f32 %v575_v63, %v6734_v46  ;;  %v838_v50 = vpop.f32.mrf.mxu1 }
 0x139   : > { %10140 = vst [vmem:[#allocation8_spill] sm:$0xff] %v7080_v25  ;;  %v7085_v12 = vpop.eup %5728  ;;  %v1929_v37 = vmul.f32 1.442695, %v1766_v4  ;;  %v1767_v56 = vsub.f32 %v7043_v31, %v1184_v59  ;;  %v1190_v44 = vmax.f32 %v1188_v43, %v1189_v8  ;;  %v7089_v52 = vadd.f32 %v832_v51, %v6736_v47  ;;  %v583_v8 = vpop.f32.mrf.mxu0 }
 0x13a   : > { %10141 = vst [vmem:[#allocation9_spill] sm:$0xff] %v7085_v12  ;;  %5734 = vpow2.f32 %v1925_v34  ;;  %v1769_v17 = vsub.f32 %v7047_v36, %v1196_v19  ;;  %v1202_v18 = vmax.f32 %v1200_v60, %v1201_v33  ;;  %v1203_v23 = vrot.slane %v7083_v1, 4  ;;  %v840_v19 = vpop.f32.mrf.mxu1 }
 0x13b   : > { %5736 = vpow2.f32 %v1929_v37  ;;  %v1931_v39 = vmul.f32 1.442695, %v1767_v56  ;;  %v1768_v63 = vsub.f32 %v7052_v28, %v1190_v44  ;;  %v1215_v10 = vrot.slane %v7089_v52, 4  ;;  %v587_v12 = vpop.f32.mrf.mxu0 }
 0x13c   : > { %v1935_v45 = vmul.f32 1.442695, %v1769_v17  ;;  %v1770_v31 = vsub.f32 %v7056_v2, %v1202_v18  ;;  %v1204_v43 = vmax.f32 %v7083_v1, %v1203_v23  ;;  %v7098_v51 = vadd.f32 %v577_v6, %v6738_v48 }
 0x13d   : > { %5738 = vpow2.f32 %v1931_v39  ;;  %v1933_v36 = vmul.f32 1.442695, %v1768_v63  ;;  %v1216_v57 = vmax.f32 %v7089_v52, %v1215_v10  ;;  %v7102_v60 = vadd.f32 %v834_v24, %v6740_v49 }
 0x13e   : > { %5740 = vpow2.f32 %v1935_v45  ;;  %v1937_v28 = vmul.f32 1.442695, %v1770_v31  ;;  %v1205_v4 = vrot.slane %v1204_v43, 2  ;;  %v1209_v59 = vrot.slane %v7098_v51, 4 }
 0x13f   : > { %5742 = vpow2.f32 %v1933_v36  ;;  %v1217_v2 = vrot.slane %v1216_v57, 2  ;;  %v1221_v34 = vrot.slane %v7102_v60, 4  ;;  %v7107_v6 = vadd.f32 %v581_v55, %v6734_v46 }
 0x140   : > { %5744 = vpow2.f32 %v1937_v28  ;;  %v1206_v33 = vmax.f32 %v1204_v43, %v1205_v4  ;;  %v1210_v37 = vmax.f32 %v7098_v51, %v1209_v59  ;;  %v7111_v24 = vadd.f32 %v838_v50, %v6736_v47 }
 0x141   : > { %v1218_v56 = vmax.f32 %v1216_v57, %v1217_v2  ;;  %v1222_v44 = vmax.f32 %v7102_v60, %v1221_v34  ;;  %v1227_v17 = vrot.slane %v7107_v6, 4  ;;  %v7116_v18 = vadd.f32 %v583_v8, %v6738_v48 }
 0x142   : > { %v1207_v23 = vrot.slane %v1206_v33, 1  ;;  %v1211_v39 = vrot.slane %v1210_v37, 2  ;;  %v1239_v55 = vrot.slane %v7111_v24, 4  ;;  %v7120_v63 = vadd.f32 %v840_v19, %v6740_v49 }
 0x143   : > { %v7122_v10 = vpop.eup %5730  ;;  %v1219_v45 = vrot.slane %v1218_v56, 1  ;;  %v1223_v50 = vrot.slane %v1222_v44, 2  ;;  %v1228_v31 = vmax.f32 %v7107_v6, %v1227_v17  ;;  %v1233_v43 = vrot.slane %v7116_v18, 4 }
 0x144   : > { %10142 = vst [vmem:[#allocation10_spill] sm:$0xff] %v7122_v10  ;;  %v7126_v36 = vpop.eup %5732  ;;  %v1208_v57 = vmax.f32 %v1206_v33, %v1207_v23  ;;  %v1212_v28 = vmax.f32 %v1210_v37, %v1211_v39  ;;  %v1240_v4 = vmax.f32 %v7111_v24, %v1239_v55  ;;  %v1245_v59 = vrot.slane %v7120_v63, 4  ;;  %v844_v55 = vpop.f32.mrf.mxu1 }
 0x145   : > { %10143 = vst [vmem:[#allocation11_spill] sm:$0xff] %v7126_v36  ;;  %v1220_v8 = vmax.f32 %v1218_v56, %v1219_v45  ;;  %v1224_v2 = vmax.f32 %v1222_v44, %v1223_v50  ;;  %v1229_v34 = vrot.slane %v1228_v31, 2  ;;  %v1234_v19 = vmax.f32 %v7116_v18, %v1233_v43 }
 0x146   : > { %v1771_v10 = vsub.f32 %v7083_v1, %v1208_v57  ;;  %v1213_v20 = vrot.slane %v1212_v28, 1  ;;  %v1241_v29 = vrot.slane %v1240_v4, 2  ;;  %v1246_v17 = vmax.f32 %v7120_v63, %v1245_v59 }
 0x147   : > { %v7133_v25 = vpop.eup %5734  ;;  %v1773_v33 = vsub.f32 %v7089_v52, %v1220_v8  ;;  %v1225_v37 = vrot.slane %v1224_v2, 1  ;;  %v1230_v23 = vmax.f32 %v1228_v31, %v1229_v34  ;;  %v1235_v39 = vrot.slane %v1234_v19, 2  ;;  %v589_v31 = vpop.f32.mrf.mxu0 }
 0x148   : > { %10144 = vst [vmem:[#allocation12_spill] sm:$0xff] %v7133_v25  ;;  %v7136_v56 = vpop.eup %5736  ;;  %v1939_v44 = vmul.f32 1.442695, %v1771_v10  ;;  %v1214_v45 = vmax.f32 %v1212_v28, %v1213_v20  ;;  %v1242_v50 = vmax.f32 %v1240_v4, %v1241_v29  ;;  %v1247_v43 = vrot.slane %v1246_v17, 2  ;;  %v846_v28 = vpop.f32.mrf.mxu1 }
 0x149   : > { %10145 = vst [vmem:[#allocation13_spill] sm:$0xff] %v7136_v56  ;;  %v1943_v1 = vmul.f32 1.442695, %v1773_v33  ;;  %v1226_v57 = vmax.f32 %v1224_v2, %v1225_v37  ;;  %v1231_v36 = vrot.slane %v1230_v23, 1  ;;  %v1236_v38 = vmax.f32 %v1234_v19, %v1235_v39 }
 0x14a   : > { %v7138_v59 = vpop.eup %5738  ;;  %5746 = vpow2.f32 %v1939_v44  ;;  %v1772_v25 = vsub.f32 %v7098_v51, %v1214_v45  ;;  %v1243_v52 = vrot.slane %v1242_v50, 1  ;;  %v1248_v8 = vmax.f32 %v1246_v17, %v1247_v43 }
 0x14b   : > { %10146 = vst [vmem:[#allocation14_spill] sm:$0xff] %v7138_v59  ;;  %v7141_v34 = vpop.eup %5740  ;;  %5748 = vpow2.f32 %v1943_v1  ;;  %v1774_v10 = vsub.f32 %v7102_v60, %v1226_v57  ;;  %v1232_v20 = vmax.f32 %v1230_v23, %v1231_v36  ;;  %v1237_v29 = vrot.slane %v1236_v38, 1  ;;  %v593_v23 = vpop.f32.mrf.mxu0 }
 0x14c   : > { %10147 = vst [vmem:[#allocation15_spill] sm:$0xff] %v7141_v34  ;;  %v7144_v4 = vpop.eup %5742  ;;  %v1941_v2 = vmul.f32 1.442695, %v1772_v25  ;;  %v1244_v19 = vmax.f32 %v1242_v50, %v1243_v52  ;;  %v1249_v33 = vrot.slane %v1248_v8, 1  ;;  %v7147_v37 = vadd.f32 %v587_v12, %v6734_v46  ;;  %v850_v1 = vpop.f32.mrf.mxu1 }
 0x14d   : > { %10148 = vst [vmem:[#allocation16_spill] sm:$0xff] %v7144_v4  ;;  %v7149_v51 = vpop.eup %5744  ;;  %v1945_v17 = vmul.f32 1.442695, %v1774_v10  ;;  %v1775_v39 = vsub.f32 %v7107_v6, %v1232_v20  ;;  %v1238_v44 = vmax.f32 %v1236_v38, %v1237_v29  ;;  %v7153_v45 = vadd.f32 %v844_v55, %v6736_v47  ;;  %v595_v29 = vpop.f32.mrf.mxu0 }
 0x14e   : > { %10149 = vst [vmem:[#allocation17_spill] sm:$0xff] %v7149_v51  ;;  %5750 = vpow2.f32 %v1941_v2  ;;  %v1777_v60 = vsub.f32 %v7111_v24, %v1244_v19  ;;  %v1250_v36 = vmax.f32 %v1248_v8, %v1249_v33  ;;  %v1251_v25 = vrot.slane %v7147_v37, 4  ;;  %v852_v19 = vpop.f32.mrf.mxu1 }
 0x14f   : > { %5752 = vpow2.f32 %v1945_v17  ;;  %v1947_v50 = vmul.f32 1.442695, %v1775_v39  ;;  %v1776_v12 = vsub.f32 %v7116_v18, %v1238_v44  ;;  %v1263_v43 = vrot.slane %v7153_v45, 4  ;;  %v599_v51 = vpop.f32.mrf.mxu0 }
 0x150   : > { %v1951_v57 = vmul.f32 1.442695, %v1777_v60  ;;  %v1778_v38 = vsub.f32 %v7120_v63, %v1250_v36  ;;  %v1252_v6 = vmax.f32 %v7147_v37, %v1251_v25  ;;  %v7162_v55 = vadd.f32 %v589_v31, %v6738_v48 }
 0x151   : > { %5754 = vpow2.f32 %v1947_v50  ;;  %v1949_v24 = vmul.f32 1.442695, %v1776_v12  ;;  %v1264_v52 = vmax.f32 %v7153_v45, %v1263_v43  ;;  %v7166_v8 = vadd.f32 %v846_v28, %v6740_v49 }
 0x152   : > { %5756 = vpow2.f32 %v1951_v57  ;;  %v1953_v18 = vmul.f32 1.442695, %v1778_v38  ;;  %v1253_v10 = vrot.slane %v1252_v6, 2  ;;  %v1257_v20 = vrot.slane %v7162_v55, 4 }
 0x153   : > { %5758 = vpow2.f32 %v1949_v24  ;;  %v1265_v63 = vrot.slane %v1264_v52, 2  ;;  %v1269_v2 = vrot.slane %v7166_v8, 4  ;;  %v7171_v31 = vadd.f32 %v593_v23, %v6734_v46 }
 0x154   : > { %5760 = vpow2.f32 %v1953_v18  ;;  %v1254_v33 = vmax.f32 %v1252_v6, %v1253_v10  ;;  %v1258_v17 = vmax.f32 %v7162_v55, %v1257_v20  ;;  %v7175_v28 = vadd.f32 %v850_v1, %v6736_v47 }
 0x155   : > { %v1266_v39 = vmax.f32 %v1264_v52, %v1265_v63  ;;  %v1270_v44 = vmax.f32 %v7166_v8, %v1269_v2  ;;  %v1275_v60 = vrot.slane %v7171_v31, 4  ;;  %v7180_v36 = vadd.f32 %v595_v29, %v6738_v48 }
 0x156   : > { %v1255_v25 = vrot.slane %v1254_v33, 1  ;;  %v1259_v50 = vrot.slane %v1258_v17, 2  ;;  %v1287_v23 = vrot.slane %v7175_v28, 4  ;;  %v7184_v12 = vadd.f32 %v852_v19, %v6740_v49 }
 0x157   : > { %v7186_v43 = vpop.eup %5746  ;;  %v1267_v57 = vrot.slane %v1266_v39, 1  ;;  %v1271_v1 = vrot.slane %v1270_v44, 2  ;;  %v1276_v38 = vmax.f32 %v7171_v31, %v1275_v60  ;;  %v1281_v6 = vrot.slane %v7180_v36, 4 }
 0x158   : > { %10150 = vst [vmem:[#allocation18_spill] sm:$0xff] %v7186_v43  ;;  %v7190_v24 = vpop.eup %5748  ;;  %v1256_v52 = vmax.f32 %v1254_v33, %v1255_v25  ;;  %v1260_v18 = vmax.f32 %v1258_v17, %v1259_v50  ;;  %v1288_v10 = vmax.f32 %v7175_v28, %v1287_v23  ;;  %v1293_v20 = vrot.slane %v7184_v12, 4  ;;  %v856_v23 = vpop.f32.mrf.mxu1 }
 0x159   : > { %10151 = vst [vmem:[#allocation19_spill] sm:$0xff] %v7190_v24  ;;  %v1268_v29 = vmax.f32 %v1266_v39, %v1267_v57  ;;  %v1272_v63 = vmax.f32 %v1270_v44, %v1271_v1  ;;  %v1277_v2 = vrot.slane %v1276_v38, 2  ;;  %v1282_v19 = vmax.f32 %v7180_v36, %v1281_v6 }
 0x15a   : > { %v1779_v43 = vsub.f32 %v7147_v37, %v1256_v52  ;;  %v1261_v34 = vrot.slane %v1260_v18, 1  ;;  %v1289_v59 = vrot.slane %v1288_v10, 2  ;;  %v1294_v60 = vmax.f32 %v7184_v12, %v1293_v20 }
 0x15b   : > { %v7197_v4 = vpop.eup %5750  ;;  %v1781_v33 = vsub.f32 %v7153_v45, %v1268_v29  ;;  %v1273_v17 = vrot.slane %v1272_v63, 1  ;;  %v1278_v25 = vmax.f32 %v1276_v38, %v1277_v2  ;;  %v1283_v50 = vrot.slane %v1282_v19, 2  ;;  %v601_v38 = vpop.f32.mrf.mxu0 }
 0x15c   : > { %10152 = vst [vmem:[#allocation20_spill] sm:$0xff] %v7197_v4  ;;  %v7200_v39 = vpop.eup %5752  ;;  %v1955_v44 = vmul.f32 1.442695, %v1779_v43  ;;  %v1262_v57 = vmax.f32 %v1260_v18, %v1261_v34  ;;  %v1290_v1 = vmax.f32 %v1288_v10, %v1289_v59  ;;  %v1295_v6 = vrot.slane %v1294_v60, 2  ;;  %v858_v18 = vpop.f32.mrf.mxu1 }
 0x15d   : > { %10153 = vst [vmem:[#allocation21_spill] sm:$0xff] %v7200_v39  ;;  %v1959_v37 = vmul.f32 1.442695, %v1781_v33  ;;  %v1274_v52 = vmax.f32 %v1272_v63, %v1273_v17  ;;  %v1279_v24 = vrot.slane %v1278_v25, 1  ;;  %v1284_v56 = vmax.f32 %v1282_v19, %v1283_v50 }
 0x15e   : > { %v7202_v20 = vpop.eup %5754  ;;  %5762 = vpow2.f32 %v1955_v44  ;;  %v1780_v4 = vsub.f32 %v7162_v55, %v1262_v57  ;;  %v1291_v45 = vrot.slane %v1290_v1, 1  ;;  %v1296_v29 = vmax.f32 %v1294_v60, %v1295_v6 }
 0x15f   : > { %10154 = vst [vmem:[#allocation22_spill] sm:$0xff] %v7202_v20  ;;  %v7205_v2 = vpop.eup %5756  ;;  %5764 = vpow2.f32 %v1959_v37  ;;  %v1782_v43 = vsub.f32 %v7166_v8, %v1274_v52  ;;  %v1280_v34 = vmax.f32 %v1278_v25, %v1279_v24  ;;  %v1285_v59 = vrot.slane %v1284_v56, 1  ;;  %v605_v25 = vpop.f32.mrf.mxu0 }
 0x160   : > { %10155 = vst [vmem:[#allocation23_spill] sm:$0xff] %v7205_v2  ;;  %v7208_v10 = vpop.eup %5758  ;;  %v1957_v63 = vmul.f32 1.442695, %v1780_v4  ;;  %v1292_v19 = vmax.f32 %v1290_v1, %v1291_v45  ;;  %v1297_v33 = vrot.slane %v1296_v29, 1  ;;  %v7211_v17 = vadd.f32 %v599_v51, %v6734_v46  ;;  %v862_v37 = vpop.f32.mrf.mxu1 }
 0x161   : > { %10156 = vst [vmem:[#allocation24_spill] sm:$0xff] %v7208_v10  ;;  %v7213_v55 = vpop.eup %5760  ;;  %v1961_v60 = vmul.f32 1.442695, %v1782_v43  ;;  %v1783_v50 = vsub.f32 %v7171_v31, %v1280_v34  ;;  %v1286_v44 = vmax.f32 %v1284_v56, %v1285_v59  ;;  %v7217_v57 = vadd.f32 %v856_v23, %v6736_v47  ;;  %v607_v59 = vpop.f32.mrf.mxu0 }
 0x162   : > { %10157 = vst [vmem:[#allocation25_spill] sm:$0xff] %v7213_v55  ;;  %5766 = vpow2.f32 %v1957_v63  ;;  %v1785_v8 = vsub.f32 %v7175_v28, %v1292_v19  ;;  %v1298_v24 = vmax.f32 %v1296_v29, %v1297_v33  ;;  %v1299_v4 = vrot.slane %v7211_v17, 4  ;;  %v864_v19 = vpop.f32.mrf.mxu1 }
 0x163   : > { %5768 = vpow2.f32 %v1961_v60  ;;  %v1963_v1 = vmul.f32 1.442695, %v1783_v50  ;;  %v1784_v51 = vsub.f32 %v7180_v36, %v1286_v44  ;;  %v1311_v6 = vrot.slane %v7217_v57, 4 }
 0x164   : > { %v1967_v52 = vmul.f32 1.442695, %v1785_v8  ;;  %v1786_v56 = vsub.f32 %v7184_v12, %v1298_v24  ;;  %v1300_v31 = vmax.f32 %v7211_v17, %v1299_v4  ;;  %v7226_v23 = vadd.f32 %v601_v38, %v6738_v48  ;;  %v868_v39 = vpop.f32.mrf.mxu1 }
 0x165   : > { %5770 = vpow2.f32 %v1963_v1  ;;  %v1965_v28 = vmul.f32 1.442695, %v1784_v51  ;;  %v1312_v45 = vmax.f32 %v7217_v57, %v1311_v6  ;;  %v7230_v29 = vadd.f32 %v858_v18, %v6740_v49 }
 0x166   : > { %5772 = vpow2.f32 %v1967_v52  ;;  %v1969_v36 = vmul.f32 1.442695, %v1786_v56  ;;  %v1301_v43 = vrot.slane %v1300_v31, 2  ;;  %v1305_v34 = vrot.slane %v7226_v23, 4 }
 0x167   : > { %5774 = vpow2.f32 %v1965_v28  ;;  %v1313_v12 = vrot.slane %v1312_v45, 2  ;;  %v1317_v63 = vrot.slane %v7230_v29, 4  ;;  %v7235_v38 = vadd.f32 %v605_v25, %v6734_v46 }
 0x168   : > { %5776 = vpow2.f32 %v1969_v36  ;;  %v1302_v33 = vmax.f32 %v1300_v31, %v1301_v43  ;;  %v1306_v60 = vmax.f32 %v7226_v23, %v1305_v34  ;;  %v7239_v18 = vadd.f32 %v862_v37, %v6736_v47 }
 0x169   : > { %v1314_v50 = vmax.f32 %v1312_v45, %v1313_v12  ;;  %v1318_v44 = vmax.f32 %v7230_v29, %v1317_v63  ;;  %v1323_v8 = vrot.slane %v7235_v38, 4  ;;  %v7244_v24 = vadd.f32 %v607_v59, %v6738_v48 }
 0x16a   : > { %v1303_v4 = vrot.slane %v1302_v33, 1  ;;  %v1307_v1 = vrot.slane %v1306_v60, 2  ;;  %v1335_v25 = vrot.slane %v7239_v18, 4  ;;  %v7248_v51 = vadd.f32 %v864_v19, %v6740_v49 }
 0x16b   : > { %v7250_v6 = vpop.eup %5762  ;;  %v1315_v52 = vrot.slane %v1314_v50, 1  ;;  %v1319_v37 = vrot.slane %v1318_v44, 2  ;;  %v1324_v56 = vmax.f32 %v7235_v38, %v1323_v8  ;;  %v1329_v31 = vrot.slane %v7244_v24, 4 }
 0x16c   : > { %10158 = vst [vmem:[#allocation26_spill] sm:$0xff] %v7250_v6  ;;  %v7254_v28 = vpop.eup %5764  ;;  %v1304_v45 = vmax.f32 %v1302_v33, %v1303_v4  ;;  %v1308_v36 = vmax.f32 %v1306_v60, %v1307_v1  ;;  %v1336_v43 = vmax.f32 %v7239_v18, %v1335_v25  ;;  %v1341_v34 = vrot.slane %v7248_v51, 4 }
 0x16d   : > { %10159 = vst [vmem:[#allocation27_spill] sm:$0xff] %v7254_v28  ;;  %v1316_v59 = vmax.f32 %v1314_v50, %v1315_v52  ;;  %v1320_v12 = vmax.f32 %v1318_v44, %v1319_v37  ;;  %v1325_v63 = vrot.slane %v1324_v56, 2  ;;  %v1330_v19 = vmax.f32 %v7244_v24, %v1329_v31  ;;  %v611_v31 = vpop.f32.mrf.mxu0 }
 0x16e   : > { %v1787_v6 = vsub.f32 %v7211_v17, %v1304_v45  ;;  %v1309_v2 = vrot.slane %v1308_v36, 1  ;;  %v1337_v20 = vrot.slane %v1336_v43, 2  ;;  %v1342_v8 = vmax.f32 %v7248_v51, %v1341_v34 }
 0x16f   : > { %v7261_v55 = vpop.eup %5766  ;;  %v1789_v33 = vsub.f32 %v7217_v57, %v1316_v59  ;;  %v1321_v60 = vrot.slane %v1320_v12, 1  ;;  %v1326_v4 = vmax.f32 %v1324_v56, %v1325_v63  ;;  %v1331_v1 = vrot.slane %v1330_v19, 2 }
 0x170   : > { %10160 = vst [vmem:[#allocation28_spill] sm:$0xff] %v7261_v55  ;;  %v7264_v25 = vpop.eup %5768  ;;  %v1971_v50 = vmul.f32 1.442695, %v1787_v6  ;;  %v1310_v44 = vmax.f32 %v1308_v36, %v1309_v2  ;;  %v1338_v52 = vmax.f32 %v1336_v43, %v1337_v20  ;;  %v1343_v37 = vrot.slane %v1342_v8, 2 }
 0x171   : > { %10161 = vst [vmem:[#allocation29_spill] sm:$0xff] %v7264_v25  ;;  %v1975_v28 = vmul.f32 1.442695, %v1789_v33  ;;  %v1322_v17 = vmax.f32 %v1320_v12, %v1321_v60  ;;  %v1327_v45 = vrot.slane %v1326_v4, 1  ;;  %v1332_v10 = vmax.f32 %v1330_v19, %v1331_v1  ;;  %v613_v60 = vpop.f32.mrf.mxu0 }
 0x172   : > { %v7266_v34 = vpop.eup %5770  ;;  %5778 = vpow2.f32 %v1971_v50  ;;  %v1788_v57 = vsub.f32 %v7226_v23, %v1310_v44  ;;  %v1339_v59 = vrot.slane %v1338_v52, 1  ;;  %v1344_v56 = vmax.f32 %v1342_v8, %v1343_v37 }
 0x173   : > { %10162 = vst [vmem:[#allocation30_spill] sm:$0xff] %v7266_v34  ;;  %v7269_v63 = vpop.eup %5772  ;;  %5780 = vpow2.f32 %v1975_v28  ;;  %v1790_v2 = vsub.f32 %v7230_v29, %v1322_v17  ;;  %v1328_v20 = vmax.f32 %v1326_v4, %v1327_v45  ;;  %v1333_v6 = vrot.slane %v1332_v10, 1  ;;  %v870_v29 = vpop.f32.mrf.mxu1 }
 0x174   : > { %10163 = vst [vmem:[#allocation31_spill] sm:$0xff] %v7269_v63  ;;  %v7272_v36 = vpop.eup %5774  ;;  %v1973_v43 = vmul.f32 1.442695, %v1788_v57  ;;  %v1340_v12 = vmax.f32 %v1338_v52, %v1339_v59  ;;  %v1345_v19 = vrot.slane %v1344_v56, 1  ;;  %v7275_v33 = vadd.f32 %v611_v31, %v6734_v46  ;;  %v617_v57 = vpop.f32.mrf.mxu0 }
 0x175   : > { %10164 = vst [vmem:[#allocation32_spill] sm:$0xff] %v7272_v36  ;;  %v7277_v1 = vpop.eup %5776  ;;  %v1977_v23 = vmul.f32 1.442695, %v1790_v2  ;;  %v1791_v8 = vsub.f32 %v7235_v38, %v1328_v20  ;;  %v1334_v50 = vmax.f32 %v1332_v10, %v1333_v6  ;;  %v7281_v28 = vadd.f32 %v868_v39, %v6736_v47  ;;  %v874_v2 = vpop.f32.mrf.mxu1 }
 0x176   : > { %10165 = vst [vmem:[#allocation33_spill] sm:$0xff] %v7277_v1  ;;  %5782 = vpow2.f32 %v1973_v43  ;;  %v1793_v4 = vsub.f32 %v7239_v18, %v1340_v12  ;;  %v1346_v44 = vmax.f32 %v1344_v56, %v1345_v19  ;;  %v1347_v52 = vrot.slane %v7275_v33, 4 }
 0x177   : > { %5784 = vpow2.f32 %v1977_v23  ;;  %v1979_v37 = vmul.f32 1.442695, %v1791_v8  ;;  %v1792_v31 = vsub.f32 %v7244_v24, %v1334_v50  ;;  %v1359_v17 = vrot.slane %v7281_v28, 4 }
 0x178   : > { %v1983_v45 = vmul.f32 1.442695, %v1793_v4  ;;  %v1794_v38 = vsub.f32 %v7248_v51, %v1346_v44  ;;  %v1348_v10 = vmax.f32 %v7275_v33, %v1347_v52  ;;  %v7290_v39 = vadd.f32 %v613_v60, %v6738_v48 }
 0x179   : > { %5786 = vpow2.f32 %v1979_v37  ;;  %v1981_v18 = vmul.f32 1.442695, %v1792_v31  ;;  %v1360_v59 = vmax.f32 %v7281_v28, %v1359_v17  ;;  %v7294_v56 = vadd.f32 %v870_v29, %v6740_v49 }
 0x17a   : > { %5788 = vpow2.f32 %v1983_v45  ;;  %v1985_v24 = vmul.f32 1.442695, %v1794_v38  ;;  %v1349_v20 = vrot.slane %v1348_v10, 2  ;;  %v1353_v6 = vrot.slane %v7290_v39, 4 }
 0x17b   : > { %5790 = vpow2.f32 %v1981_v18  ;;  %v1361_v51 = vrot.slane %v1360_v59, 2  ;;  %v1365_v43 = vrot.slane %v7294_v56, 4  ;;  %v7299_v12 = vadd.f32 %v617_v57, %v6734_v46 }
 0x17c   : > { %5792 = vpow2.f32 %v1985_v24  ;;  %v1350_v19 = vmax.f32 %v1348_v10, %v1349_v20  ;;  %v1354_v60 = vmax.f32 %v7290_v39, %v1353_v6  ;;  %v7303_v23 = vadd.f32 %v874_v2, %v6736_v47 }
 0x17d   : > { %v1362_v8 = vmax.f32 %v1360_v59, %v1361_v51  ;;  %v1366_v50 = vmax.f32 %v7294_v56, %v1365_v43  ;;  %v1371_v29 = vrot.slane %v7299_v12, 4  ;;  %v2121_v4 = vrot.slane %v6870_v11, 4 }
 0x17e   : > { %v1351_v44 = vrot.slane %v1350_v19, 1  ;;  %v1355_v52 = vrot.slane %v1354_v60, 2  ;;  %v1383_v37 = vrot.slane %v7303_v23, 4  ;;  %v2133_v31 = vrot.slane %v6872_v21, 4 }
 0x17f   : > { %v7310_v17 = vpop.eup %5778  ;;  %v1363_v45 = vrot.slane %v1362_v8, 1  ;;  %v1367_v38 = vrot.slane %v1366_v50, 2  ;;  %v1372_v10 = vmax.f32 %v7299_v12, %v1371_v29  ;;  %v2122_v57 = vadd.f32 %v6870_v11, %v2121_v4 }
 0x180   : > { %10166 = vst [vmem:[#allocation34_spill] sm:$0xff] %v7310_v17  ;;  %v7314_v18 = vpop.eup %5780  ;;  %v1352_v59 = vmax.f32 %v1350_v19, %v1351_v44  ;;  %v1356_v2 = vmax.f32 %v1354_v60, %v1355_v52  ;;  %v1384_v24 = vmax.f32 %v7303_v23, %v1383_v37  ;;  %v2134_v20 = vadd.f32 %v6872_v21, %v2133_v31 }
 0x181   : > { %10167 = vst [vmem:[#allocation35_spill] sm:$0xff] %v7314_v18  ;;  %v1364_v6 = vmax.f32 %v1362_v8, %v1363_v45  ;;  %v1368_v51 = vmax.f32 %v1366_v50, %v1367_v38  ;;  %v1373_v43 = vrot.slane %v1372_v10, 2  ;;  %v2123_v63 = vrot.slane %v2122_v57, 2 }
 0x182   : > { %v1795_v17 = vsub.f32 %v7275_v33, %v1352_v59  ;;  %v1357_v34 = vrot.slane %v1356_v2, 1  ;;  %v1385_v1 = vrot.slane %v1384_v24, 2  ;;  %v2135_v36 = vrot.slane %v2134_v20, 2  ;;  %v619_v59 = vpop.f32.mrf.mxu0 }
 0x183   : > { %v7319_v29 = vpop.eup %5782  ;;  %v1797_v4 = vsub.f32 %v7281_v28, %v1364_v6  ;;  %v1369_v18 = vrot.slane %v1368_v51, 1  ;;  %v1374_v19 = vmax.f32 %v1372_v10, %v1373_v43  ;;  %v2124_v60 = vadd.f32 %v2123_v63, %v2122_v57  ;;  %v876_v10 = vpop.f32.mrf.mxu1 }
 0x184   : > { %10168 = vst [vmem:[#allocation36_spill] sm:$0xff] %v7319_v29  ;;  %v7322_v44 = vpop.eup %5784  ;;  %v1987_v52 = vmul.f32 1.442695, %v1795_v17  ;;  %v1358_v37 = vmax.f32 %v1356_v2, %v1357_v34  ;;  %v1386_v8 = vmax.f32 %v1384_v24, %v1385_v1  ;;  %v2136_v50 = vadd.f32 %v2135_v36, %v2134_v20 }
 0x185   : > { %10169 = vst [vmem:[#allocation37_spill] sm:$0xff] %v7322_v44  ;;  %v1991_v31 = vmul.f32 1.442695, %v1797_v4  ;;  %v1370_v45 = vmax.f32 %v1368_v51, %v1369_v18  ;;  %v1375_v38 = vrot.slane %v1374_v19, 1  ;;  %v2125_v33 = vrot.slane %v2124_v60, 1 }
 0x186   : > { %v7324_v25 = vpop.eup %5786  ;;  %5794 = vpow2.f32 %v1987_v52  ;;  %v1796_v29 = vsub.f32 %v7290_v39, %v1358_v37  ;;  %v1387_v28 = vrot.slane %v1386_v8, 1  ;;  %v2137_v6 = vrot.slane %v2136_v50, 1 }
 0x187   : > { %10170 = vst [vmem:[#allocation38_spill] sm:$0xff] %v7324_v25  ;;  %v7327_v63 = vpop.eup %5788  ;;  %5796 = vpow2.f32 %v1991_v31  ;;  %v1798_v34 = vsub.f32 %v7294_v56, %v1370_v45  ;;  %v1376_v1 = vmax.f32 %v1374_v19, %v1375_v38  ;;  %v7330_v36 = vadd.f32 %v2125_v33, %v2124_v60  ;;  %v623_v19 = vpop.f32.mrf.mxu0 }
 0x188   : > { %10171 = vst [vmem:[#allocation39_spill] sm:$0xff] %v7327_v63  ;;  %v7332_v17 = vpop.eup %5790  ;;  %v1989_v57 = vmul.f32 1.442695, %v1796_v29  ;;  %v1388_v18 = vmax.f32 %v1386_v8, %v1387_v28  ;;  %v7334_v2 = vadd.f32 %v2137_v6, %v2136_v50  ;;  %v7337_v24 = vadd.f32 %v619_v59, %v6738_v48 }
 0x189   : > { %10172 = vst [vmem:[#allocation40_spill] sm:$0xff] %v7332_v17  ;;  %v7339_v39 = vpop.eup %5792  ;;  %v1993_v20 = vmul.f32 1.442695, %v1798_v34  ;;  %v1799_v51 = vsub.f32 %v7299_v12, %v1376_v1  ;;  %5798 = vrcp.f32 %v7330_v36  ;;  %v7344_v56 = vadd.f32 %v876_v10, %v6740_v49  ;;  %v880_v12 = vpop.f32.mrf.mxu1 }
 0x18a   : > { %10173 = vst [vmem:[#allocation41_spill] sm:$0xff] %v7339_v39  ;;  %5800 = vpow2.f32 %v1989_v57  ;;  %v1801_v43 = vsub.f32 %v7303_v23, %v1388_v18  ;;  %v1377_v29 = vrot.slane %v7337_v24, 4  ;;  %v2115_v4 = vrot.slane %v6860_v0, 4  ;;  %v625_v44 = vpop.f32.mrf.mxu0 }
 0x18b   : > { %5802 = vpow2.f32 %v1993_v20  ;;  %v1995_v60 = vmul.f32 1.442695, %v1799_v51  ;;  %v1389_v52 = vrot.slane %v7344_v56, 4  ;;  %v2127_v37 = vrot.slane %v6863_v53, 4 }
 0x18c   : > { %v1999_v8 = vmul.f32 1.442695, %v1801_v43  ;;  %5804 = vrcp.f32 %v7334_v2  ;;  %v1378_v50 = vmax.f32 %v7337_v24, %v1377_v29  ;;  %v2116_v31 = vadd.f32 %v6860_v0, %v2115_v4 }
 0x18d   : > { %5806 = vpow2.f32 %v1995_v60  ;;  %v1390_v23 = vmax.f32 %v7344_v56, %v1389_v52  ;;  %v2128_v45 = vadd.f32 %v6863_v53, %v2127_v37  ;;  %v7357_v38 = vadd.f32 %v623_v19, %v6734_v46 }
 0x18e   : > { %5808 = vpow2.f32 %v1999_v8  ;;  %v1379_v33 = vrot.slane %v1378_v50, 2  ;;  %v2117_v59 = vrot.slane %v2116_v31, 2  ;;  %v7360_v28 = vadd.f32 %v880_v12, %v6736_v47 }
 0x18f   : > { %v1391_v6 = vrot.slane %v1390_v23, 2  ;;  %v2129_v10 = vrot.slane %v2128_v45, 2  ;;  %v1395_v34 = vrot.slane %v7357_v38, 4  ;;  %v2145_v1 = vrot.slane %v6889_v41, 4 }
 0x190   : > { %v1380_v57 = vmax.f32 %v1378_v50, %v1379_v33  ;;  %v2118_v18 = vadd.f32 %v2117_v59, %v2116_v31  ;;  %v1407_v20 = vrot.slane %v7360_v28, 4  ;;  %v2157_v51 = vrot.slane %v6894_v26, 4 }
 0x191   : > { %v1392_v43 = vmax.f32 %v1390_v23, %v1391_v6  ;;  %v2130_v29 = vadd.f32 %v2129_v10, %v2128_v45  ;;  %v1396_v4 = vmax.f32 %v7357_v38, %v1395_v34  ;;  %v2146_v19 = vadd.f32 %v6889_v41, %v2145_v1 }
 0x192   : > { %v1381_v60 = vrot.slane %v1380_v57, 1  ;;  %v2119_v52 = vrot.slane %v2118_v18, 1  ;;  %v1408_v37 = vmax.f32 %v7360_v28, %v1407_v20  ;;  %v2158_v12 = vadd.f32 %v6894_v26, %v2157_v51 }
 0x193   : > { %v7370_v8 = vpop.eup %5794  ;;  %v1393_v50 = vrot.slane %v1392_v43, 1  ;;  %v2131_v31 = vrot.slane %v2130_v29, 1  ;;  %v1397_v33 = vrot.slane %v1396_v4, 2  ;;  %v2147_v59 = vrot.slane %v2146_v19, 2 }
 0x194   : > { %10174 = vst [vmem:[#allocation42_spill] sm:$0xff] %v7370_v8  ;;  %v7372_v63 = vpop.eup %5796  ;;  %v1382_v23 = vmax.f32 %v1380_v57, %v1381_v60  ;;  %v7374_v45 = vadd.f32 %v2119_v52, %v2118_v18  ;;  %v1409_v6 = vrot.slane %v1408_v37, 2  ;;  %v2159_v10 = vrot.slane %v2158_v12, 2 }
 0x195   : > { %10175 = vst [vmem:[#allocation43_spill] sm:$0xff] %v7372_v63  ;;  %v1394_v34 = vmax.f32 %v1392_v43, %v1393_v50  ;;  %v7376_v1 = vadd.f32 %v2131_v31, %v2130_v29  ;;  %v1398_v25 = vmax.f32 %v1396_v4, %v1397_v33  ;;  %v2148_v20 = vadd.f32 %v2147_v59, %v2146_v19 }
 0x196   : > { %v5799_v39 = vpop.eup %5798  ;;  %v1800_v51 = vsub.f32 %v7337_v24, %v1382_v23  ;;  %5810 = vrcp.f32 %v7374_v45  ;;  %v1410_v8 = vmax.f32 %v1408_v37, %v1409_v6  ;;  %v2160_v17 = vadd.f32 %v2159_v10, %v2158_v12  ;;  %v882_v23 = vpop.f32.mrf.mxu1 }
 0x197   : > { %v7380_v55 = vpop.eup %5800  ;;  %v3012_v57 = vmul.f32 %v5799_v39, %v7330_v36  ;;  %v1802_v18 = vsub.f32 %v7344_v56, %v1394_v34  ;;  %5812 = vrcp.f32 %v7376_v1  ;;  %v1399_v43 = vrot.slane %v1398_v25, 1 }
 0x198   : > { %10176 = vst [vmem:[#allocation44_spill] sm:$0xff] %v7380_v55  ;;  %v7385_v29 = vpop.eup %5802  ;;  %v1997_v4 = vmul.f32 1.442695, %v1800_v51  ;;  %v1411_v19 = vrot.slane %v1410_v8, 1  ;;  %v2149_v60 = vrot.slane %v2148_v20, 1  ;;  %v2161_v24 = vrot.slane %v2160_v17, 1 }
 0x199   : > { %10177 = vst [vmem:[#allocation45_spill] sm:$0xff] %v7385_v29  ;;  %v5805_v52 = vpop.eup %5804  ;;  %v3140_v50 = vsub.f32 2.0, %v3012_v57  ;;  %v2001_v37 = vmul.f32 1.442695, %v1802_v18  ;;  %v1400_v12 = vmax.f32 %v1398_v25, %v1399_v43  ;;  %v7388_v31 = vadd.f32 %v625_v44, %v6738_v48  ;;  %v629_v57 = vpop.f32.mrf.mxu0 }
 0x19a   : > { %v7390_v33 = vpop.eup %5806  ;;  %v3014_v36 = vmul.f32 %v5805_v52, %v7334_v2  ;;  %5814 = vpow2.f32 %v1997_v4  ;;  %v1412_v56 = vmax.f32 %v1410_v8, %v1411_v19  ;;  %v7393_v59 = vadd.f32 %v2149_v60, %v2148_v20  ;;  %v886_v43 = vpop.f32.mrf.mxu1 }
 0x19b   : > { %10178 = vst [vmem:[#allocation46_spill] sm:$0xff] %v7390_v33  ;;  %v7395_v6 = vpop.eup %5808  ;;  %v3268_v10 = vmul.f32 %v5799_v39, %v3140_v50  ;;  %5816 = vpow2.f32 %v2001_v37  ;;  %v1803_v34 = vsub.f32 %v7357_v38, %v1400_v12  ;;  %v7398_v51 = vadd.f32 %v2161_v24, %v2160_v17 }
 0x19c   : > { %10179 = vst [vmem:[#allocation47_spill] sm:$0xff] %v7395_v6  ;;  %v3142_v25 = vsub.f32 2.0, %v3014_v36  ;;  %v1805_v44 = vsub.f32 %v7360_v28, %v1412_v56  ;;  %5818 = vrcp.f32 %v7393_v59  ;;  %v1401_v2 = vrot.slane %v7388_v31, 4 }
 0x19d   : > { %v7404_v8 = vmul.f32 %v6870_v11, %v3268_v10  ;;  %v2003_v20 = vmul.f32 1.442695, %v1803_v34  ;;  %5820 = vrcp.f32 %v7398_v51  ;;  %v7408_v39 = vadd.f32 %v882_v23, %v6740_v49 }
 0x19e   : > { %v3270_v38 = vmul.f32 %v5805_v52, %v3142_v25  ;;  %v2007_v17 = vmul.f32 1.442695, %v1805_v44  ;;  %v1402_v18 = vmax.f32 %v7388_v31, %v1401_v2  ;;  %v2139_v28 = vrot.slane %v6876_v16, 4 }
 0x19f   : > { %10180 = vst [vmem:[#allocation48_spill] sm:$0xff] %v7404_v8  ;;  %3651 = vmatprep.mubr.f32.mxu0 %v7404_v8  ;;  %5822 = vpow2.f32 %v2003_v20  ;;  %v1413_v4 = vrot.slane %v7408_v39, 4  ;;  %v2151_v11 = vrot.slane %v6881_v14, 4  ;;  %v7416_v19 = vadd.f32 %v629_v57, %v6734_v46 }
 0x1a0   : > { %v7419_v60 = vmul.f32 %v6872_v21, %v3270_v38  ;;  %5824 = vpow2.f32 %v2007_v17  ;;  %v1403_v24 = vrot.slane %v1402_v18, 2  ;;  %v2140_v52 = vadd.f32 %v6876_v16, %v2139_v28 }
 0x1a1   : > { %v1414_v50 = vmax.f32 %v7408_v39, %v1413_v4  ;;  %v2152_v37 = vadd.f32 %v6881_v14, %v2151_v11  ;;  %v1419_v12 = vrot.slane %v7416_v19, 4  ;;  %v7426_v36 = vadd.f32 %v886_v43, %v6736_v47 }
 0x1a2   : > { %10181 = vst [vmem:[#allocation49_spill] sm:$0xff] %v7419_v60  ;;  %3876 = vmatprep.mubr.f32.mxu1 %v7419_v60  ;;  %v1404_v56 = vmax.f32 %v1402_v18, %v1403_v24  ;;  %v2141_v23 = vrot.slane %v2140_v52, 2  ;;  %v2169_v21 = vrot.slane %v6941_v3, 4  ;;  %v2181_v10 = vrot.slane %v6943_v9, 4 }
 0x1a3   : > { %v5811_v34 = vpop.eup %5810  ;;  %v1415_v25 = vrot.slane %v1414_v50, 2  ;;  %v2153_v44 = vrot.slane %v2152_v37, 2  ;;  %v1420_v2 = vmax.f32 %v7416_v19, %v1419_v12  ;;  %v1431_v57 = vrot.slane %v7426_v36, 4 }
 0x1a4   : > { %v5813_v20 = vpop.eup %5812  ;;  %v3011_v38 = vmul.f32 %v5811_v34, %v7374_v45  ;;  %v1405_v17 = vrot.slane %v1404_v56, 1  ;;  %v2142_v28 = vadd.f32 %v2141_v23, %v2140_v52  ;;  %v2170_v43 = vadd.f32 %v6941_v3, %v2169_v21 }
 0x1a5   : > { %v3013_v18 = vmul.f32 %v5813_v20, %v7376_v1  ;;  %v1416_v4 = vmax.f32 %v1414_v50, %v1415_v25  ;;  %v2154_v11 = vadd.f32 %v2153_v44, %v2152_v37  ;;  %v1421_v24 = vrot.slane %v1420_v2, 2 }
 0x1a6   : > { %v3139_v60 = vsub.f32 2.0, %v3011_v38  ;;  %v1406_v8 = vmax.f32 %v1404_v56, %v1405_v17  ;;  %v2143_v6 = vrot.slane %v2142_v28, 1  ;;  %v1432_v33 = vmax.f32 %v7426_v36, %v1431_v57 }
 0x1a7   : > { %v7437_v12 = vpop.eup %5814  ;;  %v3141_v63 = vsub.f32 2.0, %v3013_v18  ;;  %v1417_v29 = vrot.slane %v1416_v4, 1  ;;  %v2155_v55 = vrot.slane %v2154_v11, 1  ;;  %v1422_v45 = vmax.f32 %v1420_v2, %v1421_v24 }
 0x1a8   : > { %v7439_v27 = vpop.eup %5816  ;;  %v3267_v52 = vmul.f32 %v5811_v34, %v3139_v60  ;;  %v1804_v23 = vsub.f32 %v7388_v31, %v1406_v8  ;;  %v7442_v1 = vadd.f32 %v2143_v6, %v2142_v28  ;;  %v1433_v50 = vrot.slane %v1432_v33, 2 }
 0x1a9   : > { %v5819_v37 = vpop.eup %5818  ;;  %v3269_v21 = vmul.f32 %v5813_v20, %v3141_v63  ;;  %v1418_v56 = vmax.f32 %v1416_v4, %v1417_v29  ;;  %v7444_v25 = vadd.f32 %v2155_v55, %v2154_v11  ;;  %v1423_v44 = vrot.slane %v1422_v45, 1  ;;  %v631_v55 = vpop.f32.mrf.mxu0 }
 0x1aa   : > { %v5821_v57 = vpop.eup %5820  ;;  %v7447_v38 = vmul.f32 %v6860_v0, %v3267_v52  ;;  %v3016_v2 = vmul.f32 %v5819_v37, %v7393_v59  ;;  %v2005_v17 = vmul.f32 1.442695, %v1804_v23  ;;  %5826 = vrcp.f32 %v7442_v1  ;;  %v888_v11 = vpop.f32.mrf.mxu1 }
 0x1ab   : > { %v7452_v31 = vmul.f32 %v6863_v53, %v3269_v21  ;;  %v3018_v6 = vmul.f32 %v5821_v57, %v7398_v51  ;;  %v1806_v63 = vsub.f32 %v7408_v39, %v1418_v56  ;;  %5828 = vrcp.f32 %v7444_v25 }
 0x1ac   : > { %10182 = vst [vmem:[#allocation50_spill] sm:$0xff] %v7447_v38  ;;  %v7457_v29 = vpop.eup %5822  ;;  %3652 = vmatmul.mubr.f32.vlgmr.msra.gmra.mxu0 %v7447_v38  ;;  %v3144_v0 = vsub.f32 2.0, %v3016_v2  ;;  %5830 = vpow2.f32 %v2005_v17  ;;  %v1424_v59 = vmax.f32 %v1422_v45, %v1423_v44  ;;  %v1434_v8 = vmax.f32 %v1432_v33, %v1433_v50  ;;  %v635_v44 = vpop.f32.mrf.mxu0 }
 0x1ad   : > { %10183 = vst [vmem:[#allocation51_spill] sm:$0xff] %v7452_v31  ;;  %v7460_v60 = vpop.eup %5824  ;;  %3877 = vmatmul.mubr.f32.vlgmr.msra.gmra.mxu1 %v7452_v31  ;;  %v3146_v53 = vsub.f32 2.0, %v3018_v6  ;;  %v2009_v34 = vmul.f32 1.442695, %v1806_v63  ;;  %v2171_v51 = vrot.slane %v2170_v43, 2  ;;  %v2182_v39 = vadd.f32 %v6943_v9, %v2181_v10 }
 0x1ae   : > { %v3272_v20 = vmul.f32 %v5819_v37, %v3144_v0  ;;  %v1807_v28 = vsub.f32 %v7416_v19, %v1424_v59  ;;  %v1435_v18 = vrot.slane %v1434_v8, 1  ;;  %v7466_v4 = vadd.f32 %v631_v55, %v6738_v48 }
 0x1af   : > { %v3274_v24 = vmul.f32 %v5821_v57, %v3146_v53  ;;  %5832 = vpow2.f32 %v2009_v34  ;;  %v2172_v33 = vadd.f32 %v2171_v51, %v2170_v43  ;;  %v2183_v45 = vrot.slane %v2182_v39, 2 }
 0x1b0   : > { %v7469_v52 = vmul.f32 %v6889_v41, %v3272_v20  ;;  %v2011_v23 = vmul.f32 1.442695, %v1807_v28  ;;  %v1436_v50 = vmax.f32 %v1434_v8, %v1435_v18  ;;  %v1425_v21 = vrot.slane %v7466_v4, 4 }
 0x1b1   : > { %v7473_v10 = vmul.f32 %v6894_v26, %v3274_v24  ;;  %v2173_v19 = vrot.slane %v2172_v33, 1  ;;  %v2184_v37 = vadd.f32 %v2183_v45, %v2182_v39  ;;  %v7476_v56 = vadd.f32 %v888_v11, %v6740_v49 }
 0x1b2   : > { %10184 = vst [vmem:[#allocation52_spill] sm:$0xff] %v7469_v52  ;;  %3656 = vmatprep.mubr.f32.mxu0 %v7469_v52  ;;  %5834 = vpow2.f32 %v2011_v23  ;;  %v1809_v43 = vsub.f32 %v7426_v36, %v1436_v50  ;;  %v1426_v41 = vmax.f32 %v7466_v4, %v1425_v21  ;;  %v2163_v57 = vrot.slane %v6930_v30, 4  ;;  %v892_v36 = vpop.f32.mrf.mxu1 }
 0x1b3   : > { %10185 = vst [vmem:[#allocation53_spill] sm:$0xff] %v7473_v10  ;;  %3881 = vmatprep.mubr.f32.mxu1 %v7473_v10  ;;  %v7483_v2 = vadd.f32 %v2173_v19, %v2172_v33  ;;  %v2185_v26 = vrot.slane %v2184_v37, 1  ;;  %v1437_v17 = vrot.slane %v7476_v56, 4  ;;  %v2175_v6 = vrot.slane %v6936_v40, 4 }
 0x1b4   : > { %v2015_v63 = vmul.f32 1.442695, %v1809_v43  ;;  %v1427_v55 = vrot.slane %v1426_v41, 2  ;;  %v2164_v0 = vadd.f32 %v6930_v30, %v2163_v57  ;;  %v7489_v59 = vadd.f32 %v635_v44, %v6734_v46 }
 0x1b5   : > { %5836 = vrcp.f32 %v7483_v2  ;;  %v7492_v8 = vadd.f32 %v2185_v26, %v2184_v37  ;;  %v1438_v53 = vmax.f32 %v7476_v56, %v1437_v17  ;;  %v2176_v34 = vadd.f32 %v6936_v40, %v2175_v6 }
 0x1b6   : > { %5838 = vpow2.f32 %v2015_v63  ;;  %v1428_v51 = vmax.f32 %v1426_v41, %v1427_v55  ;;  %v2165_v39 = vrot.slane %v2164_v0, 2  ;;  %v1443_v20 = vrot.slane %v7489_v59, 4 }
 0x1b7   : > { %v5827_v28 = vpop.eup %5826  ;;  %5840 = vrcp.f32 %v7492_v8  ;;  %v1439_v18 = vrot.slane %v1438_v53, 2  ;;  %v2177_v11 = vrot.slane %v2176_v34, 2  ;;  %v7499_v24 = vadd.f32 %v892_v36, %v6736_v47 }
 0x1b8   : > { %v5829_v33 = vpop.eup %5828  ;;  %v3015_v45 = vmul.f32 %v5827_v28, %v7442_v1  ;;  %v1429_v23 = vrot.slane %v1428_v51, 1  ;;  %v2166_v50 = vadd.f32 %v2165_v39, %v2164_v0  ;;  %v1444_v21 = vmax.f32 %v7489_v59, %v1443_v20 }
 0x1b9   : > { %v7503_v19 = vpop.eup %5830  ;;  %v3017_v37 = vmul.f32 %v5829_v33, %v7444_v25  ;;  %v1440_v44 = vmax.f32 %v1438_v53, %v1439_v18  ;;  %v2178_v43 = vadd.f32 %v2177_v11, %v2176_v34  ;;  %v1455_v41 = vrot.slane %v7499_v24, 4 }
 0x1ba   : > { %v3143_v57 = vsub.f32 2.0, %v3015_v45  ;;  %v1430_v26 = vmax.f32 %v1428_v51, %v1429_v23  ;;  %v2167_v17 = vrot.slane %v2166_v50, 1  ;;  %v1445_v6 = vrot.slane %v1444_v21, 2 }
 0x1bb   : > { %v3145_v63 = vsub.f32 2.0, %v3017_v37  ;;  %v1441_v55 = vrot.slane %v1440_v44, 1  ;;  %v2179_v36 = vrot.slane %v2178_v43, 1  ;;  %v1456_v1 = vmax.f32 %v7499_v24, %v1455_v41  ;;  %v637_v37 = vpop.f32.mrf.mxu0  ;;  %v894_v41 = vpop.f32.mrf.mxu1 }
 0x1bc   : > { %v7508_v0 = vpop.eup %5832  ;;  %v3271_v39 = vmul.f32 %v5827_v28, %v3143_v57  ;;  %v1808_v20 = vsub.f32 %v7466_v4, %v1430_v26  ;;  %v7511_v31 = vadd.f32 %v2167_v17, %v2166_v50  ;;  %v1446_v25 = vmax.f32 %v1444_v21, %v1445_v6 }
 0x1bd   : > { %v3273_v53 = vmul.f32 %v5829_v33, %v3145_v63  ;;  %v1442_v34 = vmax.f32 %v1440_v44, %v1441_v55  ;;  %v7513_v18 = vadd.f32 %v2179_v36, %v2178_v43  ;;  %v1457_v51 = vrot.slane %v1456_v1, 2 }
 0x1be   : > { %v7516_v11 = vmul.f32 %v6876_v16, %v3271_v39  ;;  %v2013_v45 = vmul.f32 1.442695, %v1808_v20  ;;  %5842 = vrcp.f32 %v7511_v31  ;;  %v1447_v23 = vrot.slane %v1446_v25, 1 }
 0x1bf   : > { %v7519_v28 = vpop.eup %5834  ;;  %v7522_v4 = vmul.f32 %v6881_v14, %v3273_v53  ;;  %v1810_v33 = vsub.f32 %v7476_v56, %v1442_v34  ;;  %5844 = vrcp.f32 %v7513_v18  ;;  %v1458_v50 = vmax.f32 %v1456_v1, %v1457_v51 }
 0x1c0   : > { %10186 = vst [vmem:[#allocation54_spill] sm:$0xff] %v7516_v11  ;;  %3657 = vmatmul.mubr.f32.gmra.mxu0 %v7516_v11  ;;  %5846 = vpow2.f32 %v2013_v45  ;;  %v1448_v16 = vmax.f32 %v1446_v25, %v1447_v23  ;;  %v2193_v21 = vrot.slane %v6952_v58, 4  ;;  %v2205_v44 = vrot.slane %v6957_v35, 4  ;;  %v641_v11 = vpop.f32.mrf.mxu0 }
 0x1c1   : > { %10187 = vst [vmem:[#allocation55_spill] sm:$0xff] %v7522_v4  ;;  %3882 = vmatmul.mubr.f32.gmra.mxu1 %v7522_v4  ;;  %v2017_v43 = vmul.f32 1.442695, %v1810_v33  ;;  %v1459_v57 = vrot.slane %v1458_v50, 1  ;;  %v7531_v14 = vadd.f32 %v637_v37, %v6738_v48  ;;  %v7534_v56 = vadd.f32 %v894_v41, %v6740_v49 }
 0x1c2   : > { %v5837_v26 = vpop.eup %5836  ;;  %v1811_v17 = vsub.f32 %v7489_v59, %v1448_v16  ;;  %v2194_v6 = vadd.f32 %v6952_v58, %v2193_v21  ;;  %v2206_v63 = vadd.f32 %v6957_v35, %v2205_v44  ;;  %v2187_v55 = vrot.slane %v6947_v13, 4 }
 0x1c3   : > { %v7540_v36 = vpop.eup %5838  ;;  %v3020_v1 = vmul.f32 %v5837_v26, %v7483_v2  ;;  %5848 = vpow2.f32 %v2017_v43  ;;  %v1460_v39 = vmax.f32 %v1458_v50, %v1459_v57  ;;  %v1449_v20 = vrot.slane %v7531_v14, 4 }
 0x1c4   : > { %v5841_v25 = vpop.eup %5840  ;;  %v2019_v53 = vmul.f32 1.442695, %v1811_v17  ;;  %v2195_v34 = vrot.slane %v2194_v6, 2  ;;  %v2207_v51 = vrot.slane %v2206_v63, 2  ;;  %v1461_v59 = vrot.slane %v7534_v56, 4 }
 0x1c5   : > { %v3148_v45 = vsub.f32 2.0, %v3020_v1  ;;  %v3022_v23 = vmul.f32 %v5841_v25, %v7492_v8  ;;  %v1813_v37 = vsub.f32 %v7499_v24, %v1460_v39  ;;  %v1450_v41 = vmax.f32 %v7531_v14, %v1449_v20 }
 0x1c6   : > { %5850 = vpow2.f32 %v2019_v53  ;;  %v2196_v33 = vadd.f32 %v2195_v34, %v2194_v6  ;;  %v2208_v2 = vadd.f32 %v2207_v51, %v2206_v63  ;;  %v1462_v50 = vmax.f32 %v7534_v56, %v1461_v59 }
 0x1c7   : > { %v3276_v16 = vmul.f32 %v5837_v26, %v3148_v45  ;;  %v3150_v21 = vsub.f32 2.0, %v3022_v23  ;;  %v2023_v44 = vmul.f32 1.442695, %v1813_v37  ;;  %v1451_v43 = vrot.slane %v1450_v41, 2  ;;  %v898_v23 = vpop.f32.mrf.mxu1 }
 0x1c8   : > { %v2197_v57 = vrot.slane %v2196_v33, 1  ;;  %v2209_v17 = vrot.slane %v2208_v2, 1  ;;  %v1463_v4 = vrot.slane %v1462_v50, 2  ;;  %v2188_v1 = vadd.f32 %v6947_v13, %v2187_v55 }
 0x1c9   : > { %v7551_v8 = vmul.f32 %v6941_v3, %v3276_v16  ;;  %v3278_v24 = vmul.f32 %v5841_v25, %v3150_v21  ;;  %5852 = vpow2.f32 %v2023_v44  ;;  %v1452_v39 = vmax.f32 %v1450_v41, %v1451_v43 }
 0x1ca   : > { %v7553_v6 = vadd.f32 %v2197_v57, %v2196_v33  ;;  %v7555_v63 = vadd.f32 %v2209_v17, %v2208_v2  ;;  %v1464_v26 = vmax.f32 %v1462_v50, %v1463_v4  ;;  %v2189_v20 = vrot.slane %v2188_v1, 2 }
 0x1cb   : > { %10188 = vst [vmem:[#allocation56_spill] sm:$0xff] %v7551_v8  ;;  %v5843_v53 = vpop.eup %5842  ;;  %3661 = vmatprep.mubr.f32.mxu0 %v7551_v8  ;;  %v7559_v34 = vmul.f32 %v6943_v9, %v3278_v24  ;;  %v1453_v55 = vrot.slane %v1452_v39, 1  ;;  %v2199_v51 = vrot.slane %v6950_v22, 4  ;;  %v7563_v3 = vadd.f32 %v641_v11, %v6734_v46 }
 0x1cc   : > { %v5845_v25 = vpop.eup %5844  ;;  %v3019_v59 = vmul.f32 %v5843_v53, %v7511_v31  ;;  %5854 = vrcp.f32 %v7553_v6  ;;  %v1465_v45 = vrot.slane %v1464_v26, 1  ;;  %v2190_v4 = vadd.f32 %v2189_v20, %v2188_v1 }
 0x1cd   : > { %10189 = vst [vmem:[#allocation57_spill] sm:$0xff] %v7559_v34  ;;  %v7567_v37 = vpop.eup %5846  ;;  %3886 = vmatprep.mubr.f32.mxu1 %v7559_v34  ;;  %v3021_v9 = vmul.f32 %v5845_v25, %v7513_v18  ;;  %5856 = vrcp.f32 %v7555_v63  ;;  %v1454_v41 = vmax.f32 %v1452_v39, %v1453_v55  ;;  %v2200_v11 = vadd.f32 %v6950_v22, %v2199_v51 }
 0x1ce   : > { %v3147_v33 = vsub.f32 2.0, %v3019_v59  ;;  %v1466_v2 = vmax.f32 %v1464_v26, %v1465_v45  ;;  %v2191_v50 = vrot.slane %v2190_v4, 1  ;;  %v1467_v31 = vrot.slane %v7563_v3, 4  ;;  %v643_v45 = vpop.f32.mrf.mxu0 }
 0x1cf   : > { %v3149_v16 = vsub.f32 2.0, %v3021_v9  ;;  %v1812_v21 = vsub.f32 %v7531_v14, %v1454_v41  ;;  %v2201_v44 = vrot.slane %v2200_v11, 2  ;;  %v7576_v43 = vadd.f32 %v898_v23, %v6736_v47 }
 0x1d0   : > { %v7578_v57 = vpop.eup %5848  ;;  %v3275_v18 = vmul.f32 %v5843_v53, %v3147_v33  ;;  %v1814_v17 = vsub.f32 %v7534_v56, %v1466_v2  ;;  %v7581_v1 = vadd.f32 %v2191_v50, %v2190_v4  ;;  %v1468_v24 = vmax.f32 %v7563_v3, %v1467_v31  ;;  %v900_v53 = vpop.f32.mrf.mxu1 }
 0x1d1   : > { %v3277_v39 = vmul.f32 %v5845_v25, %v3149_v16  ;;  %v2021_v26 = vmul.f32 1.442695, %v1812_v21  ;;  %v2202_v20 = vadd.f32 %v2201_v44, %v2200_v11  ;;  %v1479_v55 = vrot.slane %v7576_v43, 4 }
 0x1d2   : > { %v7586_v14 = vmul.f32 %v6930_v30, %v3275_v18  ;;  %v2025_v51 = vmul.f32 1.442695, %v1814_v17  ;;  %5858 = vrcp.f32 %v7581_v1  ;;  %v1469_v59 = vrot.slane %v1468_v24, 2 }
 0x1d3   : > { %v7589_v23 = vpop.eup %5850  ;;  %v7592_v56 = vmul.f32 %v6936_v40, %v3277_v39  ;;  %5860 = vpow2.f32 %v2021_v26  ;;  %v2203_v25 = vrot.slane %v2202_v20, 1  ;;  %v1480_v4 = vmax.f32 %v7576_v43, %v1479_v55 }
 0x1d4   : > { %10190 = vst [vmem:[#allocation58_spill] sm:$0xff] %v7586_v14  ;;  %10191 = vst [vmem:[#allocation59_spill] sm:$0xff] %v7589_v23  ;;  %3662 = vmatmul.mubr.f32.gmra.mxu0 %v7586_v14  ;;  %5862 = vpow2.f32 %v2025_v51  ;;  %v1470_v30 = vmax.f32 %v1468_v24, %v1469_v59  ;;  %v2217_v9 = vrot.slane %v7005_v62, 4  ;;  %v2229_v41 = vrot.slane %v7008_v7, 4 }
 0x1d5   : > { %10192 = vst [vmem:[#allocation60_spill] sm:$0xff] %v7592_v56  ;;  %3887 = vmatmul.mubr.f32.gmra.mxu1 %v7592_v56  ;;  %v7599_v11 = vadd.f32 %v2203_v25, %v2202_v20  ;;  %v1481_v33 = vrot.slane %v1480_v4, 2  ;;  %v7602_v40 = vadd.f32 %v643_v45, %v6738_v48  ;;  %v7605_v2 = vadd.f32 %v900_v53, %v6740_v49 }
 0x1d6   : > { %v7607_v50 = vpop.eup %5852  ;;  %v1471_v31 = vrot.slane %v1470_v30, 1  ;;  %v2218_v16 = vadd.f32 %v7005_v62, %v2217_v9  ;;  %v2230_v21 = vadd.f32 %v7008_v7, %v2229_v41  ;;  %v2211_v44 = vrot.slane %v6994_v15, 4 }
 0x1d7   : > { %10193 = vst [vmem:[#allocation61_spill] sm:$0xff] %v7607_v50  ;;  %5864 = vrcp.f32 %v7599_v11  ;;  %v1482_v18 = vmax.f32 %v1480_v4, %v1481_v33  ;;  %v1473_v17 = vrot.slane %v7602_v40, 4  ;;  %v1485_v24 = vrot.slane %v7605_v2, 4 }
 0x1d8   : > { %v1472_v39 = vmax.f32 %v1470_v30, %v1471_v31  ;;  %v2219_v26 = vrot.slane %v2218_v16, 2  ;;  %v2231_v20 = vrot.slane %v2230_v21, 2  ;;  %v2212_v55 = vadd.f32 %v6994_v15, %v2211_v44 }
 0x1d9   : > { %v5855_v51 = vpop.eup %5854  ;;  %v1483_v59 = vrot.slane %v1482_v18, 1  ;;  %v1474_v45 = vmax.f32 %v7602_v40, %v1473_v17  ;;  %v1486_v53 = vmax.f32 %v7605_v2, %v1485_v24  ;;  %v2223_v25 = vrot.slane %v7001_v54, 4 }
 0x1da   : > { %v5857_v9 = vpop.eup %5856  ;;  %v3024_v4 = vmul.f32 %v5855_v51, %v7553_v6  ;;  %v1815_v41 = vsub.f32 %v7563_v3, %v1472_v39  ;;  %v2220_v33 = vadd.f32 %v2219_v26, %v2218_v16  ;;  %v2232_v56 = vadd.f32 %v2231_v20, %v2230_v21 }
 0x1db   : > { %v3026_v30 = vmul.f32 %v5857_v9, %v7555_v63  ;;  %v1484_v31 = vmax.f32 %v1482_v18, %v1483_v59  ;;  %v1475_v14 = vrot.slane %v1474_v45, 2  ;;  %v1487_v44 = vrot.slane %v1486_v53, 2 }
 0x1dc   : > { %v3152_v34 = vsub.f32 2.0, %v3024_v4  ;;  %v2027_v8 = vmul.f32 1.442695, %v1815_v41  ;;  %v2221_v38 = vrot.slane %v2220_v33, 1  ;;  %v2233_v17 = vrot.slane %v2232_v56, 1 }
 0x1dd   : > { %v3154_v10 = vsub.f32 2.0, %v3026_v30  ;;  %v1817_v24 = vsub.f32 %v7576_v43, %v1484_v31  ;;  %v1476_v52 = vmax.f32 %v1474_v45, %v1475_v14  ;;  %v1488_v50 = vmax.f32 %v1486_v53, %v1487_v44 }
 0x1de   : > { %v3280_v23 = vmul.f32 %v5855_v51, %v3152_v34  ;;  %5866 = vpow2.f32 %v2027_v8  ;;  %v7623_v6 = vadd.f32 %v2221_v38, %v2220_v33  ;;  %v7625_v3 = vadd.f32 %v2233_v17, %v2232_v56  ;;  %v647_v8 = vpop.f32.mrf.mxu0  ;;  %v904_v38 = vpop.f32.mrf.mxu1 }
 0x1df   : > { %v5859_v16 = vpop.eup %5858  ;;  %v3282_v63 = vmul.f32 %v5857_v9, %v3154_v10  ;;  %v2031_v21 = vmul.f32 1.442695, %v1817_v24  ;;  %v1477_v18 = vrot.slane %v1476_v52, 1  ;;  %v1489_v39 = vrot.slane %v1488_v50, 1 }
 0x1e0   : > { %v7627_v26 = vpop.eup %5860  ;;  %v7630_v20 = vmul.f32 %v6952_v58, %v3280_v23  ;;  %v3023_v43 = vmul.f32 %v5859_v16, %v7581_v1  ;;  %5868 = vrcp.f32 %v7623_v6  ;;  %v2213_v34 = vrot.slane %v2212_v55, 2 }
 0x1e1   : > { %v7634_v14 = vpop.eup %5862  ;;  %v7637_v56 = vmul.f32 %v6957_v35, %v3282_v63  ;;  %5870 = vpow2.f32 %v2031_v21  ;;  %v1478_v10 = vmax.f32 %v1476_v52, %v1477_v18  ;;  %v1490_v51 = vmax.f32 %v1488_v50, %v1489_v39  ;;  %v649_v63 = vpop.f32.mrf.mxu0 }
 0x1e2   : > { %10194 = vst [vmem:[#allocation62_spill] sm:$0xff] %v7630_v20  ;;  %3666 = vmatprep.mubr.f32.mxu0 %v7630_v20  ;;  %v3151_v59 = vsub.f32 2.0, %v3023_v43  ;;  %5872 = vrcp.f32 %v7625_v3  ;;  %v2214_v58 = vadd.f32 %v2213_v34, %v2212_v55  ;;  %v2224_v1 = vadd.f32 %v7001_v54, %v2223_v25  ;;  %v906_v18 = vpop.f32.mrf.mxu1 }
 0x1e3   : > { %10195 = vst [vmem:[#allocation63_spill] sm:$0xff] %v7637_v56  ;;  %3891 = vmatprep.mubr.f32.mxu1 %v7637_v56  ;;  %v1816_v23 = vsub.f32 %v7602_v40, %v1478_v10  ;;  %v1818_v45 = vsub.f32 %v7605_v2, %v1490_v51  ;;  %v7646_v35 = vadd.f32 %v647_v8, %v6734_v46  ;;  %v2241_v55 = vrot.slane %v7016_v42, 4 }
 0x1e4   : > { %v7649_v52 = vadd.f32 %v904_v38, %v6736_v47  ;;  %v5865_v50 = vpop.eup %5864  ;;  %v3279_v53 = vmul.f32 %v5859_v16, %v3151_v59  ;;  %v2215_v9 = vrot.slane %v2214_v58, 1  ;;  %v2225_v4 = vrot.slane %v2224_v1, 2 }
 0x1e5   : > { %v3025_v25 = vmul.f32 %v5865_v50, %v7599_v11  ;;  %v2029_v41 = vmul.f32 1.442695, %v1816_v23  ;;  %v2033_v33 = vmul.f32 1.442695, %v1818_v45  ;;  %v1491_v40 = vrot.slane %v7646_v35, 4 }
 0x1e6   : > { %v7655_v2 = vmul.f32 %v6947_v13, %v3279_v53  ;;  %v7657_v30 = vadd.f32 %v2215_v9, %v2214_v58  ;;  %v2226_v31 = vadd.f32 %v2225_v4, %v2224_v1  ;;  %v1503_v44 = vrot.slane %v7649_v52, 4 }
 0x1e7   : > { %v3153_v17 = vsub.f32 2.0, %v3025_v25  ;;  %5874 = vpow2.f32 %v2029_v41  ;;  %v1492_v24 = vmax.f32 %v7646_v35, %v1491_v40  ;;  %v2242_v16 = vadd.f32 %v7016_v42, %v2241_v55 }
 0x1e8   : > { %10196 = vst [vmem:[#allocation64_spill] sm:$0xff] %v7655_v2  ;;  %3667 = vmatmul.mubr.f32.gmra.mxu0 %v7655_v2  ;;  %5876 = vpow2.f32 %v2033_v33  ;;  %v2227_v11 = vrot.slane %v2226_v31, 1  ;;  %v1504_v21 = vmax.f32 %v7649_v52, %v1503_v44  ;;  %v2253_v13 = vrot.slane %v7021_v61, 4 }
 0x1e9   : > { %v3281_v39 = vmul.f32 %v5865_v50, %v3153_v17  ;;  %5878 = vrcp.f32 %v7657_v30  ;;  %v1493_v43 = vrot.slane %v1492_v24, 2  ;;  %v2243_v34 = vrot.slane %v2242_v16, 2 }
 0x1ea   : > { %v7666_v8 = vadd.f32 %v2227_v11, %v2226_v31  ;;  %v1505_v38 = vrot.slane %v1504_v21, 2  ;;  %v2254_v10 = vadd.f32 %v7021_v61, %v2253_v13  ;;  %v7670_v51 = vadd.f32 %v649_v63, %v6738_v48 }
 0x1eb   : > { %v7672_v59 = vpop.eup %5866  ;;  %v7675_v58 = vmul.f32 %v6950_v22, %v3281_v39  ;;  %v1494_v1 = vmax.f32 %v1492_v24, %v1493_v43  ;;  %v2244_v23 = vadd.f32 %v2243_v34, %v2242_v16  ;;  %v7678_v45 = vadd.f32 %v906_v18, %v6740_v49 }
 0x1ec   : > { %5880 = vrcp.f32 %v7666_v8  ;;  %v1506_v50 = vmax.f32 %v1504_v21, %v1505_v38  ;;  %v2255_v53 = vrot.slane %v2254_v10, 2  ;;  %v1497_v9 = vrot.slane %v7670_v51, 4 }
 0x1ed   : > { %10197 = vst [vmem:[#allocation65_spill] sm:$0xff] %v7675_v58  ;;  %v5869_v4 = vpop.eup %5868  ;;  %3892 = vmatmul.mubr.f32.gmra.mxu1 %v7675_v58  ;;  %v1495_v55 = vrot.slane %v1494_v1, 1  ;;  %v2245_v25 = vrot.slane %v2244_v23, 1  ;;  %v1509_v41 = vrot.slane %v7678_v45, 4  ;;  %v2235_v22 = vrot.slane %v7010_v5, 4 }
 0x1ee   : > { %v7685_v33 = vpop.eup %5870  ;;  %v3028_v40 = vmul.f32 %v5869_v4, %v7623_v6  ;;  %v1507_v31 = vrot.slane %v1506_v50, 1  ;;  %v2256_v44 = vadd.f32 %v2255_v53, %v2254_v10  ;;  %v1498_v17 = vmax.f32 %v7670_v51, %v1497_v9 }
 0x1ef   : > { %v5873_v24 = vpop.eup %5872  ;;  %v1496_v16 = vmax.f32 %v1494_v1, %v1495_v55  ;;  %v7689_v63 = vadd.f32 %v2245_v25, %v2244_v23  ;;  %v1510_v11 = vmax.f32 %v7678_v45, %v1509_v41  ;;  %v2236_v21 = vadd.f32 %v7010_v5, %v2235_v22  ;;  %v653_v22 = vpop.f32.mrf.mxu0 }
 0x1f0   : > { %v3156_v13 = vsub.f32 2.0, %v3028_v40  ;;  %v3030_v18 = vmul.f32 %v5873_v24, %v7625_v3  ;;  %v1508_v39 = vmax.f32 %v1506_v50, %v1507_v31  ;;  %v2257_v43 = vrot.slane %v2256_v44, 1 }
 0x1f1   : > { %v1819_v34 = vsub.f32 %v7646_v35, %v1496_v16  ;;  %5882 = vrcp.f32 %v7689_v63  ;;  %v1499_v6 = vrot.slane %v1498_v17, 2  ;;  %v1511_v38 = vrot.slane %v1510_v11, 2  ;;  %v910_v16 = vpop.f32.mrf.mxu1 }
 0x1f2   : > { %v3284_v10 = vmul.f32 %v5869_v4, %v3156_v13  ;;  %v3158_v53 = vsub.f32 2.0, %v3030_v18  ;;  %v1821_v1 = vsub.f32 %v7649_v52, %v1508_v39  ;;  %v7697_v23 = vadd.f32 %v2257_v43, %v2256_v44 }
 0x1f3   : > { %v2035_v9 = vmul.f32 1.442695, %v1819_v34  ;;  %v1500_v55 = vmax.f32 %v1498_v17, %v1499_v6  ;;  %v1512_v25 = vmax.f32 %v1510_v11, %v1511_v38  ;;  %v2237_v41 = vrot.slane %v2236_v21, 2  ;;  %v10200_v6 = vld [vmem:[#allocation4_spill] sm:$0xff] }
 0x1f4   : > { %v7699_v3 = vpop.eup %5874  ;;  %v7702_v50 = vmul.f32 %v7005_v62, %v3284_v10  ;;  %v3286_v35 = vmul.f32 %v5873_v24, %v3158_v53  ;;  %v2039_v40 = vmul.f32 1.442695, %v1821_v1  ;;  %5884 = vrcp.f32 %v7697_v23 }
 0x1f5   : > { %v7705_v4 = vpop.eup %5876  ;;  %5886 = vpow2.f32 %v2035_v9  ;;  %v1501_v52 = vrot.slane %v1500_v55, 1  ;;  %v1513_v31 = vrot.slane %v1512_v25, 1  ;;  %v2238_v44 = vadd.f32 %v2237_v41, %v2236_v21 }
 0x1f6   : > { %10198 = vst [vmem:[#allocation66_spill] sm:$0xff] %v7702_v50  ;;  %v5879_v17 = vpop.eup %5878  ;;  %3671 = vmatprep.mubr.f32.mxu0 %v7702_v50  ;;  %v7709_v11 = vmul.f32 %v7008_v7, %v3286_v35  ;;  %5888 = vpow2.f32 %v2039_v40  ;;  %v2247_v62 = vrot.slane %v7013_v32, 4  ;;  %v7713_v24 = vadd.f32 %v653_v22, %v6734_v46 }
 0x1f7   : > { %v3027_v13 = vmul.f32 %v5879_v17, %v7657_v30  ;;  %v1502_v18 = vmax.f32 %v1500_v55, %v1501_v52  ;;  %v1514_v39 = vmax.f32 %v1512_v25, %v1513_v31  ;;  %v2239_v43 = vrot.slane %v2238_v44, 1 }
 0x1f8   : > { %10199 = vst [vmem:[#allocation67_spill] sm:$0xff] %v7709_v11  ;;  %3896 = vmatprep.mubr.f32.mxu1 %v7709_v11  ;;  %v2248_v21 = vadd.f32 %v7013_v32, %v2247_v62  ;;  %v1515_v34 = vrot.slane %v7713_v24, 4  ;;  %v7720_v7 = vadd.f32 %v910_v16, %v6736_v47  ;;  %v2265_v38 = vrot.slane %v10200_v6, 4 }
 0x1f9   : > { %v5881_v10 = vpop.eup %5880  ;;  %v3155_v53 = vsub.f32 2.0, %v3027_v13  ;;  %v1820_v1 = vsub.f32 %v7670_v51, %v1502_v18  ;;  %v1822_v30 = vsub.f32 %v7678_v45, %v1514_v39  ;;  %v7725_v9 = vadd.f32 %v2239_v43, %v2238_v44  ;;  %v10202_v44 = vld [vmem:[#allocation5_spill] sm:$0xff]  ;;  %v655_v18 = vpop.f32.mrf.mxu0 }
 0x1fa   : > { %v3029_v55 = vmul.f32 %v5881_v10, %v7666_v8  ;;  %v2249_v25 = vrot.slane %v2248_v21, 2  ;;  %v1516_v41 = vmax.f32 %v7713_v24, %v1515_v34  ;;  %v1527_v22 = vrot.slane %v7720_v7, 4 }
 0x1fb   : > { %v3283_v35 = vmul.f32 %v5879_v17, %v3155_v53  ;;  %v2037_v40 = vmul.f32 1.442695, %v1820_v1  ;;  %v2041_v52 = vmul.f32 1.442695, %v1822_v30  ;;  %5890 = vrcp.f32 %v7725_v9 }
 0x1fc   : > { %v3157_v31 = vsub.f32 2.0, %v3029_v55  ;;  %v2250_v16 = vadd.f32 %v2249_v25, %v2248_v21  ;;  %v1517_v62 = vrot.slane %v1516_v41, 2  ;;  %v1528_v51 = vmax.f32 %v7720_v7, %v1527_v22 }
 0x1fd   : > { %v7733_v45 = vmul.f32 %v6994_v15, %v3283_v35  ;;  %5892 = vpow2.f32 %v2037_v40  ;;  %v2266_v8 = vadd.f32 %v10200_v6, %v2265_v38  ;;  %v2277_v13 = vrot.slane %v10202_v44, 4 }
 0x1fe   : > { %v5883_v39 = vpop.eup %5882  ;;  %v3285_v17 = vmul.f32 %v5881_v10, %v3157_v31  ;;  %5894 = vpow2.f32 %v2041_v52  ;;  %v2251_v43 = vrot.slane %v2250_v16, 1  ;;  %v1518_v34 = vmax.f32 %v1516_v41, %v1517_v62  ;;  %v912_v52 = vpop.f32.mrf.mxu1 }
 0x1ff   : > { %10201 = vst [vmem:[#allocation4_spill] sm:$0xff] %v7733_v45  ;;  %3672 = vmatmul.mubr.f32.gmra.mxu0 %v7733_v45  ;;  %v3032_v21 = vmul.f32 %v5883_v39, %v7689_v63  ;;  %v1529_v53 = vrot.slane %v1528_v51, 2  ;;  %v2267_v1 = vrot.slane %v2266_v8, 2  ;;  %v2278_v15 = vadd.f32 %v10202_v44, %v2277_v13 }
 0x200   : > { %v7741_v30 = vmul.f32 %v7001_v54, %v3285_v17  ;;  %v7743_v38 = vadd.f32 %v2251_v43, %v2250_v16  ;;  %v1519_v55 = vrot.slane %v1518_v34, 1  ;;  %v7746_v25 = vadd.f32 %v655_v18, %v6738_v48 }
 0x201   : > { %v5885_v10 = vpop.eup %5884  ;;  %v3160_v22 = vsub.f32 2.0, %v3032_v21  ;;  %v1530_v41 = vmax.f32 %v1528_v51, %v1529_v53  ;;  %v2268_v35 = vadd.f32 %v2267_v1, %v2266_v8  ;;  %v2279_v40 = vrot.slane %v2278_v15, 2 }
 0x202   : > { %10203 = vst [vmem:[#allocation5_spill] sm:$0xff] %v7741_v30  ;;  %v7748_v63 = vpop.eup %5886  ;;  %3897 = vmatmul.mubr.f32.gmra.mxu1 %v7741_v30  ;;  %v3034_v31 = vmul.f32 %v5885_v10, %v7697_v23  ;;  %5896 = vrcp.f32 %v7743_v38  ;;  %v1520_v54 = vmax.f32 %v1518_v34, %v1519_v55  ;;  %v1521_v16 = vrot.slane %v7746_v25, 4 }
 0x203   : > { %10204 = vst [vmem:[#allocation68_spill] sm:$0xff] %v7748_v63  ;;  %v7754_v62 = vpop.eup %5888  ;;  %v3288_v13 = vmul.f32 %v5883_v39, %v3160_v22  ;;  %v1531_v18 = vrot.slane %v1530_v41, 1  ;;  %v2269_v17 = vrot.slane %v2268_v35, 1  ;;  %v2280_v51 = vadd.f32 %v2279_v40, %v2278_v15 }
 0x204   : > { %10205 = vst [vmem:[#allocation69_spill] sm:$0xff] %v7754_v62  ;;  %v3162_v8 = vsub.f32 2.0, %v3034_v31  ;;  %v1823_v43 = vsub.f32 %v7713_v24, %v1520_v54  ;;  %v1522_v21 = vmax.f32 %v7746_v25, %v1521_v16  ;;  %v7759_v53 = vadd.f32 %v912_v52, %v6740_v49  ;;  %v10207_v52 = vld [vmem:[#allocation2_spill] sm:$0xff]  ;;  %v659_v31 = vpop.f32.mrf.mxu0  ;;  %v916_v16 = vpop.f32.mrf.mxu1 }
 0x205   : > { %v7762_v23 = vmul.f32 %v7016_v42, %v3288_v13  ;;  %v1532_v34 = vmax.f32 %v1530_v41, %v1531_v18  ;;  %v7764_v1 = vadd.f32 %v2269_v17, %v2268_v35  ;;  %v2281_v55 = vrot.slane %v2280_v51, 1 }
 0x206   : > { %v3290_v30 = vmul.f32 %v5885_v10, %v3162_v8  ;;  %v2043_v39 = vmul.f32 1.442695, %v1823_v43  ;;  %v1523_v22 = vrot.slane %v1522_v21, 2  ;;  %v1533_v15 = vrot.slane %v7759_v53, 4 }
 0x207   : > { %10206 = vst [vmem:[#allocation70_spill] sm:$0xff] %v7762_v23  ;;  %3676 = vmatprep.mubr.f32.mxu0 %v7762_v23  ;;  %v1825_v24 = vsub.f32 %v7720_v7, %v1532_v34  ;;  %5898 = vrcp.f32 %v7764_v1  ;;  %v7770_v40 = vadd.f32 %v2281_v55, %v2280_v51  ;;  %v2259_v42 = vrot.slane %v10207_v52, 4 }
 0x208   : > { %v5891_v41 = vpop.eup %5890  ;;  %v7774_v35 = vmul.f32 %v7021_v61, %v3290_v30  ;;  %5900 = vpow2.f32 %v2043_v39  ;;  %v1524_v10 = vmax.f32 %v1522_v21, %v1523_v22  ;;  %v1534_v54 = vmax.f32 %v7759_v53, %v1533_v15  ;;  %v10210_v61 = vld [vmem:[#allocation3_spill] sm:$0xff] }
 0x209   : > { %v3031_v13 = vmul.f32 %v5891_v41, %v7725_v9  ;;  %v2047_v18 = vmul.f32 1.442695, %v1825_v24  ;;  %5902 = vrcp.f32 %v7770_v40  ;;  %v2260_v7 = vadd.f32 %v10207_v52, %v2259_v42 }
 0x20a   : > { %10208 = vst [vmem:[#allocation2_spill] sm:$0xff] %v7774_v35  ;;  %v7780_v17 = vpop.eup %5892  ;;  %3901 = vmatprep.mubr.f32.mxu1 %v7774_v35  ;;  %v1525_v51 = vrot.slane %v1524_v10, 1  ;;  %v1535_v8 = vrot.slane %v1534_v54, 2  ;;  %v2271_v30 = vrot.slane %v10210_v61, 4  ;;  %v7785_v43 = vadd.f32 %v659_v31, %v6734_v46  ;;  %v10212_v31 = vld [vmem:[#allocation8_spill] sm:$0xff] }
 0x20b   : > { %10209 = vst [vmem:[#allocation71_spill] sm:$0xff] %v7780_v17  ;;  %v7787_v21 = vpop.eup %5894  ;;  %v3159_v34 = vsub.f32 2.0, %v3031_v13  ;;  %5904 = vpow2.f32 %v2047_v18  ;;  %v2261_v9 = vrot.slane %v2260_v7, 2  ;;  %v7790_v55 = vadd.f32 %v916_v16, %v6736_v47 }
 0x20c   : > { %10211 = vst [vmem:[#allocation3_spill] sm:$0xff] %v7787_v21  ;;  %v1526_v39 = vmax.f32 %v1524_v10, %v1525_v51  ;;  %v1536_v22 = vmax.f32 %v1534_v54, %v1535_v8  ;;  %v2272_v15 = vadd.f32 %v10210_v61, %v2271_v30  ;;  %v1539_v24 = vrot.slane %v7785_v43, 4 }
 0x20d   : > { %v3287_v42 = vmul.f32 %v5891_v41, %v3159_v34  ;;  %v2262_v45 = vadd.f32 %v2261_v9, %v2260_v7  ;;  %v1551_v35 = vrot.slane %v7790_v55, 4  ;;  %v2289_v23 = vrot.slane %v10212_v31, 4 }
 0x20e   : > { %v1824_v58 = vsub.f32 %v7746_v25, %v1526_v39  ;;  %v1537_v13 = vrot.slane %v1536_v22, 1  ;;  %v2273_v18 = vrot.slane %v2272_v15, 2  ;;  %v1540_v2 = vmax.f32 %v7785_v43, %v1539_v24 }
 0x20f   : > { %v5897_v16 = vpop.eup %5896  ;;  %v7799_v10 = vmul.f32 %v7010_v5, %v3287_v42  ;;  %v2263_v54 = vrot.slane %v2262_v45, 1  ;;  %v1552_v51 = vmax.f32 %v7790_v55, %v1551_v35  ;;  %v2290_v41 = vadd.f32 %v10212_v31, %v2289_v23 }
 0x210   : > { %v3033_v7 = vmul.f32 %v5897_v16, %v7743_v38  ;;  %v2045_v8 = vmul.f32 1.442695, %v1824_v58  ;;  %v1538_v30 = vmax.f32 %v1536_v22, %v1537_v13  ;;  %v2274_v34 = vadd.f32 %v2273_v18, %v2272_v15  ;;  %v661_v58 = vpop.f32.mrf.mxu0 }
 0x211   : > { %10213 = vst [vmem:[#allocation8_spill] sm:$0xff] %v7799_v10  ;;  %3677 = vmatmul.mubr.f32.gmra.mxu0 %v7799_v10  ;;  %v7805_v25 = vadd.f32 %v2263_v54, %v2262_v45  ;;  %v1541_v9 = vrot.slane %v1540_v2, 2  ;;  %v1553_v39 = vrot.slane %v1552_v51, 2  ;;  %v2291_v24 = vrot.slane %v2290_v41, 2  ;;  %v10214_v45 = vld [vmem:[#allocation9_spill] sm:$0xff] }
 0x212   : > { %v3161_v11 = vsub.f32 2.0, %v3033_v7  ;;  %5906 = vpow2.f32 %v2045_v8  ;;  %v1826_v5 = vsub.f32 %v7759_v53, %v1538_v30  ;;  %v2275_v42 = vrot.slane %v2274_v34, 1 }
 0x213   : > { %5908 = vrcp.f32 %v7805_v25  ;;  %v1542_v23 = vmax.f32 %v1540_v2, %v1541_v9  ;;  %v1554_v35 = vmax.f32 %v1552_v51, %v1553_v39  ;;  %v2292_v38 = vadd.f32 %v2291_v24, %v2290_v41 }
 0x214   : > { %v5899_v22 = vpop.eup %5898  ;;  %v3289_v15 = vmul.f32 %v5897_v16, %v3161_v11  ;;  %v2049_v13 = vmul.f32 1.442695, %v1826_v5  ;;  %v7809_v18 = vadd.f32 %v2275_v42, %v2274_v34  ;;  %v2301_v54 = vrot.slane %v10214_v45, 4  ;;  %v918_v16 = vpop.f32.mrf.mxu1 }
 0x215   : > { %v7812_v10 = vpop.eup %5900  ;;  %v3036_v7 = vmul.f32 %v5899_v22, %v7764_v1  ;;  %v1543_v8 = vrot.slane %v1542_v23, 1  ;;  %v1555_v53 = vrot.slane %v1554_v35, 1  ;;  %v2293_v30 = vrot.slane %v2292_v38, 1 }
 0x216   : > { %10215 = vst [vmem:[#allocation9_spill] sm:$0xff] %v7812_v10  ;;  %v5903_v50 = vpop.eup %5902  ;;  %v7816_v2 = vmul.f32 %v7013_v32, %v3289_v15  ;;  %5910 = vpow2.f32 %v2049_v13  ;;  %v2302_v51 = vadd.f32 %v10214_v45, %v2301_v54  ;;  %v7820_v11 = vadd.f32 %v661_v58, %v6738_v48 }
 0x217   : > { %v3164_v41 = vsub.f32 2.0, %v3036_v7  ;;  %v3038_v34 = vmul.f32 %v5903_v50, %v7770_v40  ;;  %5912 = vrcp.f32 %v7809_v18  ;;  %v1544_v1 = vmax.f32 %v1542_v23, %v1543_v8 }
 0x218   : > { %10216 = vst [vmem:[#allocation72_spill] sm:$0xff] %v7816_v2  ;;  %v7824_v9 = vpop.eup %5904  ;;  %3902 = vmatmul.mubr.f32.gmra.mxu1 %v7816_v2  ;;  %v1556_v39 = vmax.f32 %v1554_v35, %v1555_v53  ;;  %v7827_v32 = vadd.f32 %v2293_v30, %v2292_v38  ;;  %v2303_v24 = vrot.slane %v2302_v51, 2  ;;  %v1545_v5 = vrot.slane %v7820_v11, 4  ;;  %v10219_v30 = vld [vmem:[#allocation6_spill] sm:$0xff] }
 0x219   : > { %10217 = vst [vmem:[#allocation73_spill] sm:$0xff] %v7824_v9  ;;  %v3292_v42 = vmul.f32 %v5899_v22, %v3164_v41  ;;  %v3166_v58 = vsub.f32 2.0, %v3038_v34  ;;  %v1827_v15 = vsub.f32 %v7785_v43, %v1544_v1  ;;  %v7832_v13 = vadd.f32 %v918_v16, %v6740_v49  ;;  %v665_v41 = vpop.f32.mrf.mxu0  ;;  %v922_v34 = vpop.f32.mrf.mxu1 }
 0x21a   : > { %v1829_v40 = vsub.f32 %v7790_v55, %v1556_v39  ;;  %5914 = vrcp.f32 %v7827_v32  ;;  %v2304_v23 = vadd.f32 %v2303_v24, %v2302_v51  ;;  %v1546_v54 = vmax.f32 %v7820_v11, %v1545_v5  ;;  %v10221_v51 = vld [vmem:[#allocation7_spill] sm:$0xff] }
 0x21b   : > { %v7838_v35 = vmul.f32 %v10200_v6, %v3292_v42  ;;  %v3294_v38 = vmul.f32 %v5903_v50, %v3166_v58  ;;  %v2051_v7 = vmul.f32 1.442695, %v1827_v15  ;;  %v1557_v22 = vrot.slane %v7832_v13, 4 }
 0x21c   : > { %v2055_v8 = vmul.f32 1.442695, %v1829_v40  ;;  %v2305_v53 = vrot.slane %v2304_v23, 1  ;;  %v1547_v43 = vrot.slane %v1546_v54, 2  ;;  %v2283_v16 = vrot.slane %v10219_v30, 4 }
 0x21d   : > { %10218 = vst [vmem:[#allocation74_spill] sm:$0xff] %v7838_v35  ;;  %3681 = vmatprep.mubr.f32.mxu0 %v7838_v35  ;;  %v7844_v55 = vmul.f32 %v10202_v44, %v3294_v38  ;;  %5916 = vpow2.f32 %v2051_v7  ;;  %v1558_v6 = vmax.f32 %v7832_v13, %v1557_v22  ;;  %v2295_v50 = vrot.slane %v10221_v51, 4  ;;  %v10223_v38 = vld [vmem:[#allocation12_spill] sm:$0xff] }
 0x21e   : > { %5918 = vpow2.f32 %v2055_v8  ;;  %v7848_v1 = vadd.f32 %v2305_v53, %v2304_v23  ;;  %v1548_v39 = vmax.f32 %v1546_v54, %v1547_v43  ;;  %v2284_v24 = vadd.f32 %v10219_v30, %v2283_v16 }
 0x21f   : > { %10220 = vst [vmem:[#allocation6_spill] sm:$0xff] %v7844_v55  ;;  %v7851_v5 = vpop.eup %5906  ;;  %3906 = vmatprep.mubr.f32.mxu1 %v7844_v55  ;;  %v1559_v42 = vrot.slane %v1558_v6, 2  ;;  %v2296_v58 = vadd.f32 %v10221_v51, %v2295_v50  ;;  %v7856_v44 = vadd.f32 %v665_v41, %v6734_v46  ;;  %v7859_v15 = vadd.f32 %v922_v34, %v6736_v47 }
 0x220   : > { %10222 = vst [vmem:[#allocation7_spill] sm:$0xff] %v7851_v5  ;;  %v5909_v40 = vpop.eup %5908  ;;  %5920 = vrcp.f32 %v7848_v1  ;;  %v1549_v23 = vrot.slane %v1548_v39, 1  ;;  %v2285_v54 = vrot.slane %v2284_v24, 2  ;;  %v2313_v7 = vrot.slane %v10223_v38, 4 }
 0x221   : > { %v3035_v22 = vmul.f32 %v5909_v40, %v7805_v25  ;;  %v1560_v8 = vmax.f32 %v1558_v6, %v1559_v42  ;;  %v2297_v53 = vrot.slane %v2296_v58, 2  ;;  %v1563_v43 = vrot.slane %v7856_v44, 4 }
 0x222   : > { %v1550_v16 = vmax.f32 %v1548_v39, %v1549_v23  ;;  %v2286_v50 = vadd.f32 %v2285_v54, %v2284_v24  ;;  %v1575_v41 = vrot.slane %v7859_v15, 4  ;;  %v2314_v34 = vadd.f32 %v10223_v38, %v2313_v7 }
 0x223   : > { %v7867_v2 = vpop.eup %5910  ;;  %v3163_v55 = vsub.f32 2.0, %v3035_v22  ;;  %v1561_v35 = vrot.slane %v1560_v8, 1  ;;  %v2298_v56 = vadd.f32 %v2297_v53, %v2296_v58  ;;  %v1564_v20 = vmax.f32 %v7856_v44, %v1563_v43 }
 0x224   : > { %10224 = vst [vmem:[#allocation12_spill] sm:$0xff] %v7867_v2  ;;  %v5913_v9 = vpop.eup %5912  ;;  %v1828_v25 = vsub.f32 %v7820_v11, %v1550_v16  ;;  %v2287_v6 = vrot.slane %v2286_v50, 1  ;;  %v1576_v42 = vmax.f32 %v7859_v15, %v1575_v41  ;;  %v2315_v10 = vrot.slane %v2314_v34, 2  ;;  %v667_v41 = vpop.f32.mrf.mxu0 }
 0x225   : > { %v3291_v39 = vmul.f32 %v5909_v40, %v3163_v55  ;;  %v3037_v24 = vmul.f32 %v5913_v9, %v7809_v18  ;;  %v1562_v23 = vmax.f32 %v1560_v8, %v1561_v35  ;;  %v2299_v54 = vrot.slane %v2298_v56, 1 }
 0x226   : > { %v2053_v7 = vmul.f32 1.442695, %v1828_v25  ;;  %v7873_v5 = vadd.f32 %v2287_v6, %v2286_v50  ;;  %v1565_v22 = vrot.slane %v1564_v20, 2  ;;  %v1577_v2 = vrot.slane %v1576_v42, 2  ;;  %v924_v6 = vpop.f32.mrf.mxu1 }
 0x227   : > { %v5915_v58 = vpop.eup %5914  ;;  %v7876_v53 = vmul.f32 %v10207_v52, %v3291_v39  ;;  %v3165_v43 = vsub.f32 2.0, %v3037_v24  ;;  %v1830_v11 = vsub.f32 %v7832_v13, %v1562_v23  ;;  %v7879_v16 = vadd.f32 %v2299_v54, %v2298_v56 }
 0x228   : > { %v3040_v55 = vmul.f32 %v5915_v58, %v7827_v32  ;;  %5922 = vpow2.f32 %v2053_v7  ;;  %v1566_v18 = vmax.f32 %v1564_v20, %v1565_v22  ;;  %v1578_v35 = vmax.f32 %v1576_v42, %v1577_v2  ;;  %v10230_v22 = vld [vmem:[#allocation10_spill] sm:$0xff] }
 0x229   : > { %10225 = vst [vmem:[#allocation75_spill] sm:$0xff] %v7876_v53  ;;  %3682 = vmatmul.mubr.f32.gmra.mxu0 %v7876_v53  ;;  %v3293_v40 = vmul.f32 %v5913_v9, %v3165_v43  ;;  %v2057_v8 = vmul.f32 1.442695, %v1830_v11  ;;  %5924 = vrcp.f32 %v7873_v5  ;;  %v2316_v50 = vadd.f32 %v2315_v10, %v2314_v34  ;;  %v10229_v9 = vld [vmem:[#allocation13_spill] sm:$0xff] }
 0x22a   : > { %v7884_v52 = vpop.eup %5916  ;;  %v3168_v25 = vsub.f32 2.0, %v3040_v55  ;;  %5926 = vrcp.f32 %v7879_v16  ;;  %v1567_v56 = vrot.slane %v1566_v18, 1  ;;  %v1579_v13 = vrot.slane %v1578_v35, 1 }
 0x22b   : > { %10226 = vst [vmem:[#allocation76_spill] sm:$0xff] %v7884_v52  ;;  %v7887_v32 = vpop.eup %5918  ;;  %v7890_v20 = vmul.f32 %v10210_v61, %v3293_v40  ;;  %5928 = vpow2.f32 %v2057_v8  ;;  %v2317_v2 = vrot.slane %v2316_v50, 1  ;;  %v2325_v42 = vrot.slane %v10229_v9, 4 }
 0x22c   : > { %10227 = vst [vmem:[#allocation77_spill] sm:$0xff] %v7887_v32  ;;  %v3296_v39 = vmul.f32 %v5915_v58, %v3168_v25  ;;  %v1568_v10 = vmax.f32 %v1566_v18, %v1567_v56  ;;  %v1580_v34 = vmax.f32 %v1578_v35, %v1579_v13  ;;  %v7894_v24 = vadd.f32 %v667_v41, %v6738_v48  ;;  %v10232_v13 = vld [vmem:[#allocation11_spill] sm:$0xff] }
 0x22d   : > { %10228 = vst [vmem:[#allocation78_spill] sm:$0xff] %v7890_v20  ;;  %v5921_v23 = vpop.eup %5920  ;;  %3907 = vmatmul.mubr.f32.gmra.mxu1 %v7890_v20  ;;  %v7897_v54 = vadd.f32 %v2317_v2, %v2316_v50  ;;  %v2326_v7 = vadd.f32 %v10229_v9, %v2325_v42  ;;  %v7901_v61 = vadd.f32 %v924_v6, %v6740_v49  ;;  %v2307_v43 = vrot.slane %v10230_v22, 4  ;;  %v671_v50 = vpop.f32.mrf.mxu0 }
 0x22e   : > { %v7905_v11 = vmul.f32 %v10212_v31, %v3296_v39  ;;  %v3042_v58 = vmul.f32 %v5921_v23, %v7848_v1  ;;  %v1831_v55 = vsub.f32 %v7856_v44, %v1568_v10  ;;  %v1833_v18 = vsub.f32 %v7859_v15, %v1580_v34  ;;  %v928_v10 = vpop.f32.mrf.mxu1 }
 0x22f   : > { %5930 = vrcp.f32 %v7897_v54  ;;  %v2327_v35 = vrot.slane %v2326_v7, 2  ;;  %v1569_v40 = vrot.slane %v7894_v24, 4  ;;  %v1581_v8 = vrot.slane %v7901_v61, 4 }
 0x230   : > { %10231 = vst [vmem:[#allocation13_spill] sm:$0xff] %v7905_v11  ;;  %3686 = vmatprep.mubr.f32.mxu0 %v7905_v11  ;;  %v3170_v41 = vsub.f32 2.0, %v3042_v58  ;;  %v2059_v25 = vmul.f32 1.442695, %v1831_v55  ;;  %v2063_v31 = vmul.f32 1.442695, %v1833_v18  ;;  %v2308_v56 = vadd.f32 %v10230_v22, %v2307_v43 }
 0x231   : > { %v2328_v1 = vadd.f32 %v2327_v35, %v2326_v7  ;;  %v1570_v44 = vmax.f32 %v7894_v24, %v1569_v40  ;;  %v1582_v15 = vmax.f32 %v7901_v61, %v1581_v8  ;;  %v2319_v6 = vrot.slane %v10232_v13, 4 }
 0x232   : > { %v3298_v2 = vmul.f32 %v5921_v23, %v3170_v41  ;;  %5932 = vpow2.f32 %v2059_v25  ;;  %v2309_v42 = vrot.slane %v2308_v56, 2  ;;  %v7919_v39 = vadd.f32 %v671_v50, %v6734_v46 }
 0x233   : > { %5934 = vpow2.f32 %v2063_v31  ;;  %v2329_v34 = vrot.slane %v2328_v1, 1  ;;  %v1571_v58 = vrot.slane %v1570_v44, 2  ;;  %v1583_v55 = vrot.slane %v1582_v15, 2 }
 0x234   : > { %v7922_v43 = vmul.f32 %v10214_v45, %v3298_v2  ;;  %v2310_v7 = vadd.f32 %v2309_v42, %v2308_v56  ;;  %v2320_v18 = vadd.f32 %v10232_v13, %v2319_v6  ;;  %v1587_v35 = vrot.slane %v7919_v39, 4  ;;  %v10235_v2 = vld [vmem:[#allocation16_spill] sm:$0xff] }
 0x235   : > { %v7926_v40 = vpop.eup %5922  ;;  %v7928_v23 = vadd.f32 %v2329_v34, %v2328_v1  ;;  %v1572_v8 = vmax.f32 %v1570_v44, %v1571_v58  ;;  %v1584_v50 = vmax.f32 %v1582_v15, %v1583_v55  ;;  %v7931_v41 = vadd.f32 %v928_v10, %v6736_v47 }
 0x236   : > { %10233 = vst [vmem:[#allocation10_spill] sm:$0xff] %v7922_v43  ;;  %10234 = vst [vmem:[#allocation11_spill] sm:$0xff] %v7926_v40  ;;  %v5925_v25 = vpop.eup %5924  ;;  %3911 = vmatprep.mubr.f32.mxu1 %v7922_v43  ;;  %v2311_v31 = vrot.slane %v2310_v7, 1  ;;  %v2321_v45 = vrot.slane %v2320_v18, 2  ;;  %v1588_v56 = vmax.f32 %v7919_v39, %v1587_v35  ;;  %v2337_v6 = vrot.slane %v10235_v2, 4 }
 0x237   : > { %v5927_v42 = vpop.eup %5926  ;;  %v3039_v20 = vmul.f32 %v5925_v25, %v7873_v5  ;;  %5936 = vrcp.f32 %v7928_v23  ;;  %v1573_v1 = vrot.slane %v1572_v8, 1  ;;  %v1585_v44 = vrot.slane %v1584_v50, 1 }
 0x238   : > { %v7938_v15 = vpop.eup %5928  ;;  %v3041_v10 = vmul.f32 %v5927_v42, %v7879_v16  ;;  %v7941_v34 = vadd.f32 %v2311_v31, %v2310_v7  ;;  %v2322_v58 = vadd.f32 %v2321_v45, %v2320_v18  ;;  %v1589_v55 = vrot.slane %v1588_v56, 2 }
 0x239   : > { %10236 = vst [vmem:[#allocation16_spill] sm:$0xff] %v7938_v15  ;;  %v3167_v53 = vsub.f32 2.0, %v3039_v20  ;;  %v1574_v43 = vmax.f32 %v1572_v8, %v1573_v1  ;;  %v1586_v35 = vmax.f32 %v1584_v50, %v1585_v44  ;;  %v1599_v11 = vrot.slane %v7931_v41, 4 }
 0x23a   : > { %v3169_v32 = vsub.f32 2.0, %v3041_v10  ;;  %5938 = vrcp.f32 %v7941_v34  ;;  %v2323_v5 = vrot.slane %v2322_v58, 1  ;;  %v1590_v52 = vmax.f32 %v1588_v56, %v1589_v55 }
 0x23b   : > { %v3295_v40 = vmul.f32 %v5925_v25, %v3167_v53  ;;  %v1832_v62 = vsub.f32 %v7894_v24, %v1574_v43  ;;  %v1834_v15 = vsub.f32 %v7901_v61, %v1586_v35  ;;  %v1600_v16 = vmax.f32 %v7931_v41, %v1599_v11  ;;  %v673_v25 = vpop.f32.mrf.mxu0  ;;  %v930_v11 = vpop.f32.mrf.mxu1 }
 0x23c   : > { %v5931_v7 = vpop.eup %5930  ;;  %v3297_v18 = vmul.f32 %v5927_v42, %v3169_v32  ;;  %v7948_v31 = vadd.f32 %v2323_v5, %v2322_v58  ;;  %v1591_v20 = vrot.slane %v1590_v52, 1  ;;  %v2338_v8 = vadd.f32 %v10235_v2, %v2337_v6  ;;  %v10242_v5 = vld [vmem:[#allocation14_spill] sm:$0xff] }
 0x23d   : > { %v7952_v50 = vmul.f32 %v10219_v30, %v3295_v40  ;;  %v3044_v45 = vmul.f32 %v5931_v7, %v7897_v54  ;;  %v2061_v56 = vmul.f32 1.442695, %v1832_v62  ;;  %v2065_v53 = vmul.f32 1.442695, %v1834_v15  ;;  %v10240_v40 = vld [vmem:[#allocation17_spill] sm:$0xff] }
 0x23e   : > { %v7956_v24 = vmul.f32 %v10221_v51, %v3297_v18  ;;  %5940 = vrcp.f32 %v7948_v31  ;;  %v1592_v61 = vmax.f32 %v1590_v52, %v1591_v20  ;;  %v1601_v32 = vrot.slane %v1600_v16, 2 }
 0x23f   : > { %10237 = vst [vmem:[#allocation79_spill] sm:$0xff] %v7952_v50  ;;  %v7959_v43 = vpop.eup %5932  ;;  %3687 = vmatmul.mubr.f32.gmra.mxu0 %v7952_v50  ;;  %v3172_v6 = vsub.f32 2.0, %v3044_v45  ;;  %5942 = vpow2.f32 %v2061_v56  ;;  %v2339_v30 = vrot.slane %v2338_v8, 2  ;;  %v2349_v54 = vrot.slane %v10240_v40, 4  ;;  %v934_v50 = vpop.f32.mrf.mxu1 }
 0x240   : > { %10238 = vst [vmem:[#allocation80_spill] sm:$0xff] %v7956_v24  ;;  %10239 = vst [vmem:[#allocation81_spill] sm:$0xff] %v7959_v43  ;;  %v7963_v62 = vpop.eup %5934  ;;  %3912 = vmatmul.mubr.f32.gmra.mxu1 %v7956_v24  ;;  %5944 = vpow2.f32 %v2065_v53  ;;  %v1835_v51 = vsub.f32 %v7919_v39, %v1592_v61  ;;  %v1602_v42 = vmax.f32 %v1600_v16, %v1601_v32  ;;  %v2331_v18 = vrot.slane %v10242_v5, 4 }
 0x241   : > { %10241 = vst [vmem:[#allocation17_spill] sm:$0xff] %v7963_v62  ;;  %v7968_v52 = vadd.f32 %v673_v25, %v6738_v48  ;;  %v3300_v1 = vmul.f32 %v5931_v7, %v3172_v6  ;;  %v2340_v44 = vadd.f32 %v2339_v30, %v2338_v8  ;;  %v2350_v15 = vadd.f32 %v10240_v40, %v2349_v54  ;;  %v10244_v54 = vld [vmem:[#allocation15_spill] sm:$0xff] }
 0x242   : > { %v7972_v10 = vadd.f32 %v930_v11, %v6740_v49  ;;  %v2067_v58 = vmul.f32 1.442695, %v1835_v51  ;;  %v1603_v55 = vrot.slane %v1602_v42, 1  ;;  %v2332_v53 = vadd.f32 %v10242_v5, %v2331_v18 }
 0x243   : > { %v1593_v35 = vrot.slane %v7968_v52, 4  ;;  %v7977_v20 = vmul.f32 %v10223_v38, %v3300_v1  ;;  %v2341_v39 = vrot.slane %v2340_v44, 1  ;;  %v2351_v16 = vrot.slane %v2350_v15, 2 }
 0x244   : > { %v1605_v45 = vrot.slane %v7972_v10, 4  ;;  %v5937_v7 = vpop.eup %5936  ;;  %5946 = vpow2.f32 %v2067_v58  ;;  %v1604_v8 = vmax.f32 %v1602_v42, %v1603_v55  ;;  %v2333_v30 = vrot.slane %v2332_v53, 2 }
 0x245   : > { %10243 = vst [vmem:[#allocation14_spill] sm:$0xff] %v7977_v20  ;;  %v1594_v56 = vmax.f32 %v7968_v52, %v1593_v35  ;;  %3691 = vmatprep.mubr.f32.mxu0 %v7977_v20  ;;  %v3046_v25 = vmul.f32 %v5937_v7, %v7928_v23  ;;  %v7984_v61 = vadd.f32 %v2341_v39, %v2340_v44  ;;  %v2343_v51 = vrot.slane %v10244_v54, 4 }
 0x246   : > { %v2352_v32 = vadd.f32 %v2351_v16, %v2350_v15  ;;  %v1606_v38 = vmax.f32 %v7972_v10, %v1605_v45  ;;  %v1837_v11 = vsub.f32 %v7931_v41, %v1604_v8  ;;  %v2334_v18 = vadd.f32 %v2333_v30, %v2332_v53 }
 0x247   : > { %v1595_v6 = vrot.slane %v1594_v56, 2  ;;  %v5939_v42 = vpop.eup %5938  ;;  %v3174_v1 = vsub.f32 2.0, %v3046_v25  ;;  %5948 = vrcp.f32 %v7984_v61  ;;  %v2344_v41 = vadd.f32 %v10244_v54, %v2343_v51  ;;  %v677_v25 = vpop.f32.mrf.mxu0 }
 0x248   : > { %v2353_v58 = vrot.slane %v2352_v32, 1  ;;  %v1607_v55 = vrot.slane %v1606_v38, 2  ;;  %v3043_v35 = vmul.f32 %v5939_v42, %v7941_v34  ;;  %v2071_v23 = vmul.f32 1.442695, %v1837_v11 }
 0x249   : > { %v1596_v44 = vmax.f32 %v1594_v56, %v1595_v6  ;;  %v3302_v15 = vmul.f32 %v5937_v7, %v3174_v1  ;;  %v2335_v24 = vrot.slane %v2334_v18, 1  ;;  %v2345_v56 = vrot.slane %v2344_v41, 2 }
 0x24a   : > { %v7991_v39 = vadd.f32 %v2353_v58, %v2352_v32  ;;  %v1608_v16 = vmax.f32 %v1606_v38, %v1607_v55  ;;  %v3171_v45 = vsub.f32 2.0, %v3043_v35  ;;  %5950 = vpow2.f32 %v2071_v23 }
 0x24b   : > { %v1597_v8 = vrot.slane %v1596_v44, 1  ;;  %v5941_v20 = vpop.eup %5940  ;;  %v7995_v62 = vmul.f32 %v10229_v9, %v3302_v15  ;;  %v8001_v11 = vadd.f32 %v2335_v24, %v2334_v18  ;;  %v2346_v51 = vadd.f32 %v2345_v56, %v2344_v41  ;;  %v10249_v18 = vld [vmem:[#allocation20_spill] sm:$0xff]  ;;  %v679_v41 = vpop.f32.mrf.mxu0 }
 0x24c   : > { %5952 = vrcp.f32 %v7991_v39  ;;  %v1609_v34 = vrot.slane %v1608_v16, 1  ;;  %v7998_v7 = vpop.eup %5942  ;;  %v3299_v53 = vmul.f32 %v5939_v42, %v3171_v45  ;;  %v3045_v32 = vmul.f32 %v5941_v20, %v7948_v31 }
 0x24d   : > { %10245 = vst [vmem:[#allocation15_spill] sm:$0xff] %v7995_v62  ;;  %10246 = vst [vmem:[#allocation82_spill] sm:$0xff] %v7998_v7  ;;  %v1598_v38 = vmax.f32 %v1596_v44, %v1597_v8  ;;  %v8003_v6 = vpop.eup %5944  ;;  %3916 = vmatprep.mubr.f32.mxu1 %v7995_v62  ;;  %v8007_v9 = vadd.f32 %v677_v25, %v6734_v46  ;;  %v8010_v1 = vadd.f32 %v934_v50, %v6736_v47 }
 0x24e   : > { %10247 = vst [vmem:[#allocation83_spill] sm:$0xff] %v8003_v6  ;;  %v1610_v30 = vmax.f32 %v1608_v16, %v1609_v34  ;;  %v8013_v58 = vmul.f32 %v10230_v22, %v3299_v53  ;;  %v3173_v42 = vsub.f32 2.0, %v3045_v32  ;;  %5954 = vrcp.f32 %v8001_v11  ;;  %v10250_v22 = vld [vmem:[#allocation21_spill] sm:$0xff]  ;;  %v936_v34 = vpop.f32.mrf.mxu1 }
 0x24f   : > { %v1836_v31 = vsub.f32 %v7968_v52, %v1598_v38  ;;  %v2347_v55 = vrot.slane %v2346_v51, 1  ;;  %v1611_v35 = vrot.slane %v8007_v9, 4  ;;  %v1623_v23 = vrot.slane %v8010_v1, 4 }
 0x250   : > { %10248 = vst [vmem:[#allocation84_spill] sm:$0xff] %v8013_v58  ;;  %v1838_v24 = vsub.f32 %v7972_v10, %v1610_v30  ;;  %3692 = vmatmul.mubr.f32.gmra.mxu0 %v8013_v58  ;;  %v3301_v44 = vmul.f32 %v5941_v20, %v3173_v42  ;;  %v2361_v15 = vrot.slane %v10249_v18, 4  ;;  %v2373_v16 = vrot.slane %v10250_v22, 4 }
 0x251   : > { %v2069_v50 = vmul.f32 1.442695, %v1836_v31  ;;  %v8023_v45 = vpop.eup %5946  ;;  %v8025_v8 = vadd.f32 %v2347_v55, %v2346_v51  ;;  %v1612_v10 = vmax.f32 %v8007_v9, %v1611_v35  ;;  %v1624_v25 = vmax.f32 %v8010_v1, %v1623_v23 }
 0x252   : > { %10251 = vst [vmem:[#allocation20_spill] sm:$0xff] %v8023_v45  ;;  %v2073_v52 = vmul.f32 1.442695, %v1838_v24  ;;  %v8030_v56 = vmul.f32 %v10232_v13, %v3301_v44  ;;  %v2362_v20 = vadd.f32 %v10249_v18, %v2361_v15  ;;  %v2374_v53 = vadd.f32 %v10250_v22, %v2373_v16  ;;  %v10253_v16 = vld [vmem:[#allocation18_spill] sm:$0xff] }
 0x253   : > { %5956 = vpow2.f32 %v2069_v50  ;;  %v1613_v32 = vrot.slane %v1612_v10, 2  ;;  %v1625_v38 = vrot.slane %v1624_v25, 2  ;;  %v8035_v30 = vadd.f32 %v679_v41, %v6738_v48 }
 0x254   : > { %10252 = vst [vmem:[#allocation21_spill] sm:$0xff] %v8030_v56  ;;  %5958 = vpow2.f32 %v2073_v52  ;;  %v5949_v51 = vpop.eup %5948  ;;  %3917 = vmatmul.mubr.f32.gmra.mxu1 %v8030_v56  ;;  %v2363_v42 = vrot.slane %v2362_v20, 2  ;;  %v2375_v31 = vrot.slane %v2374_v53, 2  ;;  %v8040_v13 = vadd.f32 %v936_v34, %v6740_v49 }
 0x255   : > { %5960 = vrcp.f32 %v8025_v8  ;;  %v3048_v24 = vmul.f32 %v5949_v51, %v7984_v61  ;;  %v1614_v55 = vmax.f32 %v1612_v10, %v1613_v32  ;;  %v1626_v35 = vmax.f32 %v1624_v25, %v1625_v38 }
 0x256   : > { %v1617_v23 = vrot.slane %v8035_v30, 4  ;;  %v2364_v44 = vadd.f32 %v2363_v42, %v2362_v20  ;;  %v2376_v50 = vadd.f32 %v2375_v31, %v2374_v53  ;;  %v1629_v15 = vrot.slane %v8040_v13, 4 }
 0x257   : > { %v2355_v41 = vrot.slane %v10253_v16, 4  ;;  %v8046_v52 = vpop.eup %5950  ;;  %v3176_v56 = vsub.f32 2.0, %v3048_v24  ;;  %v1615_v58 = vrot.slane %v1614_v55, 1  ;;  %v1627_v62 = vrot.slane %v1626_v35, 1 }
 0x258   : > { %10254 = vst [vmem:[#allocation18_spill] sm:$0xff] %v8046_v52  ;;  %v1618_v34 = vmax.f32 %v8035_v30, %v1617_v23  ;;  %v2365_v43 = vrot.slane %v2364_v44, 1  ;;  %v2377_v61 = vrot.slane %v2376_v50, 1  ;;  %v1630_v10 = vmax.f32 %v8040_v13, %v1629_v15 }
 0x259   : > { %v5953_v45 = vpop.eup %5952  ;;  %v2356_v25 = vadd.f32 %v10253_v16, %v2355_v41  ;;  %v3304_v20 = vmul.f32 %v5949_v51, %v3176_v56  ;;  %v1616_v32 = vmax.f32 %v1614_v55, %v1615_v58  ;;  %v1628_v38 = vmax.f32 %v1626_v35, %v1627_v62 }
 0x25a   : > { %v3050_v53 = vmul.f32 %v5953_v45, %v7991_v39  ;;  %v8052_v42 = vadd.f32 %v2365_v43, %v2364_v44  ;;  %v8054_v31 = vadd.f32 %v2377_v61, %v2376_v50  ;;  %v1619_v24 = vrot.slane %v1618_v34, 2  ;;  %v683_v39 = vpop.f32.mrf.mxu0  ;;  %v940_v50 = vpop.f32.mrf.mxu1 }
 0x25b   : > { %v1631_v52 = vrot.slane %v1630_v10, 2  ;;  %v5955_v6 = vpop.eup %5954  ;;  %v8057_v23 = vmul.f32 %v10235_v2, %v3304_v20  ;;  %v1839_v15 = vsub.f32 %v8007_v9, %v1616_v32  ;;  %v1841_v41 = vsub.f32 %v8010_v1, %v1628_v38 }
 0x25c   : > { %v3178_v7 = vsub.f32 2.0, %v3050_v53  ;;  %v3047_v56 = vmul.f32 %v5955_v6, %v8001_v11  ;;  %5962 = vrcp.f32 %v8052_v42  ;;  %v1620_v62 = vmax.f32 %v1618_v34, %v1619_v24 }
 0x25d   : > { %10255 = vst [vmem:[#allocation85_spill] sm:$0xff] %v8057_v23  ;;  %v1632_v43 = vmax.f32 %v1630_v10, %v1631_v52  ;;  %3696 = vmatprep.mubr.f32.mxu0 %v8057_v23  ;;  %v2075_v51 = vmul.f32 1.442695, %v1839_v15  ;;  %v2079_v55 = vmul.f32 1.442695, %v1841_v41  ;;  %5964 = vrcp.f32 %v8054_v31  ;;  %v10258_v52 = vld [vmem:[#allocation19_spill] sm:$0xff] }
 0x25e   : > { %v3306_v58 = vmul.f32 %v5953_v45, %v3178_v7  ;;  %v3175_v2 = vsub.f32 2.0, %v3047_v56  ;;  %v1621_v35 = vrot.slane %v1620_v62, 1  ;;  %v2357_v9 = vrot.slane %v2356_v25, 2 }
 0x25f   : > { %v1633_v44 = vrot.slane %v1632_v43, 1  ;;  %5966 = vpow2.f32 %v2075_v51  ;;  %v2367_v34 = vrot.slane %v10258_v52, 4  ;;  %v8072_v61 = vadd.f32 %v683_v39, %v6734_v46 }
 0x260   : > { %v8065_v1 = vpop.eup %5956  ;;  %v8068_v11 = vmul.f32 %v10240_v40, %v3306_v58  ;;  %v3303_v45 = vmul.f32 %v5955_v6, %v3175_v2  ;;  %5968 = vpow2.f32 %v2079_v55  ;;  %v1622_v10 = vmax.f32 %v1620_v62, %v1621_v35  ;;  %v10261_v2 = vld [vmem:[#allocation24_spill] sm:$0xff] }
 0x261   : > { %10256 = vst [vmem:[#allocation86_spill] sm:$0xff] %v8065_v1  ;;  %v8074_v7 = vpop.eup %5958  ;;  %v1634_v20 = vmax.f32 %v1632_v43, %v1633_v44  ;;  %v2358_v32 = vadd.f32 %v2357_v9, %v2356_v25  ;;  %v2368_v38 = vadd.f32 %v10258_v52, %v2367_v34  ;;  %v1635_v40 = vrot.slane %v8072_v61, 4 }
 0x262   : > { %10257 = vst [vmem:[#allocation87_spill] sm:$0xff] %v8068_v11  ;;  %10259 = vst [vmem:[#allocation19_spill] sm:$0xff] %v8074_v7  ;;  %v5961_v53 = vpop.eup %5960  ;;  %3921 = vmatprep.mubr.f32.mxu1 %v8068_v11  ;;  %v8080_v24 = vadd.f32 %v940_v50, %v6736_v47  ;;  %v8083_v15 = vmul.f32 %v10242_v5, %v3303_v45  ;;  %v1840_v6 = vsub.f32 %v8035_v30, %v1622_v10  ;;  %v10262_v50 = vld [vmem:[#allocation25_spill] sm:$0xff]  ;;  %v685_v45 = vpop.f32.mrf.mxu0 }
 0x263   : > { %v3049_v41 = vmul.f32 %v5961_v53, %v8025_v8  ;;  %v1842_v56 = vsub.f32 %v8040_v13, %v1634_v20  ;;  %v2359_v62 = vrot.slane %v2358_v32, 1  ;;  %v2369_v43 = vrot.slane %v2368_v38, 2 }
 0x264   : > { %10260 = vst [vmem:[#allocation88_spill] sm:$0xff] %v8083_v15  ;;  %v1636_v25 = vmax.f32 %v8072_v61, %v1635_v40  ;;  %v1647_v39 = vrot.slane %v8080_v24, 4  ;;  %3697 = vmatmul.mubr.f32.gmra.mxu0 %v8083_v15  ;;  %v2077_v51 = vmul.f32 1.442695, %v1840_v6  ;;  %v2385_v5 = vrot.slane %v10261_v2, 4 }
 0x265   : > { %v3177_v58 = vsub.f32 2.0, %v3049_v41  ;;  %v2081_v55 = vmul.f32 1.442695, %v1842_v56  ;;  %v8092_v35 = vadd.f32 %v2359_v62, %v2358_v32  ;;  %v2370_v8 = vadd.f32 %v2369_v43, %v2368_v38  ;;  %v942_v41 = vpop.f32.mrf.mxu1 }
 0x266   : > { %v1637_v44 = vrot.slane %v1636_v25, 2  ;;  %v1648_v30 = vmax.f32 %v8080_v24, %v1647_v39  ;;  %5970 = vpow2.f32 %v2077_v51  ;;  %v2386_v9 = vadd.f32 %v10261_v2, %v2385_v5 }
 0x267   : > { %v3305_v13 = vmul.f32 %v5961_v53, %v3177_v58  ;;  %v2397_v34 = vrot.slane %v10262_v50, 4  ;;  %5972 = vpow2.f32 %v2081_v55  ;;  %v2371_v10 = vrot.slane %v2370_v8, 1 }
 0x268   : > { %v1638_v20 = vmax.f32 %v1636_v25, %v1637_v44  ;;  %v1649_v40 = vrot.slane %v1648_v30, 2  ;;  %5974 = vrcp.f32 %v8092_v35  ;;  %v2387_v32 = vrot.slane %v2386_v9, 2 }
 0x269   : > { %v8098_v6 = vmul.f32 %v10244_v54, %v3305_v13  ;;  %v2398_v38 = vadd.f32 %v10262_v50, %v2397_v34  ;;  %v5963_v53 = vpop.eup %5962  ;;  %v8102_v56 = vadd.f32 %v2371_v10, %v2370_v8  ;;  %v8105_v39 = vadd.f32 %v685_v45, %v6738_v48 }
 0x26a   : > { %v1639_v62 = vrot.slane %v1638_v20, 1  ;;  %v1650_v43 = vmax.f32 %v1648_v30, %v1649_v40  ;;  %v5965_v58 = vpop.eup %5964  ;;  %v3052_v25 = vmul.f32 %v5963_v53, %v8052_v42  ;;  %v2388_v54 = vadd.f32 %v2387_v32, %v2386_v9 }
 0x26b   : > { %10263 = vst [vmem:[#allocation24_spill] sm:$0xff] %v8098_v6  ;;  %3922 = vmatmul.mubr.f32.gmra.mxu1 %v8098_v6  ;;  %v2399_v51 = vrot.slane %v2398_v38, 2  ;;  %v8110_v55 = vadd.f32 %v942_v41, %v6740_v49  ;;  %v3054_v5 = vmul.f32 %v5965_v58, %v8054_v31  ;;  %5976 = vrcp.f32 %v8102_v56 }
 0x26c   : > { %v1640_v8 = vmax.f32 %v1638_v20, %v1639_v62  ;;  %v1651_v44 = vrot.slane %v1650_v43, 1  ;;  %v8114_v30 = vpop.eup %5966  ;;  %v3180_v13 = vsub.f32 2.0, %v3052_v25  ;;  %v2389_v34 = vrot.slane %v2388_v54, 1 }
 0x26d   : > { %10264 = vst [vmem:[#allocation25_spill] sm:$0xff] %v8114_v30  ;;  %v2400_v45 = vadd.f32 %v2399_v51, %v2398_v38  ;;  %v1641_v10 = vrot.slane %v8105_v39, 4  ;;  %v8117_v40 = vpop.eup %5968  ;;  %v3182_v42 = vsub.f32 2.0, %v3054_v5  ;;  %v1653_v32 = vrot.slane %v8110_v55, 4 }
 0x26e   : > { %10265 = vst [vmem:[#allocation89_spill] sm:$0xff] %v8117_v40  ;;  %v1843_v9 = vsub.f32 %v8072_v61, %v1640_v8  ;;  %v1652_v41 = vmax.f32 %v1650_v43, %v1651_v44  ;;  %v3308_v31 = vmul.f32 %v5963_v53, %v3180_v13  ;;  %v8121_v6 = vadd.f32 %v2389_v34, %v2388_v54  ;;  %v689_v53 = vpop.f32.mrf.mxu0  ;;  %v946_v54 = vpop.f32.mrf.mxu1  ;;  %v10269_v13 = vld [vmem:[#allocation23_spill] sm:$0xff] }
 0x26f   : > { %v2401_v20 = vrot.slane %v2400_v45, 1  ;;  %v1642_v62 = vmax.f32 %v8105_v39, %v1641_v10  ;;  %v3310_v15 = vmul.f32 %v5965_v58, %v3182_v42  ;;  %v1654_v51 = vmax.f32 %v8110_v55, %v1653_v32 }
 0x270   : > { %v2083_v25 = vmul.f32 1.442695, %v1843_v9  ;;  %v1845_v38 = vsub.f32 %v8080_v24, %v1652_v41  ;;  %v8127_v11 = vmul.f32 %v10249_v18, %v3308_v31  ;;  %5978 = vrcp.f32 %v8121_v6  ;;  %v10268_v18 = vld [vmem:[#allocation22_spill] sm:$0xff]  ;;  %v10272_v31 = vld [vmem:[#allocation28_spill] sm:$0xff] }
 0x271   : > { %v8130_v61 = vadd.f32 %v2401_v20, %v2400_v45  ;;  %v1643_v43 = vrot.slane %v1642_v62, 2  ;;  %v8133_v5 = vmul.f32 %v10250_v22, %v3310_v15  ;;  %v1655_v8 = vrot.slane %v1654_v51, 2 }
 0x272   : > { %10266 = vst [vmem:[#allocation90_spill] sm:$0xff] %v8127_v11  ;;  %5980 = vpow2.f32 %v2083_v25  ;;  %v2087_v58 = vmul.f32 1.442695, %v1845_v38  ;;  %3701 = vmatprep.mubr.f32.mxu0 %v8127_v11  ;;  %v2379_v44 = vrot.slane %v10268_v18, 4  ;;  %v2391_v34 = vrot.slane %v10269_v13, 4 }
 0x273   : > { %10267 = vst [vmem:[#allocation91_spill] sm:$0xff] %v8133_v5  ;;  %5982 = vrcp.f32 %v8130_v61  ;;  %v1644_v24 = vmax.f32 %v1642_v62, %v1643_v43  ;;  %v8139_v45 = vpop.eup %5970  ;;  %3926 = vmatprep.mubr.f32.mxu1 %v8133_v5  ;;  %v1656_v10 = vmax.f32 %v1654_v51, %v1655_v8  ;;  %v8143_v22 = vadd.f32 %v689_v53, %v6734_v46  ;;  %v10273_v43 = vld [vmem:[#allocation29_spill] sm:$0xff] }
 0x274   : > { %10270 = vst [vmem:[#allocation22_spill] sm:$0xff] %v8139_v45  ;;  %5984 = vpow2.f32 %v2087_v58  ;;  %v8146_v15 = vadd.f32 %v946_v54, %v6736_v47  ;;  %v8148_v42 = vpop.eup %5972  ;;  %v2380_v41 = vadd.f32 %v10268_v18, %v2379_v44  ;;  %v2392_v32 = vadd.f32 %v10269_v13, %v2391_v34 }
 0x275   : > { %10271 = vst [vmem:[#allocation23_spill] sm:$0xff] %v8148_v42  ;;  %v1645_v9 = vrot.slane %v1644_v24, 1  ;;  %v2409_v20 = vrot.slane %v10272_v31, 4  ;;  %v5975_v62 = vpop.eup %5974  ;;  %v1657_v25 = vrot.slane %v1656_v10, 1  ;;  %v1659_v38 = vrot.slane %v8143_v22, 4 }
 0x276   : > { %v1671_v51 = vrot.slane %v8146_v15, 4  ;;  %v2421_v53 = vrot.slane %v10273_v43, 4  ;;  %v3051_v54 = vmul.f32 %v5975_v62, %v8092_v35  ;;  %v2381_v8 = vrot.slane %v2380_v41, 2 }
 0x277   : > { %v1646_v58 = vmax.f32 %v1644_v24, %v1645_v9  ;;  %v2393_v5 = vrot.slane %v2392_v32, 2  ;;  %v1658_v11 = vmax.f32 %v1656_v10, %v1657_v25  ;;  %v1660_v44 = vmax.f32 %v8143_v22, %v1659_v38 }
 0x278   : > { %v1672_v34 = vmax.f32 %v8146_v15, %v1671_v51  ;;  %v2410_v23 = vadd.f32 %v10272_v31, %v2409_v20  ;;  %v5977_v40 = vpop.eup %5976  ;;  %v3179_v30 = vsub.f32 2.0, %v3051_v54  ;;  %v2382_v45 = vadd.f32 %v2381_v8, %v2380_v41  ;;  %v948_v41 = vpop.f32.mrf.mxu1 }
 0x279   : > { %v1844_v42 = vsub.f32 %v8105_v39, %v1646_v58  ;;  %v2394_v7 = vadd.f32 %v2393_v5, %v2392_v32  ;;  %v3053_v1 = vmul.f32 %v5977_v40, %v8102_v56  ;;  %v1846_v35 = vsub.f32 %v8110_v55, %v1658_v11 }
 0x27a   : > { %v1661_v24 = vrot.slane %v1660_v44, 2  ;;  %v1673_v9 = vrot.slane %v1672_v34, 2  ;;  %v3307_v63 = vmul.f32 %v5975_v62, %v3179_v30  ;;  %v2383_v25 = vrot.slane %v2382_v45, 1 }
 0x27b   : > { %v2085_v10 = vmul.f32 1.442695, %v1844_v42  ;;  %v2395_v38 = vrot.slane %v2394_v7, 1  ;;  %v3181_v21 = vsub.f32 2.0, %v3053_v1  ;;  %v2089_v51 = vmul.f32 1.442695, %v1846_v35 }
 0x27c   : > { %v1662_v17 = vmax.f32 %v1660_v44, %v1661_v24  ;;  %v1674_v20 = vmax.f32 %v1672_v34, %v1673_v9  ;;  %v8164_v54 = vmul.f32 %v10253_v16, %v3307_v63  ;;  %v8166_v39 = vadd.f32 %v2383_v25, %v2382_v45  ;;  %v691_v45 = vpop.f32.mrf.mxu0 }
 0x27d   : > { %5986 = vpow2.f32 %v2085_v10  ;;  %v8168_v5 = vadd.f32 %v2395_v38, %v2394_v7  ;;  %v5979_v56 = vpop.eup %5978  ;;  %v3309_v11 = vmul.f32 %v5977_v40, %v3181_v21  ;;  %v2411_v63 = vrot.slane %v2410_v23, 2 }
 0x27e   : > { %10274 = vst [vmem:[#allocation28_spill] sm:$0xff] %v8164_v54  ;;  %5988 = vpow2.f32 %v2089_v51  ;;  %v1663_v55 = vrot.slane %v1662_v17, 1  ;;  %v1675_v30 = vrot.slane %v1674_v20, 1  ;;  %3702 = vmatmul.mubr.f32.gmra.mxu0 %v8164_v54  ;;  %v3056_v1 = vmul.f32 %v5979_v56, %v8121_v6 }
 0x27f   : > { %v8170_v42 = vpop.eup %5980  ;;  %5990 = vrcp.f32 %v8166_v39  ;;  %v2422_v16 = vadd.f32 %v10273_v43, %v2421_v53  ;;  %v8177_v32 = vmul.f32 %v10258_v52, %v3309_v11  ;;  %v2412_v8 = vadd.f32 %v2411_v63, %v2410_v23  ;;  %v952_v63 = vpop.f32.mrf.mxu1 }
 0x280   : > { %10275 = vst [vmem:[#allocation29_spill] sm:$0xff] %v8170_v42  ;;  %v5983_v7 = vpop.eup %5982  ;;  %5992 = vrcp.f32 %v8168_v5  ;;  %v1664_v21 = vmax.f32 %v1662_v17, %v1663_v55  ;;  %v1676_v40 = vmax.f32 %v1674_v20, %v1675_v30  ;;  %v3184_v58 = vsub.f32 2.0, %v3056_v1  ;;  %v10279_v55 = vld [vmem:[#allocation26_spill] sm:$0xff]  ;;  %v695_v1 = vpop.f32.mrf.mxu0 }
 0x281   : > { %10276 = vst [vmem:[#allocation92_spill] sm:$0xff] %v8177_v32  ;;  %v8180_v62 = vpop.eup %5984  ;;  %v3058_v6 = vmul.f32 %v5983_v7, %v8130_v61  ;;  %v2423_v44 = vrot.slane %v2422_v16, 2  ;;  %3927 = vmatmul.mubr.f32.gmra.mxu1 %v8177_v32  ;;  %v8187_v52 = vadd.f32 %v691_v45, %v6738_v48  ;;  %v8190_v35 = vadd.f32 %v948_v41, %v6740_v49  ;;  %v10281_v45 = vld [vmem:[#allocation27_spill] sm:$0xff] }
 0x282   : > { %10277 = vst [vmem:[#allocation93_spill] sm:$0xff] %v8180_v62  ;;  %v1847_v53 = vsub.f32 %v8143_v22, %v1664_v21  ;;  %v1849_v34 = vsub.f32 %v8146_v15, %v1676_v40  ;;  %v3312_v17 = vmul.f32 %v5979_v56, %v3184_v58  ;;  %v2413_v9 = vrot.slane %v2412_v8, 1 }
 0x283   : > { %v3186_v24 = vsub.f32 2.0, %v3058_v6  ;;  %v2424_v10 = vadd.f32 %v2423_v44, %v2422_v16  ;;  %v1665_v23 = vrot.slane %v8187_v52, 4  ;;  %v1677_v38 = vrot.slane %v8190_v35, 4 }
 0x284   : > { %v2091_v25 = vmul.f32 1.442695, %v1847_v53  ;;  %v2095_v61 = vmul.f32 1.442695, %v1849_v34  ;;  %v8195_v22 = vmul.f32 %v10261_v2, %v3312_v17  ;;  %v8197_v51 = vadd.f32 %v2413_v9, %v2412_v8  ;;  %v10283_v17 = vld [vmem:[#allocation32_spill] sm:$0xff] }
 0x285   : > { %v3314_v15 = vmul.f32 %v5983_v7, %v3186_v24  ;;  %v2425_v20 = vrot.slane %v2424_v10, 1  ;;  %v1666_v11 = vmax.f32 %v8187_v52, %v1665_v23  ;;  %v1678_v56 = vmax.f32 %v8190_v35, %v1677_v38  ;;  %v10285_v23 = vld [vmem:[#allocation33_spill] sm:$0xff] }
 0x286   : > { %10278 = vst [vmem:[#allocation94_spill] sm:$0xff] %v8195_v22  ;;  %5994 = vpow2.f32 %v2091_v25  ;;  %v2403_v30 = vrot.slane %v10279_v55, 4  ;;  %3706 = vmatprep.mubr.f32.mxu0 %v8195_v22  ;;  %v2415_v41 = vrot.slane %v10281_v45, 4  ;;  %v8218_v6 = vadd.f32 %v952_v63, %v6736_v47 }
 0x287   : > { %v8204_v16 = vmul.f32 %v10262_v50, %v3314_v15  ;;  %5996 = vpow2.f32 %v2095_v61  ;;  %v8206_v2 = vadd.f32 %v2425_v20, %v2424_v10  ;;  %v1667_v7 = vrot.slane %v1666_v11, 2 }
 0x288   : > { %5998 = vrcp.f32 %v8197_v51  ;;  %v1679_v21 = vrot.slane %v1678_v56, 2  ;;  %v2404_v40 = vadd.f32 %v10279_v55, %v2403_v30  ;;  %v2416_v58 = vadd.f32 %v10281_v45, %v2415_v41 }
 0x289   : > { %10280 = vst [vmem:[#allocation26_spill] sm:$0xff] %v8204_v16  ;;  %3931 = vmatprep.mubr.f32.mxu1 %v8204_v16  ;;  %6000 = vrcp.f32 %v8206_v2  ;;  %v8215_v50 = vadd.f32 %v695_v1, %v6734_v46  ;;  %v1668_v44 = vmax.f32 %v1666_v11, %v1667_v7  ;;  %v2433_v24 = vrot.slane %v10283_v17, 4 }
 0x28a   : > { %v8220_v8 = vpop.eup %5986  ;;  %v1680_v53 = vmax.f32 %v1678_v56, %v1679_v21  ;;  %v2405_v34 = vrot.slane %v2404_v40, 2  ;;  %v2417_v10 = vrot.slane %v2416_v58, 2  ;;  %v1695_v61 = vrot.slane %v8218_v6, 4 }
 0x28b   : > { %10282 = vst [vmem:[#allocation27_spill] sm:$0xff] %v8220_v8  ;;  %v8223_v9 = vpop.eup %5988  ;;  %v1683_v25 = vrot.slane %v8215_v50, 4  ;;  %v2445_v38 = vrot.slane %v10285_v23, 4  ;;  %v1669_v20 = vrot.slane %v1668_v44, 1  ;;  %v2434_v63 = vadd.f32 %v10283_v17, %v2433_v24 }
 0x28c   : > { %10284 = vst [vmem:[#allocation32_spill] sm:$0xff] %v8223_v9  ;;  %v5991_v15 = vpop.eup %5990  ;;  %v1681_v30 = vrot.slane %v1680_v53, 1  ;;  %v2406_v1 = vadd.f32 %v2405_v34, %v2404_v40  ;;  %v2418_v41 = vadd.f32 %v2417_v10, %v2416_v58  ;;  %v1696_v21 = vmax.f32 %v8218_v6, %v1695_v61 }
 0x28d   : > { %v5993_v11 = vpop.eup %5992  ;;  %v3055_v56 = vmul.f32 %v5991_v15, %v8166_v39  ;;  %v1684_v7 = vmax.f32 %v8215_v50, %v1683_v25  ;;  %v1670_v54 = vmax.f32 %v1668_v44, %v1669_v20  ;;  %v697_v20 = vpop.f32.mrf.mxu0 }
 0x28e   : > { %v3057_v32 = vmul.f32 %v5993_v11, %v8168_v5  ;;  %v1682_v16 = vmax.f32 %v1680_v53, %v1681_v30  ;;  %v2407_v22 = vrot.slane %v2406_v1, 1  ;;  %v2419_v42 = vrot.slane %v2418_v41, 1 }
 0x28f   : > { %v3183_v62 = vsub.f32 2.0, %v3055_v56  ;;  %v1685_v9 = vrot.slane %v1684_v7, 2  ;;  %v1697_v8 = vrot.slane %v1696_v21, 2  ;;  %v1848_v34 = vsub.f32 %v8187_v52, %v1670_v54 }
 0x290   : > { %v3185_v40 = vsub.f32 2.0, %v3057_v32  ;;  %v1850_v24 = vsub.f32 %v8190_v35, %v1682_v16  ;;  %v8235_v39 = vadd.f32 %v2407_v22, %v2406_v1  ;;  %v8237_v10 = vadd.f32 %v2419_v42, %v2418_v41 }
 0x291   : > { %v3311_v58 = vmul.f32 %v5991_v15, %v3183_v62  ;;  %v1686_v25 = vmax.f32 %v1684_v7, %v1685_v9  ;;  %v1698_v61 = vmax.f32 %v1696_v21, %v1697_v8  ;;  %v2093_v44 = vmul.f32 1.442695, %v1848_v34  ;;  %v954_v62 = vpop.f32.mrf.mxu1 }
 0x292   : > { %v3313_v5 = vmul.f32 %v5993_v11, %v3185_v40  ;;  %v2097_v53 = vmul.f32 1.442695, %v1850_v24  ;;  %6002 = vrcp.f32 %v8235_v39  ;;  %v2435_v22 = vrot.slane %v2434_v63, 2 }
 0x293   : > { %v8240_v30 = vpop.eup %5994  ;;  %v8243_v32 = vmul.f32 %v10268_v18, %v3311_v58  ;;  %6004 = vrcp.f32 %v8237_v10  ;;  %v1687_v54 = vrot.slane %v1686_v25, 1  ;;  %v1699_v52 = vrot.slane %v1698_v61, 1 }
 0x294   : > { %10286 = vst [vmem:[#allocation33_spill] sm:$0xff] %v8240_v30  ;;  %v8246_v42 = vpop.eup %5996  ;;  %v8249_v35 = vmul.f32 %v10269_v13, %v3313_v5  ;;  %6006 = vpow2.f32 %v2093_v44  ;;  %v2446_v16 = vadd.f32 %v10285_v23, %v2445_v38  ;;  %v8254_v15 = vadd.f32 %v697_v20, %v6738_v48 }
 0x295   : > { %10287 = vst [vmem:[#allocation95_spill] sm:$0xff] %v8243_v32  ;;  %10288 = vst [vmem:[#allocation96_spill] sm:$0xff] %v8246_v42  ;;  %v5999_v8 = vpop.eup %5998  ;;  %3707 = vmatmul.mubr.f32.gmra.mxu0 %v8243_v32  ;;  %6008 = vpow2.f32 %v2097_v53  ;;  %v1688_v18 = vmax.f32 %v1686_v25, %v1687_v54  ;;  %v1700_v9 = vmax.f32 %v1698_v61, %v1699_v52  ;;  %v10290_v54 = vld [vmem:[#allocation30_spill] sm:$0xff] }
 0x296   : > { %10289 = vst [vmem:[#allocation97_spill] sm:$0xff] %v8249_v35  ;;  %v6001_v1 = vpop.eup %6000  ;;  %3932 = vmatmul.mubr.f32.gmra.mxu1 %v8249_v35  ;;  %v3060_v11 = vmul.f32 %v5999_v8, %v8197_v51  ;;  %v2436_v13 = vadd.f32 %v2435_v22, %v2434_v63  ;;  %v2447_v56 = vrot.slane %v2446_v16, 2  ;;  %v8259_v41 = vadd.f32 %v954_v62, %v6740_v49  ;;  %v701_v62 = vpop.f32.mrf.mxu0 }
 0x297   : > { %v3062_v38 = vmul.f32 %v6001_v1, %v8206_v2  ;;  %v1851_v7 = vsub.f32 %v8215_v50, %v1688_v18  ;;  %v1853_v21 = vsub.f32 %v8218_v6, %v1700_v9  ;;  %v1689_v40 = vrot.slane %v8254_v15, 4  ;;  %v958_v9 = vpop.f32.mrf.mxu1 }
 0x298   : > { %v3188_v34 = vsub.f32 2.0, %v3060_v11  ;;  %v2437_v24 = vrot.slane %v2436_v13, 1  ;;  %v2448_v58 = vadd.f32 %v2447_v56, %v2446_v16  ;;  %v1701_v25 = vrot.slane %v8259_v41, 4 }
 0x299   : > { %v3190_v61 = vsub.f32 2.0, %v3062_v38  ;;  %v2099_v51 = vmul.f32 1.442695, %v1851_v7  ;;  %v2103_v63 = vmul.f32 1.442695, %v1853_v21  ;;  %v1690_v5 = vmax.f32 %v8254_v15, %v1689_v40 }
 0x29a   : > { %v3316_v44 = vmul.f32 %v5999_v8, %v3188_v34  ;;  %v8267_v53 = vadd.f32 %v2437_v24, %v2436_v13  ;;  %v2449_v2 = vrot.slane %v2448_v58, 1  ;;  %v1702_v50 = vmax.f32 %v8259_v41, %v1701_v25  ;;  %v10294_v34 = vld [vmem:[#allocation36_spill] sm:$0xff] }
 0x29b   : > { %v3318_v20 = vmul.f32 %v6001_v1, %v3190_v61  ;;  %6010 = vpow2.f32 %v2099_v51  ;;  %v1691_v6 = vrot.slane %v1690_v5, 2  ;;  %v2427_v52 = vrot.slane %v10290_v54, 4 }
 0x29c   : > { %v8272_v22 = vmul.f32 %v10272_v31, %v3316_v44  ;;  %6012 = vpow2.f32 %v2103_v63  ;;  %v8274_v16 = vadd.f32 %v2449_v2, %v2448_v58  ;;  %v1703_v18 = vrot.slane %v1702_v50, 2  ;;  %v10293_v31 = vld [vmem:[#allocation31_spill] sm:$0xff] }
 0x29d   : > { %v8277_v8 = vmul.f32 %v10273_v43, %v3318_v20  ;;  %6014 = vrcp.f32 %v8267_v53  ;;  %v1692_v11 = vmax.f32 %v1690_v5, %v1691_v6  ;;  %v2428_v1 = vadd.f32 %v10290_v54, %v2427_v52 }
 0x29e   : > { %10291 = vst [vmem:[#allocation30_spill] sm:$0xff] %v8272_v22  ;;  %3711 = vmatprep.mubr.f32.mxu0 %v8272_v22  ;;  %6016 = vrcp.f32 %v8274_v16  ;;  %v1704_v13 = vmax.f32 %v1702_v50, %v1703_v18  ;;  %v2439_v56 = vrot.slane %v10293_v31, 4  ;;  %v8285_v38 = vadd.f32 %v701_v62, %v6734_v46 }
 0x29f   : > { %10292 = vst [vmem:[#allocation98_spill] sm:$0xff] %v8277_v8  ;;  %v6003_v7 = vpop.eup %6002  ;;  %3936 = vmatprep.mubr.f32.mxu1 %v8277_v8  ;;  %v1693_v43 = vrot.slane %v1692_v11, 1  ;;  %v2429_v21 = vrot.slane %v2428_v1, 2  ;;  %v8289_v40 = vadd.f32 %v958_v9, %v6736_v47  ;;  %v2457_v24 = vrot.slane %v10294_v34, 4 }
 0x2a0   : > { %v6005_v58 = vpop.eup %6004  ;;  %v3059_v25 = vmul.f32 %v6003_v7, %v8235_v39  ;;  %v1705_v61 = vrot.slane %v1704_v13, 1  ;;  %v2440_v51 = vadd.f32 %v10293_v31, %v2439_v56  ;;  %v1707_v63 = vrot.slane %v8285_v38, 4 }
 0x2a1   : > { %v8295_v46 = vpop.eup %6006  ;;  %v3061_v5 = vmul.f32 %v6005_v58, %v8237_v10  ;;  %v1694_v44 = vmax.f32 %v1692_v11, %v1693_v43  ;;  %v2430_v2 = vadd.f32 %v2429_v21, %v2428_v1  ;;  %v1719_v50 = vrot.slane %v8289_v40, 4 }
 0x2a2   : > { %v8299_v47 = vpop.eup %6008  ;;  %v3187_v20 = vsub.f32 2.0, %v3059_v25  ;;  %v1706_v6 = vmax.f32 %v1704_v13, %v1705_v61  ;;  %v2441_v52 = vrot.slane %v2440_v51, 2  ;;  %v1708_v39 = vmax.f32 %v8285_v38, %v1707_v63 }
 0x2a3   : > { %10295 = vst [vmem:[#allocation31_spill] sm:$0xff] %v8299_v47  ;;  %v3189_v62 = vsub.f32 2.0, %v3061_v5  ;;  %v1852_v18 = vsub.f32 %v8254_v15, %v1694_v44  ;;  %v2431_v9 = vrot.slane %v2430_v2, 1  ;;  %v1720_v56 = vmax.f32 %v8289_v40, %v1719_v50  ;;  %v703_v15 = vpop.f32.mrf.mxu0 }
 0x2a4   : > { %v3315_v35 = vmul.f32 %v6003_v7, %v3187_v20  ;;  %v1854_v10 = vsub.f32 %v8259_v41, %v1706_v6  ;;  %v2442_v11 = vadd.f32 %v2441_v52, %v2440_v51  ;;  %v1709_v1 = vrot.slane %v1708_v39, 2  ;;  %v960_v51 = vpop.f32.mrf.mxu1 }
 0x2a5   : > { %v3317_v43 = vmul.f32 %v6005_v58, %v3189_v62  ;;  %v2101_v21 = vmul.f32 1.442695, %v1852_v18  ;;  %v8305_v32 = vadd.f32 %v2431_v9, %v2430_v2  ;;  %v1721_v25 = vrot.slane %v1720_v56, 2  ;;  %v4166_v9 = vld [vmem:[%s9932_s6 + $0x8] sm:$0xff] }
 0x2a6   : > { %v8308_v13 = vmul.f32 %v10279_v55, %v3315_v35  ;;  %v2105_v61 = vmul.f32 1.442695, %v1854_v10  ;;  %v2443_v63 = vrot.slane %v2442_v11, 1  ;;  %v1710_v5 = vmax.f32 %v1708_v39, %v1709_v1  ;;  %v10299_v35 = vld [vmem:[#allocation37_spill] sm:$0xff]  ;;  %4296 = vmatprep.subr.mxu0 %v4166_v9  ;;  %v4167_v9 = vld [vmem:[%s9932_s6 + $0x10] sm:$0xff] }
 0x2a7   : > { %v8311_v44 = vmul.f32 %v10281_v45, %v3317_v43  ;;  %6018 = vpow2.f32 %v2101_v21  ;;  %v1722_v7 = vmax.f32 %v1720_v56, %v1721_v25  ;;  %v2458_v41 = vadd.f32 %v10294_v34, %v2457_v24  ;;  %v4165_v56 = vld [vmem:[%s9932_s6] sm:$0xff] }
 0x2a8   : > { %10296 = vst [vmem:[#allocation36_spill] sm:$0xff] %v8308_v13  ;;  %v8314_v58 = vpop.eup %6010  ;;  %3712 = vmatmul.mubr.f32.gmra.mxu0 %v8308_v13  ;;  %6020 = vpow2.f32 %v2105_v61  ;;  %v8317_v2 = vadd.f32 %v2443_v63, %v2442_v11  ;;  %v1711_v55 = vrot.slane %v1710_v5, 1  ;;  %v2469_v50 = vrot.slane %v10299_v35, 4 }
 0x2a9   : > { %10297 = vst [vmem:[#allocation99_spill] sm:$0xff] %v8311_v44  ;;  %10298 = vst [vmem:[#allocation100_spill] sm:$0xff] %v8314_v58  ;;  %v8320_v20 = vpop.eup %6012  ;;  %3937 = vmatmul.mubr.f32.gmra.mxu1 %v8311_v44  ;;  %6022 = vrcp.f32 %v8305_v32  ;;  %v1723_v45 = vrot.slane %v1722_v7, 1  ;;  %v2459_v6 = vrot.slane %v2458_v41, 2  ;;  %v8325_v24 = vadd.f32 %v703_v15, %v6738_v48  ;;  %v4168_v48 = vld [vmem:[%s9932_s6 + $0x18] sm:$0xff]  ;;  %4297 = vmatpush1.msra.mxu0 %v4165_v56 }
 0x2aa   : > { %10300 = vst [vmem:[#allocation37_spill] sm:$0xff] %v8320_v20  ;;  %v6015_v52 = vpop.eup %6014  ;;  %6024 = vrcp.f32 %v8317_v2  ;;  %v1712_v39 = vmax.f32 %v1710_v5, %v1711_v55  ;;  %v2470_v62 = vadd.f32 %v10299_v35, %v2469_v50  ;;  %v8330_v18 = vadd.f32 %v960_v51, %v6740_v49  ;;  %4553 = vmatprep.subr.mxu1 %v4168_v48 }
 0x2ab   : > { %v6017_v10 = vpop.eup %6016  ;;  %v3064_v11 = vmul.f32 %v6015_v52, %v8267_v53  ;;  %v1724_v1 = vmax.f32 %v1722_v7, %v1723_v45  ;;  %v2460_v43 = vadd.f32 %v2459_v6, %v2458_v41  ;;  %v1713_v49 = vrot.slane %v8325_v24, 4  ;;  %4554 = vmatpush1.msra.mxu1 %v4167_v9 }
 0x2ac   : > { %v3066_v21 = vmul.f32 %v6017_v10, %v8274_v16  ;;  %v1855_v25 = vsub.f32 %v8285_v38, %v1712_v39  ;;  %v2471_v61 = vrot.slane %v2470_v62, 2  ;;  %v1725_v63 = vrot.slane %v8330_v18, 4 }
 0x2ad   : > { %v3192_v5 = vsub.f32 2.0, %v3064_v11  ;;  %v1857_v15 = vsub.f32 %v8289_v40, %v1724_v1  ;;  %v2461_v51 = vrot.slane %v2460_v43, 1  ;;  %v1714_v53 = vmax.f32 %v8325_v24, %v1713_v49  ;;  %v10303_v1 = vld [vmem:[#allocation34_spill] sm:$0xff] }
 0x2ae   : > { %v10301_v7 = vmov 0.0   ;;  %v3194_v41 = vsub.f32 2.0, %v3066_v21  ;;  %v2107_v55 = vmul.f32 1.442695, %v1855_v25  ;;  %v2472_v50 = vadd.f32 %v2471_v61, %v2470_v62  ;;  %v10305_v25 = vld [vmem:[#allocation35_spill] sm:$0xff] }
 0x2af   : > { %4979 = vmatprep.subr.mxu0 %v10301_v7  ;;  %v1726_v45 = vmax.f32 %v8330_v18, %v1725_v63  ;;  %v3320_v16 = vmul.f32 %v6015_v52, %v3192_v5  ;;  %v2111_v6 = vmul.f32 1.442695, %v1857_v15  ;;  %v8350_v38 = vadd.f32 %v2461_v51, %v2460_v43  ;;  %5204 = vmatprep.subr.mxu1 %v10301_v7  ;;  %v10306_v63 = vld [vmem:[#allocation40_spill] sm:$0xff]  ;;  %v10308_v51 = vld [vmem:[#allocation41_spill] sm:$0xff] }
 0x2b0   : > { %v1715_v39 = vrot.slane %v1714_v53, 2  ;;  %v3322_v40 = vmul.f32 %v6017_v10, %v3194_v41  ;;  %6026 = vpow2.f32 %v2107_v55  ;;  %v2473_v56 = vrot.slane %v2472_v50, 1  ;;  %v10309_v41 = vld [vmem:[#allocation38_spill] sm:$0xff] }
 0x2b1   : > { %v1727_v48 = vrot.slane %v1726_v45, 2  ;;  %v8356_v11 = vmul.f32 %v10283_v17, %v3320_v16  ;;  %6028 = vpow2.f32 %v2111_v6  ;;  %v2451_v52 = vrot.slane %v10303_v1, 4 }
 0x2b2   : > { %v1716_v62 = vmax.f32 %v1714_v53, %v1715_v39  ;;  %v8361_v43 = vmul.f32 %v10285_v23, %v3322_v40  ;;  %6030 = vrcp.f32 %v8350_v38  ;;  %v8364_v49 = vadd.f32 %v2473_v56, %v2472_v50 }
 0x2b3   : > { %10302 = vst [vmem:[#allocation101_spill] sm:$0xff] %v8356_v11  ;;  %v1728_v10 = vmax.f32 %v1726_v45, %v1727_v48  ;;  %3716 = vmatprep.mubr.f32.mxu0 %v8356_v11  ;;  %v2452_v17 = vadd.f32 %v10303_v1, %v2451_v52  ;;  %v2463_v61 = vrot.slane %v10305_v25, 4  ;;  %v2481_v5 = vrot.slane %v10306_v63, 4  ;;  %v10311_v52 = vld [vmem:[#allocation39_spill] sm:$0xff] }
 0x2b4   : > { %10304 = vst [vmem:[#allocation34_spill] sm:$0xff] %v8361_v43  ;;  %v1717_v21 = vrot.slane %v1716_v62, 1  ;;  %v8370_v15 = vpop.eup %6018  ;;  %3941 = vmatprep.mubr.f32.mxu1 %v8361_v43  ;;  %6032 = vrcp.f32 %v8364_v49  ;;  %v2493_v53 = vrot.slane %v10308_v51, 4  ;;  %v2475_v55 = vrot.slane %v10309_v41, 4 }
 0x2b5   : > { %10307 = vst [vmem:[#allocation35_spill] sm:$0xff] %v8370_v15  ;;  %v1729_v23 = vrot.slane %v1728_v10, 1  ;;  %v8376_v50 = vpop.eup %6020  ;;  %v2453_v16 = vrot.slane %v2452_v17, 2  ;;  %v2464_v6 = vadd.f32 %v10305_v25, %v2463_v61  ;;  %v2482_v39 = vadd.f32 %v10306_v63, %v2481_v5 }
 0x2b6   : > { %10310 = vst [vmem:[#allocation40_spill] sm:$0xff] %v8376_v50  ;;  %v1718_v45 = vmax.f32 %v1716_v62, %v1717_v21  ;;  %v6023_v9 = vpop.eup %6022  ;;  %v2494_v56 = vadd.f32 %v10308_v51, %v2493_v53  ;;  %v2476_v48 = vadd.f32 %v10309_v41, %v2475_v55  ;;  %v2487_v44 = vrot.slane %v10311_v52, 4 }
 0x2b7   : > { %v1730_v40 = vmax.f32 %v1728_v10, %v1729_v23  ;;  %v6025_v13 = vpop.eup %6024  ;;  %v3063_v43 = vmul.f32 %v6023_v9, %v8305_v32  ;;  %v2454_v8 = vadd.f32 %v2453_v16, %v2452_v17  ;;  %v2465_v62 = vrot.slane %v2464_v6, 2 }
 0x2b8   : > { %v1856_v11 = vsub.f32 %v8325_v24, %v1718_v45  ;;  %v3065_v21 = vmul.f32 %v6025_v13, %v8317_v2  ;;  %v2483_v5 = vrot.slane %v2482_v39, 2  ;;  %v2495_v22 = vrot.slane %v2494_v56, 2 }
 0x2b9   : > { %v1858_v61 = vsub.f32 %v8330_v18, %v1730_v40  ;;  %v3191_v10 = vsub.f32 2.0, %v3063_v43  ;;  %v2455_v53 = vrot.slane %v2454_v8, 1  ;;  %v2466_v7 = vadd.f32 %v2465_v62, %v2464_v6 }
 0x2ba   : > { %v2109_v23 = vmul.f32 1.442695, %v1856_v11  ;;  %v3193_v55 = vsub.f32 2.0, %v3065_v21  ;;  %v2484_v58 = vadd.f32 %v2483_v5, %v2482_v39  ;;  %v2496_v50 = vadd.f32 %v2495_v22, %v2494_v56 }
 0x2bb   : > { %v2113_v20 = vmul.f32 1.442695, %v1858_v61  ;;  %v3319_v15 = vmul.f32 %v6023_v9, %v3191_v10  ;;  %v8387_v32 = vadd.f32 %v2455_v53, %v2454_v8  ;;  %v2467_v24 = vrot.slane %v2466_v7, 1  ;;  %v10317_v9 = vld [vmem:[#allocation45_spill] sm:$0xff] }
 0x2bc   : > { %6034 = vpow2.f32 %v2109_v23  ;;  %v3321_v17 = vmul.f32 %v6025_v13, %v3193_v55  ;;  %v2485_v2 = vrot.slane %v2484_v58, 1  ;;  %v2497_v45 = vrot.slane %v2496_v50, 1 }
 0x2bd   : > { %6036 = vpow2.f32 %v2113_v20  ;;  %v8389_v18 = vpop.eup %6026  ;;  %v8392_v43 = vmul.f32 %v10290_v54, %v3319_v15  ;;  %v8395_v11 = vadd.f32 %v2467_v24, %v2466_v7  ;;  %v2477_v16 = vrot.slane %v2476_v48, 2  ;;  %v10316_v7 = vld [vmem:[#allocation44_spill] sm:$0xff]  ;;  %v10319_v24 = vld [vmem:[#allocation43_spill] sm:$0xff] }
 0x2be   : > { %10312 = vst [vmem:[#allocation41_spill] sm:$0xff] %v8389_v18  ;;  %6038 = vrcp.f32 %v8387_v32  ;;  %v8397_v22 = vpop.eup %6028  ;;  %v8400_v8 = vmul.f32 %v10293_v31, %v3321_v17  ;;  %v8402_v6 = vadd.f32 %v2485_v2, %v2484_v58  ;;  %v8404_v13 = vadd.f32 %v2497_v45, %v2496_v50  ;;  %v10318_v50 = vld [vmem:[#allocation42_spill] sm:$0xff] }
 0x2bf   : > { %10313 = vst [vmem:[#allocation38_spill] sm:$0xff] %v8392_v43  ;;  %10314 = vst [vmem:[#allocation39_spill] sm:$0xff] %v8397_v22  ;;  %v2488_v20 = vadd.f32 %v10311_v52, %v2487_v44  ;;  %v6031_v39 = vpop.eup %6030  ;;  %3717 = vmatmul.mubr.f32.gmra.mxu0 %v8392_v43  ;;  %6040 = vrcp.f32 %v8395_v11  ;;  %v2478_v54 = vadd.f32 %v2477_v16, %v2476_v48  ;;  %v2505_v15 = vrot.slane %v10316_v7, 4 }
 0x2c0   : > { %10315 = vst [vmem:[#allocation102_spill] sm:$0xff] %v8400_v8  ;;  %v2517_v40 = vrot.slane %v10317_v9, 4  ;;  %3942 = vmatmul.mubr.f32.gmra.mxu1 %v8400_v8  ;;  %v3068_v31 = vmul.f32 %v6031_v39, %v8350_v38  ;;  %6042 = vrcp.f32 %v8402_v6  ;;  %v2499_v56 = vrot.slane %v10318_v50, 4 }
 0x2c1   : > { %v2489_v58 = vrot.slane %v2488_v20, 2  ;;  %v6033_v44 = vpop.eup %6032  ;;  %6044 = vrcp.f32 %v8404_v13  ;;  %v2479_v62 = vrot.slane %v2478_v54, 1  ;;  %v2506_v21 = vadd.f32 %v10316_v7, %v2505_v15 }
 0x2c2   : > { %v2518_v48 = vadd.f32 %v10317_v9, %v2517_v40  ;;  %v3196_v61 = vsub.f32 2.0, %v3068_v31  ;;  %v3070_v5 = vmul.f32 %v6033_v44, %v8364_v49  ;;  %v2500_v23 = vadd.f32 %v10318_v50, %v2499_v56 }
 0x2c3   : > { %v2490_v10 = vadd.f32 %v2489_v58, %v2488_v20  ;;  %v8420_v38 = vadd.f32 %v2479_v62, %v2478_v54  ;;  %v2507_v53 = vrot.slane %v2506_v21, 2  ;;  %v2511_v17 = vrot.slane %v10319_v24, 4 }
 0x2c4   : > { %v2519_v55 = vrot.slane %v2518_v48, 2  ;;  %v3324_v2 = vmul.f32 %v6031_v39, %v3196_v61  ;;  %v3198_v45 = vsub.f32 2.0, %v3070_v5  ;;  %v2501_v8 = vrot.slane %v2500_v23, 2 }
 0x2c5   : > { %v2491_v16 = vrot.slane %v2490_v10, 1  ;;  %6046 = vrcp.f32 %v8420_v38  ;;  %v2508_v15 = vadd.f32 %v2507_v53, %v2506_v21  ;;  %v2512_v31 = vadd.f32 %v10319_v24, %v2511_v17  ;;  %v10324_v17 = vld [vmem:[#allocation46_spill] sm:$0xff] }
 0x2c6   : > { %v2520_v40 = vadd.f32 %v2519_v55, %v2518_v48  ;;  %v8426_v49 = vmul.f32 %v10294_v34, %v3324_v2  ;;  %v3326_v20 = vmul.f32 %v6033_v44, %v3198_v45  ;;  %v2502_v58 = vadd.f32 %v2501_v8, %v2500_v23  ;;  %v10325_v45 = vld [vmem:[#allocation47_spill] sm:$0xff] }
 0x2c7   : > { %v8428_v54 = vadd.f32 %v2491_v16, %v2490_v10  ;;  %v2509_v56 = vrot.slane %v2508_v15, 1  ;;  %v2513_v43 = vrot.slane %v2512_v31, 2  ;;  %v2529_v39 = vrot.slane %v7437_v12, 4 }
 0x2c8   : > { %10320 = vst [vmem:[#allocation44_spill] sm:$0xff] %v8426_v49  ;;  %v2521_v62 = vrot.slane %v2520_v40, 1  ;;  %3721 = vmatprep.mubr.f32.mxu0 %v8426_v49  ;;  %v8435_v21 = vmul.f32 %v10299_v35, %v3326_v20  ;;  %v2503_v34 = vrot.slane %v2502_v58, 1  ;;  %v2541_v44 = vrot.slane %v7439_v27, 4 }
 0x2c9   : > { %v8431_v61 = vpop.eup %6034  ;;  %6048 = vrcp.f32 %v8428_v54  ;;  %v8441_v8 = vadd.f32 %v2509_v56, %v2508_v15  ;;  %v2514_v10 = vadd.f32 %v2513_v43, %v2512_v31  ;;  %v2530_v23 = vadd.f32 %v7437_v12, %v2529_v39 }
 0x2ca   : > { %10321 = vst [vmem:[#allocation45_spill] sm:$0xff] %v8431_v61  ;;  %10322 = vst [vmem:[#allocation42_spill] sm:$0xff] %v8435_v21  ;;  %v8439_v48 = vpop.eup %6036  ;;  %v8443_v5 = vadd.f32 %v2521_v62, %v2520_v40  ;;  %3946 = vmatprep.mubr.f32.mxu1 %v8435_v21  ;;  %v8447_v55 = vadd.f32 %v2503_v34, %v2502_v58  ;;  %v2542_v35 = vadd.f32 %v7439_v27, %v2541_v44 }
 0x2cb   : > { %10323 = vst [vmem:[#allocation43_spill] sm:$0xff] %v8439_v48  ;;  %v6039_v53 = vpop.eup %6038  ;;  %v2523_v2 = vrot.slane %v10324_v17, 4  ;;  %v2535_v16 = vrot.slane %v10325_v45, 4  ;;  %6050 = vrcp.f32 %v8441_v8  ;;  %v2515_v15 = vrot.slane %v2514_v10, 1 }
 0x2cc   : > { %v3067_v20 = vmul.f32 %v6039_v53, %v8387_v32  ;;  %v2531_v40 = vrot.slane %v2530_v23, 2  ;;  %v6041_v43 = vpop.eup %6040  ;;  %6052 = vrcp.f32 %v8443_v5  ;;  %v2543_v31 = vrot.slane %v2542_v35, 2 }
 0x2cd   : > { %v2524_v56 = vadd.f32 %v10324_v17, %v2523_v2  ;;  %v2536_v58 = vadd.f32 %v10325_v45, %v2535_v16  ;;  %v6043_v62 = vpop.eup %6042  ;;  %v3069_v34 = vmul.f32 %v6041_v43, %v8395_v11  ;;  %6054 = vrcp.f32 %v8447_v55 }
 0x2ce   : > { %v3195_v39 = vsub.f32 2.0, %v3067_v20  ;;  %v8459_v44 = vadd.f32 %v2515_v15, %v2514_v10  ;;  %v6045_v32 = vpop.eup %6044  ;;  %v3072_v21 = vmul.f32 %v6043_v62, %v8402_v6  ;;  %v2532_v49 = vadd.f32 %v2531_v40, %v2530_v23 }
 0x2cf   : > { %v2544_v22 = vadd.f32 %v2543_v31, %v2542_v35  ;;  %v2525_v18 = vrot.slane %v2524_v56, 2  ;;  %v3197_v61 = vsub.f32 2.0, %v3069_v34  ;;  %v3074_v2 = vmul.f32 %v6045_v32, %v8404_v13 }
 0x2d0   : > { %v3323_v48 = vmul.f32 %v6039_v53, %v3195_v39  ;;  %6056 = vrcp.f32 %v8459_v44  ;;  %v3200_v16 = vsub.f32 2.0, %v3072_v21  ;;  %v2533_v20 = vrot.slane %v2532_v49, 1 }
 0x2d1   : > { %v2545_v42 = vrot.slane %v2544_v22, 1  ;;  %v2526_v11 = vadd.f32 %v2525_v18, %v2524_v56  ;;  %v3325_v10 = vmul.f32 %v6041_v43, %v3197_v61  ;;  %v3202_v15 = vsub.f32 2.0, %v3074_v2 }
 0x2d2   : > { %v8465_v30 = vmul.f32 %v10303_v1, %v3323_v48  ;;  %v2537_v47 = vrot.slane %v2536_v58, 2  ;;  %v6047_v6 = vpop.eup %6046  ;;  %v3328_v23 = vmul.f32 %v6043_v62, %v3200_v16  ;;  %v8467_v35 = vadd.f32 %v2533_v20, %v2532_v49 }
 0x2d3   : > { %v8469_v53 = vadd.f32 %v2545_v42, %v2544_v22  ;;  %v2527_v40 = vrot.slane %v2526_v11, 1  ;;  %v8473_v13 = vmul.f32 %v10305_v25, %v3325_v10  ;;  %v3330_v21 = vmul.f32 %v6045_v32, %v3202_v15 }
 0x2d4   : > { %10326 = vst [vmem:[#allocation46_spill] sm:$0xff] %v8465_v30  ;;  %3722 = vmatmul.mubr.f32.gmra.mxu0 %v8465_v30  ;;  %v3071_v18 = vmul.f32 %v6047_v6, %v8420_v38  ;;  %v2538_v1 = vadd.f32 %v2537_v47, %v2536_v58  ;;  %v8477_v61 = vmul.f32 %v10306_v63, %v3328_v23  ;;  %6058 = vrcp.f32 %v8467_v35 }
 0x2d5   : > { %10327 = vst [vmem:[#allocation47_spill] sm:$0xff] %v8473_v13  ;;  %v8480_v48 = vadd.f32 %v2527_v40, %v2526_v11  ;;  %v2553_v42 = vrot.slane %v7503_v19, 4  ;;  %3947 = vmatmul.mubr.f32.gmra.mxu1 %v8473_v13  ;;  %v8485_v49 = vmul.f32 %v10308_v51, %v3330_v21  ;;  %6060 = vrcp.f32 %v8469_v53 }
 0x2d6   : > { %10328 = vst [vmem:[#allocation103_spill] sm:$0xff] %v8477_v61  ;;  %v6049_v22 = vpop.eup %6048  ;;  %v3199_v25 = vsub.f32 2.0, %v3071_v18  ;;  %v2539_v38 = vrot.slane %v2538_v1, 1  ;;  %3726 = vmatprep.mubr.f32.mxu0 %v8477_v61  ;;  %v2565_v43 = vrot.slane %v7508_v0, 4  ;;  %v2547_v51 = vrot.slane %v7457_v29, 4 }
 0x2d7   : > { %10329 = vst [vmem:[#allocation104_spill] sm:$0xff] %v8485_v49  ;;  %v3073_v47 = vmul.f32 %v6049_v22, %v8428_v54  ;;  %6062 = vrcp.f32 %v8480_v48  ;;  %v2554_v63 = vadd.f32 %v7503_v19, %v2553_v42  ;;  %3951 = vmatprep.mubr.f32.mxu1 %v8485_v49  ;;  %v2559_v58 = vrot.slane %v7460_v60, 4 }
 0x2d8   : > { %v3327_v31 = vmul.f32 %v6047_v6, %v3199_v25  ;;  %v8494_v56 = vadd.f32 %v2539_v38, %v2538_v1  ;;  %v6051_v62 = vpop.eup %6050  ;;  %v2566_v54 = vadd.f32 %v7508_v0, %v2565_v43  ;;  %v2577_v32 = vrot.slane %v7567_v37, 4 }
 0x2d9   : > { %v3201_v39 = vsub.f32 2.0, %v3073_v47  ;;  %v2555_v34 = vrot.slane %v2554_v63, 2  ;;  %v6053_v2 = vpop.eup %6052  ;;  %v3076_v20 = vmul.f32 %v6051_v62, %v8441_v8  ;;  %v2548_v11 = vadd.f32 %v7457_v29, %v2547_v51 }
 0x2da   : > { %v8501_v16 = vmul.f32 %v10309_v41, %v3327_v31  ;;  %6064 = vrcp.f32 %v8494_v56  ;;  %v6055_v10 = vpop.eup %6054  ;;  %v3078_v6 = vmul.f32 %v6053_v2, %v8443_v5  ;;  %v2567_v40 = vrot.slane %v2566_v54, 2 }
 0x2db   : > { %v3329_v15 = vmul.f32 %v6049_v22, %v3201_v39  ;;  %v2556_v23 = vadd.f32 %v2555_v34, %v2554_v63  ;;  %v3204_v21 = vsub.f32 2.0, %v3076_v20  ;;  %v3075_v18 = vmul.f32 %v6055_v10, %v8447_v55 }
 0x2dc   : > { %10330 = vst [vmem:[#allocation105_spill] sm:$0xff] %v8501_v16  ;;  %3727 = vmatmul.mubr.f32.gmra.mxu0 %v8501_v16  ;;  %v2549_v1 = vrot.slane %v2548_v11, 2  ;;  %v2560_v41 = vadd.f32 %v7460_v60, %v2559_v58  ;;  %v3206_v25 = vsub.f32 2.0, %v3078_v6  ;;  %v2568_v47 = vadd.f32 %v2567_v40, %v2566_v54 }
 0x2dd   : > { %v6057_v42 = vpop.eup %6056  ;;  %v8511_v8 = vmul.f32 %v10311_v52, %v3329_v15  ;;  %v2557_v38 = vrot.slane %v2556_v23, 1  ;;  %v3332_v22 = vmul.f32 %v6051_v62, %v3204_v21  ;;  %v3203_v43 = vsub.f32 2.0, %v3075_v18 }
 0x2de   : > { %v3077_v5 = vmul.f32 %v6057_v42, %v8459_v44  ;;  %v2550_v63 = vadd.f32 %v2549_v1, %v2548_v11  ;;  %v3334_v31 = vmul.f32 %v6053_v2, %v3206_v25  ;;  %v2569_v55 = vrot.slane %v2568_v47, 1 }
 0x2df   : > { %10331 = vst [vmem:[#allocation106_spill] sm:$0xff] %v8511_v8  ;;  %3952 = vmatmul.mubr.f32.gmra.mxu1 %v8511_v8  ;;  %v8515_v51 = vadd.f32 %v2557_v38, %v2556_v23  ;;  %v2561_v39 = vrot.slane %v2560_v41, 2  ;;  %v8518_v58 = vmul.f32 %v10316_v7, %v3332_v22  ;;  %v3331_v52 = vmul.f32 %v6055_v10, %v3203_v43 }
 0x2e0   : > { %v3205_v34 = vsub.f32 2.0, %v3077_v5  ;;  %v2551_v20 = vrot.slane %v2550_v63, 1  ;;  %v8521_v54 = vmul.f32 %v10317_v9, %v3334_v31  ;;  %v8524_v44 = vadd.f32 %v2569_v55, %v2568_v47 }
 0x2e1   : > { %10332 = vst [vmem:[#allocation107_spill] sm:$0xff] %v8518_v58  ;;  %6066 = vrcp.f32 %v8515_v51  ;;  %v2562_v62 = vadd.f32 %v2561_v39, %v2560_v41  ;;  %v6059_v11 = vpop.eup %6058  ;;  %3731 = vmatprep.mubr.f32.mxu0 %v8518_v58  ;;  %v8528_v2 = vmul.f32 %v10318_v50, %v3331_v52  ;;  %v2578_v10 = vadd.f32 %v7567_v37, %v2577_v32 }
 0x2e2   : > { %10333 = vst [vmem:[#allocation108_spill] sm:$0xff] %v8521_v54  ;;  %v3333_v15 = vmul.f32 %v6057_v42, %v3205_v34  ;;  %v8530_v7 = vadd.f32 %v2551_v20, %v2550_v63  ;;  %v6061_v6 = vpop.eup %6060  ;;  %3956 = vmatprep.mubr.f32.mxu1 %v8521_v54  ;;  %v3080_v9 = vmul.f32 %v6059_v11, %v8467_v35  ;;  %6068 = vrcp.f32 %v8524_v44 }
 0x2e3   : > { %10334 = vst [vmem:[#allocation109_spill] sm:$0xff] %v8528_v2  ;;  %v2563_v23 = vrot.slane %v2562_v62, 1  ;;  %v2589_v40 = vrot.slane %v7578_v57, 4  ;;  %3732 = vmatmul.mubr.f32.gmra.mxu0 %v8528_v2  ;;  %v3082_v18 = vmul.f32 %v6061_v6, %v8469_v53  ;;  %v2579_v32 = vrot.slane %v2578_v10, 2 }
 0x2e4   : > { %v6063_v21 = vpop.eup %6062  ;;  %v8539_v50 = vmul.f32 %v10319_v24, %v3333_v15  ;;  %6070 = vrcp.f32 %v8530_v7  ;;  %v3208_v1 = vsub.f32 2.0, %v3080_v9  ;;  %v2571_v47 = vrot.slane %v7519_v28, 4 }
 0x2e5   : > { %v3079_v41 = vmul.f32 %v6063_v21, %v8480_v48  ;;  %v8544_v35 = vadd.f32 %v2563_v23, %v2562_v62  ;;  %v2590_v42 = vadd.f32 %v7578_v57, %v2589_v40  ;;  %v3210_v25 = vsub.f32 2.0, %v3082_v18 }
 0x2e6   : > { %10335 = vst [vmem:[#allocation110_spill] sm:$0xff] %v8539_v50  ;;  %3957 = vmatmul.mubr.f32.gmra.mxu1 %v8539_v50  ;;  %v2580_v38 = vadd.f32 %v2579_v32, %v2578_v10  ;;  %v2583_v24 = vrot.slane %v7540_v36, 4  ;;  %v3336_v53 = vmul.f32 %v6059_v11, %v3208_v1  ;;  %v2572_v55 = vadd.f32 %v7519_v28, %v2571_v47  ;;  %v10339_v32 = vld [vmem:[#allocation59_spill] sm:$0xff]  ;;  %v10341_v47 = vld [vmem:[#allocation61_spill] sm:$0xff] }
 0x2e7   : > { %v6065_v22 = vpop.eup %6064  ;;  %v3207_v43 = vsub.f32 2.0, %v3079_v41  ;;  %6072 = vrcp.f32 %v8544_v35  ;;  %v2591_v5 = vrot.slane %v2590_v42, 2  ;;  %v3338_v63 = vmul.f32 %v6061_v6, %v3210_v25 }
 0x2e8   : > { %v3081_v48 = vmul.f32 %v6065_v22, %v8494_v56  ;;  %v2581_v31 = vrot.slane %v2580_v38, 1  ;;  %v8554_v39 = vmul.f32 %v7437_v12, %v3336_v53  ;;  %v2584_v20 = vadd.f32 %v7540_v36, %v2583_v24 }
 0x2e9   : > { %v3335_v52 = vmul.f32 %v6063_v21, %v3207_v43  ;;  %v2592_v34 = vadd.f32 %v2591_v5, %v2590_v42  ;;  %v8558_v62 = vmul.f32 %v7439_v27, %v3338_v63  ;;  %v2573_v10 = vrot.slane %v2572_v55, 2 }
 0x2ea   : > { %10336 = vst [vmem:[#allocation111_spill] sm:$0xff] %v8554_v39  ;;  %v3209_v11 = vsub.f32 2.0, %v3081_v48  ;;  %v8560_v15 = vadd.f32 %v2581_v31, %v2580_v38  ;;  %3736 = vmatprep.mubr.f32.mxu0 %v8554_v39  ;;  %v2585_v9 = vrot.slane %v2584_v20, 2  ;;  %v2601_v12 = vrot.slane %v7627_v26, 4 }
 0x2eb   : > { %10337 = vst [vmem:[#allocation112_spill] sm:$0xff] %v8558_v62  ;;  %v8564_v56 = vmul.f32 %v10324_v17, %v3335_v52  ;;  %v2593_v6 = vrot.slane %v2592_v34, 1  ;;  %3961 = vmatprep.mubr.f32.mxu1 %v8558_v62  ;;  %v2574_v27 = vadd.f32 %v2573_v10, %v2572_v55  ;;  %v2613_v40 = vrot.slane %v7634_v14, 4 }
 0x2ec   : > { %v3337_v23 = vmul.f32 %v6065_v22, %v3209_v11  ;;  %6074 = vrcp.f32 %v8560_v15  ;;  %v2586_v18 = vadd.f32 %v2585_v9, %v2584_v20  ;;  %v2602_v17 = vadd.f32 %v7627_v26, %v2601_v12 }
 0x2ed   : > { %10338 = vst [vmem:[#allocation113_spill] sm:$0xff] %v8564_v56  ;;  %3737 = vmatmul.mubr.f32.gmra.mxu0 %v8564_v56  ;;  %v8571_v21 = vadd.f32 %v2593_v6, %v2592_v34  ;;  %v2595_v1 = vrot.slane %v10339_v32, 4  ;;  %v2575_v25 = vrot.slane %v2574_v27, 1  ;;  %v2614_v38 = vadd.f32 %v7634_v14, %v2613_v40 }
 0x2ee   : > { %v6067_v41 = vpop.eup %6066  ;;  %v8576_v42 = vmul.f32 %v10325_v45, %v3337_v23  ;;  %v2607_v24 = vrot.slane %v10341_v47, 4  ;;  %v2587_v53 = vrot.slane %v2586_v18, 1  ;;  %v2603_v43 = vrot.slane %v2602_v17, 2 }
 0x2ef   : > { %v3084_v22 = vmul.f32 %v6067_v41, %v8515_v51  ;;  %6076 = vrcp.f32 %v8571_v21  ;;  %v6069_v5 = vpop.eup %6068  ;;  %v8583_v63 = vadd.f32 %v2575_v25, %v2574_v27  ;;  %v2615_v48 = vrot.slane %v2614_v38, 2 }
 0x2f0   : > { %10340 = vst [vmem:[#allocation59_spill] sm:$0xff] %v8576_v42  ;;  %3962 = vmatmul.mubr.f32.gmra.mxu1 %v8576_v42  ;;  %v2596_v45 = vadd.f32 %v10339_v32, %v2595_v1  ;;  %v2608_v31 = vadd.f32 %v10341_v47, %v2607_v24  ;;  %v3086_v34 = vmul.f32 %v6069_v5, %v8524_v44 }
 0x2f1   : > { %v6071_v55 = vpop.eup %6070  ;;  %v3212_v52 = vsub.f32 2.0, %v3084_v22  ;;  %v8588_v20 = vadd.f32 %v2587_v53, %v2586_v18  ;;  %v2604_v51 = vadd.f32 %v2603_v43, %v2602_v17  ;;  %6078 = vrcp.f32 %v8583_v63 }
 0x2f2   : > { %v3083_v11 = vmul.f32 %v6071_v55, %v8530_v7  ;;  %v2616_v10 = vadd.f32 %v2615_v48, %v2614_v38  ;;  %v2597_v6 = vrot.slane %v2596_v45, 2  ;;  %v3214_v12 = vsub.f32 2.0, %v3086_v34 }
 0x2f3   : > { %v3340_v9 = vmul.f32 %v6067_v41, %v3212_v52  ;;  %6080 = vrcp.f32 %v8588_v20  ;;  %v2605_v23 = vrot.slane %v2604_v51, 1  ;;  %v2609_v24 = vrot.slane %v2608_v31, 2 }
 0x2f4   : > { %v6073_v27 = vpop.eup %6072  ;;  %v3211_v40 = vsub.f32 2.0, %v3083_v11  ;;  %v2617_v1 = vrot.slane %v2616_v10, 1  ;;  %v2598_v25 = vadd.f32 %v2597_v6, %v2596_v45  ;;  %v3342_v18 = vmul.f32 %v6069_v5, %v3214_v12 }
 0x2f5   : > { %v8594_v44 = vmul.f32 %v7503_v19, %v3340_v9  ;;  %v3085_v7 = vmul.f32 %v6073_v27, %v8544_v35  ;;  %v8597_v17 = vadd.f32 %v2605_v23, %v2604_v51  ;;  %v2610_v53 = vadd.f32 %v2609_v24, %v2608_v31 }
 0x2f6   : > { %v3339_v38 = vmul.f32 %v6071_v55, %v3211_v40  ;;  %v8599_v22 = vadd.f32 %v2617_v1, %v2616_v10  ;;  %v2599_v41 = vrot.slane %v2598_v25, 1  ;;  %v8603_v43 = vmul.f32 %v7508_v0, %v3342_v18  ;;  %v10346_v40 = vld [vmem:[#allocation71_spill] sm:$0xff] }
 0x2f7   : > { %10342 = vst [vmem:[#allocation61_spill] sm:$0xff] %v8594_v44  ;;  %3741 = vmatprep.mubr.f32.mxu0 %v8594_v44  ;;  %v3213_v48 = vsub.f32 2.0, %v3085_v7  ;;  %6082 = vrcp.f32 %v8597_v17  ;;  %v2625_v19 = vrot.slane %v7699_v3, 4  ;;  %v2611_v45 = vrot.slane %v2610_v53, 1 }
 0x2f8   : > { %10343 = vst [vmem:[#allocation114_spill] sm:$0xff] %v8603_v43  ;;  %v8608_v5 = vmul.f32 %v7457_v29, %v3339_v38  ;;  %6084 = vrcp.f32 %v8599_v22  ;;  %v8611_v35 = vadd.f32 %v2599_v41, %v2598_v25  ;;  %3966 = vmatprep.mubr.f32.mxu1 %v8603_v43  ;;  %v2637_v52 = vrot.slane %v7705_v4, 4 }
 0x2f9   : > { %v6075_v55 = vpop.eup %6074  ;;  %v3341_v31 = vmul.f32 %v6073_v27, %v3213_v48  ;;  %v2626_v0 = vadd.f32 %v7699_v3, %v2625_v19  ;;  %v2619_v34 = vrot.slane %v7672_v59, 4  ;;  %v8620_v51 = vadd.f32 %v2611_v45, %v2610_v53  ;;  %v10347_v53 = vld [vmem:[#allocation3_spill] sm:$0xff] }
 0x2fa   : > { %10344 = vst [vmem:[#allocation115_spill] sm:$0xff] %v8608_v5  ;;  %3742 = vmatmul.mubr.f32.gmra.mxu0 %v8608_v5  ;;  %v3088_v29 = vmul.f32 %v6075_v55, %v8560_v15  ;;  %6086 = vrcp.f32 %v8611_v35  ;;  %v2631_v11 = vrot.slane %v7685_v33, 4  ;;  %v2638_v9 = vadd.f32 %v7705_v4, %v2637_v52 }
 0x2fb   : > { %v8624_v10 = vmul.f32 %v7460_v60, %v3341_v31  ;;  %v2627_v6 = vrot.slane %v2626_v0, 2  ;;  %v2620_v12 = vadd.f32 %v7672_v59, %v2619_v34  ;;  %6088 = vrcp.f32 %v8620_v51 }
 0x2fc   : > { %v6077_v23 = vpop.eup %6076  ;;  %v3216_v27 = vsub.f32 2.0, %v3088_v29  ;;  %v2632_v15 = vadd.f32 %v7685_v33, %v2631_v11  ;;  %v2649_v1 = vrot.slane %v10346_v40, 4  ;;  %v2639_v60 = vrot.slane %v2638_v9, 2 }
 0x2fd   : > { %10345 = vst [vmem:[#allocation116_spill] sm:$0xff] %v8624_v10  ;;  %3967 = vmatmul.mubr.f32.gmra.mxu1 %v8624_v10  ;;  %v3090_v25 = vmul.f32 %v6077_v23, %v8571_v21  ;;  %v2628_v24 = vadd.f32 %v2627_v6, %v2626_v0  ;;  %v2621_v18 = vrot.slane %v2620_v12, 2  ;;  %v2661_v48 = vrot.slane %v10347_v53, 4 }
 0x2fe   : > { %v3344_v7 = vmul.f32 %v6075_v55, %v3216_v27  ;;  %v2633_v38 = vrot.slane %v2632_v15, 2  ;;  %v2650_v41 = vadd.f32 %v10346_v40, %v2649_v1  ;;  %v6079_v19 = vpop.eup %6078  ;;  %v2640_v52 = vadd.f32 %v2639_v60, %v2638_v9 }
 0x2ff   : > { %v3218_v45 = vsub.f32 2.0, %v3090_v25  ;;  %v2629_v31 = vrot.slane %v2628_v24, 1  ;;  %v2622_v34 = vadd.f32 %v2621_v18, %v2620_v12  ;;  %v3087_v21 = vmul.f32 %v6079_v19, %v8583_v63 }
 0x300   : > { %v6081_v29 = vpop.eup %6080  ;;  %v8636_v11 = vmul.f32 %v7567_v37, %v3344_v7  ;;  %v2634_v0 = vadd.f32 %v2633_v38, %v2632_v15  ;;  %v2651_v6 = vrot.slane %v2650_v41, 2  ;;  %v2641_v1 = vrot.slane %v2640_v52, 1 }
 0x301   : > { %v3346_v10 = vmul.f32 %v6077_v23, %v3218_v45  ;;  %v3089_v55 = vmul.f32 %v6081_v29, %v8588_v20  ;;  %v8640_v27 = vadd.f32 %v2629_v31, %v2628_v24  ;;  %v3215_v25 = vsub.f32 2.0, %v3087_v21 }
 0x302   : > { %10348 = vst [vmem:[#allocation71_spill] sm:$0xff] %v8636_v11  ;;  %3746 = vmatprep.mubr.f32.mxu0 %v8636_v11  ;;  %v2623_v5 = vrot.slane %v2622_v34, 1  ;;  %v2635_v9 = vrot.slane %v2634_v0, 1  ;;  %v2652_v12 = vadd.f32 %v2651_v6, %v2650_v41  ;;  %v8647_v63 = vadd.f32 %v2641_v1, %v2640_v52 }
 0x303   : > { %v8644_v60 = vmul.f32 %v7578_v57, %v3346_v10  ;;  %v3217_v37 = vsub.f32 2.0, %v3089_v55  ;;  %6090 = vrcp.f32 %v8640_v27  ;;  %v3343_v15 = vmul.f32 %v6079_v19, %v3215_v25  ;;  %v10354_v55 = vld [vmem:[#allocation7_spill] sm:$0xff] }
 0x304   : > { %v6083_v23 = vpop.eup %6082  ;;  %v8649_v20 = vadd.f32 %v2623_v5, %v2622_v34  ;;  %v8651_v24 = vadd.f32 %v2635_v9, %v2634_v0  ;;  %v2653_v18 = vrot.slane %v2652_v12, 1  ;;  %6092 = vrcp.f32 %v8647_v63 }
 0x305   : > { %10349 = vst [vmem:[#allocation3_spill] sm:$0xff] %v8644_v60  ;;  %v6085_v7 = vpop.eup %6084  ;;  %3971 = vmatprep.mubr.f32.mxu1 %v8644_v60  ;;  %v3345_v38 = vmul.f32 %v6081_v29, %v3217_v37  ;;  %v3092_v41 = vmul.f32 %v6083_v23, %v8597_v17  ;;  %v2662_v57 = vadd.f32 %v10347_v53, %v2661_v48  ;;  %v2673_v1 = vrot.slane %v10354_v55, 4 }
 0x306   : > { %v8658_v10 = vmul.f32 %v7519_v28, %v3343_v15  ;;  %v3094_v19 = vmul.f32 %v6085_v7, %v8599_v22  ;;  %6094 = vrcp.f32 %v8649_v20  ;;  %v8662_v5 = vadd.f32 %v2653_v18, %v2652_v12  ;;  %v10352_v22 = vld [vmem:[#allocation68_spill] sm:$0xff] }
 0x307   : > { %v6087_v45 = vpop.eup %6086  ;;  %v8665_v31 = vmul.f32 %v7540_v36, %v3345_v38  ;;  %v3220_v52 = vsub.f32 2.0, %v3092_v41  ;;  %6096 = vrcp.f32 %v8651_v24  ;;  %v2663_v17 = vrot.slane %v2662_v57, 2  ;;  %v10353_v36 = vld [vmem:[#allocation69_spill] sm:$0xff] }
 0x308   : > { %10350 = vst [vmem:[#allocation117_spill] sm:$0xff] %v8658_v10  ;;  %3747 = vmatmul.mubr.f32.gmra.mxu0 %v8658_v10  ;;  %v3222_v48 = vsub.f32 2.0, %v3094_v19  ;;  %v3091_v28 = vmul.f32 %v6087_v45, %v8611_v35  ;;  %6098 = vrcp.f32 %v8662_v5  ;;  %v2643_v34 = vrot.slane %v10352_v22, 4  ;;  %v6089_v29 = vpop.eup %6088 }
 0x309   : > { %10351 = vst [vmem:[#allocation118_spill] sm:$0xff] %v8665_v31  ;;  %3972 = vmatmul.mubr.f32.gmra.mxu1 %v8665_v31  ;;  %v3348_v21 = vmul.f32 %v6083_v23, %v3220_v52  ;;  %v2664_v0 = vadd.f32 %v2663_v17, %v2662_v57  ;;  %v2655_v6 = vrot.slane %v10353_v36, 4  ;;  %v3093_v12 = vmul.f32 %v6089_v29, %v8620_v51  ;;  %v10357_v17 = vld [vmem:[#allocation12_spill] sm:$0xff] }
 0x30a   : > { %v3350_v25 = vmul.f32 %v6085_v7, %v3222_v48  ;;  %v3219_v9 = vsub.f32 2.0, %v3091_v28  ;;  %v2644_v37 = vadd.f32 %v10352_v22, %v2643_v34  ;;  %v2674_v38 = vadd.f32 %v10354_v55, %v2673_v1 }
 0x30b   : > { %v8678_v35 = vmul.f32 %v7627_v26, %v3348_v21  ;;  %v2665_v15 = vrot.slane %v2664_v0, 1  ;;  %v2656_v18 = vadd.f32 %v10353_v36, %v2655_v6  ;;  %v3221_v57 = vsub.f32 2.0, %v3093_v12  ;;  %v10361_v12 = vld [vmem:[#allocation73_spill] sm:$0xff] }
 0x30c   : > { %v8683_v23 = vmul.f32 %v7634_v14, %v3350_v25  ;;  %v3347_v41 = vmul.f32 %v6087_v45, %v3219_v9  ;;  %v2645_v19 = vrot.slane %v2644_v37, 2  ;;  %v2675_v52 = vrot.slane %v2674_v38, 2  ;;  %v10359_v14 = vld [vmem:[#allocation9_spill] sm:$0xff] }
 0x30d   : > { %10355 = vst [vmem:[#allocation68_spill] sm:$0xff] %v8678_v35  ;;  %3751 = vmatprep.mubr.f32.mxu0 %v8678_v35  ;;  %v8686_v7 = vadd.f32 %v2665_v15, %v2664_v0  ;;  %v2657_v51 = vrot.slane %v2656_v18, 2  ;;  %v2685_v26 = vrot.slane %v10357_v17, 4  ;;  %v3349_v28 = vmul.f32 %v6089_v29, %v3221_v57  ;;  %v8704_v15 = vpop.f32.mrf.mxu1 }
 0x30e   : > { %10356 = vst [vmem:[#allocation69_spill] sm:$0xff] %v8683_v23  ;;  %3976 = vmatprep.mubr.f32.mxu1 %v8683_v23  ;;  %v8691_v48 = vmul.f32 %v10339_v32, %v3347_v41  ;;  %v2646_v34 = vadd.f32 %v2645_v19, %v2644_v37  ;;  %v2667_v21 = vrot.slane %v10359_v14, 4  ;;  %v2676_v6 = vadd.f32 %v2675_v52, %v2674_v38  ;;  %v8702_v37 = vpop.f32.mrf.mxu0 }
 0x30f   : > { %6100 = vrcp.f32 %v8686_v7  ;;  %v2658_v45 = vadd.f32 %v2657_v51, %v2656_v18  ;;  %v2686_v0 = vadd.f32 %v10357_v17, %v2685_v26  ;;  %v8698_v25 = vmul.f32 %v10341_v47, %v3349_v28  ;;  %v10362_v26 = vld [vmem:[#allocation11_spill] sm:$0xff] }
 0x310   : > { %10358 = vst [vmem:[#allocation7_spill] sm:$0xff] %v8691_v48  ;;  %v6091_v1 = vpop.eup %6090  ;;  %3752 = vmatmul.mubr.f32.gmra.mxu0 %v8691_v48  ;;  %v2647_v9 = vrot.slane %v2646_v34, 1  ;;  %v2668_v32 = vadd.f32 %v10359_v14, %v2667_v21  ;;  %v2679_v29 = vrot.slane %v10361_v12, 4  ;;  %v2677_v41 = vrot.slane %v2676_v6, 1  ;;  %v3655_v21 = vpop.f32.mrf.mxu0 }
 0x311   : > { %10360 = vst [vmem:[#allocation12_spill] sm:$0xff] %v8698_v25  ;;  %v3096_v18 = vmul.f32 %v6091_v1, %v8640_v27  ;;  %v2659_v38 = vrot.slane %v2658_v45, 1  ;;  %v2687_v57 = vrot.slane %v2686_v0, 2  ;;  %v6093_v19 = vpop.eup %6092  ;;  %3977 = vmatmul.mubr.f32.gmra.mxu1 %v8698_v25  ;;  %v2697_v28 = vrot.slane %v10362_v26, 4  ;;  %v3880_v48 = vpop.f32.mrf.mxu1 }
 0x312   : > { %v8708_v51 = vadd.f32 %v2647_v9, %v2646_v34  ;;  %v2669_v47 = vrot.slane %v2668_v32, 2  ;;  %v2680_v52 = vadd.f32 %v10361_v12, %v2679_v29  ;;  %v3098_v23 = vmul.f32 %v6093_v19, %v8647_v63  ;;  %v8719_v29 = vpop.f32.mrf.mxu0 }
 0x313   : > { %v6095_v31 = vpop.eup %6094  ;;  %v3224_v10 = vsub.f32 2.0, %v3096_v18  ;;  %v8713_v27 = vadd.f32 %v2659_v38, %v2658_v45  ;;  %v8715_v35 = vadd.f32 %v2677_v41, %v2676_v6  ;;  %v2688_v34 = vadd.f32 %v2687_v57, %v2686_v0  ;;  %v8721_v11 = vpop.f32.mrf.mxu1 }
 0x314   : > { %v6097_v60 = vpop.eup %6096  ;;  %v3095_v25 = vmul.f32 %v6095_v31, %v8649_v20  ;;  %6102 = vrcp.f32 %v8708_v51  ;;  %v2670_v9 = vadd.f32 %v2669_v47, %v2668_v32  ;;  %v3226_v18 = vsub.f32 2.0, %v3098_v23  ;;  %v3660_v38 = vpop.f32.mrf.mxu0 }
 0x315   : > { %v6099_v48 = vpop.eup %6098  ;;  %v3352_v21 = vmul.f32 %v6091_v1, %v3224_v10  ;;  %v3097_v63 = vmul.f32 %v6097_v60, %v8651_v24  ;;  %6104 = vrcp.f32 %v8713_v27  ;;  %v2689_v20 = vrot.slane %v2688_v34, 1  ;;  %v3885_v0 = vpop.f32.mrf.mxu1 }
 0x316   : > { %v3223_v45 = vsub.f32 2.0, %v3095_v25  ;;  %v3100_v6 = vmul.f32 %v6099_v48, %v8662_v5  ;;  %6106 = vrcp.f32 %v8715_v35  ;;  %v3354_v41 = vmul.f32 %v6093_v19, %v3226_v18  ;;  %v8732_v42 = vpop.f32.mrf.mxu0 }
 0x317   : > { %v8728_v32 = vmul.f32 %v7699_v3, %v3352_v21  ;;  %v3225_v57 = vsub.f32 2.0, %v3097_v63  ;;  %v2671_v47 = vrot.slane %v2670_v9, 1  ;;  %v8730_v1 = vadd.f32 %v2689_v20, %v2688_v34  ;;  %v8734_v25 = vpop.f32.mrf.mxu1  ;;  %v10370_v20 = vld [vmem:[#allocation77_spill] sm:$0xff] }
 0x318   : > { %v3351_v10 = vmul.f32 %v6095_v31, %v3223_v45  ;;  %v3228_v23 = vsub.f32 2.0, %v3100_v6  ;;  %v2681_v24 = vrot.slane %v2680_v52, 2  ;;  %v8738_v5 = vmul.f32 %v7705_v4, %v3354_v41  ;;  %v3665_v18 = vpop.f32.mrf.mxu0 }
 0x319   : > { %10363 = vst [vmem:[#allocation9_spill] sm:$0xff] %v8728_v32  ;;  %3756 = vmatprep.mubr.f32.mxu0 %v8728_v32  ;;  %v3353_v38 = vmul.f32 %v6097_v60, %v3225_v57  ;;  %v8740_v3 = vadd.f32 %v2671_v47, %v2670_v9  ;;  %v2698_v19 = vadd.f32 %v10362_v26, %v2697_v28  ;;  %6108 = vrcp.f32 %v8730_v1  ;;  %v3890_v63 = vpop.f32.mrf.mxu1  ;;  %v10367_v60 = vld [vmem:[#allocation16_spill] sm:$0xff]  ;;  %v10372_v18 = vld [vmem:[#allocation83_spill] sm:$0xff] }
 0x31a   : > { %10364 = vst [vmem:[#allocation73_spill] sm:$0xff] %v8738_v5  ;;  %v8744_v31 = vmul.f32 %v7672_v59, %v3351_v10  ;;  %v3356_v34 = vmul.f32 %v6099_v48, %v3228_v23  ;;  %v2682_v21 = vadd.f32 %v2681_v24, %v2680_v52  ;;  %3981 = vmatprep.mubr.f32.mxu1 %v8738_v5  ;;  %v2709_v9 = vrot.slane %v10367_v60, 4  ;;  %v10369_v52 = vld [vmem:[#allocation76_spill] sm:$0xff]  ;;  %v8759_v41 = vpop.f32.mrf.mxu0  ;;  %v10371_v23 = vld [vmem:[#allocation82_spill] sm:$0xff] }
 0x31b   : > { %v8749_v45 = vmul.f32 %v7685_v33, %v3353_v38  ;;  %6110 = vrcp.f32 %v8740_v3  ;;  %v2699_v4 = vrot.slane %v2698_v19, 2  ;;  %v2691_v6 = vrot.slane %v10369_v52, 4  ;;  %v8761_v33 = vpop.f32.mrf.mxu1 }
 0x31c   : > { %10365 = vst [vmem:[#allocation11_spill] sm:$0xff] %v8744_v31  ;;  %v6101_v28 = vpop.eup %6100  ;;  %3757 = vmatmul.mubr.f32.gmra.mxu0 %v8744_v31  ;;  %v8755_v59 = vmul.f32 %v10346_v40, %v3356_v34  ;;  %v2683_v48 = vrot.slane %v2682_v21, 1  ;;  %v2703_v0 = vrot.slane %v10370_v20, 4  ;;  %v2710_v10 = vadd.f32 %v10367_v60, %v2709_v9  ;;  %v3670_v31 = vpop.f32.mrf.mxu0 }
 0x31d   : > { %10366 = vst [vmem:[#allocation119_spill] sm:$0xff] %v8749_v45  ;;  %3982 = vmatmul.mubr.f32.gmra.mxu1 %v8749_v45  ;;  %v3102_v57 = vmul.f32 %v6101_v28, %v8686_v7  ;;  %v2700_v47 = vadd.f32 %v2699_v4, %v2698_v19  ;;  %v2721_v24 = vrot.slane %v10371_v23, 4  ;;  %v2692_v38 = vadd.f32 %v10369_v52, %v2691_v6  ;;  %v3895_v5 = vpop.f32.mrf.mxu1 }
 0x31e   : > { %10368 = vst [vmem:[#allocation16_spill] sm:$0xff] %v8755_v59  ;;  %3761 = vmatprep.mubr.f32.mxu0 %v8755_v59  ;;  %v8768_v40 = vadd.f32 %v2683_v48, %v2682_v21  ;;  %v2704_v34 = vadd.f32 %v10370_v20, %v2703_v0  ;;  %v2733_v63 = vrot.slane %v10372_v18, 4  ;;  %v2711_v7 = vrot.slane %v2710_v10, 2  ;;  %v8776_v48 = vpop.f32.mrf.mxu0 }
 0x31f   : > { %v3230_v45 = vsub.f32 2.0, %v3102_v57  ;;  %v2701_v32 = vrot.slane %v2700_v47, 1  ;;  %v2722_v19 = vadd.f32 %v10371_v23, %v2721_v24  ;;  %v2693_v4 = vrot.slane %v2692_v38, 2  ;;  %v8778_v6 = vpop.f32.mrf.mxu1 }
 0x320   : > { %6112 = vrcp.f32 %v8768_v40  ;;  %v2705_v9 = vrot.slane %v2704_v34, 2  ;;  %v2734_v21 = vadd.f32 %v10372_v18, %v2733_v63  ;;  %v2712_v5 = vadd.f32 %v2711_v7, %v2710_v10  ;;  %v3675_v2 = vpop.f32.mrf.mxu0 }
 0x321   : > { %v6103_v0 = vpop.eup %6102  ;;  %v3358_v59 = vmul.f32 %v6101_v28, %v3230_v45  ;;  %v8780_v56 = vadd.f32 %v2701_v32, %v2700_v47  ;;  %v2723_v31 = vrot.slane %v2722_v19, 2  ;;  %v2694_v24 = vadd.f32 %v2693_v4, %v2692_v38  ;;  %v3900_v62 = vpop.f32.mrf.mxu1 }
 0x322   : > { %v6105_v57 = vpop.eup %6104  ;;  %v3099_v43 = vmul.f32 %v6103_v0, %v8708_v51  ;;  %v2706_v44 = vadd.f32 %v2705_v9, %v2704_v34  ;;  %v2735_v50 = vrot.slane %v2734_v21, 2  ;;  %v2713_v32 = vrot.slane %v2712_v5, 1  ;;  %v8789_v51 = vpop.f32.mrf.mxu0 }
 0x323   : > { %v6107_v39 = vpop.eup %6106  ;;  %v8784_v63 = vmul.f32 %v10347_v53, %v3358_v59  ;;  %v3101_v8 = vmul.f32 %v6105_v57, %v8713_v27  ;;  %6114 = vrcp.f32 %v8780_v56  ;;  %v2695_v47 = vrot.slane %v2694_v24, 1  ;;  %v8791_v38 = vpop.f32.mrf.mxu1 }
 0x324   : > { %v3227_v45 = vsub.f32 2.0, %v3099_v43  ;;  %v3104_v28 = vmul.f32 %v6107_v39, %v8715_v35  ;;  %v2707_v10 = vrot.slane %v2706_v44, 1  ;;  %v8794_v62 = vadd.f32 %v2713_v32, %v2712_v5  ;;  %v3680_v35 = vpop.f32.mrf.mxu0 }
 0x325   : > { %10373 = vst [vmem:[#allocation76_spill] sm:$0xff] %v8784_v63  ;;  %3986 = vmatprep.mubr.f32.mxu1 %v8784_v63  ;;  %v3229_v2 = vsub.f32 2.0, %v3101_v8  ;;  %v2724_v53 = vadd.f32 %v2723_v31, %v2722_v19  ;;  %v2736_v59 = vadd.f32 %v2735_v50, %v2734_v21  ;;  %v8796_v7 = vadd.f32 %v2695_v47, %v2694_v24  ;;  %v3905_v4 = vpop.f32.mrf.mxu1  ;;  %v10382_v47 = vld [vmem:[#allocation19_spill] sm:$0xff] }
 0x326   : > { %v3355_v27 = vmul.f32 %v6103_v0, %v3227_v45  ;;  %v3232_v34 = vsub.f32 2.0, %v3104_v28  ;;  %v8798_v43 = vadd.f32 %v2707_v10, %v2706_v44  ;;  %v6109_v9 = vpop.eup %6108  ;;  %6116 = vrcp.f32 %v8794_v62  ;;  %v8806_v21 = vpop.f32.mrf.mxu0  ;;  %v10385_v4 = vld [vmem:[#allocation20_spill] sm:$0xff] }
 0x327   : > { %v3357_v16 = vmul.f32 %v6105_v57, %v3229_v2  ;;  %v2725_v54 = vrot.slane %v2724_v53, 1  ;;  %v2737_v58 = vrot.slane %v2736_v59, 1  ;;  %v3106_v50 = vmul.f32 %v6109_v9, %v8730_v1  ;;  %10375 = vst [vmem:[#allocation82_spill] sm:$0xff] %v8806_v21  ;;  %v8808_v44 = vpop.f32.mrf.mxu1  ;;  %v10379_v57 = vld [vmem:[#allocation81_spill] sm:$0xff] }
 0x328   : > { %v6111_v63 = vpop.eup %6110  ;;  %v8802_v8 = vmul.f32 %v10352_v22, %v3355_v27  ;;  %v3360_v19 = vmul.f32 %v6107_v39, %v3232_v34  ;;  %6118 = vrcp.f32 %v8796_v7  ;;  %10376 = vst [vmem:[#allocation83_spill] sm:$0xff] %v8808_v44  ;;  %v2715_v24 = vrot.slane %v10379_v57, 4  ;;  %v3685_v32 = vpop.f32.mrf.mxu0 }
 0x329   : > { %v8811_v0 = vmul.f32 %v10353_v36, %v3357_v16  ;;  %v3103_v5 = vmul.f32 %v6111_v63, %v8740_v3  ;;  %6120 = vrcp.f32 %v8798_v43  ;;  %v8815_v31 = vadd.f32 %v2725_v54, %v2724_v53  ;;  %v3910_v45 = vpop.f32.mrf.mxu1  ;;  %v10380_v36 = vld [vmem:[#allocation17_spill] sm:$0xff]  ;;  %v10381_v3 = vld [vmem:[#allocation86_spill] sm:$0xff] }
 0x32a   : > { %10374 = vst [vmem:[#allocation77_spill] sm:$0xff] %v8802_v8  ;;  %3762 = vmatmul.mubr.f32.gmra.mxu0 %v8802_v8  ;;  %v8819_v39 = vmul.f32 %v10354_v55, %v3360_v19  ;;  %v3234_v22 = vsub.f32 2.0, %v3106_v50  ;;  %v8821_v1 = vadd.f32 %v2737_v58, %v2736_v59  ;;  %v2727_v54 = vrot.slane %v10380_v36, 4  ;;  %v8832_v2 = vpop.f32.mrf.mxu0 }
 0x32b   : > { %10377 = vst [vmem:[#allocation120_spill] sm:$0xff] %v8811_v0  ;;  %3987 = vmatmul.mubr.f32.gmra.mxu1 %v8811_v0  ;;  %v3231_v16 = vsub.f32 2.0, %v3103_v5  ;;  %6122 = vrcp.f32 %v8815_v31  ;;  %v2745_v28 = vrot.slane %v10381_v3, 4  ;;  %v2716_v58 = vadd.f32 %v10379_v57, %v2715_v24  ;;  %10383 = vst [vmem:[#allocation81_spill] sm:$0xff] %v8832_v2  ;;  %v8834_v53 = vpop.f32.mrf.mxu1  ;;  %v10388_v0 = vld [vmem:[#allocation18_spill] sm:$0xff] }
 0x32c   : > { %10378 = vst [vmem:[#allocation121_spill] sm:$0xff] %v8819_v39  ;;  %3766 = vmatprep.mubr.f32.mxu0 %v8819_v39  ;;  %v3362_v55 = vmul.f32 %v6109_v9, %v3234_v22  ;;  %6124 = vrcp.f32 %v8821_v1  ;;  %v2757_v10 = vrot.slane %v10382_v47, 4  ;;  %10384 = vst [vmem:[#allocation17_spill] sm:$0xff] %v8834_v53  ;;  %v2728_v34 = vadd.f32 %v10380_v36, %v2727_v54  ;;  %v3690_v24 = vpop.f32.mrf.mxu0 }
 0x32d   : > { %v6113_v59 = vpop.eup %6112  ;;  %v3359_v27 = vmul.f32 %v6111_v63, %v3231_v16  ;;  %v2746_v35 = vadd.f32 %v10381_v3, %v2745_v28  ;;  %v2739_v19 = vrot.slane %v10385_v4, 4  ;;  %v2717_v5 = vrot.slane %v2716_v58, 2  ;;  %v3915_v32 = vpop.f32.mrf.mxu1 }
 0x32e   : > { %v8840_v9 = vmul.f32 %v10357_v17, %v3362_v55  ;;  %v3105_v50 = vmul.f32 %v6113_v59, %v8768_v40  ;;  %v2758_v22 = vadd.f32 %v10382_v47, %v2757_v10  ;;  %v2729_v63 = vrot.slane %v2728_v34, 2  ;;  %v8850_v8 = vpop.f32.mrf.mxu0 }
 0x32f   : > { %v8845_v45 = vmul.f32 %v10359_v14, %v3359_v27  ;;  %v2747_v16 = vrot.slane %v2746_v35, 2  ;;  %v2740_v54 = vadd.f32 %v10385_v4, %v2739_v19  ;;  %v2718_v17 = vadd.f32 %v2717_v5, %v2716_v58  ;;  %10389 = vst [vmem:[#allocation20_spill] sm:$0xff] %v8850_v8  ;;  %v8852_v10 = vpop.f32.mrf.mxu1 }
 0x330   : > { %10386 = vst [vmem:[#allocation86_spill] sm:$0xff] %v8840_v9  ;;  %v6115_v28 = vpop.eup %6114  ;;  %3991 = vmatprep.mubr.f32.mxu1 %v8840_v9  ;;  %v3233_v39 = vsub.f32 2.0, %v3105_v50  ;;  %v2759_v55 = vrot.slane %v2758_v22, 2  ;;  %v2751_v40 = vrot.slane %v10388_v0, 4  ;;  %10390 = vst [vmem:[#allocation18_spill] sm:$0xff] %v8852_v10  ;;  %v2730_v27 = vadd.f32 %v2729_v63, %v2728_v34  ;;  %v3695_v58 = vpop.f32.mrf.mxu0 }
 0x331   : > { %10387 = vst [vmem:[#allocation19_spill] sm:$0xff] %v8845_v45  ;;  %3767 = vmatmul.mubr.f32.gmra.mxu0 %v8845_v45  ;;  %v3108_v14 = vmul.f32 %v6115_v28, %v8780_v56  ;;  %v2748_v24 = vadd.f32 %v2747_v16, %v2746_v35  ;;  %v2741_v32 = vrot.slane %v2740_v54, 2  ;;  %v2719_v13 = vrot.slane %v2718_v17, 1  ;;  %v3920_v5 = vpop.f32.mrf.mxu1 }
 0x332   : > { %v3361_v19 = vmul.f32 %v6113_v59, %v3233_v39  ;;  %v2760_v30 = vadd.f32 %v2759_v55, %v2758_v22  ;;  %v2752_v50 = vadd.f32 %v10388_v0, %v2751_v40  ;;  %v2731_v49 = vrot.slane %v2730_v27, 1  ;;  %v8862_v35 = vpop.f32.mrf.mxu0 }
 0x333   : > { %v3236_v9 = vsub.f32 2.0, %v3108_v14  ;;  %v2749_v61 = vrot.slane %v2748_v24, 1  ;;  %v2742_v53 = vadd.f32 %v2741_v32, %v2740_v54  ;;  %v6117_v8 = vpop.eup %6116  ;;  %v8860_v45 = vadd.f32 %v2719_v13, %v2718_v17  ;;  %10392 = vst [vmem:[#allocation123_spill] sm:$0xff] %v8862_v35  ;;  %v8864_v39 = vpop.f32.mrf.mxu1 }
 0x334   : > { %v8858_v10 = vmul.f32 %v10361_v12, %v3361_v19  ;;  %v2761_v56 = vrot.slane %v2760_v30, 1  ;;  %v2753_v34 = vrot.slane %v2752_v50, 2  ;;  %10393 = vst [vmem:[#allocation124_spill] sm:$0xff] %v8864_v39  ;;  %v3110_v63 = vmul.f32 %v6117_v8, %v8794_v62  ;;  %v3700_v40 = vpop.f32.mrf.mxu0 }
 0x335   : > { %v6119_v59 = vpop.eup %6118  ;;  %v3364_v22 = vmul.f32 %v6115_v28, %v3236_v9  ;;  %v8867_v16 = vadd.f32 %v2731_v49, %v2730_v27  ;;  %v8869_v55 = vadd.f32 %v2749_v61, %v2748_v24  ;;  %6126 = vrcp.f32 %v8860_v45  ;;  %v3925_v14 = vpop.f32.mrf.mxu1 }
 0x336   : > { %10391 = vst [vmem:[#allocation122_spill] sm:$0xff] %v8858_v10  ;;  %v6121_v54 = vpop.eup %6120  ;;  %3992 = vmatmul.mubr.f32.gmra.mxu1 %v8858_v10  ;;  %v3107_v13 = vmul.f32 %v6119_v59, %v8796_v7  ;;  %v8874_v12 = vadd.f32 %v2761_v56, %v2760_v30  ;;  %v2743_v17 = vrot.slane %v2742_v53, 1  ;;  %v3238_v62 = vsub.f32 2.0, %v3110_v63  ;;  %v10396_v56 = vld [vmem:[#allocation22_spill] sm:$0xff]  ;;  %v10398_v63 = vld [vmem:[#allocation23_spill] sm:$0xff]  ;;  %v10401_v14 = vld [vmem:[#allocation89_spill] sm:$0xff] }
 0x337   : > { %v8877_v9 = vmul.f32 %v10362_v26, %v3364_v22  ;;  %v3109_v49 = vmul.f32 %v6121_v54, %v8798_v43  ;;  %6128 = vrcp.f32 %v8867_v16  ;;  %v2754_v27 = vadd.f32 %v2753_v34, %v2752_v50 }
 0x338   : > { %v6123_v61 = vpop.eup %6122  ;;  %v3235_v28 = vsub.f32 2.0, %v3107_v13  ;;  %6130 = vrcp.f32 %v8869_v55  ;;  %v8882_v7 = vadd.f32 %v2743_v17, %v2742_v53  ;;  %v3366_v24 = vmul.f32 %v6117_v8, %v3238_v62 }
 0x339   : > { %10394 = vst [vmem:[#allocation125_spill] sm:$0xff] %v8877_v9  ;;  %v6125_v30 = vpop.eup %6124  ;;  %3771 = vmatprep.mubr.f32.mxu0 %v8877_v9  ;;  %v3237_v32 = vsub.f32 2.0, %v3109_v49  ;;  %v3112_v26 = vmul.f32 %v6123_v61, %v8815_v31  ;;  %6132 = vrcp.f32 %v8874_v12  ;;  %v2755_v58 = vrot.slane %v2754_v27, 1 }
 0x33a   : > { %v3363_v19 = vmul.f32 %v6119_v59, %v3235_v28  ;;  %v3114_v43 = vmul.f32 %v6125_v30, %v8821_v1  ;;  %6134 = vrcp.f32 %v8882_v7  ;;  %v8890_v5 = vmul.f32 %v10367_v60, %v3366_v24  ;;  %v10403_v28 = vld [vmem:[#allocation27_spill] sm:$0xff] }
 0x33b   : > { %v3365_v53 = vmul.f32 %v6121_v54, %v3237_v32  ;;  %v3240_v50 = vsub.f32 2.0, %v3112_v26  ;;  %v2769_v34 = vrot.slane %v10396_v56, 4  ;;  %v8896_v31 = vadd.f32 %v2755_v58, %v2754_v27  ;;  %v10400_v54 = vld [vmem:[#allocation25_spill] sm:$0xff]  ;;  %v10405_v26 = vld [vmem:[#allocation32_spill] sm:$0xff] }
 0x33c   : > { %10395 = vst [vmem:[#allocation126_spill] sm:$0xff] %v8890_v5  ;;  %v8894_v8 = vmul.f32 %v10369_v52, %v3363_v19  ;;  %v3242_v22 = vsub.f32 2.0, %v3114_v43  ;;  %v2781_v59 = vrot.slane %v10398_v63, 4  ;;  %3996 = vmatprep.mubr.f32.mxu1 %v8890_v5  ;;  %v2763_v17 = vrot.slane %v10400_v54, 4 }
 0x33d   : > { %v8901_v1 = vmul.f32 %v10370_v20, %v3365_v53  ;;  %v3368_v13 = vmul.f32 %v6123_v61, %v3240_v50  ;;  %v2770_v60 = vadd.f32 %v10396_v56, %v2769_v34  ;;  %6136 = vrcp.f32 %v8896_v31  ;;  %v10406_v50 = vld [vmem:[#allocation29_spill] sm:$0xff] }
 0x33e   : > { %10397 = vst [vmem:[#allocation22_spill] sm:$0xff] %v8894_v8  ;;  %3772 = vmatmul.mubr.f32.gmra.mxu0 %v8894_v8  ;;  %v3370_v40 = vmul.f32 %v6125_v30, %v3242_v22  ;;  %v2782_v52 = vadd.f32 %v10398_v63, %v2781_v59  ;;  %v2775_v62 = vrot.slane %v10401_v14, 4  ;;  %v2764_v61 = vadd.f32 %v10400_v54, %v2763_v17  ;;  %v8920_v43 = vpop.f32.mrf.mxu0 }
 0x33f   : > { %10399 = vst [vmem:[#allocation23_spill] sm:$0xff] %v8901_v1  ;;  %3997 = vmatmul.mubr.f32.gmra.mxu1 %v8901_v1  ;;  %v8911_v49 = vmul.f32 %v10371_v23, %v3368_v13  ;;  %v2771_v20 = vrot.slane %v2770_v60, 2  ;;  %v2793_v27 = vrot.slane %v10403_v28, 4  ;;  %v2805_v19 = vrot.slane %v10405_v26, 4  ;;  %v10407_v13 = vld [vmem:[#allocation93_spill] sm:$0xff] }
 0x340   : > { %v8916_v24 = vmul.f32 %v10372_v18, %v3370_v40  ;;  %v2783_v30 = vrot.slane %v2782_v52, 2  ;;  %v2776_v32 = vadd.f32 %v10401_v14, %v2775_v62  ;;  %v2765_v23 = vrot.slane %v2764_v61, 2  ;;  %v3705_v40 = vpop.f32.mrf.mxu0 }
 0x341   : > { %10402 = vst [vmem:[#allocation25_spill] sm:$0xff] %v8911_v49  ;;  %3776 = vmatprep.mubr.f32.mxu0 %v8911_v49  ;;  %v2772_v58 = vadd.f32 %v2771_v20, %v2770_v60  ;;  %v2794_v53 = vadd.f32 %v10403_v28, %v2793_v27  ;;  %v2787_v34 = vrot.slane %v10406_v50, 4  ;;  %v2806_v59 = vadd.f32 %v10405_v26, %v2805_v19  ;;  %v8929_v20 = vpop.f32.mrf.mxu1 }
 0x342   : > { %10404 = vst [vmem:[#allocation89_spill] sm:$0xff] %v8916_v24  ;;  %4001 = vmatprep.mubr.f32.mxu1 %v8916_v24  ;;  %v2784_v22 = vadd.f32 %v2783_v30, %v2782_v52  ;;  %v2777_v18 = vrot.slane %v2776_v32, 2  ;;  %v2799_v17 = vrot.slane %v10407_v13, 4  ;;  %v6127_v62 = vpop.eup %6126  ;;  %v2766_v8 = vadd.f32 %v2765_v23, %v2764_v61 }
 0x343   : > { %v2773_v1 = vrot.slane %v2772_v58, 1  ;;  %v2795_v5 = vrot.slane %v2794_v53, 2  ;;  %v2788_v60 = vadd.f32 %v10406_v50, %v2787_v34  ;;  %v3111_v49 = vmul.f32 %v6127_v62, %v8860_v45  ;;  %v3930_v35 = vpop.f32.mrf.mxu1 }
 0x344   : > { %v6129_v27 = vpop.eup %6128  ;;  %v2785_v9 = vrot.slane %v2784_v22, 1  ;;  %v2778_v24 = vadd.f32 %v2777_v18, %v2776_v32  ;;  %v2807_v52 = vrot.slane %v2806_v59, 2  ;;  %v2767_v40 = vrot.slane %v2766_v8, 1 }
 0x345   : > { %v6131_v30 = vpop.eup %6130  ;;  %v3113_v19 = vmul.f32 %v6129_v27, %v8867_v16  ;;  %v8933_v10 = vadd.f32 %v2773_v1, %v2772_v58  ;;  %v2796_v39 = vadd.f32 %v2795_v5, %v2794_v53  ;;  %v3239_v23 = vsub.f32 2.0, %v3111_v49 }
 0x346   : > { %v6133_v61 = vpop.eup %6132  ;;  %v3116_v34 = vmul.f32 %v6131_v30, %v8869_v55  ;;  %v8936_v2 = vadd.f32 %v2785_v9, %v2784_v22  ;;  %v2779_v44 = vrot.slane %v2778_v24, 1  ;;  %v8940_v18 = vadd.f32 %v2767_v40, %v2766_v8 }
 0x347   : > { %v6135_v21 = vpop.eup %6134  ;;  %v3241_v45 = vsub.f32 2.0, %v3113_v19  ;;  %v3118_v32 = vmul.f32 %v6133_v61, %v8874_v12  ;;  %6138 = vrcp.f32 %v8933_v10  ;;  %v3367_v16 = vmul.f32 %v6127_v62, %v3239_v23 }
 0x348   : > { %v3244_v1 = vsub.f32 2.0, %v3116_v34  ;;  %v3115_v5 = vmul.f32 %v6135_v21, %v8882_v7  ;;  %6140 = vrcp.f32 %v8936_v2  ;;  %v8945_v55 = vadd.f32 %v2779_v44, %v2778_v24 }
 0x349   : > { %v3369_v35 = vmul.f32 %v6129_v27, %v3241_v45  ;;  %v3246_v49 = vsub.f32 2.0, %v3118_v32  ;;  %6142 = vrcp.f32 %v8940_v18  ;;  %v8948_v9 = vmul.f32 %v10379_v57, %v3367_v16  ;;  %v10414_v45 = vld [vmem:[#allocation96_spill] sm:$0xff] }
 0x34a   : > { %v3372_v12 = vmul.f32 %v6131_v30, %v3244_v1  ;;  %v3243_v58 = vsub.f32 2.0, %v3115_v5  ;;  %v2797_v53 = vrot.slane %v2796_v39, 1  ;;  %v6137_v8 = vpop.eup %6136  ;;  %6144 = vrcp.f32 %v8945_v55 }
 0x34b   : > { %v8951_v22 = vmul.f32 %v10380_v36, %v3369_v35  ;;  %v3374_v62 = vmul.f32 %v6133_v61, %v3246_v49  ;;  %v2808_v7 = vadd.f32 %v2807_v52, %v2806_v59  ;;  %3777 = vmatmul.mubr.f32.gmra.mxu0 %v8948_v9  ;;  %v3117_v57 = vmul.f32 %v6137_v8, %v8896_v31  ;;  %v10412_v52 = vld [vmem:[#allocation31_spill] sm:$0xff] }
 0x34c   : > { %v8956_v27 = vmul.f32 %v10381_v3, %v3372_v12  ;;  %v3371_v44 = vmul.f32 %v6135_v21, %v3243_v58  ;;  %v8959_v24 = vadd.f32 %v2797_v53, %v2796_v39  ;;  %v2789_v19 = vrot.slane %v2788_v60, 2 }
 0x34d   : > { %10408 = vst [vmem:[#allocation27_spill] sm:$0xff] %v8951_v22  ;;  %4002 = vmatmul.mubr.f32.gmra.mxu1 %v8951_v22  ;;  %v8963_v30 = vmul.f32 %v10382_v47, %v3374_v62  ;;  %v2809_v36 = vrot.slane %v2808_v7, 1  ;;  %v2800_v40 = vadd.f32 %v10407_v13, %v2799_v17  ;;  %v3245_v3 = vsub.f32 2.0, %v3117_v57  ;;  %v10416_v62 = vld [vmem:[#allocation35_spill] sm:$0xff] }
 0x34e   : > { %10409 = vst [vmem:[#allocation32_spill] sm:$0xff] %v8956_v27  ;;  %3781 = vmatprep.mubr.f32.mxu0 %v8956_v27  ;;  %v8968_v59 = vmul.f32 %v10385_v4, %v3371_v44  ;;  %6146 = vrcp.f32 %v8959_v24  ;;  %v2817_v21 = vrot.slane %v8295_v46, 4  ;;  %v2790_v47 = vadd.f32 %v2789_v19, %v2788_v60  ;;  %v10413_v4 = vld [vmem:[#allocation33_spill] sm:$0xff] }
 0x34f   : > { %10410 = vst [vmem:[#allocation29_spill] sm:$0xff] %v8963_v30  ;;  %4006 = vmatprep.mubr.f32.mxu1 %v8963_v30  ;;  %v8973_v39 = vadd.f32 %v2809_v36, %v2808_v7  ;;  %v2801_v31 = vrot.slane %v2800_v40, 2  ;;  %v2829_v61 = vrot.slane %v10412_v52, 4  ;;  %v3373_v17 = vmul.f32 %v6137_v8, %v3245_v3 }
 0x350   : > { %10411 = vst [vmem:[#allocation93_spill] sm:$0xff] %v8968_v59  ;;  %3782 = vmatmul.mubr.f32.gmra.mxu0 %v8968_v59  ;;  %v2818_v23 = vadd.f32 %v8295_v46, %v2817_v21  ;;  %v2811_v34 = vrot.slane %v10413_v4, 4  ;;  %v2823_v32 = vrot.slane %v10414_v45, 4  ;;  %v2791_v16 = vrot.slane %v2790_v47, 1 }
 0x351   : > { %6148 = vrcp.f32 %v8973_v39  ;;  %v2802_v1 = vadd.f32 %v2801_v31, %v2800_v40  ;;  %v2830_v5 = vadd.f32 %v10412_v52, %v2829_v61  ;;  %v8983_v60 = vmul.f32 %v10388_v0, %v3373_v17  ;;  %v10417_v40 = vld [vmem:[#allocation40_spill] sm:$0xff] }
 0x352   : > { %v2819_v35 = vrot.slane %v2818_v23, 2  ;;  %v2812_v49 = vadd.f32 %v10413_v4, %v2811_v34  ;;  %v2824_v12 = vadd.f32 %v10414_v45, %v2823_v32  ;;  %v8987_v58 = vadd.f32 %v2791_v16, %v2790_v47 }
 0x353   : > { %10415 = vst [vmem:[#allocation31_spill] sm:$0xff] %v8983_v60  ;;  %v2803_v53 = vrot.slane %v2802_v1, 1  ;;  %v2831_v8 = vrot.slane %v2830_v5, 2  ;;  %v2841_v7 = vrot.slane %v10416_v62, 4  ;;  %4007 = vmatmul.mubr.f32.gmra.mxu1 %v8983_v60  ;;  %v2853_v0 = vrot.slane %v10417_v40, 4 }
 0x354   : > { %v6139_v44 = vpop.eup %6138  ;;  %v2820_v57 = vadd.f32 %v2819_v35, %v2818_v23  ;;  %v2813_v36 = vrot.slane %v2812_v49, 2  ;;  %v2825_v19 = vrot.slane %v2824_v12, 2  ;;  %6150 = vrcp.f32 %v8987_v58 }
 0x355   : > { %v6141_v3 = vpop.eup %6140  ;;  %v3120_v21 = vmul.f32 %v6139_v44, %v8933_v10  ;;  %v8994_v31 = vadd.f32 %v2803_v53, %v2802_v1  ;;  %v2832_v47 = vadd.f32 %v2831_v8, %v2830_v5  ;;  %v8997_v60 = vpop.f32.mrf.mxu0 }
 0x356   : > { %v6143_v61 = vpop.eup %6142  ;;  %v3122_v17 = vmul.f32 %v6141_v3, %v8936_v2  ;;  %v2821_v34 = vrot.slane %v2820_v57, 1  ;;  %v2814_v32 = vadd.f32 %v2813_v36, %v2812_v49  ;;  %v2826_v16 = vadd.f32 %v2825_v19, %v2824_v12  ;;  %v9001_v10 = vpop.f32.mrf.mxu1 }
 0x357   : > { %v3248_v23 = vsub.f32 2.0, %v3120_v21  ;;  %v3119_v35 = vmul.f32 %v6143_v61, %v8940_v18  ;;  %6152 = vrcp.f32 %v8994_v31  ;;  %v2833_v59 = vrot.slane %v2832_v47, 1  ;;  %v6145_v30 = vpop.eup %6144  ;;  %v3710_v2 = vpop.f32.mrf.mxu0 }
 0x358   : > { %v3250_v1 = vsub.f32 2.0, %v3122_v17  ;;  %v9003_v53 = vadd.f32 %v2821_v34, %v2820_v57  ;;  %v2815_v5 = vrot.slane %v2814_v32, 1  ;;  %v2827_v8 = vrot.slane %v2826_v16, 1  ;;  %v3935_v19 = vpop.f32.mrf.mxu1 }
 0x359   : > { %v3376_v27 = vmul.f32 %v6139_v44, %v3248_v23  ;;  %v3247_v49 = vsub.f32 2.0, %v3119_v35  ;;  %v3121_v12 = vmul.f32 %v6145_v30, %v8945_v55  ;;  %v9006_v36 = vadd.f32 %v2833_v59, %v2832_v47  ;;  %v10422_v35 = vld [vmem:[#allocation45_spill] sm:$0xff] }
 0x35a   : > { %v3378_v18 = vmul.f32 %v6141_v3, %v3250_v1  ;;  %6154 = vrcp.f32 %v9003_v53  ;;  %v9009_v21 = vadd.f32 %v2815_v5, %v2814_v32  ;;  %v9011_v22 = vadd.f32 %v2827_v8, %v2826_v16  ;;  %v10420_v16 = vld [vmem:[#allocation37_spill] sm:$0xff] }
 0x35b   : > { %v6147_v17 = vpop.eup %6146  ;;  %v9014_v57 = vmul.f32 %v10396_v56, %v3376_v27  ;;  %v3375_v34 = vmul.f32 %v6143_v61, %v3247_v49  ;;  %v3249_v2 = vsub.f32 2.0, %v3121_v12  ;;  %6156 = vrcp.f32 %v9006_v36 }
 0x35c   : > { %v9018_v55 = vmul.f32 %v10398_v63, %v3378_v18  ;;  %v3124_v59 = vmul.f32 %v6147_v17, %v8959_v24  ;;  %6158 = vrcp.f32 %v9009_v21  ;;  %v2842_v44 = vadd.f32 %v10416_v62, %v2841_v7  ;;  %v10419_v24 = vld [vmem:[#allocation100_spill] sm:$0xff] }
 0x35d   : > { %3786 = vmatprep.mubr.f32.mxu0 %v9014_v57  ;;  %v9025_v3 = vmul.f32 %v10400_v54, %v3375_v34  ;;  %v3377_v56 = vmul.f32 %v6145_v30, %v3249_v2  ;;  %6160 = vrcp.f32 %v9011_v22  ;;  %v2854_v27 = vadd.f32 %v10417_v40, %v2853_v0  ;;  %v10423_v34 = vld [vmem:[#allocation43_spill] sm:$0xff] }
 0x35e   : > { %v6149_v47 = vpop.eup %6148  ;;  %4011 = vmatprep.mubr.f32.mxu1 %v9018_v55  ;;  %v3252_v63 = vsub.f32 2.0, %v3124_v59  ;;  %v2843_v61 = vrot.slane %v2842_v44, 2  ;;  %v2835_v32 = vrot.slane %v10419_v24, 4  ;;  %v2847_v23 = vrot.slane %v10420_v16, 4 }
 0x35f   : > { %10418 = vst [vmem:[#allocation33_spill] sm:$0xff] %v9025_v3  ;;  %3787 = vmatmul.mubr.f32.gmra.mxu0 %v9025_v3  ;;  %v9034_v7 = vmul.f32 %v10401_v14, %v3377_v56  ;;  %v3126_v54 = vmul.f32 %v6149_v47, %v8973_v39  ;;  %v2855_v30 = vrot.slane %v2854_v27, 2  ;;  %v2865_v1 = vrot.slane %v10422_v35, 4 }
 0x360   : > { %v3380_v0 = vmul.f32 %v6147_v17, %v3252_v63  ;;  %v2844_v5 = vadd.f32 %v2843_v61, %v2842_v44  ;;  %v2836_v8 = vadd.f32 %v10419_v24, %v2835_v32  ;;  %v2848_v49 = vadd.f32 %v10420_v16, %v2847_v23 }
 0x361   : > { %10421 = vst [vmem:[#allocation96_spill] sm:$0xff] %v9034_v7  ;;  %4012 = vmatmul.mubr.f32.gmra.mxu1 %v9034_v7  ;;  %v3254_v12 = vsub.f32 2.0, %v3126_v54  ;;  %v2856_v19 = vadd.f32 %v2855_v30, %v2854_v27  ;;  %v2866_v18 = vadd.f32 %v10422_v35, %v2865_v1  ;;  %v2877_v14 = vrot.slane %v10423_v34, 4  ;;  %v6151_v2 = vpop.eup %6150 }
 0x362   : > { %v9044_v39 = vmul.f32 %v10403_v28, %v3380_v0  ;;  %v2845_v59 = vrot.slane %v2844_v5, 1  ;;  %v2837_v56 = vrot.slane %v2836_v8, 2  ;;  %v2849_v17 = vrot.slane %v2848_v49, 2 }
 0x363   : > { %v3382_v44 = vmul.f32 %v6149_v47, %v3254_v12  ;;  %v3123_v63 = vmul.f32 %v6151_v2, %v8987_v58  ;;  %v2857_v61 = vrot.slane %v2856_v19, 1  ;;  %v2867_v32 = vrot.slane %v2866_v18, 2 }
 0x364   : > { %10424 = vst [vmem:[#allocation35_spill] sm:$0xff] %v9044_v39  ;;  %v6153_v23 = vpop.eup %6152  ;;  %3791 = vmatprep.mubr.f32.mxu0 %v9044_v39  ;;  %v9048_v27 = vadd.f32 %v2845_v59, %v2844_v5  ;;  %v2838_v54 = vadd.f32 %v2837_v56, %v2836_v8  ;;  %v2850_v30 = vadd.f32 %v2849_v17, %v2848_v49 }
 0x365   : > { %v2878_v1 = vadd.f32 %v10423_v34, %v2877_v14  ;;  %v9052_v28 = vmul.f32 %v10405_v26, %v3382_v44  ;;  %v3251_v0 = vsub.f32 2.0, %v3123_v63  ;;  %v3125_v7 = vmul.f32 %v6153_v23, %v8994_v31 }
 0x366   : > { %v9055_v47 = vadd.f32 %v2857_v61, %v2856_v19  ;;  %6162 = vrcp.f32 %v9048_v27  ;;  %v2839_v58 = vrot.slane %v2838_v54, 1  ;;  %v2851_v12 = vrot.slane %v2850_v30, 1 }
 0x367   : > { %v2868_v3 = vadd.f32 %v2867_v32, %v2866_v18  ;;  %v6155_v39 = vpop.eup %6154  ;;  %4016 = vmatprep.mubr.f32.mxu1 %v9052_v28  ;;  %v3379_v5 = vmul.f32 %v6151_v2, %v3251_v0  ;;  %v3253_v8 = vsub.f32 2.0, %v3125_v7  ;;  %v2879_v49 = vrot.slane %v2878_v1, 2 }
 0x368   : > { %6164 = vrcp.f32 %v9055_v47  ;;  %v6157_v26 = vpop.eup %6156  ;;  %v3128_v14 = vmul.f32 %v6155_v39, %v9003_v53  ;;  %v9061_v59 = vadd.f32 %v2839_v58, %v2838_v54  ;;  %v9063_v31 = vadd.f32 %v2851_v12, %v2850_v30  ;;  %v9069_v7 = vpop.f32.mrf.mxu0 }
 0x369   : > { %v2869_v19 = vrot.slane %v2868_v3, 1  ;;  %v6159_v56 = vpop.eup %6158  ;;  %v9066_v17 = vmul.f32 %v10406_v50, %v3379_v5  ;;  %v3381_v18 = vmul.f32 %v6153_v23, %v3253_v8  ;;  %v3130_v44 = vmul.f32 %v6157_v26, %v9006_v36  ;;  %v9075_v54 = vpop.f32.mrf.mxu1  ;;  %v10425_v5 = vld [vmem:[#allocation41_spill] sm:$0xff] }
 0x36a   : > { %v2880_v2 = vadd.f32 %v2879_v49, %v2878_v1  ;;  %v6161_v63 = vpop.eup %6160  ;;  %v3256_v61 = vsub.f32 2.0, %v3128_v14  ;;  %v3127_v32 = vmul.f32 %v6159_v56, %v9009_v21  ;;  %6166 = vrcp.f32 %v9061_v59  ;;  %v3715_v30 = vpop.f32.mrf.mxu0 }
 0x36b   : > { %v9073_v53 = vadd.f32 %v2869_v19, %v2868_v3  ;;  %3792 = vmatmul.mubr.f32.gmra.mxu0 %v9066_v17  ;;  %v9079_v50 = vmul.f32 %v10407_v13, %v3381_v18  ;;  %v3258_v23 = vsub.f32 2.0, %v3130_v44  ;;  %v3129_v36 = vmul.f32 %v6161_v63, %v9011_v22  ;;  %v3940_v3 = vpop.f32.mrf.mxu1  ;;  %v10426_v13 = vld [vmem:[#allocation39_spill] sm:$0xff] }
 0x36c   : > { %6168 = vrcp.f32 %v9063_v31  ;;  %v3384_v1 = vmul.f32 %v6155_v39, %v3256_v61  ;;  %v3255_v0 = vsub.f32 2.0, %v3127_v32  ;;  %v2881_v21 = vrot.slane %v2880_v2, 1 }
 0x36d   : > { %6170 = vrcp.f32 %v9073_v53  ;;  %4017 = vmatmul.mubr.f32.gmra.mxu1 %v9079_v50  ;;  %v3386_v58 = vmul.f32 %v6157_v26, %v3258_v23  ;;  %v3257_v12 = vsub.f32 2.0, %v3129_v36  ;;  %v2859_v8 = vrot.slane %v10425_v5, 4 }
 0x36e   : > { %v2871_v49 = vrot.slane %v10426_v13, 4  ;;  %v9088_v14 = vmul.f32 %v8295_v46, %v3384_v1  ;;  %v3383_v22 = vmul.f32 %v6159_v56, %v3255_v0  ;;  %v2882_v19 = vadd.f32 %v2881_v21, %v2880_v2 }
 0x36f   : > { %v3654_v39 = vadd.f32 1e-09, %v8702_v37  ;;  %v9092_v18 = vmul.f32 %v10412_v52, %v3386_v58  ;;  %v3385_v44 = vmul.f32 %v6161_v63, %v3257_v12  ;;  %v2860_v61 = vadd.f32 %v10425_v5, %v2859_v8 }
 0x370   : > { %v2872_v26 = vadd.f32 %v10426_v13, %v2871_v49  ;;  %3796 = vmatprep.mubr.f32.mxu0 %v9088_v14  ;;  %v9098_v32 = vmul.f32 %v10413_v4, %v3383_v22  ;;  %6172 = vrcp.f32 %v2882_v19  ;;  %v3659_v4 = vadd.f32 1e-09, %v8719_v29 }
 0x371   : > { %4021 = vmatprep.mubr.f32.mxu1 %v9092_v18  ;;  %v9102_v46 = vmul.f32 %v10414_v45, %v3385_v44  ;;  %v2861_v37 = vrot.slane %v2860_v61, 2  ;;  %v9106_v52 = vadd.f32 %v8704_v15, %v3654_v39  ;;  %v3664_v15 = vadd.f32 1e-09, %v8732_v42 }
 0x372   : > { %v2873_v56 = vrot.slane %v2872_v26, 2  ;;  %3797 = vmatmul.mubr.f32.gmra.mxu0 %v9098_v32  ;;  %v9115_v49 = vadd.f32 %v8721_v11, %v3659_v4 }
 0x373   : > { %v6163_v2 = vpop.eup %6162  ;;  %4022 = vmatmul.mubr.f32.gmra.mxu1 %v9102_v46  ;;  %v2862_v63 = vadd.f32 %v2861_v37, %v2860_v61  ;;  %6174 = vrcp.f32 %v9106_v52  ;;  %v3669_v61 = vadd.f32 1e-09, %v8759_v41 }
 0x374   : > { %v2874_v23 = vadd.f32 %v2873_v56, %v2872_v26  ;;  %v3132_v30 = vmul.f32 %v6163_v2, %v9048_v27 }
 0x375   : > { %v6165_v36 = vpop.eup %6164  ;;  %v2863_v1 = vrot.slane %v2862_v63, 1 }
 0x376   : > { %v3134_v45 = vmul.f32 %v6165_v36, %v9055_v47  ;;  %v2875_v0 = vrot.slane %v2874_v23, 1  ;;  %v3260_v21 = vsub.f32 2.0, %v3132_v30  ;;  %v3894_v30 = vadd.f32 %v8761_v33, %v3669_v61 }
 0x377   : > { %v6167_v3 = vpop.eup %6166  ;;  %v2864_v12 = vadd.f32 %v2863_v1, %v2862_v63  ;;  %v3704_v63 = vadd.f32 1e-09, %v8920_v43 }
 0x378   : > { %v3262_v58 = vsub.f32 2.0, %v3134_v45  ;;  %v2876_v8 = vadd.f32 %v2875_v0, %v2874_v23  ;;  %v3388_v22 = vmul.f32 %v6163_v2, %v3260_v21  ;;  %v3131_v27 = vmul.f32 %v6167_v3, %v9061_v59 }
 0x379   : > { %v6169_v29 = vpop.eup %6168  ;;  %6176 = vrcp.f32 %v2864_v12  ;;  %v3889_v59 = vadd.f32 %v8734_v25, %v3664_v15  ;;  %v9142_v45 = vadd.f32 %v8929_v20, %v3704_v63  ;;  %v3679_v20 = vadd.f32 1e-09, %v8789_v51 }
 0x37a   : > { %v6171_v39 = vpop.eup %6170  ;;  %v3390_v47 = vmul.f32 %v6165_v36, %v3262_v58  ;;  %v3133_v44 = vmul.f32 %v6169_v29, %v9063_v31  ;;  %v9121_v42 = vmul.f32 %v10416_v62, %v3388_v22  ;;  %v3259_v26 = vsub.f32 2.0, %v3131_v27  ;;  %v10427_v58 = vld [vmem:[#allocation82_spill] sm:$0xff] }
 0x37b   : > { %v3136_v37 = vmul.f32 %v6171_v39, %v9073_v53  ;;  %6178 = vrcp.f32 %v2876_v8  ;;  %v3709_v53 = vadd.f32 1e-09, %v8997_v60  ;;  %v3674_v36 = vadd.f32 1e-09, %v8776_v48 }
 0x37c   : > { %v9125_v11 = vmul.f32 %v10417_v40, %v3390_v47  ;;  %v3261_v56 = vsub.f32 2.0, %v3133_v44  ;;  %6180 = vrcp.f32 %v9115_v49  ;;  %3801 = vmatprep.mubr.f32.mxu0 %v9121_v42  ;;  %v3387_v31 = vmul.f32 %v6167_v3, %v3259_v26 }
 0x37d   : > { %v3264_v2 = vsub.f32 2.0, %v3136_v37  ;;  %v6173_v41 = vpop.eup %6172  ;;  %6182 = vrcp.f32 %v3889_v59  ;;  %v9152_v48 = vadd.f32 %v9001_v10, %v3709_v53  ;;  %v3899_v0 = vadd.f32 %v8778_v6, %v3674_v36  ;;  %v10429_v37 = vld [vmem:[#allocation81_spill] sm:$0xff] }
 0x37e   : > { %4026 = vmatprep.mubr.f32.mxu1 %v9125_v11  ;;  %v3389_v62 = vmul.f32 %v6169_v29, %v3261_v56  ;;  %v9134_v40 = vmul.f32 %v10419_v24, %v3387_v31  ;;  %v3138_v4 = vmul.f32 %v6173_v41, %v2882_v19  ;;  %6184 = vrcp.f32 %v3894_v30 }
 0x37f   : > { %v3392_v23 = vmul.f32 %v6171_v39, %v3264_v2  ;;  %v9148_v24 = vpop.f32.mrf.mxu0  ;;  %v9168_v3 = vadd.f32 %v8791_v38, %v3679_v20  ;;  %v3684_v51 = vadd.f32 1e-09, %v10427_v58  ;;  %6186 = vrcp.f32 %v3899_v0  ;;  %v10430_v2 = vld [vmem:[#allocation20_spill] sm:$0xff] }
 0x380   : > { %v9138_v25 = vmul.f32 %v10420_v16, %v3389_v62  ;;  %3802 = vmatmul.mubr.f32.gmra.mxu0 %v9134_v40  ;;  %v3266_v60 = vsub.f32 2.0, %v3138_v4  ;;  %v3714_v16 = vadd.f32 1e-09, %v9069_v7  ;;  %v9155_v19 = vpop.f32.mrf.mxu1  ;;  %v3689_v56 = vadd.f32 1e-09, %v10429_v37  ;;  %v10435_v58 = vld [vmem:[#allocation124_spill] sm:$0xff] }
 0x381   : > { %v9146_v43 = vmul.f32 %v10422_v35, %v3392_v23  ;;  %v3720_v1 = vpop.f32.mrf.mxu0  ;;  %v6175_v35 = vpop.eup %6174  ;;  %6188 = vrcp.f32 %v9168_v3 }
 0x382   : > { %4027 = vmatmul.mubr.f32.gmra.mxu1 %v9138_v25  ;;  %v3394_v33 = vmul.f32 %v6173_v41, %v3266_v60  ;;  %v9161_v21 = vadd.f32 %v9075_v54, %v3714_v16  ;;  %v3945_v15 = vpop.f32.mrf.mxu1  ;;  %v4069_v27 = vmul.f32 %v6175_v35, %v9106_v52  ;;  %v3694_v41 = vadd.f32 1e-09, %v10430_v2  ;;  %v10434_v60 = vld [vmem:[#allocation123_spill] sm:$0xff] }
 0x383   : > { %3806 = vmatprep.mubr.f32.mxu0 %v9146_v43  ;;  %v3699_v16 = vadd.f32 1e-09, %v10434_v60 }
 0x384   : > { %v9164_v10 = vmul.f32 %v10423_v34, %v3394_v33  ;;  %v10428_v34 = vld [vmem:[#allocation83_spill] sm:$0xff]  ;;  %v4101_v26 = vsub.f32 2.0, %v4069_v27 }
 0x385   : > { %v9174_v44 = vadd.f32 %v10428_v34, %v3684_v51 }
 0x386   : > { %v6177_v7 = vpop.eup %6176  ;;  %4031 = vmatprep.mubr.f32.mxu1 %v9164_v10  ;;  %v4133_v62 = vmul.f32 %v6175_v35, %v4101_v26 }
 0x387   : > { %v3135_v22 = vmul.f32 %v6177_v7, %v2864_v12  ;;  %6190 = vrcp.f32 %v9174_v44 }
 0x388   : > { %v6179_v29 = vpop.eup %6178 }
 0x389   : > { %v6181_v6 = vpop.eup %6180  ;;  %v3137_v54 = vmul.f32 %v6179_v29, %v2876_v8  ;;  %v3263_v39 = vsub.f32 2.0, %v3135_v22  ;;  %v4922_v22 = vld [vmem:[%s9929_s3 + $0x70] sm:$0xff] }
 0x38a   : > { %v4070_v38 = vmul.f32 %v6181_v6, %v9115_v49  ;;  %v6183_v31 = vpop.eup %6182  ;;  %v10431_v49 = vld [vmem:[#allocation17_spill] sm:$0xff] }
 0x38b   : > { %v3265_v47 = vsub.f32 2.0, %v3137_v54  ;;  %v3391_v61 = vmul.f32 %v6177_v7, %v3263_v39  ;;  %v4071_v53 = vmul.f32 %v6183_v31, %v3889_v59  ;;  %v9188_v23 = vadd.f32 %v10431_v49, %v3689_v56  ;;  %v6185_v4 = vpop.eup %6184  ;;  %v4923_v59 = vld [vmem:[%s9929_s3 + $0x78] sm:$0xff] }
 0x38c   : > { %v4102_v63 = vsub.f32 2.0, %v4070_v38  ;;  %v4072_v1 = vmul.f32 %v6185_v4, %v3894_v30  ;;  %v6187_v35 = vpop.eup %6186  ;;  %v4955_v7 = vld [vmem:[%s9929_s3 + $0x178] sm:$0xff]  ;;  %v9211_v30 = vadd.f32 %v10435_v58, %v3699_v16 }
 0x38d   : > { %v3393_v12 = vmul.f32 %v6179_v29, %v3265_v47  ;;  %v9179_v52 = vmul.f32 %v10425_v5, %v3391_v61  ;;  %v10432_v5 = vmov 0.0   ;;  %v4103_v20 = vsub.f32 2.0, %v4071_v53 }
 0x38e   : > { %v4134_v33 = vmul.f32 %v6181_v6, %v4102_v63  ;;  %6192 = vrcp.f32 %v9188_v23  ;;  %v6189_v27 = vpop.eup %6188  ;;  %v4104_v54 = vsub.f32 2.0, %v4072_v1  ;;  %v4073_v39 = vmul.f32 %v6187_v35, %v3899_v0 }
 0x38f   : > { %v9182_v8 = vmul.f32 %v10426_v13, %v3393_v12  ;;  %3807 = vmatmul.mubr.f32.gmra.mxu0 %v9179_v52  ;;  %v10433_v13 = vld [vmem:[#allocation18_spill] sm:$0xff]  ;;  %v4135_v6 = vmul.f32 %v6183_v31, %v4103_v20  ;;  %v4074_v26 = vmul.f32 %v6189_v27, %v9168_v3 }
 0x390   : > { %4330 = vmatprep.mubr.f32.mxu0 %v10432_v5  ;;  %v9194_v36 = vadd.f32 %v10433_v13, %v3694_v41  ;;  %v4136_v0 = vmul.f32 %v6185_v4, %v4104_v54  ;;  %v4105_v61 = vsub.f32 2.0, %v4073_v39  ;;  %v4921_v4 = vld [vmem:[%s9929_s3 + $0x68] sm:$0xff] }
 0x391   : > { %4032 = vmatmul.mubr.f32.gmra.mxu1 %v9182_v8  ;;  %v4106_v31 = vsub.f32 2.0, %v4074_v26 }
 0x392   : > { %4587 = vmatprep.mubr.f32.mxu1 %v10432_v5  ;;  %6194 = vrcp.f32 %v9194_v36  ;;  %v4137_v56 = vmul.f32 %v6187_v35, %v4105_v61 }
 0x393   : > { %5590 = vmatmul.mubr.msk.f32.vlgmr.msra.gmra.mxu0 %vm4169_vm1, %v4133_v62  ;;  %6196 = vrcp.f32 %v9211_v30  ;;  %v4138_v63 = vmul.f32 %v6189_v27, %v4106_v31 }
 0x394   : > { %4336 = vmatprep.mubr.f32.mxu0 %v10432_v5  ;;  %v9204_v15 = vpop.f32.mrf.mxu0  ;;  %4980 = vmatpush1.msra.mxu0 %v4923_v59  ;;  %v6191_v34 = vpop.eup %6190  ;;  %6198 = vrcp.f32 %v9142_v45 }
 0x395   : > { %5622 = vmatmul.mubr.msk.f32.vlgmr.msra.gmra.mxu1 %vm4169_vm1, %v4133_v62  ;;  %v9213_v51 = vpop.f32.mrf.mxu1  ;;  %4981 = vmatprep.subr.mxu0 %v10432_v5  ;;  %v4075_v12 = vmul.f32 %v6191_v34, %v9174_v44  ;;  %6200 = vrcp.f32 %v9152_v48  ;;  %v3719_v62 = vadd.f32 1e-09, %v9148_v24  ;;  %v4954_v44 = vld [vmem:[%s9929_s3 + $0x170] sm:$0xff]  ;;  %v3724_v35 = vadd.f32 1e-09, %v9204_v15 }
 0x396   : > { %4593 = vmatprep.mubr.f32.mxu1 %v10432_v5  ;;  %v3725_v29 = vpop.f32.mrf.mxu0  ;;  %5205 = vmatpush1.msra.mxu1 %v4955_v7  ;;  %6202 = vrcp.f32 %v9161_v21  ;;  %v4953_v7 = vld [vmem:[%s9929_s3 + $0x168] sm:$0xff] }
 0x397   : > { %5591 = vmatmul.mubr.msk.f32.gmra.mxu0 %vm4169_vm1, %v4134_v33  ;;  %5206 = vmatprep.subr.mxu1 %v10432_v5  ;;  %v3950_v47 = vpop.f32.mrf.mxu1  ;;  %v4107_v53 = vsub.f32 2.0, %v4075_v12  ;;  %v9273_v27 = vadd.f32 %v9213_v51, %v3724_v35 }
 0x398   : > { %4342 = vmatprep.mubr.f32.mxu0 %v10432_v5  ;;  %4982 = vmatpush1.msra.mxu0 %v4922_v22 }
 0x399   : > { %5623 = vmatmul.mubr.msk.f32.gmra.mxu1 %vm4169_vm1, %v4134_v33  ;;  %4983 = vmatprep.subr.mxu0 %v10432_v5  ;;  %v4139_v33 = vmul.f32 %v6191_v34, %v4107_v53 }
 0x39a   : > { %4599 = vmatprep.mubr.f32.mxu1 %v10432_v5  ;;  %5207 = vmatpush1.msra.mxu1 %v4954_v44 }
 0x39b   : > { %5592 = vmatmul.mubr.msk.f32.gmra.mxu0 %vm4169_vm1, %v4135_v6  ;;  %v6193_v3 = vpop.eup %6192  ;;  %5208 = vmatprep.subr.mxu1 %v10432_v5 }
 0x39c   : > { %4348 = vmatprep.mubr.f32.mxu0 %v10432_v5  ;;  %v3728_v38 = vpop.f32.mrf.mxu0  ;;  %v4076_v49 = vmul.f32 %v6193_v3, %v9188_v23  ;;  %v9253_v23 = vadd.f32 %v9155_v19, %v3719_v62  ;;  %4984 = vmatpush1.msra.mxu0 %v4921_v4 }
 0x39d   : > { %5624 = vmatmul.mubr.msk.f32.gmra.mxu1 %vm4169_vm1, %v4135_v6  ;;  %4985 = vmatprep.subr.mxu0 %v10432_v5  ;;  %v3729_v6 = vadd.f32 1e-09, %v3728_v38 }
 0x39e   : > { %4605 = vmatprep.mubr.f32.mxu1 %v10432_v5  ;;  %v3730_v37 = vpop.f32.mrf.mxu0  ;;  %v4108_v20 = vsub.f32 2.0, %v4076_v49  ;;  %6204 = vrcp.f32 %v9253_v23  ;;  %5209 = vmatpush1.msra.mxu1 %v4953_v7  ;;  %v4951_v7 = vld [vmem:[%s9929_s3 + $0x158] sm:$0xff] }
 0x39f   : > { %5593 = vmatmul.mubr.msk.f32.gmra.mxu0 %vm4169_vm1, %v4136_v0  ;;  %v3953_v2 = vpop.f32.mrf.mxu1  ;;  %v6195_v13 = vpop.eup %6194  ;;  %5210 = vmatprep.subr.mxu1 %v10432_v5  ;;  %6206 = vrcp.f32 %v9273_v27 }
 0x3a0   : > { %4354 = vmatprep.mubr.f32.mxu0 %v10432_v5  ;;  %v6197_v59 = vpop.eup %6196  ;;  %v4077_v1 = vmul.f32 %v6195_v13, %v9194_v36  ;;  %v4920_v36 = vld [vmem:[%s9929_s3 + $0x60] sm:$0xff]  ;;  %v4140_v29 = vmul.f32 %v6193_v3, %v4108_v20  ;;  %v9283_v51 = vadd.f32 %v3953_v2, %v3729_v6 }
 0x3a1   : > { %5625 = vmatmul.mubr.msk.f32.gmra.mxu1 %vm4169_vm1, %v4136_v0  ;;  %v3955_v41 = vpop.f32.mrf.mxu1  ;;  %v4078_v58 = vmul.f32 %v6197_v59, %v9211_v30  ;;  %4986 = vmatpush1.msra.mxu0 %v4920_v36  ;;  %v6199_v15 = vpop.eup %6198  ;;  %v4918_v36 = vld [vmem:[%s9929_s3 + $0x50] sm:$0xff] }
 0x3a2   : > { %4611 = vmatprep.mubr.f32.mxu1 %v10432_v5  ;;  %v4109_v22 = vsub.f32 2.0, %v4077_v1  ;;  %4987 = vmatprep.subr.mxu0 %v10432_v5  ;;  %v4079_v39 = vmul.f32 %v6199_v15, %v9142_v45  ;;  %v6201_v47 = vpop.eup %6200  ;;  %6208 = vrcp.f32 %v9283_v51  ;;  %v4919_v41 = vld [vmem:[%s9929_s3 + $0x58] sm:$0xff] }
 0x3a3   : > { %5594 = vmatmul.mubr.msk.f32.gmra.mxu0 %vm4169_vm1, %v4137_v56  ;;  %v3733_v24 = vpop.f32.mrf.mxu0  ;;  %v4110_v54 = vsub.f32 2.0, %v4078_v58  ;;  %v4080_v45 = vmul.f32 %v6201_v47, %v9152_v48  ;;  %v4952_v48 = vld [vmem:[%s9929_s3 + $0x160] sm:$0xff] }
 0x3a4   : > { %4360 = vmatprep.mubr.f32.mxu0 %v10432_v5  ;;  %v4141_v34 = vmul.f32 %v6195_v13, %v4109_v22  ;;  %v3734_v0 = vadd.f32 1e-09, %v3733_v24  ;;  %v4111_v38 = vsub.f32 2.0, %v4079_v39  ;;  %5211 = vmatpush1.msra.mxu1 %v4952_v48 }
 0x3a5   : > { %5626 = vmatmul.mubr.msk.f32.gmra.mxu1 %vm4169_vm1, %v4137_v56  ;;  %v3735_v16 = vpop.f32.mrf.mxu0  ;;  %v6203_v56 = vpop.eup %6202  ;;  %v4142_v31 = vmul.f32 %v6197_v59, %v4110_v54  ;;  %v4112_v3 = vsub.f32 2.0, %v4080_v45  ;;  %4988 = vmatpush1.msra.mxu0 %v4919_v41 }
 0x3a6   : > { %4617 = vmatprep.mubr.f32.mxu1 %v10432_v5  ;;  %v3958_v60 = vpop.f32.mrf.mxu1  ;;  %v4081_v53 = vmul.f32 %v6203_v56, %v9161_v21  ;;  %5212 = vmatprep.subr.mxu1 %v10432_v5 }
 0x3a7   : > { %5595 = vmatmul.mubr.msk.f32.gmra.mxu0 %vm4169_vm1, %v4138_v63  ;;  %v3959_v12 = vadd.f32 %v3958_v60, %v3734_v0  ;;  %4989 = vmatprep.subr.mxu0 %v10432_v5  ;;  %v4144_v21 = vmul.f32 %v6201_v47, %v4112_v3  ;;  %v4917_v0 = vld [vmem:[%s9929_s3 + $0x48] sm:$0xff] }
 0x3a8   : > { %4366 = vmatprep.mubr.f32.mxu0 %v10432_v5  ;;  %v3960_v19 = vpop.f32.mrf.mxu1  ;;  %v4113_v13 = vsub.f32 2.0, %v4081_v53  ;;  %5213 = vmatpush1.msra.mxu1 %v4951_v7 }
 0x3a9   : > { %5627 = vmatmul.mubr.msk.f32.gmra.mxu1 %vm4169_vm1, %v4138_v63  ;;  %v4143_v63 = vmul.f32 %v6199_v15, %v4111_v38  ;;  %6210 = vrcp.f32 %v3959_v12  ;;  %4990 = vmatpush1.msra.mxu0 %v4918_v36 }
 0x3aa   : > { %4623 = vmatprep.mubr.f32.mxu1 %v10432_v5  ;;  %5214 = vmatprep.subr.mxu1 %v10432_v5 }
 0x3ab   : > { %5596 = vmatmul.mubr.msk.f32.gmra.mxu0 %vm4169_vm1, %v4139_v33  ;;  %v6205_v62 = vpop.eup %6204  ;;  %4991 = vmatprep.subr.mxu0 %v10432_v5 }
 0x3ac   : > { %4372 = vmatprep.mubr.f32.mxu0 %v10432_v5  ;;  %v4082_v44 = vmul.f32 %v6205_v62, %v9253_v23  ;;  %v6207_v60 = vpop.eup %6206  ;;  %4992 = vmatpush1.msra.mxu0 %v4917_v0 }
 0x3ad   : > { %5628 = vmatmul.mubr.msk.f32.gmra.mxu1 %vm4169_vm1, %v4139_v33  ;;  %v3738_v30 = vpop.f32.mrf.mxu0  ;;  %v4145_v33 = vmul.f32 %v6203_v56, %v4113_v13  ;;  %v4083_v1 = vmul.f32 %v6207_v60, %v9273_v27  ;;  %4993 = vmatprep.subr.mxu0 %v10432_v5  ;;  %v4949_v13 = vld [vmem:[%s9929_s3 + $0x148] sm:$0xff] }
 0x3ae   : > { %4629 = vmatprep.mubr.f32.mxu1 %v10432_v5  ;;  %v3739_v2 = vadd.f32 1e-09, %v3738_v30  ;;  %v4114_v20 = vsub.f32 2.0, %v4082_v44 }
 0x3af   : > { %5597 = vmatmul.mubr.msk.f32.gmra.mxu0 %vm4169_vm1, %v4140_v29  ;;  %v3740_v61 = vpop.f32.mrf.mxu0  ;;  %v6209_v19 = vpop.eup %6208  ;;  %v4115_v15 = vsub.f32 2.0, %v4083_v1 }
 0x3b0   : > { %4378 = vmatprep.mubr.f32.mxu0 %v10432_v5  ;;  %v3963_v26 = vpop.f32.mrf.mxu1  ;;  %v4146_v58 = vmul.f32 %v6205_v62, %v4114_v20 }
 0x3b1   : > { %5629 = vmatmul.mubr.msk.f32.gmra.mxu1 %vm4169_vm1, %v4140_v29  ;;  %v9302_v49 = vadd.f32 %v3963_v26, %v3739_v2  ;;  %v4084_v29 = vmul.f32 %v6209_v19, %v9283_v51  ;;  %v4147_v27 = vmul.f32 %v6207_v60, %v4115_v15  ;;  %v4950_v51 = vld [vmem:[%s9929_s3 + $0x150] sm:$0xff] }
 0x3b2   : > { %4635 = vmatprep.mubr.f32.mxu1 %v10432_v5  ;;  %v3965_v37 = vpop.f32.mrf.mxu1  ;;  %5215 = vmatpush1.msra.mxu1 %v4950_v51 }
 0x3b3   : > { %5598 = vmatmul.mubr.msk.f32.gmra.mxu0 %vm4169_vm1, %v4141_v34  ;;  %6212 = vrcp.f32 %v9302_v49  ;;  %v4116_v6 = vsub.f32 2.0, %v4084_v29  ;;  %5216 = vmatprep.subr.mxu1 %v10432_v5  ;;  %v4948_v29 = vld [vmem:[%s9929_s3 + $0x140] sm:$0xff] }
 0x3b4   : > { %4384 = vmatprep.mubr.f32.mxu0 %v10432_v5  ;;  %5217 = vmatpush1.msra.mxu1 %v4949_v13  ;;  %v4908_v13 = vld [vmem:[%s9929_s3] sm:$0xff] }
 0x3b5   : > { %5630 = vmatmul.mubr.msk.f32.gmra.mxu1 %vm4169_vm1, %v4141_v34  ;;  %v4148_v26 = vmul.f32 %v6209_v19, %v4116_v6  ;;  %5218 = vmatprep.subr.mxu1 %v10432_v5  ;;  %v4947_v6 = vld [vmem:[%s9929_s3 + $0x138] sm:$0xff] }
 0x3b6   : > { %4641 = vmatprep.mubr.f32.mxu1 %v10432_v5  ;;  %v6211_v22 = vpop.eup %6210  ;;  %5219 = vmatpush1.msra.mxu1 %v4948_v29 }
 0x3b7   : > { %5599 = vmatmul.mubr.msk.f32.gmra.mxu0 %vm4169_vm1, %v4142_v31  ;;  %v4085_v30 = vmul.f32 %v6211_v22, %v3959_v12  ;;  %5220 = vmatprep.subr.mxu1 %v10432_v5 }
 0x3b8   : > { %4390 = vmatprep.mubr.f32.mxu0 %v10432_v5  ;;  %5221 = vmatpush1.msra.mxu1 %v4947_v6 }
 0x3b9   : > { %5631 = vmatmul.mubr.msk.f32.gmra.mxu1 %vm4169_vm1, %v4142_v31  ;;  %v4117_v38 = vsub.f32 2.0, %v4085_v30  ;;  %v4914_v30 = vld [vmem:[%s9929_s3 + $0x30] sm:$0xff]  ;;  %5222 = vmatprep.subr.mxu1 %v10432_v5 }
 0x3ba   : > { %4647 = vmatprep.mubr.f32.mxu1 %v10432_v5  ;;  %v3743_v4 = vpop.f32.mrf.mxu0 }
 0x3bb   : > { %5600 = vmatmul.mubr.msk.f32.gmra.mxu0 %vm4169_vm1, %v4143_v63  ;;  %v3744_v24 = vadd.f32 1e-09, %v3743_v4  ;;  %v4149_v12 = vmul.f32 %v6211_v22, %v4117_v38  ;;  %v4915_v22 = vld [vmem:[%s9929_s3 + $0x38] sm:$0xff] }
 0x3bc   : > { %4396 = vmatprep.mubr.f32.mxu0 %v10432_v5  ;;  %v3745_v16 = vpop.f32.mrf.mxu0 }
 0x3bd   : > { %5632 = vmatmul.mubr.msk.f32.gmra.mxu1 %vm4169_vm1, %v4143_v63  ;;  %v3968_v23 = vpop.f32.mrf.mxu1 }
 0x3be   : > { %4653 = vmatprep.mubr.f32.mxu1 %v10432_v5  ;;  %v3969_v59 = vadd.f32 %v3968_v23, %v3744_v24  ;;  %v4916_v24 = vld [vmem:[%s9929_s3 + $0x40] sm:$0xff] }
 0x3bf   : > { %5601 = vmatmul.mubr.msk.f32.gmra.mxu0 %vm4169_vm1, %v4144_v21  ;;  %v3970_v35 = vpop.f32.mrf.mxu1 }
 0x3c0   : > { %6214 = vrcp.f32 %v3969_v59  ;;  %4402 = vmatprep.mubr.f32.mxu0 %v10432_v5  ;;  %v6213_v54 = vpop.eup %6212  ;;  %4994 = vmatpush1.msra.mxu0 %v4916_v24 }
 0x3c1   : > { %5633 = vmatmul.mubr.msk.f32.gmra.mxu1 %vm4169_vm1, %v4144_v21  ;;  %v4086_v45 = vmul.f32 %v6213_v54, %v9302_v49  ;;  %4995 = vmatprep.subr.mxu0 %v10432_v5 }
 0x3c2   : > { %4659 = vmatprep.mubr.f32.mxu1 %v10432_v5  ;;  %4996 = vmatpush1.msra.mxu0 %v4915_v22 }
 0x3c3   : > { %5602 = vmatmul.mubr.msk.f32.gmra.mxu0 %vm4169_vm1, %v4145_v33  ;;  %v4118_v2 = vsub.f32 2.0, %v4086_v45  ;;  %4997 = vmatprep.subr.mxu0 %v10432_v5 }
 0x3c4   : > { %4408 = vmatprep.mubr.f32.mxu0 %v10432_v5  ;;  %4998 = vmatpush1.msra.mxu0 %v4914_v30 }
 0x3c5   : > { %5634 = vmatmul.mubr.msk.f32.gmra.mxu1 %vm4169_vm1, %v4145_v33  ;;  %v4150_v53 = vmul.f32 %v6213_v54, %v4118_v2  ;;  %4999 = vmatprep.subr.mxu0 %v10432_v5  ;;  %v4943_v2 = vld [vmem:[%s9929_s3 + $0x118] sm:$0xff] }
 0x3c6   : > { %4665 = vmatprep.mubr.f32.mxu1 %v10432_v5 }
 0x3c7   : > { %5603 = vmatmul.mubr.msk.f32.gmra.mxu0 %vm4169_vm1, %v4146_v58 }
 0x3c8   : > { %v3748_v39 = vpop.f32.mrf.mxu0  ;;  %4414 = vmatprep.mubr.f32.mxu0 %v10432_v5 }
 0x3c9   : > { %5635 = vmatmul.mubr.msk.f32.gmra.mxu1 %vm4169_vm1, %v4146_v58  ;;  %v3749_v47 = vadd.f32 1e-09, %v3748_v39  ;;  %v3973_v34 = vpop.f32.mrf.mxu1  ;;  %v4946_v39 = vld [vmem:[%s9929_s3 + $0x130] sm:$0xff] }
 0x3ca   : > { %4671 = vmatprep.mubr.f32.mxu1 %v10432_v5  ;;  %v3750_v61 = vpop.f32.mrf.mxu0  ;;  %5223 = vmatpush1.msra.mxu1 %v4946_v39  ;;  %v4968_v39 = vld [vmem:[%s9929_s3 + $0x1e0] sm:$0xff] }
 0x3cb   : > { %v3974_v37 = vadd.f32 %v3973_v34, %v3749_v47  ;;  %v3975_v56 = vpop.f32.mrf.mxu1  ;;  %5604 = vmatmul.mubr.msk.f32.gmra.mxu0 %vm4169_vm1, %v4147_v27  ;;  %v4913_v47 = vld [vmem:[%s9929_s3 + $0x28] sm:$0xff]  ;;  %5224 = vmatprep.subr.mxu1 %v10432_v5 }
 0x3cc   : > { %4420 = vmatprep.mubr.f32.mxu0 %v10432_v5  ;;  %v4945_v61 = vld [vmem:[%s9929_s3 + $0x128] sm:$0xff]  ;;  %5000 = vmatpush1.msra.mxu0 %v4913_v47  ;;  %v4944_v56 = vld [vmem:[%s9929_s3 + $0x120] sm:$0xff]  ;;  %v4935_v47 = vld [vmem:[%s9929_s3 + $0xd8] sm:$0xff] }
 0x3cd   : > { %5636 = vmatmul.mubr.msk.f32.gmra.mxu1 %vm4169_vm1, %v4147_v27  ;;  %v6215_v31 = vpop.eup %6214  ;;  %6216 = vrcp.f32 %v3974_v37  ;;  %5001 = vmatprep.subr.mxu0 %v10432_v5 }
 0x3ce   : > { %4677 = vmatprep.mubr.f32.mxu1 %v10432_v5  ;;  %v4087_v3 = vmul.f32 %v6215_v31, %v3969_v59  ;;  %5225 = vmatpush1.msra.mxu1 %v4945_v61  ;;  %v4966_v61 = vld [vmem:[%s9929_s3 + $0x1d0] sm:$0xff] }
 0x3cf   : > { %5605 = vmatmul.mubr.msk.f32.gmra.mxu0 %vm4169_vm1, %v4148_v26  ;;  %5226 = vmatprep.subr.mxu1 %v10432_v5 }
 0x3d0   : > { %v3753_v48 = vpop.f32.mrf.mxu0  ;;  %4426 = vmatprep.mubr.f32.mxu0 %v10432_v5  ;;  %v4119_v49 = vsub.f32 2.0, %v4087_v3  ;;  %v4910_v3 = vld [vmem:[%s9929_s3 + $0x10] sm:$0xff]  ;;  %5227 = vmatpush1.msra.mxu1 %v4944_v56 }
 0x3d1   : > { %5637 = vmatmul.mubr.msk.f32.gmra.mxu1 %vm4169_vm1, %v4148_v26  ;;  %v3754_v41 = vadd.f32 1e-09, %v3753_v48  ;;  %v3978_v62 = vpop.f32.mrf.mxu1  ;;  %v4912_v26 = vld [vmem:[%s9929_s3 + $0x20] sm:$0xff]  ;;  %5228 = vmatprep.subr.mxu1 %v10432_v5 }
 0x3d2   : > { %4683 = vmatprep.mubr.f32.mxu1 %v10432_v5  ;;  %v3755_v63 = vpop.f32.mrf.mxu0  ;;  %v4151_v21 = vmul.f32 %v6215_v31, %v4119_v49  ;;  %v4911_v31 = vld [vmem:[%s9929_s3 + $0x18] sm:$0xff]  ;;  %5002 = vmatpush1.msra.mxu0 %v4912_v26  ;;  %v4942_v49 = vld [vmem:[%s9929_s3 + $0x110] sm:$0xff]  ;;  %v4933_v26 = vld [vmem:[%s9929_s3 + $0xc8] sm:$0xff] }
 0x3d3   : > { %v3979_v44 = vadd.f32 %v3978_v62, %v3754_v41  ;;  %5606 = vmatmul.mubr.msk.f32.gmra.mxu0 %vm4169_vm1, %v4149_v12  ;;  %v3980_v4 = vpop.f32.mrf.mxu1  ;;  %5003 = vmatprep.subr.mxu0 %v10432_v5 }
 0x3d4   : > { %4432 = vmatprep.mubr.f32.mxu0 %v10432_v5  ;;  %5004 = vmatpush1.msra.mxu0 %v4911_v31 }
 0x3d5   : > { %5638 = vmatmul.mubr.msk.f32.gmra.mxu1 %vm4169_vm1, %v4149_v12  ;;  %6218 = vrcp.f32 %v3979_v44  ;;  %5005 = vmatprep.subr.mxu0 %v10432_v5 }
 0x3d6   : > { %4689 = vmatprep.mubr.f32.mxu1 %v10432_v5  ;;  %5229 = vmatpush1.msra.mxu1 %v4943_v2  ;;  %v4964_v2 = vld [vmem:[%s9929_s3 + $0x1c0] sm:$0xff] }
 0x3d7   : > { %5607 = vmatmul.mubr.msk.f32.gmra.mxu0 %vm4169_vm1, %v4150_v53  ;;  %5230 = vmatprep.subr.mxu1 %v10432_v5 }
 0x3d8   : > { %4438 = vmatprep.mubr.f32.mxu0 %v10432_v5  ;;  %5006 = vmatpush1.msra.mxu0 %v4910_v3  ;;  %v4931_v3 = vld [vmem:[%s9929_s3 + $0xb8] sm:$0xff] }
 0x3d9   : > { %5639 = vmatmul.mubr.msk.f32.gmra.mxu1 %vm4169_vm1, %v4150_v53  ;;  %5007 = vmatprep.subr.mxu0 %v10432_v5 }
 0x3da   : > { %4695 = vmatprep.mubr.f32.mxu1 %v10432_v5  ;;  %v6217_v60 = vpop.eup %6216  ;;  %5231 = vmatpush1.msra.mxu1 %v4942_v49 }
 0x3db   : > { %v4088_v16 = vmul.f32 %v6217_v60, %v3974_v37  ;;  %5608 = vmatmul.mubr.msk.f32.gmra.mxu0 %vm4169_vm1, %v4151_v21  ;;  %5232 = vmatprep.subr.mxu1 %v10432_v5 }
 0x3dc   : > { %v3758_v23 = vpop.f32.mrf.mxu0  ;;  %4444 = vmatprep.mubr.f32.mxu0 %v10432_v5 }
 0x3dd   : > { %5640 = vmatmul.mubr.msk.f32.gmra.mxu1 %vm4169_vm1, %v4151_v21  ;;  %v4120_v59 = vsub.f32 2.0, %v4088_v16  ;;  %v3759_v33 = vadd.f32 1e-09, %v3758_v23  ;;  %v3983_v20 = vpop.f32.mrf.mxu1  ;;  %v4941_v21 = vld [vmem:[%s9929_s3 + $0x108] sm:$0xff]  ;;  %v4940_v16 = vld [vmem:[%s9929_s3 + $0x100] sm:$0xff]  ;;  %v4939_v23 = vld [vmem:[%s9929_s3 + $0xf8] sm:$0xff] }
 0x3de   : > { %4701 = vmatprep.mubr.f32.mxu1 %v10432_v5  ;;  %v3760_v1 = vpop.f32.mrf.mxu0  ;;  %5233 = vmatpush1.msra.mxu1 %v4941_v21 }
 0x3df   : > { %v4152_v35 = vmul.f32 %v6217_v60, %v4120_v59  ;;  %v3984_v19 = vadd.f32 %v3983_v20, %v3759_v33  ;;  %v3985_v7 = vpop.f32.mrf.mxu1  ;;  %5234 = vmatprep.subr.mxu1 %v10432_v5  ;;  %v4971_v59 = vld [vmem:[%s9929_s3 + $0x1f8] sm:$0xff]  ;;  %v4938_v33 = vld [vmem:[%s9929_s3 + $0xf0] sm:$0xff] }
 0x3e0   : > { %5235 = vmatpush1.msra.mxu1 %v4940_v16  ;;  %v4970_v1 = vld [vmem:[%s9929_s3 + $0x1f0] sm:$0xff] }
 0x3e1   : > { %6220 = vrcp.f32 %v3984_v19  ;;  %5609 = vmatmul.mubr.msk.f32.gmra.mxu0 %vm4169_vm1, %v4152_v35  ;;  %5641 = vmatmul.mubr.msk.f32.gmra.mxu1 %vm4169_vm1, %v4152_v35  ;;  %v4937_v35 = vld [vmem:[%s9929_s3 + $0xe8] sm:$0xff] }
 0x3e2   : > { %v6219_v36 = vpop.eup %6218  ;;  %4450 = vmatprep.mubr.f32.mxu0 %v10432_v5  ;;  %4707 = vmatprep.mubr.f32.mxu1 %v10432_v5 }
 0x3e3   : > { %v4089_v58 = vmul.f32 %v6219_v36, %v3979_v44  ;;  %v4909_v44 = vld [vmem:[%s9929_s3 + $0x8] sm:$0xff]  ;;  %5236 = vmatprep.subr.mxu1 %v10432_v5 }
 0x3e4   : > { %5008 = vmatpush1.msra.mxu0 %v4909_v44  ;;  %5237 = vmatpush2.msra.mxu1 %v4971_v59  ;;  %v4961_v59 = vld [vmem:[%s9929_s3 + $0x1a8] sm:$0xff] }
 0x3e5   : > { %v4121_v15 = vsub.f32 2.0, %v4089_v58  ;;  %5009 = vmatprep.subr.mxu0 %v10432_v5  ;;  %5238 = vmatprep.subr.mxu1 %v10432_v5  ;;  %v4936_v58 = vld [vmem:[%s9929_s3 + $0xe0] sm:$0xff] }
 0x3e6   : > { %5010 = vmatpush1.msra.mxu0 %v4908_v13  ;;  %5239 = vmatpush2.msra.mxu1 %v4970_v1  ;;  %v4962_v13 = vld [vmem:[%s9929_s3 + $0x1b0] sm:$0xff] }
 0x3e7   : > { %v4153_v27 = vmul.f32 %v6219_v36, %v4121_v15  ;;  %5011 = vmatprep.subr.mxu0 %v10432_v5  ;;  %v4969_v36 = vld [vmem:[%s9929_s3 + $0x1e8] sm:$0xff]  ;;  %5240 = vmatprep.subr.mxu1 %v10432_v5 }
 0x3e8   : > { %5012 = vmatpush2.msra.mxu0 %v4939_v23  ;;  %5241 = vmatpush2.msra.mxu1 %v4969_v36  ;;  %v4960_v36 = vld [vmem:[%s9929_s3 + $0x1a0] sm:$0xff] }
 0x3e9   : > { %5610 = vmatmul.mubr.msk.f32.gmra.mxu0 %vm4169_vm1, %v4153_v27  ;;  %5642 = vmatmul.mubr.msk.f32.gmra.mxu1 %vm4169_vm1, %v4153_v27 }
 0x3ea   : > { %v3763_v54 = vpop.f32.mrf.mxu0  ;;  %4456 = vmatprep.mubr.f32.mxu0 %v10432_v5  ;;  %4713 = vmatprep.mubr.f32.mxu1 %v10432_v5 }
 0x3eb   : > { %v3764_v34 = vadd.f32 1e-09, %v3763_v54  ;;  %v3988_v51 = vpop.f32.mrf.mxu1  ;;  %5013 = vmatprep.subr.mxu0 %v10432_v5  ;;  %5242 = vmatprep.subr.mxu1 %v10432_v5 }
 0x3ec   : > { %v3765_v0 = vpop.f32.mrf.mxu0  ;;  %5014 = vmatpush2.msra.mxu0 %v4938_v33  ;;  %5243 = vmatpush2.msra.mxu1 %v4968_v39  ;;  %v4928_v33 = vld [vmem:[%s9929_s3 + $0xa0] sm:$0xff] }
 0x3ed   : > { %v3989_v38 = vadd.f32 %v3988_v51, %v3764_v34  ;;  %v3990_v45 = vpop.f32.mrf.mxu1  ;;  %5015 = vmatprep.subr.mxu0 %v10432_v5  ;;  %v4967_v34 = vld [vmem:[%s9929_s3 + $0x1d8] sm:$0xff]  ;;  %v4934_v51 = vld [vmem:[%s9929_s3 + $0xd0] sm:$0xff]  ;;  %5244 = vmatprep.subr.mxu1 %v10432_v5  ;;  %v4956_v39 = vld [vmem:[%s9929_s3 + $0x180] sm:$0xff] }
 0x3ee   : > { %v6221_v37 = vpop.eup %6220  ;;  %5016 = vmatpush2.msra.mxu0 %v4937_v35  ;;  %5245 = vmatpush2.msra.mxu1 %v4967_v34  ;;  %v4965_v45 = vld [vmem:[%s9929_s3 + $0x1c8] sm:$0xff] }
 0x3ef   : > { %v4090_v12 = vmul.f32 %v6221_v37, %v3984_v19  ;;  %6222 = vrcp.f32 %v3989_v38  ;;  %5017 = vmatprep.subr.mxu0 %v10432_v5  ;;  %5246 = vmatprep.subr.mxu1 %v10432_v5 }
 0x3f0   : > { %5018 = vmatpush2.msra.mxu0 %v4936_v58  ;;  %5247 = vmatpush2.msra.mxu1 %v4966_v61  ;;  %v4927_v58 = vld [vmem:[%s9929_s3 + $0x98] sm:$0xff] }
 0x3f1   : > { %v4122_v48 = vsub.f32 2.0, %v4090_v12  ;;  %v3768_v41 = vpop.f32.mrf.mxu0  ;;  %5019 = vmatprep.subr.mxu0 %v10432_v5  ;;  %5248 = vmatprep.subr.mxu1 %v10432_v5 }
 0x3f2   : > { %v3769_v63 = vadd.f32 1e-09, %v3768_v41  ;;  %5020 = vmatpush2.msra.mxu0 %v4935_v47  ;;  %5249 = vmatpush2.msra.mxu1 %v4965_v45 }
 0x3f3   : > { %v4154_v62 = vmul.f32 %v6221_v37, %v4122_v48  ;;  %v3770_v53 = vpop.f32.mrf.mxu0  ;;  %5021 = vmatprep.subr.mxu0 %v10432_v5  ;;  %v4932_v37 = vld [vmem:[%s9929_s3 + $0xc0] sm:$0xff]  ;;  %5250 = vmatprep.subr.mxu1 %v10432_v5 }
 0x3f4   : > { %5022 = vmatpush2.msra.mxu0 %v4934_v51  ;;  %v4930_v53 = vld [vmem:[%s9929_s3 + $0xb0] sm:$0xff]  ;;  %5251 = vmatpush2.msra.mxu1 %v4964_v2 }
 0x3f5   : > { %5611 = vmatmul.mubr.msk.f32.gmra.mxu0 %vm4169_vm1, %v4154_v62  ;;  %5643 = vmatmul.mubr.msk.f32.gmra.mxu1 %vm4169_vm1, %v4154_v62 }
 0x3f6   : > { %v3993_v4 = vpop.f32.mrf.mxu1  ;;  %4462 = vmatprep.mubr.f32.mxu0 %v10432_v5  ;;  %4719 = vmatprep.mubr.f32.mxu1 %v10432_v5 }
 0x3f7   : > { %v3994_v24 = vadd.f32 %v3993_v4, %v3769_v63  ;;  %5023 = vmatprep.subr.mxu0 %v10432_v5  ;;  %v4963_v63 = vld [vmem:[%s9929_s3 + $0x1b8] sm:$0xff]  ;;  %5252 = vmatprep.subr.mxu1 %v10432_v5 }
 0x3f8   : > { %v3995_v60 = vpop.f32.mrf.mxu1  ;;  %5024 = vmatpush2.msra.mxu0 %v4933_v26  ;;  %5253 = vmatpush2.msra.mxu1 %v4963_v63 }
 0x3f9   : > { %6224 = vrcp.f32 %v3994_v24  ;;  %5025 = vmatprep.subr.mxu0 %v10432_v5  ;;  %5254 = vmatprep.subr.mxu1 %v10432_v5 }
 0x3fa   : > { %5026 = vmatpush2.msra.mxu0 %v4932_v37  ;;  %5255 = vmatpush2.msra.mxu1 %v4962_v13 }
 0x3fb   : > { %5027 = vmatprep.subr.mxu0 %v10432_v5  ;;  %5256 = vmatprep.subr.mxu1 %v10432_v5 }
 0x3fc   : > { %v6223_v20 = vpop.eup %6222  ;;  %5028 = vmatpush2.msra.mxu0 %v4931_v3  ;;  %5257 = vmatpush2.msra.mxu1 %v4961_v59 }
 0x3fd   : > { %v4091_v19 = vmul.f32 %v6223_v20, %v3989_v38  ;;  %5029 = vmatprep.subr.mxu0 %v10432_v5  ;;  %5258 = vmatprep.subr.mxu1 %v10432_v5 }
 0x3fe   : > { %v3773_v7 = vpop.f32.mrf.mxu0  ;;  %5030 = vmatpush2.msra.mxu0 %v4930_v53  ;;  %5259 = vmatpush2.msra.mxu1 %v4960_v36 }
 0x3ff   : > { %v4123_v15 = vsub.f32 2.0, %v4091_v19  ;;  %v3774_v29 = vadd.f32 1e-09, %v3773_v7  ;;  %v3998_v22 = vpop.f32.mrf.mxu1  ;;  %5031 = vmatprep.subr.mxu0 %v10432_v5  ;;  %5260 = vmatprep.subr.mxu1 %v10432_v5 }
 0x400   : > { %v3775_v27 = vpop.f32.mrf.mxu0 }
 0x401   : > { %v4155_v6 = vmul.f32 %v6223_v20, %v4123_v15  ;;  %v3999_v30 = vadd.f32 %v3998_v22, %v3774_v29  ;;  %v4000_v54 = vpop.f32.mrf.mxu1  ;;  %v4959_v15 = vld [vmem:[%s9929_s3 + $0x198] sm:$0xff]  ;;  %v4926_v29 = vld [vmem:[%s9929_s3 + $0x90] sm:$0xff]  ;;  %v4925_v27 = vld [vmem:[%s9929_s3 + $0x88] sm:$0xff] }
 0x402   : > { %v4958_v22 = vld [vmem:[%s9929_s3 + $0x190] sm:$0xff]  ;;  %5261 = vmatpush2.msra.mxu1 %v4959_v15 }
 0x403   : > { %6226 = vrcp.f32 %v3999_v30  ;;  %5612 = vmatmul.mubr.msk.f32.gmra.mxu0 %vm4169_vm1, %v4155_v6  ;;  %5644 = vmatmul.mubr.msk.f32.gmra.mxu1 %vm4169_vm1, %v4155_v6  ;;  %v4957_v6 = vld [vmem:[%s9929_s3 + $0x188] sm:$0xff] }
 0x404   : > { %4468 = vmatprep.mubr.f32.mxu0 %v10432_v5  ;;  %4725 = vmatprep.mubr.f32.mxu1 %v10432_v5 }
 0x405   : > { %5262 = vmatprep.subr.mxu1 %v10432_v5 }
 0x406   : > { %v6225_v0 = vpop.eup %6224  ;;  %5263 = vmatpush2.msra.mxu1 %v4958_v22 }
 0x407   : > { %v4092_v38 = vmul.f32 %v6225_v0, %v3994_v24  ;;  %v4929_v24 = vld [vmem:[%s9929_s3 + $0xa8] sm:$0xff]  ;;  %5264 = vmatprep.subr.mxu1 %v10432_v5 }
 0x408   : > { %5032 = vmatpush2.msra.mxu0 %v4929_v24  ;;  %5265 = vmatpush2.msra.mxu1 %v4957_v6 }
 0x409   : > { %v4124_v56 = vsub.f32 2.0, %v4092_v38  ;;  %5033 = vmatprep.subr.mxu0 %v10432_v5  ;;  %5266 = vmatprep.subr.mxu1 %v10432_v5 }
 0x40a   : > { %5034 = vmatpush2.msra.mxu0 %v4928_v33  ;;  %5267 = vmatpush2.msra.mxu1 %v4956_v39 }
 0x40b   : > { %v4156_v31 = vmul.f32 %v6225_v0, %v4124_v56  ;;  %v3778_v12 = vpop.f32.mrf.mxu0  ;;  %5035 = vmatprep.subr.mxu0 %v10432_v5 }
 0x40c   : > { %v3779_v48 = vadd.f32 1e-09, %v3778_v12  ;;  %5036 = vmatpush2.msra.mxu0 %v4927_v58 }
 0x40d   : > { %v4003_v41 = vpop.f32.mrf.mxu1  ;;  %5613 = vmatmul.mubr.msk.f32.gmra.mxu0 %vm4169_vm1, %v4156_v31  ;;  %5645 = vmatmul.mubr.msk.f32.gmra.mxu1 %vm4169_vm1, %v4156_v31  ;;  %v3780_v62 = vpop.f32.mrf.mxu0 }
 0x40e   : > { %4474 = vmatprep.mubr.f32.mxu0 %v10432_v5  ;;  %4731 = vmatprep.mubr.f32.mxu1 %v10432_v5  ;;  %v4004_v49 = vadd.f32 %v4003_v41, %v3779_v48 }
 0x40f   : > { %v4005_v44 = vpop.f32.mrf.mxu1  ;;  %5037 = vmatprep.subr.mxu0 %v10432_v5 }
 0x410   : > { %v6227_v4 = vpop.eup %6226  ;;  %v3783_v21 = vpop.f32.mrf.mxu0  ;;  %6228 = vrcp.f32 %v4004_v49  ;;  %5038 = vmatpush2.msra.mxu0 %v4926_v29 }
 0x411   : > { %v4093_v60 = vmul.f32 %v6227_v4, %v3999_v30  ;;  %v3784_v16 = vadd.f32 1e-09, %v3783_v21  ;;  %5039 = vmatprep.subr.mxu0 %v10432_v5  ;;  %v4924_v30 = vld [vmem:[%s9929_s3 + $0x80] sm:$0xff] }
 0x412   : > { %v3785_v23 = vpop.f32.mrf.mxu0  ;;  %5040 = vmatpush2.msra.mxu0 %v4925_v27 }
 0x413   : > { %v4125_v20 = vsub.f32 2.0, %v4093_v60  ;;  %v4008_v1 = vpop.f32.mrf.mxu1  ;;  %5041 = vmatprep.subr.mxu0 %v10432_v5 }
 0x414   : > { %v4009_v19 = vadd.f32 %v4008_v1, %v3784_v16  ;;  %5042 = vmatpush2.msra.mxu0 %v4924_v30 }
 0x415   : > { %v4157_v35 = vmul.f32 %v6227_v4, %v4125_v20  ;;  %v4010_v7 = vpop.f32.mrf.mxu1 }
 0x416   : > { %6230 = vrcp.f32 %v4009_v19 }
 0x417   : > { %5614 = vmatmul.mubr.msk.f32.gmra.mxu0 %vm4169_vm1, %v4157_v35  ;;  %5646 = vmatmul.mubr.msk.f32.gmra.mxu1 %vm4169_vm1, %v4157_v35 }
 0x418   : > { %4480 = vmatprep.mubr.f32.mxu0 %v10432_v5  ;;  %4737 = vmatprep.mubr.f32.mxu1 %v10432_v5 }
 0x41d   : > { %v6229_v54 = vpop.eup %6228 }
 0x41e   : > { %v4094_v47 = vmul.f32 %v6229_v54, %v4004_v49 }
 0x41f   : > { %v3788_v34 = vpop.f32.mrf.mxu0 }
 0x420   : > { %v3789_v51 = vadd.f32 1e-09, %v3788_v34  ;;  %v4126_v0 = vsub.f32 2.0, %v4094_v47 }
 0x421   : > { %v4013_v61 = vpop.f32.mrf.mxu1  ;;  %v3790_v26 = vpop.f32.mrf.mxu0 }
 0x422   : > { %v4014_v38 = vadd.f32 %v4013_v61, %v3789_v51  ;;  %v4158_v45 = vmul.f32 %v6229_v54, %v4126_v0 }
 0x423   : > { %v4015_v37 = vpop.f32.mrf.mxu1  ;;  %v6231_v56 = vpop.eup %6230 }
 0x424   : > { %6232 = vrcp.f32 %v4014_v38  ;;  %v4095_v31 = vmul.f32 %v6231_v56, %v4009_v19  ;;  %5615 = vmatmul.mubr.msk.f32.gmra.mxu0 %vm4169_vm1, %v4158_v45  ;;  %5647 = vmatmul.mubr.msk.f32.gmra.mxu1 %vm4169_vm1, %v4158_v45 }
 0x425   : > { %4486 = vmatprep.mubr.f32.mxu0 %v10432_v5  ;;  %4743 = vmatprep.mubr.f32.mxu1 %v10432_v5 }
 0x426   : > { %v4127_v12 = vsub.f32 2.0, %v4095_v31 }
 0x428   : > { %v4159_v2 = vmul.f32 %v6231_v56, %v4127_v12 }
 0x42a   : > { %5616 = vmatmul.mubr.msk.f32.gmra.mxu0 %vm4169_vm1, %v4159_v2  ;;  %5648 = vmatmul.mubr.msk.f32.gmra.mxu1 %vm4169_vm1, %v4159_v2 }
 0x42b   : > { %v3793_v3 = vpop.f32.mrf.mxu0  ;;  %4492 = vmatprep.mubr.f32.mxu0 %v10432_v5  ;;  %4749 = vmatprep.mubr.f32.mxu1 %v10432_v5 }
 0x42c   : > { %v3794_v48 = vadd.f32 1e-09, %v3793_v3 }
 0x42d   : > { %v4018_v41 = vpop.f32.mrf.mxu1  ;;  %v3795_v62 = vpop.f32.mrf.mxu0 }
 0x42e   : > { %v4019_v63 = vadd.f32 %v4018_v41, %v3794_v48 }
 0x42f   : > { %v4020_v53 = vpop.f32.mrf.mxu1 }
 0x430   : > { %6234 = vrcp.f32 %v4019_v63 }
 0x431   : > { %v6233_v49 = vpop.eup %6232 }
 0x432   : > { %v4096_v44 = vmul.f32 %v6233_v49, %v4014_v38  ;;  %v3798_v4 = vpop.f32.mrf.mxu0 }
 0x433   : > { %v3799_v21 = vadd.f32 1e-09, %v3798_v4  ;;  %v4023_v13 = vpop.f32.mrf.mxu1 }
 0x434   : > { %v4128_v24 = vsub.f32 2.0, %v4096_v44  ;;  %v3800_v60 = vpop.f32.mrf.mxu0 }
 0x435   : > { %v4024_v16 = vadd.f32 %v4023_v13, %v3799_v21  ;;  %v4025_v23 = vpop.f32.mrf.mxu1 }
 0x436   : > { %v4160_v59 = vmul.f32 %v6233_v49, %v4128_v24 }
 0x437   : > { %6236 = vrcp.f32 %v4024_v16 }
 0x438   : > { %5617 = vmatmul.mubr.msk.f32.gmra.mxu0 %vm4169_vm1, %v4160_v59  ;;  %5649 = vmatmul.mubr.msk.f32.gmra.mxu1 %vm4169_vm1, %v4160_v59 }
 0x439   : > { %4498 = vmatprep.mubr.f32.mxu0 %v10432_v5  ;;  %4755 = vmatprep.mubr.f32.mxu1 %v10432_v5 }
 0x43d   : > { %v6235_v33 = vpop.eup %6234 }
 0x43e   : > { %v4097_v20 = vmul.f32 %v6235_v33, %v4019_v63 }
 0x440   : > { %v4129_v1 = vsub.f32 2.0, %v4097_v20  ;;  %v3803_v35 = vpop.f32.mrf.mxu0 }
 0x441   : > { %v3804_v19 = vadd.f32 1e-09, %v3803_v35 }
 0x442   : > { %v4028_v7 = vpop.f32.mrf.mxu1  ;;  %v4161_v36 = vmul.f32 %v6235_v33, %v4129_v1  ;;  %v3805_v58 = vpop.f32.mrf.mxu0  ;;  %v10436_v33 = vld [vmem:[#allocation48_spill] sm:$0xff]  ;;  %v10437_v1 = vld [vmem:[#allocation49_spill] sm:$0xff] }
 0x443   : > { %v4029_v15 = vadd.f32 %v4028_v7, %v3804_v19 }
 0x444   : > { %v4030_v29 = vpop.f32.mrf.mxu1  ;;  %v6237_v22 = vpop.eup %6236  ;;  %5618 = vmatmul.mubr.msk.f32.gmra.mxu0 %vm4169_vm1, %v4161_v36  ;;  %5650 = vmatmul.mubr.msk.f32.gmra.mxu1 %vm4169_vm1, %v4161_v36 }
 0x445   : > { %v4098_v27 = vmul.f32 %v6237_v22, %v4024_v16  ;;  %6238 = vrcp.f32 %v4029_v15  ;;  %4504 = vmatprep.mubr.f32.mxu0 %v10432_v5  ;;  %4761 = vmatprep.mubr.f32.mxu1 %v10432_v5 }
 0x447   : > { %v4130_v6 = vsub.f32 2.0, %v4098_v27 }
 0x449   : > { %v4162_v30 = vmul.f32 %v6237_v22, %v4130_v6  ;;  %v10439_v22 = vld [vmem:[#allocation53_spill] sm:$0xff] }
 0x44b   : > { %5619 = vmatmul.mubr.msk.f32.gmra.mxu0 %vm4169_vm1, %v4162_v30  ;;  %5651 = vmatmul.mubr.msk.f32.gmra.mxu1 %vm4169_vm1, %v4162_v30  ;;  %v10440_v30 = vld [vmem:[#allocation50_spill] sm:$0xff] }
 0x44c   : > { %4510 = vmatprep.mubr.f32.mxu0 %v10432_v5  ;;  %4767 = vmatprep.mubr.f32.mxu1 %v10432_v5 }
 0x44f   : > { %v3808_v54 = vpop.f32.mrf.mxu0 }
 0x450   : > { %v3809_v39 = vadd.f32 1e-09, %v3808_v54 }
 0x451   : > { %v4033_v47 = vpop.f32.mrf.mxu1  ;;  %v3810_v34 = vpop.f32.mrf.mxu0 }
 0x452   : > { %v6239_v51 = vpop.eup %6238  ;;  %v4034_v0 = vadd.f32 %v4033_v47, %v3809_v39  ;;  %v10441_v39 = vld [vmem:[#allocation51_spill] sm:$0xff] }
 0x453   : > { %v4035_v61 = vpop.f32.mrf.mxu1  ;;  %v4099_v26 = vmul.f32 %v6239_v51, %v4029_v15  ;;  %v4332_v38 = vpop.f32.mrf.mxu0  ;;  %v10438_v15 = vld [vmem:[#allocation52_spill] sm:$0xff] }
 0x454   : > { %6240 = vrcp.f32 %v4034_v0  ;;  %v4780_v54 = vmul.f32 %v4332_v38, %v10440_v30  ;;  %v10442_v61 = vld [vmem:[#allocation56_spill] sm:$0xff]  ;;  %v10451_v30 = vld [vmem:[#allocation67_spill] sm:$0xff] }
 0x455   : > { %v4589_v45 = vpop.f32.mrf.mxu1  ;;  %v4131_v37 = vsub.f32 2.0, %v4099_v26  ;;  %v4334_v56 = vpop.f32.mrf.mxu0 }
 0x456   : > { %v4781_v20 = vmul.f32 %v4334_v56, %v10436_v33  ;;  %v4782_v47 = vmul.f32 %v4589_v45, %v10441_v39 }
 0x457   : > { %v4591_v31 = vpop.f32.mrf.mxu1  ;;  %v4163_v12 = vmul.f32 %v6239_v51, %v4131_v37  ;;  %v4338_v2 = vpop.f32.mrf.mxu0  ;;  %v10443_v37 = vld [vmem:[#allocation57_spill] sm:$0xff] }
 0x459   : > { %v4595_v3 = vpop.f32.mrf.mxu1  ;;  %5620 = vmatmul.mubr.msk.f32.gmra.mxu0 %vm4169_vm1, %v4163_v12  ;;  %5652 = vmatmul.mubr.msk.f32.gmra.mxu1 %vm4169_vm1, %v4163_v12  ;;  %v4340_v48 = vpop.f32.mrf.mxu0  ;;  %v10444_v12 = vld [vmem:[#allocation54_spill] sm:$0xff] }
 0x45a   : > { %4516 = vmatprep.mubr.f32.mxu0 %v10432_v5  ;;  %4773 = vmatprep.mubr.f32.mxu1 %v10432_v5  ;;  %v4783_v5 = vmul.f32 %v4591_v31, %v10437_v1  ;;  %v4785_v29 = vmul.f32 %v4340_v48, %v10438_v15  ;;  %v4784_v48 = vmul.f32 %v4338_v2, %v10444_v12  ;;  %v10455_v12 = vld [vmem:[#allocation2_spill] sm:$0xff] }
 0x45b   : > { %v4597_v41 = vpop.f32.mrf.mxu1  ;;  %v4344_v62 = vpop.f32.mrf.mxu0 }
 0x45c   : > { %v4787_v27 = vmul.f32 %v4597_v41, %v10439_v22  ;;  %v10445_v41 = vld [vmem:[#allocation55_spill] sm:$0xff]  ;;  %v10450_v22 = vld [vmem:[#allocation66_spill] sm:$0xff] }
 0x45d   : > { %v4601_v63 = vpop.f32.mrf.mxu1  ;;  %v4346_v53 = vpop.f32.mrf.mxu0  ;;  %v4786_v38 = vmul.f32 %v4595_v3, %v10445_v41 }
 0x45e   : > { %v4789_v26 = vmul.f32 %v4346_v53, %v10442_v61 }
 0x45f   : > { %v4603_v49 = vpop.f32.mrf.mxu1  ;;  %v4350_v44 = vpop.f32.mrf.mxu0 }
 0x460   : > { %v4791_v56 = vmul.f32 %v4603_v49, %v10443_v37  ;;  %v10448_v49 = vld [vmem:[#allocation58_spill] sm:$0xff] }
 0x461   : > { %v4607_v4 = vpop.f32.mrf.mxu1  ;;  %v6241_v21 = vpop.eup %6240  ;;  %v10454_v37 = vld [vmem:[#allocation70_spill] sm:$0xff] }
 0x462   : > { %v4352_v13 = vpop.f32.mrf.mxu0  ;;  %v4100_v24 = vmul.f32 %v6241_v21, %v4034_v0 }
 0x463   : > { %v4609_v60 = vpop.f32.mrf.mxu1 }
 0x464   : > { %v9616_v16 = vpop.f32.mrf.mxu0  ;;  %v4132_v23 = vsub.f32 2.0, %v4100_v24 }
 0x465   : > { %v9618_v59 = vpop.f32.mrf.mxu1 }
 0x466   : > { %v4358_v35 = vpop.f32.mrf.mxu0  ;;  %v4164_v19 = vmul.f32 %v6241_v21, %v4132_v23  ;;  %v10446_v23 = vld [vmem:[#allocation62_spill] sm:$0xff] }
 0x467   : > { %v4615_v7 = vpop.f32.mrf.mxu1  ;;  %v4793_v33 = vmul.f32 %v4352_v13, %v10446_v23 }
 0x468   : > { %v9622_v36 = vpop.f32.mrf.mxu0  ;;  %5621 = vmatmul.mubr.msk.f32.gmra.mxu0 %vm4169_vm1, %v4164_v19  ;;  %5653 = vmatmul.mubr.msk.f32.gmra.mxu1 %vm4169_vm1, %v4164_v19  ;;  %v10449_v19 = vld [vmem:[#allocation60_spill] sm:$0xff]  ;;  %v4799_v13 = vmul.f32 %v4615_v7, %v10451_v30  ;;  %v10462_v30 = vld [vmem:[#allocation13_spill] sm:$0xff] }
 0x469   : > { %v9626_v58 = vpop.f32.mrf.mxu1  ;;  %5043 = vmatprep.mubr.f32.mxu0 %v4781_v20  ;;  %5268 = vmatprep.mubr.f32.mxu1 %v4783_v5  ;;  %v10447_v20 = vld [vmem:[#allocation63_spill] sm:$0xff]  ;;  %v4788_v5 = vmul.f32 %v4344_v62, %v10448_v49  ;;  %v4790_v2 = vmul.f32 %v4601_v63, %v10449_v19  ;;  %v10456_v7 = vld [vmem:[#allocation4_spill] sm:$0xff] }
 0x46a   : > { %v4364_v6 = vpop.f32.mrf.mxu0  ;;  %v4795_v53 = vmul.f32 %v4609_v60, %v10447_v20  ;;  %v10452_v60 = vld [vmem:[#allocation64_spill] sm:$0xff]  ;;  %v4796_v41 = vmul.f32 %v9616_v16, %v10456_v7  ;;  %v10458_v20 = vld [vmem:[#allocation74_spill] sm:$0xff] }
 0x46b   : > { %v4621_v34 = vpop.f32.mrf.mxu1  ;;  %v4792_v39 = vmul.f32 %v4350_v44, %v10452_v60  ;;  %v10457_v44 = vld [vmem:[#allocation5_spill] sm:$0xff]  ;;  %v10461_v19 = vld [vmem:[#allocation72_spill] sm:$0xff] }
 0x46c   : > { %v9632_v51 = vpop.f32.mrf.mxu0  ;;  %5044 = vmatmul.mubr.f32.vlgmr.msra.gmra.mxu0 %v4780_v54  ;;  %5269 = vmatmul.mubr.f32.vlgmr.msra.gmra.mxu1 %v4782_v47  ;;  %v10453_v47 = vld [vmem:[#allocation65_spill] sm:$0xff] }
 0x46d   : > { %v9634_v0 = vpop.f32.mrf.mxu1  ;;  %5048 = vmatprep.mubr.f32.mxu0 %v4785_v29  ;;  %5273 = vmatprep.mubr.f32.mxu1 %v4787_v27  ;;  %v4797_v27 = vmul.f32 %v4358_v35, %v10450_v22  ;;  %v4794_v62 = vmul.f32 %v4607_v4, %v10453_v47  ;;  %v4803_v35 = vmul.f32 %v4621_v34, %v10455_v12  ;;  %v10465_v47 = vld [vmem:[#allocation78_spill] sm:$0xff] }
 0x46e   : > { %v4370_v31 = vpop.f32.mrf.mxu0  ;;  %v4798_v4 = vmul.f32 %v9618_v59, %v10457_v44  ;;  %v4802_v59 = vmul.f32 %v9626_v58, %v10461_v19  ;;  %v4806_v58 = vmul.f32 %v9634_v0, %v10465_v47  ;;  %v10466_v12 = vld [vmem:[#allocation14_spill] sm:$0xff]  ;;  %v10469_v44 = vld [vmem:[#allocation80_spill] sm:$0xff]  ;;  %v10473_v19 = vld [vmem:[#allocation21_spill] sm:$0xff] }
 0x46f   : > { %v4627_v21 = vpop.f32.mrf.mxu1  ;;  %v10477_v47 = vld [vmem:[#allocation24_spill] sm:$0xff] }
 0x470   : > { %v9640_v45 = vpop.f32.mrf.mxu0  ;;  %5049 = vmatmul.mubr.f32.gmra.mxu0 %v4784_v48  ;;  %5274 = vmatmul.mubr.f32.gmra.mxu1 %v4786_v38 }
 0x471   : > { %v9642_v24 = vpop.f32.mrf.mxu1  ;;  %5053 = vmatprep.mubr.f32.mxu0 %v4789_v26  ;;  %5278 = vmatprep.mubr.f32.mxu1 %v4791_v56  ;;  %v4801_v56 = vmul.f32 %v4364_v6, %v10454_v37  ;;  %v4805_v6 = vmul.f32 %v4370_v31, %v10458_v20 }
 0x472   : > { %v4376_v1 = vpop.f32.mrf.mxu0  ;;  %v4810_v0 = vmul.f32 %v9642_v24, %v10469_v44 }
 0x473   : > { %v4633_v15 = vpop.f32.mrf.mxu1  ;;  %v4809_v31 = vmul.f32 %v4376_v1, %v10462_v30 }
 0x474   : > { %v9648_v3 = vpop.f32.mrf.mxu0  ;;  %5054 = vmatmul.mubr.f32.gmra.mxu0 %v4788_v5  ;;  %5279 = vmatmul.mubr.f32.gmra.mxu1 %v4790_v2  ;;  %v10460_v5 = vld [vmem:[#allocation8_spill] sm:$0xff] }
 0x475   : > { %v9650_v29 = vpop.f32.mrf.mxu1  ;;  %5058 = vmatprep.mubr.f32.mxu0 %v4793_v33  ;;  %5283 = vmatprep.mubr.f32.mxu1 %v4795_v53  ;;  %v10459_v53 = vld [vmem:[#allocation6_spill] sm:$0xff]  ;;  %v4800_v16 = vmul.f32 %v9622_v36, %v10460_v5 }
 0x476   : > { %v4382_v54 = vpop.f32.mrf.mxu0  ;;  %v4807_v34 = vmul.f32 %v4627_v21, %v10459_v53  ;;  %v10470_v53 = vld [vmem:[#allocation85_spill] sm:$0xff]  ;;  %v4814_v24 = vmul.f32 %v9650_v29, %v10473_v19 }
 0x477   : > { %v4639_v61 = vpop.f32.mrf.mxu1  ;;  %v4813_v1 = vmul.f32 %v4382_v54, %v10466_v12 }
 0x478   : > { %v9656_v63 = vpop.f32.mrf.mxu0  ;;  %5059 = vmatmul.mubr.f32.gmra.mxu0 %v4792_v39  ;;  %5284 = vmatmul.mubr.f32.gmra.mxu1 %v4794_v62  ;;  %v10464_v39 = vld [vmem:[#allocation75_spill] sm:$0xff] }
 0x479   : > { %v9658_v26 = vpop.f32.mrf.mxu1  ;;  %5063 = vmatprep.mubr.f32.mxu0 %v4797_v27  ;;  %5288 = vmatprep.mubr.f32.mxu1 %v4799_v13  ;;  %v10463_v13 = vld [vmem:[#allocation10_spill] sm:$0xff]  ;;  %v4804_v36 = vmul.f32 %v9632_v51, %v10464_v39 }
 0x47a   : > { %v4388_v48 = vpop.f32.mrf.mxu0  ;;  %v4811_v21 = vmul.f32 %v4633_v15, %v10463_v13  ;;  %v10474_v13 = vld [vmem:[#allocation90_spill] sm:$0xff]  ;;  %v4818_v29 = vmul.f32 %v9658_v26, %v10477_v47 }
 0x47b   : > { %v4645_v38 = vpop.f32.mrf.mxu1  ;;  %v4817_v54 = vmul.f32 %v4388_v48, %v10470_v53 }
 0x47c   : > { %v9666_v23 = vpop.f32.mrf.mxu0  ;;  %5064 = vmatmul.mubr.f32.gmra.mxu0 %v4796_v41  ;;  %5289 = vmatmul.mubr.f32.gmra.mxu1 %v4798_v4  ;;  %v10468_v41 = vld [vmem:[#allocation79_spill] sm:$0xff] }
 0x47d   : > { %v9668_v33 = vpop.f32.mrf.mxu1  ;;  %5068 = vmatprep.mubr.f32.mxu0 %v4801_v56  ;;  %5293 = vmatprep.mubr.f32.mxu1 %v4803_v35  ;;  %v10467_v35 = vld [vmem:[#allocation15_spill] sm:$0xff]  ;;  %v4808_v51 = vmul.f32 %v9640_v45, %v10468_v41 }
 0x47e   : > { %v4394_v49 = vpop.f32.mrf.mxu0  ;;  %v4815_v15 = vmul.f32 %v4639_v61, %v10467_v35  ;;  %v10478_v35 = vld [vmem:[#allocation94_spill] sm:$0xff] }
 0x47f   : > { %v4651_v2 = vpop.f32.mrf.mxu1  ;;  %v4821_v48 = vmul.f32 %v4394_v49, %v10474_v13  ;;  %v10479_v49 = vld [vmem:[#allocation26_spill] sm:$0xff] }
 0x480   : > { %v9676_v22 = vpop.f32.mrf.mxu0  ;;  %5069 = vmatmul.mubr.f32.gmra.mxu0 %v4800_v16  ;;  %5294 = vmatmul.mubr.f32.gmra.mxu1 %v4802_v59  ;;  %v10472_v16 = vld [vmem:[#allocation84_spill] sm:$0xff] }
 0x481   : > { %v9678_v27 = vpop.f32.mrf.mxu1  ;;  %5073 = vmatprep.mubr.f32.mxu0 %v4805_v6  ;;  %5298 = vmatprep.mubr.f32.mxu1 %v4807_v34  ;;  %v10471_v34 = vld [vmem:[#allocation87_spill] sm:$0xff]  ;;  %v4812_v45 = vmul.f32 %v9648_v3, %v10472_v16  ;;  %v10483_v16 = vld [vmem:[#allocation98_spill] sm:$0xff] }
 0x482   : > { %v4400_v60 = vpop.f32.mrf.mxu0  ;;  %v4819_v61 = vmul.f32 %v4645_v38, %v10471_v34  ;;  %v10482_v34 = vld [vmem:[#allocation30_spill] sm:$0xff] }
 0x483   : > { %v4657_v62 = vpop.f32.mrf.mxu1 }
 0x484   : > { %v9686_v37 = vpop.f32.mrf.mxu0  ;;  %5074 = vmatmul.mubr.f32.gmra.mxu0 %v4804_v36  ;;  %5299 = vmatmul.mubr.f32.gmra.mxu1 %v4806_v58  ;;  %v10476_v36 = vld [vmem:[#allocation88_spill] sm:$0xff]  ;;  %v4827_v41 = vmul.f32 %v4657_v62, %v10479_v49  ;;  %v10484_v62 = vld [vmem:[#allocation95_spill] sm:$0xff]  ;;  %v10491_v49 = vld [vmem:[#allocation42_spill] sm:$0xff] }
 0x485   : > { %v9688_v56 = vpop.f32.mrf.mxu1  ;;  %5078 = vmatprep.mubr.f32.mxu0 %v4809_v31  ;;  %5303 = vmatprep.mubr.f32.mxu1 %v4811_v21  ;;  %v10475_v21 = vld [vmem:[#allocation91_spill] sm:$0xff]  ;;  %v4816_v3 = vmul.f32 %v9656_v63, %v10476_v36  ;;  %v10481_v63 = vld [vmem:[#allocation92_spill] sm:$0xff]  ;;  %v4824_v19 = vmul.f32 %v9676_v22, %v10484_v62  ;;  %v10487_v36 = vld [vmem:[#allocation34_spill] sm:$0xff] }
 0x486   : > { %v4406_v7 = vpop.f32.mrf.mxu0  ;;  %v4823_v38 = vmul.f32 %v4651_v2, %v10475_v21  ;;  %v10486_v21 = vld [vmem:[#allocation101_spill] sm:$0xff]  ;;  %v10497_v62 = vld [vmem:[#allocation47_spill] sm:$0xff] }
 0x487   : > { %v4663_v4 = vpop.f32.mrf.mxu1 }
 0x488   : > { %v9696_v20 = vpop.f32.mrf.mxu0  ;;  %5079 = vmatmul.mubr.f32.gmra.mxu0 %v4808_v51  ;;  %5304 = vmatmul.mubr.f32.gmra.mxu1 %v4810_v0  ;;  %v10480_v51 = vld [vmem:[#allocation28_spill] sm:$0xff]  ;;  %v4822_v0 = vmul.f32 %v9668_v33, %v10481_v63  ;;  %v10493_v63 = vld [vmem:[#allocation102_spill] sm:$0xff] }
 0x489   : > { %v9698_v6 = vpop.f32.mrf.mxu1  ;;  %5083 = vmatprep.mubr.f32.mxu0 %v4813_v1  ;;  %5308 = vmatprep.mubr.f32.mxu1 %v4815_v15  ;;  %v4825_v15 = vmul.f32 %v4400_v60, %v10478_v35  ;;  %v4820_v44 = vmul.f32 %v9666_v23, %v10480_v51  ;;  %v4831_v60 = vmul.f32 %v4663_v4, %v10483_v16  ;;  %v10488_v4 = vld [vmem:[#allocation36_spill] sm:$0xff] }
 0x48a   : > { %v4412_v5 = vpop.f32.mrf.mxu0  ;;  %v4828_v47 = vmul.f32 %v9686_v37, %v10488_v4  ;;  %v4834_v37 = vmul.f32 %v9698_v6, %v10493_v63  ;;  %v10503_v4 = vld [vmem:[#allocation112_spill] sm:$0xff]  ;;  %v10508_v63 = vld [vmem:[#allocation113_spill] sm:$0xff] }
 0x48b   : > { %v4669_v59 = vpop.f32.mrf.mxu1 }
 0x48c   : > { %v9706_v30 = vpop.f32.mrf.mxu0  ;;  %5084 = vmatmul.mubr.f32.gmra.mxu0 %v4812_v45  ;;  %5309 = vmatmul.mubr.f32.gmra.mxu1 %v4814_v24  ;;  %v10485_v24 = vld [vmem:[#allocation97_spill] sm:$0xff] }
 0x48d   : > { %v9708_v31 = vpop.f32.mrf.mxu1  ;;  %5088 = vmatprep.mubr.f32.mxu0 %v4817_v54  ;;  %5313 = vmatprep.mubr.f32.mxu1 %v4819_v61  ;;  %v4829_v61 = vmul.f32 %v4406_v7, %v10482_v34  ;;  %v4826_v23 = vmul.f32 %v9678_v27, %v10485_v24  ;;  %v4835_v7 = vmul.f32 %v4669_v59, %v10487_v36  ;;  %v10490_v27 = vld [vmem:[#allocation44_spill] sm:$0xff]  ;;  %v10501_v36 = vld [vmem:[#allocation106_spill] sm:$0xff] }
 0x48e   : > { %v4418_v39 = vpop.f32.mrf.mxu0  ;;  %v10495_v34 = vld [vmem:[#allocation104_spill] sm:$0xff] }
 0x48f   : > { %v4675_v58 = vpop.f32.mrf.mxu1  ;;  %v10499_v24 = vld [vmem:[#allocation108_spill] sm:$0xff] }
 0x490   : > { %v9716_v12 = vpop.f32.mrf.mxu0  ;;  %5089 = vmatmul.mubr.f32.gmra.mxu0 %v4816_v3  ;;  %5314 = vmatmul.mubr.f32.gmra.mxu1 %v4818_v29  ;;  %v10489_v29 = vld [vmem:[#allocation99_spill] sm:$0xff] }
 0x491   : > { %v4679_v1 = vpop.f32.mrf.mxu1  ;;  %5093 = vmatprep.mubr.f32.mxu0 %v4821_v48  ;;  %5318 = vmatprep.mubr.f32.mxu1 %v4823_v38  ;;  %v4833_v38 = vmul.f32 %v4412_v5, %v10486_v21  ;;  %v4830_v22 = vmul.f32 %v9688_v56, %v10489_v29  ;;  %v10494_v56 = vld [vmem:[#allocation103_spill] sm:$0xff] }
 0x492   : > { %v4424_v2 = vpop.f32.mrf.mxu0 }
 0x493   : > { %v4681_v26 = vpop.f32.mrf.mxu1 }
 0x494   : > { %v4428_v53 = vpop.f32.mrf.mxu0  ;;  %5094 = vmatmul.mubr.f32.gmra.mxu0 %v4820_v44  ;;  %5319 = vmatmul.mubr.f32.gmra.mxu1 %v4822_v0  ;;  %v10492_v44 = vld [vmem:[#allocation38_spill] sm:$0xff]  ;;  %v4841_v0 = vmul.f32 %v4424_v2, %v10494_v56  ;;  %v10511_v56 = vld [vmem:[#allocation3_spill] sm:$0xff] }
 0x495   : > { %v4685_v54 = vpop.f32.mrf.mxu1  ;;  %5098 = vmatprep.mubr.f32.mxu0 %v4825_v15  ;;  %5323 = vmatprep.mubr.f32.mxu1 %v4827_v41  ;;  %v4837_v15 = vmul.f32 %v4418_v39, %v10490_v27  ;;  %v4839_v41 = vmul.f32 %v4675_v58, %v10491_v49  ;;  %v4832_v59 = vmul.f32 %v9696_v20, %v10492_v44  ;;  %v10498_v20 = vld [vmem:[#allocation107_spill] sm:$0xff]  ;;  %v10507_v49 = vld [vmem:[#allocation114_spill] sm:$0xff] }
 0x496   : > { %v4430_v45 = vpop.f32.mrf.mxu0 }
 0x497   : > { %v4687_v13 = vpop.f32.mrf.mxu1  ;;  %v4845_v6 = vmul.f32 %v4430_v45, %v10498_v20  ;;  %v10504_v45 = vld [vmem:[#allocation109_spill] sm:$0xff] }
 0x498   : > { %v4434_v33 = vpop.f32.mrf.mxu0  ;;  %5099 = vmatmul.mubr.f32.gmra.mxu0 %v4824_v19  ;;  %5324 = vmatmul.mubr.f32.gmra.mxu1 %v4826_v23  ;;  %v4838_v19 = vmul.f32 %v9708_v31, %v10497_v62  ;;  %v4847_v23 = vmul.f32 %v4687_v13, %v10499_v24  ;;  %v4844_v27 = vmul.f32 %v4428_v53, %v10504_v45  ;;  %v10505_v13 = vld [vmem:[#allocation110_spill] sm:$0xff]  ;;  %v10510_v53 = vld [vmem:[#allocation71_spill] sm:$0xff]  ;;  %v10515_v62 = vld [vmem:[#allocation69_spill] sm:$0xff] }
 0x499   : > { %v4691_v48 = vpop.f32.mrf.mxu1  ;;  %5103 = vmatprep.mubr.f32.mxu0 %v4829_v61  ;;  %5328 = vmatprep.mubr.f32.mxu1 %v4831_v60  ;;  %v4843_v61 = vmul.f32 %v4681_v26, %v10495_v34  ;;  %v10496_v60 = vld [vmem:[#allocation46_spill] sm:$0xff]  ;;  %v10516_v24 = vld [vmem:[#allocation117_spill] sm:$0xff]  ;;  %v10523_v45 = vld [vmem:[#allocation119_spill] sm:$0xff] }
 0x49a   : > { %v4436_v3 = vpop.f32.mrf.mxu0  ;;  %v4836_v58 = vmul.f32 %v9706_v30, %v10496_v60  ;;  %v10502_v30 = vld [vmem:[#allocation111_spill] sm:$0xff] }
 0x49b   : > { %v4693_v35 = vpop.f32.mrf.mxu1  ;;  %v4849_v31 = vmul.f32 %v4436_v3, %v10502_v30  ;;  %v4848_v3 = vmul.f32 %v4434_v33, %v10508_v63  ;;  %v10512_v60 = vld [vmem:[#allocation115_spill] sm:$0xff]  ;;  %v10514_v33 = vld [vmem:[#allocation68_spill] sm:$0xff]  ;;  %v10519_v30 = vld [vmem:[#allocation73_spill] sm:$0xff] }
 0x49c   : > { %5104 = vmatmul.mubr.f32.gmra.mxu0 %v4828_v47  ;;  %5329 = vmatmul.mubr.f32.gmra.mxu1 %v4830_v22  ;;  %v4440_v51 = vpop.f32.mrf.mxu0  ;;  %v4851_v47 = vmul.f32 %v4693_v35, %v10503_v4  ;;  %v10520_v4 = vld [vmem:[#allocation7_spill] sm:$0xff]  ;;  %v10525_v63 = vld [vmem:[#allocation76_spill] sm:$0xff] }
 0x49d   : > { %5108 = vmatprep.mubr.f32.mxu0 %v4833_v38  ;;  %5333 = vmatprep.mubr.f32.mxu1 %v4835_v7  ;;  %v4697_v5 = vpop.f32.mrf.mxu1  ;;  %v10500_v38 = vld [vmem:[#allocation105_spill] sm:$0xff]  ;;  %v4842_v7 = vmul.f32 %v4679_v1, %v10501_v36 }
 0x49e   : > { %v4442_v16 = vpop.f32.mrf.mxu0  ;;  %v4840_v26 = vmul.f32 %v9716_v12, %v10500_v38  ;;  %v10506_v12 = vld [vmem:[#allocation61_spill] sm:$0xff]  ;;  %v10517_v38 = vld [vmem:[#allocation118_spill] sm:$0xff] }
 0x49f   : > { %v4699_v39 = vpop.f32.mrf.mxu1  ;;  %v4853_v1 = vmul.f32 %v4442_v16, %v10506_v12  ;;  %v4852_v16 = vmul.f32 %v4440_v51, %v10512_v60  ;;  %v10518_v51 = vld [vmem:[#allocation9_spill] sm:$0xff]  ;;  %v10529_v60 = vld [vmem:[#allocation86_spill] sm:$0xff] }
 0x4a0   : > { %5109 = vmatmul.mubr.f32.gmra.mxu0 %v4832_v59  ;;  %5334 = vmatmul.mubr.f32.gmra.mxu1 %v4834_v37  ;;  %v10509_v37 = vld [vmem:[#allocation59_spill] sm:$0xff] }
 0x4a1   : > { %5113 = vmatprep.mubr.f32.mxu0 %v4837_v15  ;;  %5338 = vmatprep.mubr.f32.mxu1 %v4839_v41  ;;  %v4446_v21 = vpop.f32.mrf.mxu0  ;;  %v4703_v2 = vpop.f32.mrf.mxu1  ;;  %v4846_v15 = vmul.f32 %v4685_v54, %v10505_v13  ;;  %v4855_v41 = vmul.f32 %v4699_v39, %v10507_v49  ;;  %v4850_v35 = vmul.f32 %v4691_v48, %v10509_v37  ;;  %v10524_v49 = vld [vmem:[#allocation16_spill] sm:$0xff] }
 0x4a2   : > { %v10527_v37 = vld [vmem:[#allocation120_spill] sm:$0xff] }
 0x4a3   : > { %v4448_v29 = vpop.f32.mrf.mxu0  ;;  %v4705_v22 = vpop.f32.mrf.mxu1 }
 0x4a4   : > { %5114 = vmatmul.mubr.f32.gmra.mxu0 %v4836_v58  ;;  %5339 = vmatmul.mubr.f32.gmra.mxu1 %v4838_v19  ;;  %v4857_v54 = vmul.f32 %v4448_v29, %v10510_v53  ;;  %v10513_v58 = vld [vmem:[#allocation116_spill] sm:$0xff] }
 0x4a5   : > { %5118 = vmatprep.mubr.f32.mxu0 %v4841_v0  ;;  %5343 = vmatprep.mubr.f32.mxu1 %v4843_v61  ;;  %v4859_v0 = vmul.f32 %v4705_v22, %v10511_v56  ;;  %v4854_v39 = vmul.f32 %v4697_v5, %v10513_v58  ;;  %v10521_v29 = vld [vmem:[#allocation12_spill] sm:$0xff]  ;;  %v10530_v58 = vld [vmem:[#allocation19_spill] sm:$0xff] }
 0x4a8   : > { %5119 = vmatmul.mubr.f32.gmra.mxu0 %v4840_v26  ;;  %5344 = vmatmul.mubr.f32.gmra.mxu1 %v4842_v7  ;;  %v4858_v26 = vmul.f32 %v4703_v2, %v10517_v38  ;;  %v10533_v38 = vld [vmem:[#allocation126_spill] sm:$0xff] }
 0x4a9   : > { %5123 = vmatprep.mubr.f32.mxu0 %v4845_v6  ;;  %5348 = vmatprep.mubr.f32.mxu1 %v4847_v23  ;;  %v4452_v44 = vpop.f32.mrf.mxu0  ;;  %v4709_v59 = vpop.f32.mrf.mxu1  ;;  %v4856_v23 = vmul.f32 %v4446_v21, %v10516_v24  ;;  %v10522_v21 = vld [vmem:[#allocation11_spill] sm:$0xff]  ;;  %v10532_v24 = vld [vmem:[#allocation125_spill] sm:$0xff] }
 0x4aa   : > { %v4862_v22 = vmul.f32 %v4709_v59, %v10521_v29  ;;  %v10536_v29 = vld [vmem:[#allocation25_spill] sm:$0xff] }
 0x4ab   : > { %v4454_v34 = vpop.f32.mrf.mxu0  ;;  %v4711_v61 = vpop.f32.mrf.mxu1 }
 0x4ac   : > { %5124 = vmatmul.mubr.f32.gmra.mxu0 %v4844_v27  ;;  %5349 = vmatmul.mubr.f32.gmra.mxu1 %v4846_v15  ;;  %v4861_v48 = vmul.f32 %v4454_v34, %v10514_v33  ;;  %v4863_v19 = vmul.f32 %v4711_v61, %v10515_v62  ;;  %v10528_v34 = vld [vmem:[#allocation121_spill] sm:$0xff]  ;;  %v10531_v33 = vld [vmem:[#allocation122_spill] sm:$0xff] }
 0x4ad   : > { %5128 = vmatprep.mubr.f32.mxu0 %v4849_v31  ;;  %5353 = vmatprep.mubr.f32.mxu1 %v4851_v47  ;;  %v4860_v47 = vmul.f32 %v4452_v44, %v10520_v4 }
 0x4b0   : > { %5129 = vmatmul.mubr.f32.gmra.mxu0 %v4848_v3  ;;  %5354 = vmatmul.mubr.f32.gmra.mxu1 %v4850_v35  ;;  %v10526_v3 = vld [vmem:[#allocation77_spill] sm:$0xff] }
 0x4b1   : > { %5133 = vmatprep.mubr.f32.mxu0 %v4853_v1  ;;  %5358 = vmatprep.mubr.f32.mxu1 %v4855_v41 }
 0x4b4   : > { %5134 = vmatmul.mubr.f32.gmra.mxu0 %v4852_v16  ;;  %5359 = vmatmul.mubr.f32.gmra.mxu1 %v4854_v39 }
 0x4b5   : > { %5138 = vmatprep.mubr.f32.mxu0 %v4857_v54  ;;  %5363 = vmatprep.mubr.f32.mxu1 %v4859_v0  ;;  %v4458_v20 = vpop.f32.mrf.mxu0  ;;  %v4715_v6 = vpop.f32.mrf.mxu1 }
 0x4b6   : > { %v4864_v2 = vmul.f32 %v4458_v20, %v10522_v21  ;;  %v4866_v27 = vmul.f32 %v4715_v6, %v10523_v45  ;;  %v10537_v21 = vld [vmem:[#allocation89_spill] sm:$0xff] }
 0x4b7   : > { %v4460_v36 = vpop.f32.mrf.mxu0  ;;  %v4717_v7 = vpop.f32.mrf.mxu1 }
 0x4b8   : > { %5139 = vmatmul.mubr.f32.gmra.mxu0 %v4856_v23  ;;  %5364 = vmatmul.mubr.f32.gmra.mxu1 %v4858_v26  ;;  %v4865_v5 = vmul.f32 %v4460_v36, %v10518_v51  ;;  %v4867_v31 = vmul.f32 %v4717_v7, %v10519_v30  ;;  %v10534_v36 = vld [vmem:[#allocation22_spill] sm:$0xff]  ;;  %v10535_v51 = vld [vmem:[#allocation23_spill] sm:$0xff] }
 0x4b9   : > { %5143 = vmatprep.mubr.f32.mxu0 %v4861_v48  ;;  %5368 = vmatprep.mubr.f32.mxu1 %v4863_v19 }
 0x4bc   : > { %5144 = vmatmul.mubr.f32.gmra.mxu0 %v4860_v47  ;;  %5369 = vmatmul.mubr.f32.gmra.mxu1 %v4862_v22 }
 0x4bd   : > { %5148 = vmatprep.mubr.f32.mxu0 %v4865_v5  ;;  %5373 = vmatprep.mubr.f32.mxu1 %v4867_v31 }
 0x4c0   : > { %5149 = vmatmul.mubr.f32.gmra.mxu0 %v4864_v2  ;;  %5374 = vmatmul.mubr.f32.gmra.mxu1 %v4866_v27  ;;  %v10538_v27 = vld [vmem:[#allocation27_spill] sm:$0xff] }
 0x4c3   : > { %v4464_v13 = vpop.f32.mrf.mxu0  ;;  %v4721_v15 = vpop.f32.mrf.mxu1 }
 0x4c4   : > { %v4868_v59 = vmul.f32 %v4464_v13, %v10526_v3  ;;  %v4870_v35 = vmul.f32 %v4721_v15, %v10527_v37 }
 0x4c5   : > { %v4466_v12 = vpop.f32.mrf.mxu0  ;;  %v4723_v1 = vpop.f32.mrf.mxu1 }
 0x4c6   : > { %v4869_v41 = vmul.f32 %v4466_v12, %v10524_v49  ;;  %v4871_v44 = vmul.f32 %v4723_v1, %v10525_v63 }
 0x4c8   : > { %5153 = vmatprep.mubr.f32.mxu0 %v4869_v41  ;;  %5378 = vmatprep.mubr.f32.mxu1 %v4871_v44  ;;  %v10539_v41 = vld [vmem:[#allocation32_spill] sm:$0xff]  ;;  %v10540_v44 = vld [vmem:[#allocation29_spill] sm:$0xff] }
 0x4c9   : > { %5154 = vmatmul.mubr.f32.gmra.mxu0 %v4868_v59  ;;  %5379 = vmatmul.mubr.f32.gmra.mxu1 %v4870_v35  ;;  %v10541_v59 = vld [vmem:[#allocation93_spill] sm:$0xff]  ;;  %v10542_v35 = vld [vmem:[#allocation31_spill] sm:$0xff] }
 0x4cd   : > { %v4470_v53 = vpop.f32.mrf.mxu0  ;;  %v4727_v54 = vpop.f32.mrf.mxu1 }
 0x4ce   : > { %v4872_v39 = vmul.f32 %v4470_v53, %v10530_v58  ;;  %v4874_v48 = vmul.f32 %v4727_v54, %v10531_v33  ;;  %v10544_v58 = vld [vmem:[#allocation96_spill] sm:$0xff] }
 0x4cf   : > { %v4472_v56 = vpop.f32.mrf.mxu0  ;;  %v4729_v0 = vpop.f32.mrf.mxu1 }
 0x4d0   : > { %v4873_v61 = vmul.f32 %v4472_v56, %v10528_v34  ;;  %v4875_v16 = vmul.f32 %v4729_v0, %v10529_v60  ;;  %v10543_v60 = vld [vmem:[#allocation33_spill] sm:$0xff] }
 0x4d2   : > { %5158 = vmatprep.mubr.f32.mxu0 %v4873_v61  ;;  %5383 = vmatprep.mubr.f32.mxu1 %v4875_v16 }
 0x4d3   : > { %5159 = vmatmul.mubr.f32.gmra.mxu0 %v4872_v39  ;;  %5384 = vmatmul.mubr.f32.gmra.mxu1 %v4874_v48 }
 0x4d7   : > { %v4476_v62 = vpop.f32.mrf.mxu0  ;;  %v4733_v19 = vpop.f32.mrf.mxu1 }
 0x4d8   : > { %v4876_v7 = vmul.f32 %v4476_v62, %v10534_v36  ;;  %v4878_v5 = vmul.f32 %v4733_v19, %v10535_v51 }
 0x4d9   : > { %v4478_v20 = vpop.f32.mrf.mxu0  ;;  %v4735_v6 = vpop.f32.mrf.mxu1 }
 0x4da   : > { %v4877_v23 = vmul.f32 %v4478_v20, %v10532_v24  ;;  %v4879_v26 = vmul.f32 %v4735_v6, %v10533_v38  ;;  %v10545_v20 = vld [vmem:[#allocation35_spill] sm:$0xff] }
 0x4dc   : > { %5163 = vmatprep.mubr.f32.mxu0 %v4877_v23  ;;  %5388 = vmatprep.mubr.f32.mxu1 %v4879_v26 }
 0x4dd   : > { %5164 = vmatmul.mubr.f32.gmra.mxu0 %v4876_v7  ;;  %5389 = vmatmul.mubr.f32.gmra.mxu1 %v4878_v5 }
 0x4e4   : > { %v4482_v30 = vpop.f32.mrf.mxu0  ;;  %v4739_v31 = vpop.f32.mrf.mxu1 }
 0x4e5   : > { %v4880_v45 = vmul.f32 %v4482_v30, %v8948_v9  ;;  %v4882_v13 = vmul.f32 %v4739_v31, %v10538_v27 }
 0x4e6   : > { %v4484_v4 = vpop.f32.mrf.mxu0  ;;  %v4741_v47 = vpop.f32.mrf.mxu1 }
 0x4e7   : > { %v4881_v22 = vmul.f32 %v4484_v4, %v10536_v29  ;;  %v4883_v2 = vmul.f32 %v4741_v47, %v10537_v21  ;;  %v9814_v21 = vld [vmem:[%s9930_s4] ss:$0 sm:$0xff] }
 0x4e9   : > { %5168 = vmatprep.mubr.f32.mxu0 %v4881_v22  ;;  %5393 = vmatprep.mubr.f32.mxu1 %v4883_v2 }
 0x4ea   : > { %v4488_v15 = vpop.f32.mrf.mxu0  ;;  %v4745_v12 = vpop.f32.mrf.mxu1  ;;  %5169 = vmatmul.mubr.f32.gmra.mxu0 %v4880_v45  ;;  %5394 = vmatmul.mubr.f32.gmra.mxu1 %v4882_v13 }
 0x4eb   : > { %v4884_v37 = vmul.f32 %v4488_v15, %v10541_v59  ;;  %v4886_v53 = vmul.f32 %v4745_v12, %v10542_v35 }
 0x4ec   : > { %v4490_v1 = vpop.f32.mrf.mxu0  ;;  %v4747_v49 = vpop.f32.mrf.mxu1 }
 0x4ed   : > { %v4885_v63 = vmul.f32 %v4490_v1, %v10539_v41  ;;  %v4887_v3 = vmul.f32 %v4747_v49, %v10540_v44 }
 0x4ef   : > { %5173 = vmatprep.mubr.f32.mxu0 %v4885_v63  ;;  %5398 = vmatprep.mubr.f32.mxu1 %v4887_v3 }
 0x4f0   : > { %5174 = vmatmul.mubr.f32.gmra.mxu0 %v4884_v37  ;;  %5399 = vmatmul.mubr.f32.gmra.mxu1 %v4886_v53 }
 0x4f8   : > { %v4494_v9 = vpop.f32.mrf.mxu0  ;;  %v4751_v54 = vpop.f32.mrf.mxu1 }
 0x4f9   : > { %v4888_v16 = vmul.f32 %v4494_v9, %v10543_v60  ;;  %v4890_v39 = vmul.f32 %v4751_v54, %v10544_v58 }
 0x4fa   : > { %v4496_v56 = vpop.f32.mrf.mxu0  ;;  %v4753_v0 = vpop.f32.mrf.mxu1 }
 0x4fb   : > { %v4889_v34 = vmul.f32 %v4496_v56, %v9014_v57  ;;  %v4891_v61 = vmul.f32 %v4753_v0, %v9018_v55 }
 0x4fd   : > { %5178 = vmatprep.mubr.f32.mxu0 %v4889_v34  ;;  %5403 = vmatprep.mubr.f32.mxu1 %v4891_v61 }
 0x4fe   : > { %5179 = vmatmul.mubr.f32.gmra.mxu0 %v4888_v16  ;;  %5404 = vmatmul.mubr.f32.gmra.mxu1 %v4890_v39 }
 0x504   : > { %v4500_v33 = vpop.f32.mrf.mxu0  ;;  %v4757_v48 = vpop.f32.mrf.mxu1 }
 0x505   : > { %v4892_v57 = vmul.f32 %v4500_v33, %v9066_v17  ;;  %v4894_v55 = vmul.f32 %v4757_v48, %v9079_v50 }
 0x506   : > { %v4502_v62 = vpop.f32.mrf.mxu0  ;;  %v4759_v19 = vpop.f32.mrf.mxu1 }
 0x507   : > { %v4893_v6 = vmul.f32 %v4502_v62, %v10545_v20  ;;  %v4895_v24 = vmul.f32 %v4759_v19, %v9052_v28 }
 0x509   : > { %5183 = vmatprep.mubr.f32.mxu0 %v4893_v6  ;;  %5408 = vmatprep.mubr.f32.mxu1 %v4895_v24 }
 0x50a   : > { %5184 = vmatmul.mubr.f32.gmra.mxu0 %v4892_v57  ;;  %5409 = vmatmul.mubr.f32.gmra.mxu1 %v4894_v55 }
 0x50b   : > { %v4506_v23 = vpop.f32.mrf.mxu0  ;;  %v4763_v38 = vpop.f32.mrf.mxu1 }
 0x50c   : > { %v4896_v5 = vmul.f32 %v4506_v23, %v9098_v32  ;;  %v4898_v28 = vmul.f32 %v4763_v38, %v9102_v46 }
 0x50d   : > { %v4508_v26 = vpop.f32.mrf.mxu0  ;;  %v4765_v36 = vpop.f32.mrf.mxu1 }
 0x50e   : > { %v4897_v7 = vmul.f32 %v4508_v26, %v9088_v14  ;;  %v4899_v51 = vmul.f32 %v4765_v36, %v9092_v18 }
 0x510   : > { %5188 = vmatprep.mubr.f32.mxu0 %v4897_v7  ;;  %5413 = vmatprep.mubr.f32.mxu1 %v4899_v51 }
 0x511   : > { %5189 = vmatmul.mubr.f32.gmra.mxu0 %v4896_v5  ;;  %5414 = vmatmul.mubr.f32.gmra.mxu1 %v4898_v28 }
 0x519   : > { %v4512_v17 = vpop.f32.mrf.mxu0  ;;  %v4769_v50 = vpop.f32.mrf.mxu1 }
 0x51a   : > { %v4900_v14 = vmul.f32 %v4512_v17, %v9134_v40  ;;  %v4902_v18 = vmul.f32 %v4769_v50, %v9138_v25 }
 0x51b   : > { %v4514_v30 = vpop.f32.mrf.mxu0  ;;  %v4771_v31 = vpop.f32.mrf.mxu1 }
 0x51c   : > { %v4901_v4 = vmul.f32 %v4514_v30, %v9121_v42  ;;  %v4903_v47 = vmul.f32 %v4771_v31, %v9125_v11 }
 0x51e   : > { %5193 = vmatprep.mubr.f32.mxu0 %v4901_v4  ;;  %5418 = vmatprep.mubr.f32.mxu1 %v4903_v47 }
 0x51f   : > { %5194 = vmatmul.mubr.f32.gmra.mxu0 %v4900_v14  ;;  %5419 = vmatmul.mubr.f32.gmra.mxu1 %v4902_v18 }
 0x528   : > { %v4518_v32 = vpop.f32.mrf.mxu0  ;;  %v4775_v46 = vpop.f32.mrf.mxu1 }
 0x529   : > { %v4904_v40 = vmul.f32 %v4518_v32, %v9179_v52  ;;  %v4906_v25 = vmul.f32 %v4775_v46, %v9182_v8 }
 0x52a   : > { %v4520_v29 = vpop.f32.mrf.mxu0  ;;  %v4777_v22 = vpop.f32.mrf.mxu1 }
 0x52b   : > { %v4905_v42 = vmul.f32 %v4520_v29, %v9146_v43  ;;  %v4907_v11 = vmul.f32 %v4777_v22, %v9164_v10 }
 0x52c   : > { %v5045_v2 = vpop.f32.mrf.mxu0  ;;  %v5270_v45 = vpop.f32.mrf.mxu1 }
 0x52d   : > { %5198 = vmatprep.mubr.f32.mxu0 %v4905_v42  ;;  %5423 = vmatprep.mubr.f32.mxu1 %v4907_v11  ;;  %v5046_v27 = vadd.f32 %v9814_v21, %v5045_v2 }
 0x52e   : > { %5199 = vmatmul.mubr.f32.gmra.mxu0 %v4904_v40  ;;  %5424 = vmatmul.mubr.f32.gmra.mxu1 %v4906_v25  ;;  %v5047_v43 = vpop.f32.mrf.mxu0  ;;  %v5272_v10 = vpop.f32.mrf.mxu1 }
 0x52f   : > { %v5271_v52 = vadd.f32 %v5270_v45, %v5046_v27 }
 0x530   : > { %v5050_v8 = vpop.f32.mrf.mxu0  ;;  %v5275_v13 = vpop.f32.mrf.mxu1 }
 0x531   : > { %5429 = vst.msk [vmem:[%s9826_s11] sm:$0xff] %vm352_vm0, %v5271_v52  ;;  %v5051_v15 = vadd.f32 %v9814_v21, %v5050_v8 }
 0x532   : > { %v5052_v12 = vpop.f32.mrf.mxu0  ;;  %v5277_v1 = vpop.f32.mrf.mxu1 }
 0x533   : > { %v5276_v49 = vadd.f32 %v5275_v13, %v5051_v15 }
 0x534   : > { %v5055_v41 = vpop.f32.mrf.mxu0  ;;  %v5280_v63 = vpop.f32.mrf.mxu1 }
 0x535   : > { %5430 = vst.msk [vmem:[%s9826_s11 + $0x8] sm:$0xff] %vm352_vm0, %v5276_v49  ;;  %v5056_v44 = vadd.f32 %v9814_v21, %v5055_v41 }
 0x536   : > { %v5057_v3 = vpop.f32.mrf.mxu0  ;;  %v5282_v59 = vpop.f32.mrf.mxu1 }
 0x537   : > { %v5281_v37 = vadd.f32 %v5280_v63, %v5056_v44 }
 0x538   : > { %v5060_v35 = vpop.f32.mrf.mxu0  ;;  %v5285_v53 = vpop.f32.mrf.mxu1 }
 0x539   : > { %5431 = vst.msk [vmem:[%s9826_s11 + $0x10] sm:$0xff] %vm352_vm0, %v5281_v37  ;;  %v5061_v9 = vadd.f32 %v9814_v21, %v5060_v35 }
 0x53a   : > { %v5062_v54 = vpop.f32.mrf.mxu0  ;;  %v5287_v56 = vpop.f32.mrf.mxu1 }
 0x53b   : > { %v5286_v0 = vadd.f32 %v5285_v53, %v5061_v9 }
 0x53c   : > { %v5065_v34 = vpop.f32.mrf.mxu0  ;;  %v5290_v61 = vpop.f32.mrf.mxu1 }
 0x53d   : > { %5432 = vst.msk [vmem:[%s9826_s11 + $0x18] sm:$0xff] %vm352_vm0, %v5286_v0  ;;  %v5066_v60 = vadd.f32 %v9814_v21, %v5065_v34 }
 0x53e   : > { %v5067_v16 = vpop.f32.mrf.mxu0  ;;  %v5292_v58 = vpop.f32.mrf.mxu1 }
 0x53f   : > { %v5291_v39 = vadd.f32 %v5290_v61, %v5066_v60 }
 0x540   : > { %v5070_v33 = vpop.f32.mrf.mxu0  ;;  %v5295_v48 = vpop.f32.mrf.mxu1 }
 0x541   : > { %5433 = vst.msk [vmem:[%s9826_s11 + $0x20] sm:$0xff] %vm352_vm0, %v5291_v39  ;;  %v5071_v62 = vadd.f32 %v9814_v21, %v5070_v33 }
 0x542   : > { %v5072_v19 = vpop.f32.mrf.mxu0  ;;  %v5297_v20 = vpop.f32.mrf.mxu1 }
 0x543   : > { %v5296_v6 = vadd.f32 %v5295_v48, %v5071_v62 }
 0x544   : > { %v5075_v24 = vpop.f32.mrf.mxu0  ;;  %v5300_v57 = vpop.f32.mrf.mxu1 }
 0x545   : > { %5434 = vst.msk [vmem:[%s9826_s11 + $0x28] sm:$0xff] %vm352_vm0, %v5296_v6  ;;  %v5076_v55 = vadd.f32 %v9814_v21, %v5075_v24 }
 0x546   : > { %v5077_v23 = vpop.f32.mrf.mxu0  ;;  %v5302_v38 = vpop.f32.mrf.mxu1 }
 0x547   : > { %v5301_v26 = vadd.f32 %v5300_v57, %v5076_v55 }
 0x548   : > { %v5080_v36 = vpop.f32.mrf.mxu0  ;;  %v5305_v7 = vpop.f32.mrf.mxu1 }
 0x549   : > { %5435 = vst.msk [vmem:[%s9826_s11 + $0x30] sm:$0xff] %vm352_vm0, %v5301_v26  ;;  %v5081_v51 = vadd.f32 %v9814_v21, %v5080_v36 }
 0x54a   : > { %v5082_v5 = vpop.f32.mrf.mxu0  ;;  %v5307_v28 = vpop.f32.mrf.mxu1 }
 0x54b   : > { %v5306_v17 = vadd.f32 %v5305_v7, %v5081_v51 }
 0x54c   : > { %v5085_v50 = vpop.f32.mrf.mxu0  ;;  %v5310_v30 = vpop.f32.mrf.mxu1 }
 0x54d   : > { %5436 = vst.msk [vmem:[%s9826_s11 + $0x38] sm:$0xff] %vm352_vm0, %v5306_v17  ;;  %v5086_v31 = vadd.f32 %v9814_v21, %v5085_v50 }
 0x54e   : > { %v5087_v4 = vpop.f32.mrf.mxu0  ;;  %v5312_v47 = vpop.f32.mrf.mxu1 }
 0x54f   : > { %v5311_v14 = vadd.f32 %v5310_v30, %v5086_v31 }
 0x550   : > { %v5090_v18 = vpop.f32.mrf.mxu0  ;;  %v5315_v32 = vpop.f32.mrf.mxu1 }
 0x551   : > { %5437 = vst.msk [vmem:[%s9826_s11 + $0x40] sm:$0xff] %vm352_vm0, %v5311_v14  ;;  %v5091_v46 = vadd.f32 %v9814_v21, %v5090_v18 }
 0x552   : > { %v5092_v29 = vpop.f32.mrf.mxu0  ;;  %v5317_v22 = vpop.f32.mrf.mxu1 }
 0x553   : > { %v5316_v42 = vadd.f32 %v5315_v32, %v5091_v46 }
 0x554   : > { %v5095_v11 = vpop.f32.mrf.mxu0  ;;  %v5320_v40 = vpop.f32.mrf.mxu1 }
 0x555   : > { %5438 = vst.msk [vmem:[%s9826_s11 + $0x48] sm:$0xff] %vm352_vm0, %v5316_v42  ;;  %v5096_v25 = vadd.f32 %v9814_v21, %v5095_v11 }
 0x556   : > { %v5097_v2 = vpop.f32.mrf.mxu0  ;;  %v5322_v45 = vpop.f32.mrf.mxu1 }
 0x557   : > { %v5321_v27 = vadd.f32 %v5320_v40, %v5096_v25 }
 0x558   : > { %v5100_v43 = vpop.f32.mrf.mxu0  ;;  %v5325_v10 = vpop.f32.mrf.mxu1 }
 0x559   : > { %5439 = vst.msk [vmem:[%s9826_s11 + $0x50] sm:$0xff] %vm352_vm0, %v5321_v27  ;;  %v5101_v52 = vadd.f32 %v9814_v21, %v5100_v43 }
 0x55a   : > { %v5102_v8 = vpop.f32.mrf.mxu0  ;;  %v5327_v13 = vpop.f32.mrf.mxu1 }
 0x55b   : > { %v5326_v15 = vadd.f32 %v5325_v10, %v5101_v52 }
 0x55c   : > { %v5105_v12 = vpop.f32.mrf.mxu0  ;;  %v5330_v1 = vpop.f32.mrf.mxu1 }
 0x55d   : > { %5440 = vst.msk [vmem:[%s9826_s11 + $0x58] sm:$0xff] %vm352_vm0, %v5326_v15  ;;  %v5106_v49 = vadd.f32 %v9814_v21, %v5105_v12 }
 0x55e   : > { %v5107_v41 = vpop.f32.mrf.mxu0  ;;  %v5332_v63 = vpop.f32.mrf.mxu1 }
 0x55f   : > { %v5331_v44 = vadd.f32 %v5330_v1, %v5106_v49 }
 0x560   : > { %v5110_v3 = vpop.f32.mrf.mxu0  ;;  %v5335_v59 = vpop.f32.mrf.mxu1 }
 0x561   : > { %5441 = vst.msk [vmem:[%s9826_s11 + $0x60] sm:$0xff] %vm352_vm0, %v5331_v44  ;;  %v5111_v37 = vadd.f32 %v9814_v21, %v5110_v3 }
 0x562   : > { %v5112_v35 = vpop.f32.mrf.mxu0  ;;  %v5337_v53 = vpop.f32.mrf.mxu1 }
 0x563   : > { %v5336_v9 = vadd.f32 %v5335_v59, %v5111_v37 }
 0x564   : > { %v5115_v54 = vpop.f32.mrf.mxu0  ;;  %v5340_v56 = vpop.f32.mrf.mxu1 }
 0x565   : > { %5442 = vst.msk [vmem:[%s9826_s11 + $0x68] sm:$0xff] %vm352_vm0, %v5336_v9  ;;  %v5116_v0 = vadd.f32 %v9814_v21, %v5115_v54 }
 0x566   : > { %v5117_v34 = vpop.f32.mrf.mxu0  ;;  %v5342_v61 = vpop.f32.mrf.mxu1 }
 0x567   : > { %v5341_v60 = vadd.f32 %v5340_v56, %v5116_v0 }
 0x568   : > { %v5120_v16 = vpop.f32.mrf.mxu0  ;;  %v5345_v58 = vpop.f32.mrf.mxu1 }
 0x569   : > { %5443 = vst.msk [vmem:[%s9826_s11 + $0x70] sm:$0xff] %vm352_vm0, %v5341_v60  ;;  %v5121_v39 = vadd.f32 %v9814_v21, %v5120_v16 }
 0x56a   : > { %v5122_v33 = vpop.f32.mrf.mxu0  ;;  %v5347_v48 = vpop.f32.mrf.mxu1 }
 0x56b   : > { %v5346_v62 = vadd.f32 %v5345_v58, %v5121_v39 }
 0x56c   : > { %v5125_v19 = vpop.f32.mrf.mxu0  ;;  %v5350_v20 = vpop.f32.mrf.mxu1 }
 0x56d   : > { %5444 = vst.msk [vmem:[%s9826_s11 + $0x78] sm:$0xff] %vm352_vm0, %v5346_v62  ;;  %v5126_v6 = vadd.f32 %v9814_v21, %v5125_v19 }
 0x56e   : > { %v5127_v24 = vpop.f32.mrf.mxu0  ;;  %v5352_v57 = vpop.f32.mrf.mxu1 }
 0x56f   : > { %v5351_v55 = vadd.f32 %v5350_v20, %v5126_v6 }
 0x570   : > { %v5130_v23 = vpop.f32.mrf.mxu0  ;;  %v5355_v38 = vpop.f32.mrf.mxu1 }
 0x571   : > { %5445 = vst.msk [vmem:[%s9826_s11 + $0x80] sm:$0xff] %vm352_vm0, %v5351_v55  ;;  %v5131_v26 = vadd.f32 %v9814_v21, %v5130_v23 }
 0x572   : > { %v5132_v36 = vpop.f32.mrf.mxu0  ;;  %v5357_v7 = vpop.f32.mrf.mxu1 }
 0x573   : > { %v5356_v51 = vadd.f32 %v5355_v38, %v5131_v26 }
 0x574   : > { %v5135_v5 = vpop.f32.mrf.mxu0  ;;  %v5360_v28 = vpop.f32.mrf.mxu1 }
 0x575   : > { %5446 = vst.msk [vmem:[%s9826_s11 + $0x88] sm:$0xff] %vm352_vm0, %v5356_v51  ;;  %v5136_v17 = vadd.f32 %v9814_v21, %v5135_v5 }
 0x576   : > { %v5137_v50 = vpop.f32.mrf.mxu0  ;;  %v5362_v30 = vpop.f32.mrf.mxu1 }
 0x577   : > { %v5361_v31 = vadd.f32 %v5360_v28, %v5136_v17 }
 0x578   : > { %v5140_v4 = vpop.f32.mrf.mxu0  ;;  %v5365_v47 = vpop.f32.mrf.mxu1 }
 0x579   : > { %5447 = vst.msk [vmem:[%s9826_s11 + $0x90] sm:$0xff] %vm352_vm0, %v5361_v31  ;;  %v5141_v14 = vadd.f32 %v9814_v21, %v5140_v4 }
 0x57a   : > { %v5142_v18 = vpop.f32.mrf.mxu0  ;;  %v5367_v32 = vpop.f32.mrf.mxu1 }
 0x57b   : > { %v5366_v46 = vadd.f32 %v5365_v47, %v5141_v14 }
 0x57c   : > { %v5145_v29 = vpop.f32.mrf.mxu0  ;;  %v5370_v22 = vpop.f32.mrf.mxu1 }
 0x57d   : > { %5448 = vst.msk [vmem:[%s9826_s11 + $0x98] sm:$0xff] %vm352_vm0, %v5366_v46  ;;  %v5146_v42 = vadd.f32 %v9814_v21, %v5145_v29 }
 0x57e   : > { %v5147_v11 = vpop.f32.mrf.mxu0  ;;  %v5372_v40 = vpop.f32.mrf.mxu1 }
 0x57f   : > { %v5371_v25 = vadd.f32 %v5370_v22, %v5146_v42 }
 0x580   : > { %v5150_v2 = vpop.f32.mrf.mxu0  ;;  %v5375_v45 = vpop.f32.mrf.mxu1 }
 0x581   : > { %5449 = vst.msk [vmem:[%s9826_s11 + $0xa0] sm:$0xff] %vm352_vm0, %v5371_v25  ;;  %v5151_v27 = vadd.f32 %v9814_v21, %v5150_v2 }
 0x582   : > { %v5152_v43 = vpop.f32.mrf.mxu0  ;;  %v5377_v10 = vpop.f32.mrf.mxu1 }
 0x583   : > { %v5376_v52 = vadd.f32 %v5375_v45, %v5151_v27 }
 0x585   : > { %5450 = vst.msk [vmem:[%s9826_s11 + $0xa8] sm:$0xff] %vm352_vm0, %v5376_v52 }
 0x589   : > { %v5155_v8 = vpop.f32.mrf.mxu0  ;;  %v5380_v13 = vpop.f32.mrf.mxu1 }
 0x58a   : > { %v5156_v15 = vadd.f32 %v9814_v21, %v5155_v8 }
 0x58b   : > { %v5157_v12 = vpop.f32.mrf.mxu0  ;;  %v5382_v1 = vpop.f32.mrf.mxu1 }
 0x58c   : > { %v5381_v49 = vadd.f32 %v5380_v13, %v5156_v15 }
 0x58e   : > { %5451 = vst.msk [vmem:[%s9826_s11 + $0xb0] sm:$0xff] %vm352_vm0, %v5381_v49 }
 0x593   : > { %v5160_v41 = vpop.f32.mrf.mxu0  ;;  %v5385_v63 = vpop.f32.mrf.mxu1 }
 0x594   : > { %v5161_v44 = vadd.f32 %v9814_v21, %v5160_v41 }
 0x595   : > { %v5162_v3 = vpop.f32.mrf.mxu0  ;;  %v5387_v59 = vpop.f32.mrf.mxu1 }
 0x596   : > { %v5386_v37 = vadd.f32 %v5385_v63, %v5161_v44 }
 0x598   : > { %5452 = vst.msk [vmem:[%s9826_s11 + $0xb8] sm:$0xff] %vm352_vm0, %v5386_v37 }
 0x59d   : > { %v5165_v35 = vpop.f32.mrf.mxu0  ;;  %v5390_v53 = vpop.f32.mrf.mxu1 }
 0x59e   : > { %v5166_v9 = vadd.f32 %v9814_v21, %v5165_v35 }
 0x59f   : > { %v5167_v54 = vpop.f32.mrf.mxu0  ;;  %v5392_v56 = vpop.f32.mrf.mxu1 }
 0x5a0   : > { %v5391_v0 = vadd.f32 %v5390_v53, %v5166_v9 }
 0x5a2   : > { %5453 = vst.msk [vmem:[%s9826_s11 + $0xc0] sm:$0xff] %vm352_vm0, %v5391_v0 }
 0x5aa   : > { %v5170_v34 = vpop.f32.mrf.mxu0  ;;  %v5395_v61 = vpop.f32.mrf.mxu1 }
 0x5ab   : > { %v5171_v60 = vadd.f32 %v9814_v21, %v5170_v34 }
 0x5ac   : > { %v5172_v16 = vpop.f32.mrf.mxu0  ;;  %v5397_v58 = vpop.f32.mrf.mxu1 }
 0x5ad   : > { %v5396_v39 = vadd.f32 %v5395_v61, %v5171_v60 }
 0x5af   : > { %5454 = vst.msk [vmem:[%s9826_s11 + $0xc8] sm:$0xff] %vm352_vm0, %v5396_v39 }
 0x5b0   : > { %v5175_v33 = vpop.f32.mrf.mxu0  ;;  %v5400_v48 = vpop.f32.mrf.mxu1 }
 0x5b1   : > { %v5176_v62 = vadd.f32 %v9814_v21, %v5175_v33 }
 0x5b2   : > { %v5177_v19 = vpop.f32.mrf.mxu0  ;;  %v5402_v20 = vpop.f32.mrf.mxu1 }
 0x5b3   : > { %v5401_v6 = vadd.f32 %v5400_v48, %v5176_v62 }
 0x5b5   : > { %5455 = vst.msk [vmem:[%s9826_s11 + $0xd0] sm:$0xff] %vm352_vm0, %v5401_v6 }
 0x5be   : > { %v5180_v24 = vpop.f32.mrf.mxu0  ;;  %v5405_v57 = vpop.f32.mrf.mxu1 }
 0x5bf   : > { %v5181_v55 = vadd.f32 %v9814_v21, %v5180_v24 }
 0x5c0   : > { %v5182_v23 = vpop.f32.mrf.mxu0  ;;  %v5407_v38 = vpop.f32.mrf.mxu1 }
 0x5c1   : > { %v5406_v26 = vadd.f32 %v5405_v57, %v5181_v55 }
 0x5c3   : > { %5456 = vst.msk [vmem:[%s9826_s11 + $0xd8] sm:$0xff] %vm352_vm0, %v5406_v26 }
 0x5ca   : > { %v5185_v36 = vpop.f32.mrf.mxu0  ;;  %v5410_v7 = vpop.f32.mrf.mxu1 }
 0x5cb   : > { %v5186_v51 = vadd.f32 %v9814_v21, %v5185_v36 }
 0x5cc   : > { %v5187_v5 = vpop.f32.mrf.mxu0  ;;  %v5412_v28 = vpop.f32.mrf.mxu1 }
 0x5cd   : > { %v5411_v17 = vadd.f32 %v5410_v7, %v5186_v51 }
 0x5cf   : > { %5457 = vst.msk [vmem:[%s9826_s11 + $0xe0] sm:$0xff] %vm352_vm0, %v5411_v17 }
 0x5d1   : > { %v5190_v50 = vpop.f32.mrf.mxu0  ;;  %v5415_v30 = vpop.f32.mrf.mxu1 }
 0x5d2   : > { %v5191_v31 = vadd.f32 %v9814_v21, %v5190_v50 }
 0x5d3   : > { %v5192_v4 = vpop.f32.mrf.mxu0  ;;  %v5417_v47 = vpop.f32.mrf.mxu1 }
 0x5d4   : > { %v5416_v14 = vadd.f32 %v5415_v30, %v5191_v31 }
 0x5d6   : > { %5458 = vst.msk [vmem:[%s9826_s11 + $0xe8] sm:$0xff] %vm352_vm0, %v5416_v14 }
 0x5df   : > { %v5195_v18 = vpop.f32.mrf.mxu0  ;;  %v5420_v32 = vpop.f32.mrf.mxu1 }
 0x5e0   : > { %v5196_v46 = vadd.f32 %v9814_v21, %v5195_v18 }
 0x5e1   : > { %v5197_v29 = vpop.f32.mrf.mxu0  ;;  %v5422_v22 = vpop.f32.mrf.mxu1 }
 0x5e2   : > { %v5421_v42 = vadd.f32 %v5420_v32, %v5196_v46 }
 0x5e4   : > { %5459 = vst.msk [vmem:[%s9826_s11 + $0xf0] sm:$0xff] %vm352_vm0, %v5421_v42 }
 0x5ee   : > { %v5200_v11 = vpop.f32.mrf.mxu0  ;;  %v5425_v40 = vpop.f32.mrf.mxu1 }
 0x5ef   : > { %v5201_v25 = vadd.f32 %v9814_v21, %v5200_v11 }
 0x5f0   : > { %v5202_v2 = vpop.f32.mrf.mxu0  ;;  %v5427_v45 = vpop.f32.mrf.mxu1 }
 0x5f1   : > { %v5426_v27 = vadd.f32 %v5425_v40, %v5201_v25 }
 0x5f3   : > { %5460 = vst.msk [vmem:[%s9826_s11 + $0xf8] sm:$0xff] %vm352_vm0, %v5426_v27 }
 0x5f4 PF: > { %s17_s24 = sadd.s32 1, %s6248_s24  }
 0x5f5   : > { %p14_p4 = scmp.ge.s32.totalorder %s17_s24, 4  }
 0x5f7   :  { %16 = sbr.rel (!%p14_p4) target bundleno = 1 (0x1), region = 78 }

</bundles_post_ra>
